<compile_context>
chip_gen: v5e
topology: v5e:2x2
jax: 0.10.0
libtpu: 0.0.40
codegen_flags: <defaults>
</compile_context>

<pallas_src>
import functools
import math

import numpy as np
import jax
import jax.numpy as jnp
from jax import lax
from jax.experimental import pallas as pl
from jax.experimental.pallas import tpu as pltpu

CP = 128  # lane-dense output width of the fusion conv


# ----------------------------------------------------------------------------
# Static bilinear-interpolation helpers (align_corners=True)
# ----------------------------------------------------------------------------
def _bilinear_taps(n_in, n_out):
    taps = []
    for i in range(n_out):
        src = 0.0 if n_out == 1 else i * (n_in - 1) / (n_out - 1)
        i0 = min(int(math.floor(src)), n_in - 1)
        i1 = min(i0 + 1, n_in - 1)
        f = min(max(src - i0, 0.0), 1.0)
        taps.append((i0, i1, float(f)))
    return tuple(taps)


def _interp_matrix(n_in, n_out):
    m = np.zeros((n_out, n_in), np.float32)
    for i, (i0, i1, f) in enumerate(_bilinear_taps(n_in, n_out)):
        m[i, i0] += 1.0 - f
        m[i, i1] += f
    return m


# ----------------------------------------------------------------------------
# In-kernel 3x3 SAME conv: 9 shifted-view MXU dots (roll + mask, no im2col)
# ----------------------------------------------------------------------------
def _conv3x3(x2d, w_ref, W):
    """x2d: (H*W, Cin) f32, row p = pixel (p // W, p % W).
    w_ref: (9, Cin, N) bf16 ref, tap index t = 3*ky + kx.
    Returns (H*W, N) f32.  K of every dot is exactly Cin (no zero-padded K)."""
    M = x2d.shape[0]
    pix = lax.broadcasted_iota(jnp.int32, (M, 1), 0)
    if (W & (W - 1)) == 0:
        w_in = pix & (W - 1)          # p % W for power-of-two W (demo path)
    else:
        w_in = pix % W                # generic path (not hit at demo sizes)

    acc = None
    for ky in range(3):
        dy = ky - 1
        for kx in range(3):
            dx = kx - 1
            s = dy * W + dx           # flattened-pixel shift of this tap
            if s == 0:
                t = x2d
            else:
                # out[p] = x2d[p + s]  (np.roll semantics: shift by -s)
                t = pltpu.roll(x2d, shift=(-s) % M, axis=0)
            conds = []
            if dy < 0:
                conds.append(pix >= W)            # h - 1 >= 0
            if dy > 0:
                conds.append(pix < M - W)         # h + 1 <  H
            if dx < 0:
                conds.append(w_in >= 1)           # w - 1 >= 0
            if dx > 0:
                conds.append(w_in < W - 1)        # w + 1 <  W
            if conds:
                valid = functools.reduce(lambda a, b: a & b, conds)
                t = jnp.where(valid, t, 0.0)
            d = jnp.dot(t.astype(jnp.bfloat16), w_ref[3 * ky + kx],
                        preferred_element_type=jnp.float32)
            acc = d if acc is None else acc + d
    return acc


# ----------------------------------------------------------------------------
# Fused Upconv kernel (one batch element per grid step)
# ----------------------------------------------------------------------------
def _upconv_kernel(x1_ref, x2_ref, up_ref, w1_ref, b1_ref, w2_ref, b2_ref,
                   w3_ref, b3_ref, o_ref, *, W1, W2, do_upsample):
    # Branch 1: conv3x3 + folded BN + ReLU -> lanes [0, Cout) of a 2*Cout slab.
    x1 = x1_ref[0].astype(jnp.float32)                       # (H1*W1, C1)
    y1 = jnp.maximum(_conv3x3(x1, w1_ref, W1) + b1_ref[...], 0.0)

    # Bilinear upsample (align_corners=True) as ONE MXU matmul with the static
    # kron(U_h, U_w) interpolation matrix: (H2*W2, H1*W1) @ (H1*W1, 2*Cout).
    if do_upsample:
        y1 = jnp.dot(up_ref[...], y1, preferred_element_type=jnp.float32)

    # Branch 2: conv3x3 + folded BN + ReLU -> lanes [Cout, 2*Cout).
    x2 = x2_ref[0].astype(jnp.float32)                       # (H2*W2, C2)
    y2 = jnp.maximum(_conv3x3(x2, w2_ref, W2) + b2_ref[...], 0.0)

    # Channel concat == add: the two branches occupy disjoint lane ranges.
    cat = y1 + y2                                            # (H2*W2, 2*Cout)

    # Fusion conv + folded BN + ReLU, lane-dense CP-wide output.
    y = jnp.maximum(_conv3x3(cat, w3_ref, W2) + b3_ref[...], 0.0)
    o_ref[0] = y                                             # (H2*W2, CP) f32


def upconv_pallas(x1, x2, spatial, packed, scale_factor):
    """x1: (N, H1*W1, C1) bf16, x2: (N, H2*W2, C2) bf16 -> (N, H2*W2, CP) f32."""
    H1, W1, H2, W2 = spatial
    N, M1, C1 = x1.shape
    N2, M2, C2 = x2.shape
    assert N == N2 and H2 == H1 * scale_factor and W2 == W1 * scale_factor
    w1p, b1p, w2p, b2p, w3p, b3p = packed
    CC = w1p.shape[-1]                     # 2 * out_channels

    do_up = (H1, W1) != (H2, W2)
    if do_up:
        U = jnp.asarray(np.kron(_interp_matrix(H1, H2), _interp_matrix(W1, W2)))
    else:
        U = jnp.zeros((8, 128), jnp.float32)   # dummy, never read in-kernel

    kernel = functools.partial(_upconv_kernel, W1=W1, W2=W2, do_upsample=do_up)

    flops = 2 * N * (9 * M1 * C1 * CC + 9 * M2 * C2 * CC
                     + (M2 * M1 * CC if do_up else 0) + 9 * M2 * CC * CP)
    bytes_accessed = (2 * (x1.size + x2.size)
                      + 2 * (w1p.size + w2p.size + w3p.size)
                      + 4 * (b1p.size + b2p.size + b3p.size + U.size)
                      + 4 * N * M2 * CP)

    return pl.pallas_call(
        kernel,
        out_shape=jax.ShapeDtypeStruct((N, M2, CP), jnp.float32),
        grid=(N,),
        in_specs=[
            pl.BlockSpec((1, M1, C1), lambda n: (n, 0, 0)),
            pl.BlockSpec((1, M2, C2), lambda n: (n, 0, 0)),
            pl.BlockSpec(U.shape, lambda n: (0, 0)),
            pl.BlockSpec(w1p.shape, lambda n: (0, 0, 0)),
            pl.BlockSpec(b1p.shape, lambda n: (0, 0)),
            pl.BlockSpec(w2p.shape, lambda n: (0, 0, 0)),
            pl.BlockSpec(b2p.shape, lambda n: (0, 0)),
            pl.BlockSpec(w3p.shape, lambda n: (0, 0, 0)),
            pl.BlockSpec(b3p.shape, lambda n: (0, 0)),
        ],
        out_specs=pl.BlockSpec((1, M2, CP), lambda n: (n, 0, 0)),
        compiler_params=pltpu.CompilerParams(
            dimension_semantics=("parallel",),
            vmem_limit_bytes=64 * 1024 * 1024),
        cost_estimate=pl.CostEstimate(
            flops=flops, transcendentals=0, bytes_accessed=bytes_accessed),
    )(x1, x2, U, w1p, b1p, w2p, b2p, w3p, b3p)


# ----------------------------------------------------------------------------
# Parameter construction (synthetic, deterministic) + BN folding (eval mode)
# ----------------------------------------------------------------------------
def make_conv_bn_params(key, cin, cout, eps=1e-5):
    """Conv2d(3x3, bias=True) + BatchNorm2d(eval) folded into (w, bias)."""
    kw, kcb, kg, kb, km, kv = jax.random.split(key, 6)
    w = jax.random.normal(kw, (3, 3, cin, cout), jnp.float32) * 0.1     # HWIO
    conv_b = 0.1 * jax.random.normal(kcb, (cout,), jnp.float32)
    gamma = 1.0 + 0.1 * jax.random.normal(kg, (cout,), jnp.float32)
    beta = 0.1 * jax.random.normal(kb, (cout,), jnp.float32)
    mean = 0.1 * jax.random.normal(km, (cout,), jnp.float32)
    var = 1.0 + 0.1 * jnp.abs(jax.random.normal(kv, (cout,), jnp.float32))
    scale = gamma * lax.rsqrt(var + eps)
    w_fold = w * scale[None, None, None, :]            # BN scale folded into W
    b_fold = beta + (conv_b - mean) * scale            # conv bias + BN shift
    # Round weights to bf16 once so kernel and f32 reference see the same W.
    w_fold = w_fold.astype(jnp.bfloat16).astype(jnp.float32)
    return w_fold, b_fold


def _pack_tap_weight(w_hwio, n_lanes, lane_offset):
    """(3,3,Cin,Cout) -> (9, Cin, n_lanes) bf16, Cout placed at lane_offset."""
    cin, cout = w_hwio.shape[2], w_hwio.shape[3]
    wp = jnp.zeros((3, 3, cin, n_lanes), jnp.float32)
    wp = wp.at[:, :, :, lane_offset:lane_offset + cout].set(w_hwio)
    return wp.reshape(9, cin, n_lanes).astype(jnp.bfloat16)


def _pack_bias(b, n_lanes, lane_offset):
    return (jnp.zeros((1, n_lanes), jnp.float32)
            .at[0, lane_offset:lane_offset + b.shape[0]].set(b))


def _upsample_bilinear_ref(x, scale_factor):
    if scale_factor == 1:
        return x
    N, H, W, C = x.shape
    up_h = _bilinear_taps(H, H * scale_factor)
    up_w = _bilinear_taps(W, W * scale_factor)
    i0 = jnp.array([a for (a, _, _) in up_h])
    i1 = jnp.array([b for (_, b, _) in up_h])
    fh = jnp.array([f for (_, _, f) in up_h], jnp.float32)[None, :, None, None]
    j0 = jnp.array([a for (a, _, _) in up_w])
    j1 = jnp.array([b for (_, b, _) in up_w])
    fw = jnp.array([f for (_, _, f) in up_w], jnp.float32)[None, None, :, None]
    rows = x[:, i0] * (1.0 - fh) + x[:, i1] * fh
    return rows[:, :, j0] * (1.0 - fw) + rows[:, :, j1] * fw


class UpconvPallas:
    """Mirrors Upconv.forward (BatchNorm in eval/inference mode, folded)."""
    # TODO(synk): training-mode BatchNorm (batch statistics) not implemented.

    def __init__(self, in_channels, mid_channels, out_channels, scale_factor=1,
                 key=jax.random.PRNGKey(0)):
        assert out_channels <= CP
        k1, k2, k3 = jax.random.split(key, 3)
        self.out_channels = out_channels
        self.scale_factor = scale_factor
        w1, b1 = make_conv_bn_params(k1, in_channels, out_channels)
        w2, b2 = make_conv_bn_params(k2, mid_channels, out_channels)
        w3, b3 = make_conv_bn_params(k3, out_channels * 2, out_channels)
        self._ref_params = (w1, b1, w2, b2, w3, b3)
        cc = 2 * out_channels            # concat lane width: [x1 branch | x2 branch]
        self.packed = (
            _pack_tap_weight(w1, cc, 0), _pack_bias(b1, cc, 0),
            _pack_tap_weight(w2, cc, out_channels), _pack_bias(b2, cc, out_channels),
            _pack_tap_weight(w3, CP, 0), _pack_bias(b3, CP, 0),
        )

    def __call__(self, x1_nchw, x2_nchw):
        n, _, h1, w1 = x1_nchw.shape
        _, _, h2, w2 = x2_nchw.shape
        # NCHW -> NHWC, cast to bf16 (half the input DMA), flatten H*W rows.
        x1 = jnp.transpose(x1_nchw, (0, 2, 3, 1)).astype(jnp.bfloat16)
        x2 = jnp.transpose(x2_nchw, (0, 2, 3, 1)).astype(jnp.bfloat16)
        x1 = x1.reshape(n, h1 * w1, -1)
        x2 = x2.reshape(n, h2 * w2, -1)
        y = upconv_pallas(x1, x2, (h1, w1, h2, w2), self.packed,
                          self.scale_factor)                  # (N, H2*W2, CP)
        y = y[:, :, :self.out_channels].reshape(n, h2, w2, self.out_channels)
        return jnp.transpose(y, (0, 3, 1, 2))                 # back to NCHW

    def reference(self, x1_nchw, x2_nchw):
        """Pure-JAX reference with the same folded params (for validation)."""
        w1, b1, w2, b2, w3, b3 = self._ref_params
        x1 = jnp.transpose(x1_nchw, (0, 2, 3, 1)).astype(jnp.bfloat16)
        x2 = jnp.transpose(x2_nchw, (0, 2, 3, 1)).astype(jnp.bfloat16)
        x1 = x1.astype(jnp.float32)
        x2 = x2.astype(jnp.float32)

        def conv_bn_relu(x, w, b):
            y = lax.conv_general_dilated(
                x, w, (1, 1), "SAME",
                dimension_numbers=("NHWC", "HWIO", "NHWC"),
                precision=lax.Precision.HIGHEST)
            return jnp.maximum(y + b, 0.0)

        y1 = conv_bn_relu(x1, w1, b1)
        y1 = _upsample_bilinear_ref(y1, self.scale_factor)
        y2 = conv_bn_relu(x2, w2, b2)
        y = conv_bn_relu(jnp.concatenate([y1, y2], axis=-1), w3, b3)
        return jnp.transpose(y, (0, 3, 1, 2))


if __name__ == "__main__":
    key = jax.random.PRNGKey(0)
    k_in, k_mid, k_params = jax.random.split(key, 3)

    # batch=2, in_channels=4, mid_channels=4, out_channels=8, scale_factor=2:
    # x1 spatial 8x8 (upsampled to 16x16), x2 spatial 16x16.
    N, Cin, Cmid, Cout, sf = 2, 4, 4, 8, 2
    x1 = jax.random.normal(k_in, (N, Cin, 8, 8), jnp.float32)       # NCHW
    x2 = jax.random.normal(k_mid, (N, Cmid, 16, 16), jnp.float32)   # NCHW

    model = UpconvPallas(Cin, Cmid, Cout, scale_factor=sf, key=k_params)
    y = jax.block_until_ready(model(x1, x2))

    assert y.shape == (N, Cout, 16, 16), y.shape
    assert bool(jnp.all(jnp.isfinite(y)))
    assert bool(jnp.all(y >= 0.0))                    # final ReLU

    # Validate against a pure-JAX reference with identical folded parameters
    # (kernel uses bf16 matmul operands with f32 accumulation).
    y_ref = jax.block_until_ready(model.reference(x1, x2))
    max_err = float(jnp.max(jnp.abs(y - y_ref)))
    assert max_err < 5e-2, f"max abs error vs reference: {max_err}"

    print("KERNEL_OK")
</pallas_src>

<mosaic_0001>
module attributes {stable_mosaic.version = 11 : i64} {
  func.func @_upconv_kernel(%arg0: i32, %arg1: memref<1x64x4xbf16, #tpu.memory_space<vmem>>, %arg2: memref<1x256x4xbf16, #tpu.memory_space<vmem>>, %arg3: memref<256x64xf32, #tpu.memory_space<vmem>>, %arg4: memref<9x4x16xbf16, #tpu.memory_space<vmem>>, %arg5: memref<1x16xf32, #tpu.memory_space<vmem>>, %arg6: memref<9x4x16xbf16, #tpu.memory_space<vmem>>, %arg7: memref<1x16xf32, #tpu.memory_space<vmem>>, %arg8: memref<9x16x128xbf16, #tpu.memory_space<vmem>>, %arg9: memref<1x128xf32, #tpu.memory_space<vmem>>, %arg10: memref<1x256x128xf32, #tpu.memory_space<vmem>>) attributes {dimension_semantics = [#tpu.dimension_semantics<parallel>], iteration_bounds = array<i64: 2>, scalar_prefetch = 0 : i64, scratch_operands = 0 : i64, tpu.core_type = #tpu.core_type<tc>, window_params = [{transform_indices = @transform_0, window_bounds = array<i64: 1, 64, 4>}, {transform_indices = @transform_1, window_bounds = array<i64: 1, 256, 4>}, {pipeline_mode = #tpu.pipeline_mode<synchronous>, transform_indices = @transform_2, window_bounds = array<i64: 256, 64>}, {pipeline_mode = #tpu.pipeline_mode<synchronous>, transform_indices = @transform_3, window_bounds = array<i64: 9, 4, 16>}, {pipeline_mode = #tpu.pipeline_mode<synchronous>, transform_indices = @transform_4, window_bounds = array<i64: 1, 16>}, {pipeline_mode = #tpu.pipeline_mode<synchronous>, transform_indices = @transform_5, window_bounds = array<i64: 9, 4, 16>}, {pipeline_mode = #tpu.pipeline_mode<synchronous>, transform_indices = @transform_6, window_bounds = array<i64: 1, 16>}, {pipeline_mode = #tpu.pipeline_mode<synchronous>, transform_indices = @transform_7, window_bounds = array<i64: 9, 16, 128>}, {pipeline_mode = #tpu.pipeline_mode<synchronous>, transform_indices = @transform_8, window_bounds = array<i64: 1, 128>}, {transform_indices = @transform_9, window_bounds = array<i64: 1, 256, 128>}]} {
    %c0 = arith.constant 0 : index
    %c0_0 = arith.constant 0 : index
    %c0_1 = arith.constant 0 : index
    %0 = vector.load %arg1[%c0, %c0_0, %c0_1] : memref<1x64x4xbf16, #tpu.memory_space<vmem>>, vector<1x64x4xbf16>
    %1 = vector.shape_cast %0 : vector<1x64x4xbf16> to vector<64x4xbf16>
    %2 = arith.extf %1 : vector<64x4xbf16> to vector<64x4xf32>
    %3 = tpu.iota {dimensions = array<i32: 0>} : vector<64x1xi32>
    %c7_i32 = arith.constant 7 : i32
    %4 = vector.broadcast %c7_i32 : i32 to vector<64x1xi32>
    %5 = arith.andi %3, %4 : vector<64x1xi32>
    %c9_i32 = arith.constant 9 : i32
    %6 = tpu.dynamic_rotate %2 by %c9_i32 dim 0 : vector<64x4xf32>, i32 -> vector<64x4xf32>
    %c8_i32 = arith.constant 8 : i32
    %7 = vector.broadcast %c8_i32 : i32 to vector<64x1xi32>
    %8 = arith.cmpi sge, %3, %7 : vector<64x1xi32>
    %c1_i32 = arith.constant 1 : i32
    %9 = vector.broadcast %c1_i32 : i32 to vector<64x1xi32>
    %10 = arith.cmpi sge, %5, %9 : vector<64x1xi32>
    %11 = arith.andi %8, %10 : vector<64x1xi1>
    %cst = arith.constant 0.000000e+00 : f32
    %12 = vector.shape_cast %11 : vector<64x1xi1> to vector<64x1xi1>
    %13 = vector.broadcast %12 : vector<64x1xi1> to vector<64x4xi1>
    %14 = vector.broadcast %cst : f32 to vector<64x4xf32>
    %15 = arith.select %13, %6, %14 : vector<64x4xi1>, vector<64x4xf32>
    %16 = arith.truncf %15 : vector<64x4xf32> to vector<64x4xbf16>
    %c0_2 = arith.constant 0 : index
    %c0_3 = arith.constant 0 : index
    %c0_4 = arith.constant 0 : index
    %17 = vector.load %arg4[%c0_2, %c0_3, %c0_4] : memref<9x4x16xbf16, #tpu.memory_space<vmem>>, vector<1x4x16xbf16>
    %18 = vector.shape_cast %17 : vector<1x4x16xbf16> to vector<4x16xbf16>
    %cst_5 = arith.constant dense<0.000000e+00> : vector<64x16xf32>
    %19 = tpu.matmul %16, %18, %cst_5 {dimension_numbers = #tpu.dot_dimension_numbers<[1], [0], [0], [1], [0, 0, 1, 1], [], []>} : vector<64x4xbf16>, vector<4x16xbf16>, vector<64x16xf32> -> vector<64x16xf32>
    %c8_i32_6 = arith.constant 8 : i32
    %20 = tpu.dynamic_rotate %2 by %c8_i32_6 dim 0 : vector<64x4xf32>, i32 -> vector<64x4xf32>
    %c8_i32_7 = arith.constant 8 : i32
    %21 = vector.broadcast %c8_i32_7 : i32 to vector<64x1xi32>
    %22 = arith.cmpi sge, %3, %21 : vector<64x1xi32>
    %cst_8 = arith.constant 0.000000e+00 : f32
    %23 = vector.shape_cast %22 : vector<64x1xi1> to vector<64x1xi1>
    %24 = vector.broadcast %23 : vector<64x1xi1> to vector<64x4xi1>
    %25 = vector.broadcast %cst_8 : f32 to vector<64x4xf32>
    %26 = arith.select %24, %20, %25 : vector<64x4xi1>, vector<64x4xf32>
    %27 = arith.truncf %26 : vector<64x4xf32> to vector<64x4xbf16>
    %c1 = arith.constant 1 : index
    %c0_9 = arith.constant 0 : index
    %c0_10 = arith.constant 0 : index
    %28 = vector.load %arg4[%c1, %c0_9, %c0_10] : memref<9x4x16xbf16, #tpu.memory_space<vmem>>, vector<1x4x16xbf16>
    %29 = vector.shape_cast %28 : vector<1x4x16xbf16> to vector<4x16xbf16>
    %cst_11 = arith.constant dense<0.000000e+00> : vector<64x16xf32>
    %30 = tpu.matmul %27, %29, %cst_11 {dimension_numbers = #tpu.dot_dimension_numbers<[1], [0], [0], [1], [0, 0, 1, 1], [], []>} : vector<64x4xbf16>, vector<4x16xbf16>, vector<64x16xf32> -> vector<64x16xf32>
    %31 = arith.addf %19, %30 : vector<64x16xf32>
    %c7_i32_12 = arith.constant 7 : i32
    %32 = tpu.dynamic_rotate %2 by %c7_i32_12 dim 0 : vector<64x4xf32>, i32 -> vector<64x4xf32>
    %c8_i32_13 = arith.constant 8 : i32
    %33 = vector.broadcast %c8_i32_13 : i32 to vector<64x1xi32>
    %34 = arith.cmpi sge, %3, %33 : vector<64x1xi32>
    %c7_i32_14 = arith.constant 7 : i32
    %35 = vector.broadcast %c7_i32_14 : i32 to vector<64x1xi32>
    %36 = arith.cmpi slt, %5, %35 : vector<64x1xi32>
    %37 = arith.andi %34, %36 : vector<64x1xi1>
    %cst_15 = arith.constant 0.000000e+00 : f32
    %38 = vector.shape_cast %37 : vector<64x1xi1> to vector<64x1xi1>
    %39 = vector.broadcast %38 : vector<64x1xi1> to vector<64x4xi1>
    %40 = vector.broadcast %cst_15 : f32 to vector<64x4xf32>
    %41 = arith.select %39, %32, %40 : vector<64x4xi1>, vector<64x4xf32>
    %42 = arith.truncf %41 : vector<64x4xf32> to vector<64x4xbf16>
    %c2 = arith.constant 2 : index
    %c0_16 = arith.constant 0 : index
    %c0_17 = arith.constant 0 : index
    %43 = vector.load %arg4[%c2, %c0_16, %c0_17] : memref<9x4x16xbf16, #tpu.memory_space<vmem>>, vector<1x4x16xbf16>
    %44 = vector.shape_cast %43 : vector<1x4x16xbf16> to vector<4x16xbf16>
    %cst_18 = arith.constant dense<0.000000e+00> : vector<64x16xf32>
    %45 = tpu.matmul %42, %44, %cst_18 {dimension_numbers = #tpu.dot_dimension_numbers<[1], [0], [0], [1], [0, 0, 1, 1], [], []>} : vector<64x4xbf16>, vector<4x16xbf16>, vector<64x16xf32> -> vector<64x16xf32>
    %46 = arith.addf %31, %45 : vector<64x16xf32>
    %c1_i32_19 = arith.constant 1 : i32
    %47 = tpu.dynamic_rotate %2 by %c1_i32_19 dim 0 : vector<64x4xf32>, i32 -> vector<64x4xf32>
    %c1_i32_20 = arith.constant 1 : i32
    %48 = vector.broadcast %c1_i32_20 : i32 to vector<64x1xi32>
    %49 = arith.cmpi sge, %5, %48 : vector<64x1xi32>
    %cst_21 = arith.constant 0.000000e+00 : f32
    %50 = vector.shape_cast %49 : vector<64x1xi1> to vector<64x1xi1>
    %51 = vector.broadcast %50 : vector<64x1xi1> to vector<64x4xi1>
    %52 = vector.broadcast %cst_21 : f32 to vector<64x4xf32>
    %53 = arith.select %51, %47, %52 : vector<64x4xi1>, vector<64x4xf32>
    %54 = arith.truncf %53 : vector<64x4xf32> to vector<64x4xbf16>
    %c3 = arith.constant 3 : index
    %c0_22 = arith.constant 0 : index
    %c0_23 = arith.constant 0 : index
    %55 = vector.load %arg4[%c3, %c0_22, %c0_23] : memref<9x4x16xbf16, #tpu.memory_space<vmem>>, vector<1x4x16xbf16>
    %56 = vector.shape_cast %55 : vector<1x4x16xbf16> to vector<4x16xbf16>
    %cst_24 = arith.constant dense<0.000000e+00> : vector<64x16xf32>
    %57 = tpu.matmul %54, %56, %cst_24 {dimension_numbers = #tpu.dot_dimension_numbers<[1], [0], [0], [1], [0, 0, 1, 1], [], []>} : vector<64x4xbf16>, vector<4x16xbf16>, vector<64x16xf32> -> vector<64x16xf32>
    %58 = arith.addf %46, %57 : vector<64x16xf32>
    %59 = arith.truncf %2 : vector<64x4xf32> to vector<64x4xbf16>
    %c4 = arith.constant 4 : index
    %c0_25 = arith.constant 0 : index
    %c0_26 = arith.constant 0 : index
    %60 = vector.load %arg4[%c4, %c0_25, %c0_26] : memref<9x4x16xbf16, #tpu.memory_space<vmem>>, vector<1x4x16xbf16>
    %61 = vector.shape_cast %60 : vector<1x4x16xbf16> to vector<4x16xbf16>
    %cst_27 = arith.constant dense<0.000000e+00> : vector<64x16xf32>
    %62 = tpu.matmul %59, %61, %cst_27 {dimension_numbers = #tpu.dot_dimension_numbers<[1], [0], [0], [1], [0, 0, 1, 1], [], []>} : vector<64x4xbf16>, vector<4x16xbf16>, vector<64x16xf32> -> vector<64x16xf32>
    %63 = arith.addf %58, %62 : vector<64x16xf32>
    %c63_i32 = arith.constant 63 : i32
    %64 = tpu.dynamic_rotate %2 by %c63_i32 dim 0 : vector<64x4xf32>, i32 -> vector<64x4xf32>
    %c7_i32_28 = arith.constant 7 : i32
    %65 = vector.broadcast %c7_i32_28 : i32 to vector<64x1xi32>
    %66 = arith.cmpi slt, %5, %65 : vector<64x1xi32>
    %cst_29 = arith.constant 0.000000e+00 : f32
    %67 = vector.shape_cast %66 : vector<64x1xi1> to vector<64x1xi1>
    %68 = vector.broadcast %67 : vector<64x1xi1> to vector<64x4xi1>
    %69 = vector.broadcast %cst_29 : f32 to vector<64x4xf32>
    %70 = arith.select %68, %64, %69 : vector<64x4xi1>, vector<64x4xf32>
    %71 = arith.truncf %70 : vector<64x4xf32> to vector<64x4xbf16>
    %c5 = arith.constant 5 : index
    %c0_30 = arith.constant 0 : index
    %c0_31 = arith.constant 0 : index
    %72 = vector.load %arg4[%c5, %c0_30, %c0_31] : memref<9x4x16xbf16, #tpu.memory_space<vmem>>, vector<1x4x16xbf16>
    %73 = vector.shape_cast %72 : vector<1x4x16xbf16> to vector<4x16xbf16>
    %cst_32 = arith.constant dense<0.000000e+00> : vector<64x16xf32>
    %74 = tpu.matmul %71, %73, %cst_32 {dimension_numbers = #tpu.dot_dimension_numbers<[1], [0], [0], [1], [0, 0, 1, 1], [], []>} : vector<64x4xbf16>, vector<4x16xbf16>, vector<64x16xf32> -> vector<64x16xf32>
    %75 = arith.addf %63, %74 : vector<64x16xf32>
    %c57_i32 = arith.constant 57 : i32
    %76 = tpu.dynamic_rotate %2 by %c57_i32 dim 0 : vector<64x4xf32>, i32 -> vector<64x4xf32>
    %c56_i32 = arith.constant 56 : i32
    %77 = vector.broadcast %c56_i32 : i32 to vector<64x1xi32>
    %78 = arith.cmpi slt, %3, %77 : vector<64x1xi32>
    %c1_i32_33 = arith.constant 1 : i32
    %79 = vector.broadcast %c1_i32_33 : i32 to vector<64x1xi32>
    %80 = arith.cmpi sge, %5, %79 : vector<64x1xi32>
    %81 = arith.andi %78, %80 : vector<64x1xi1>
    %cst_34 = arith.constant 0.000000e+00 : f32
    %82 = vector.shape_cast %81 : vector<64x1xi1> to vector<64x1xi1>
    %83 = vector.broadcast %82 : vector<64x1xi1> to vector<64x4xi1>
    %84 = vector.broadcast %cst_34 : f32 to vector<64x4xf32>
    %85 = arith.select %83, %76, %84 : vector<64x4xi1>, vector<64x4xf32>
    %86 = arith.truncf %85 : vector<64x4xf32> to vector<64x4xbf16>
    %c6 = arith.constant 6 : index
    %c0_35 = arith.constant 0 : index
    %c0_36 = arith.constant 0 : index
    %87 = vector.load %arg4[%c6, %c0_35, %c0_36] : memref<9x4x16xbf16, #tpu.memory_space<vmem>>, vector<1x4x16xbf16>
    %88 = vector.shape_cast %87 : vector<1x4x16xbf16> to vector<4x16xbf16>
    %cst_37 = arith.constant dense<0.000000e+00> : vector<64x16xf32>
    %89 = tpu.matmul %86, %88, %cst_37 {dimension_numbers = #tpu.dot_dimension_numbers<[1], [0], [0], [1], [0, 0, 1, 1], [], []>} : vector<64x4xbf16>, vector<4x16xbf16>, vector<64x16xf32> -> vector<64x16xf32>
    %90 = arith.addf %75, %89 : vector<64x16xf32>
    %c56_i32_38 = arith.constant 56 : i32
    %91 = tpu.dynamic_rotate %2 by %c56_i32_38 dim 0 : vector<64x4xf32>, i32 -> vector<64x4xf32>
    %c56_i32_39 = arith.constant 56 : i32
    %92 = vector.broadcast %c56_i32_39 : i32 to vector<64x1xi32>
    %93 = arith.cmpi slt, %3, %92 : vector<64x1xi32>
    %cst_40 = arith.constant 0.000000e+00 : f32
    %94 = vector.shape_cast %93 : vector<64x1xi1> to vector<64x1xi1>
    %95 = vector.broadcast %94 : vector<64x1xi1> to vector<64x4xi1>
    %96 = vector.broadcast %cst_40 : f32 to vector<64x4xf32>
    %97 = arith.select %95, %91, %96 : vector<64x4xi1>, vector<64x4xf32>
    %98 = arith.truncf %97 : vector<64x4xf32> to vector<64x4xbf16>
    %c7 = arith.constant 7 : index
    %c0_41 = arith.constant 0 : index
    %c0_42 = arith.constant 0 : index
    %99 = vector.load %arg4[%c7, %c0_41, %c0_42] : memref<9x4x16xbf16, #tpu.memory_space<vmem>>, vector<1x4x16xbf16>
    %100 = vector.shape_cast %99 : vector<1x4x16xbf16> to vector<4x16xbf16>
    %cst_43 = arith.constant dense<0.000000e+00> : vector<64x16xf32>
    %101 = tpu.matmul %98, %100, %cst_43 {dimension_numbers = #tpu.dot_dimension_numbers<[1], [0], [0], [1], [0, 0, 1, 1], [], []>} : vector<64x4xbf16>, vector<4x16xbf16>, vector<64x16xf32> -> vector<64x16xf32>
    %102 = arith.addf %90, %101 : vector<64x16xf32>
    %c55_i32 = arith.constant 55 : i32
    %103 = tpu.dynamic_rotate %2 by %c55_i32 dim 0 : vector<64x4xf32>, i32 -> vector<64x4xf32>
    %c56_i32_44 = arith.constant 56 : i32
    %104 = vector.broadcast %c56_i32_44 : i32 to vector<64x1xi32>
    %105 = arith.cmpi slt, %3, %104 : vector<64x1xi32>
    %c7_i32_45 = arith.constant 7 : i32
    %106 = vector.broadcast %c7_i32_45 : i32 to vector<64x1xi32>
    %107 = arith.cmpi slt, %5, %106 : vector<64x1xi32>
    %108 = arith.andi %105, %107 : vector<64x1xi1>
    %cst_46 = arith.constant 0.000000e+00 : f32
    %109 = vector.shape_cast %108 : vector<64x1xi1> to vector<64x1xi1>
    %110 = vector.broadcast %109 : vector<64x1xi1> to vector<64x4xi1>
    %111 = vector.broadcast %cst_46 : f32 to vector<64x4xf32>
    %112 = arith.select %110, %103, %111 : vector<64x4xi1>, vector<64x4xf32>
    %113 = arith.truncf %112 : vector<64x4xf32> to vector<64x4xbf16>
    %c8 = arith.constant 8 : index
    %c0_47 = arith.constant 0 : index
    %c0_48 = arith.constant 0 : index
    %114 = vector.load %arg4[%c8, %c0_47, %c0_48] : memref<9x4x16xbf16, #tpu.memory_space<vmem>>, vector<1x4x16xbf16>
    %115 = vector.shape_cast %114 : vector<1x4x16xbf16> to vector<4x16xbf16>
    %cst_49 = arith.constant dense<0.000000e+00> : vector<64x16xf32>
    %116 = tpu.matmul %113, %115, %cst_49 {dimension_numbers = #tpu.dot_dimension_numbers<[1], [0], [0], [1], [0, 0, 1, 1], [], []>} : vector<64x4xbf16>, vector<4x16xbf16>, vector<64x16xf32> -> vector<64x16xf32>
    %117 = arith.addf %102, %116 : vector<64x16xf32>
    %c0_50 = arith.constant 0 : index
    %c0_51 = arith.constant 0 : index
    %118 = vector.load %arg5[%c0_50, %c0_51] : memref<1x16xf32, #tpu.memory_space<vmem>>, vector<1x16xf32>
    %119 = vector.broadcast %118 : vector<1x16xf32> to vector<64x16xf32>
    %120 = arith.addf %117, %119 : vector<64x16xf32>
    %cst_52 = arith.constant 0.000000e+00 : f32
    %121 = vector.broadcast %cst_52 : f32 to vector<64x16xf32>
    %122 = arith.maximumf %120, %121 : vector<64x16xf32>
    %c0_53 = arith.constant 0 : index
    %c0_54 = arith.constant 0 : index
    %123 = vector.load %arg3[%c0_53, %c0_54] : memref<256x64xf32, #tpu.memory_space<vmem>>, vector<256x64xf32>
    %cst_55 = arith.constant dense<0.000000e+00> : vector<256x16xf32>
    %124 = tpu.matmul %123, %122, %cst_55 {dimension_numbers = #tpu.dot_dimension_numbers<[1], [0], [0], [1], [0, 0, 1, 1], [], []>} : vector<256x64xf32>, vector<64x16xf32>, vector<256x16xf32> -> vector<256x16xf32>
    %c0_56 = arith.constant 0 : index
    %c0_57 = arith.constant 0 : index
    %c0_58 = arith.constant 0 : index
    %125 = vector.load %arg2[%c0_56, %c0_57, %c0_58] : memref<1x256x4xbf16, #tpu.memory_space<vmem>>, vector<1x256x4xbf16>
    %126 = vector.shape_cast %125 : vector<1x256x4xbf16> to vector<256x4xbf16>
    %127 = arith.extf %126 : vector<256x4xbf16> to vector<256x4xf32>
    %128 = tpu.iota {dimensions = array<i32: 0>} : vector<256x1xi32>
    %c15_i32 = arith.constant 15 : i32
    %129 = vector.broadcast %c15_i32 : i32 to vector<256x1xi32>
    %130 = arith.andi %128, %129 : vector<256x1xi32>
    %c17_i32 = arith.constant 17 : i32
    %131 = tpu.dynamic_rotate %127 by %c17_i32 dim 0 : vector<256x4xf32>, i32 -> vector<256x4xf32>
    %c16_i32 = arith.constant 16 : i32
    %132 = vector.broadcast %c16_i32 : i32 to vector<256x1xi32>
    %133 = arith.cmpi sge, %128, %132 : vector<256x1xi32>
    %c1_i32_59 = arith.constant 1 : i32
    %134 = vector.broadcast %c1_i32_59 : i32 to vector<256x1xi32>
    %135 = arith.cmpi sge, %130, %134 : vector<256x1xi32>
    %136 = arith.andi %133, %135 : vector<256x1xi1>
    %cst_60 = arith.constant 0.000000e+00 : f32
    %137 = vector.shape_cast %136 : vector<256x1xi1> to vector<256x1xi1>
    %138 = vector.broadcast %137 : vector<256x1xi1> to vector<256x4xi1>
    %139 = vector.broadcast %cst_60 : f32 to vector<256x4xf32>
    %140 = arith.select %138, %131, %139 : vector<256x4xi1>, vector<256x4xf32>
    %141 = arith.truncf %140 : vector<256x4xf32> to vector<256x4xbf16>
    %c0_61 = arith.constant 0 : index
    %c0_62 = arith.constant 0 : index
    %c0_63 = arith.constant 0 : index
    %142 = vector.load %arg6[%c0_61, %c0_62, %c0_63] : memref<9x4x16xbf16, #tpu.memory_space<vmem>>, vector<1x4x16xbf16>
    %143 = vector.shape_cast %142 : vector<1x4x16xbf16> to vector<4x16xbf16>
    %cst_64 = arith.constant dense<0.000000e+00> : vector<256x16xf32>
    %144 = tpu.matmul %141, %143, %cst_64 {dimension_numbers = #tpu.dot_dimension_numbers<[1], [0], [0], [1], [0, 0, 1, 1], [], []>} : vector<256x4xbf16>, vector<4x16xbf16>, vector<256x16xf32> -> vector<256x16xf32>
    %c16_i32_65 = arith.constant 16 : i32
    %145 = tpu.dynamic_rotate %127 by %c16_i32_65 dim 0 : vector<256x4xf32>, i32 -> vector<256x4xf32>
    %c16_i32_66 = arith.constant 16 : i32
    %146 = vector.broadcast %c16_i32_66 : i32 to vector<256x1xi32>
    %147 = arith.cmpi sge, %128, %146 : vector<256x1xi32>
    %cst_67 = arith.constant 0.000000e+00 : f32
    %148 = vector.shape_cast %147 : vector<256x1xi1> to vector<256x1xi1>
    %149 = vector.broadcast %148 : vector<256x1xi1> to vector<256x4xi1>
    %150 = vector.broadcast %cst_67 : f32 to vector<256x4xf32>
    %151 = arith.select %149, %145, %150 : vector<256x4xi1>, vector<256x4xf32>
    %152 = arith.truncf %151 : vector<256x4xf32> to vector<256x4xbf16>
    %c1_68 = arith.constant 1 : index
    %c0_69 = arith.constant 0 : index
    %c0_70 = arith.constant 0 : index
    %153 = vector.load %arg6[%c1_68, %c0_69, %c0_70] : memref<9x4x16xbf16, #tpu.memory_space<vmem>>, vector<1x4x16xbf16>
    %154 = vector.shape_cast %153 : vector<1x4x16xbf16> to vector<4x16xbf16>
    %cst_71 = arith.constant dense<0.000000e+00> : vector<256x16xf32>
    %155 = tpu.matmul %152, %154, %cst_71 {dimension_numbers = #tpu.dot_dimension_numbers<[1], [0], [0], [1], [0, 0, 1, 1], [], []>} : vector<256x4xbf16>, vector<4x16xbf16>, vector<256x16xf32> -> vector<256x16xf32>
    %156 = arith.addf %144, %155 : vector<256x16xf32>
    %c15_i32_72 = arith.constant 15 : i32
    %157 = tpu.dynamic_rotate %127 by %c15_i32_72 dim 0 : vector<256x4xf32>, i32 -> vector<256x4xf32>
    %c16_i32_73 = arith.constant 16 : i32
    %158 = vector.broadcast %c16_i32_73 : i32 to vector<256x1xi32>
    %159 = arith.cmpi sge, %128, %158 : vector<256x1xi32>
    %c15_i32_74 = arith.constant 15 : i32
    %160 = vector.broadcast %c15_i32_74 : i32 to vector<256x1xi32>
    %161 = arith.cmpi slt, %130, %160 : vector<256x1xi32>
    %162 = arith.andi %159, %161 : vector<256x1xi1>
    %cst_75 = arith.constant 0.000000e+00 : f32
    %163 = vector.shape_cast %162 : vector<256x1xi1> to vector<256x1xi1>
    %164 = vector.broadcast %163 : vector<256x1xi1> to vector<256x4xi1>
    %165 = vector.broadcast %cst_75 : f32 to vector<256x4xf32>
    %166 = arith.select %164, %157, %165 : vector<256x4xi1>, vector<256x4xf32>
    %167 = arith.truncf %166 : vector<256x4xf32> to vector<256x4xbf16>
    %c2_76 = arith.constant 2 : index
    %c0_77 = arith.constant 0 : index
    %c0_78 = arith.constant 0 : index
    %168 = vector.load %arg6[%c2_76, %c0_77, %c0_78] : memref<9x4x16xbf16, #tpu.memory_space<vmem>>, vector<1x4x16xbf16>
    %169 = vector.shape_cast %168 : vector<1x4x16xbf16> to vector<4x16xbf16>
    %cst_79 = arith.constant dense<0.000000e+00> : vector<256x16xf32>
    %170 = tpu.matmul %167, %169, %cst_79 {dimension_numbers = #tpu.dot_dimension_numbers<[1], [0], [0], [1], [0, 0, 1, 1], [], []>} : vector<256x4xbf16>, vector<4x16xbf16>, vector<256x16xf32> -> vector<256x16xf32>
    %171 = arith.addf %156, %170 : vector<256x16xf32>
    %c1_i32_80 = arith.constant 1 : i32
    %172 = tpu.dynamic_rotate %127 by %c1_i32_80 dim 0 : vector<256x4xf32>, i32 -> vector<256x4xf32>
    %c1_i32_81 = arith.constant 1 : i32
    %173 = vector.broadcast %c1_i32_81 : i32 to vector<256x1xi32>
    %174 = arith.cmpi sge, %130, %173 : vector<256x1xi32>
    %cst_82 = arith.constant 0.000000e+00 : f32
    %175 = vector.shape_cast %174 : vector<256x1xi1> to vector<256x1xi1>
    %176 = vector.broadcast %175 : vector<256x1xi1> to vector<256x4xi1>
    %177 = vector.broadcast %cst_82 : f32 to vector<256x4xf32>
    %178 = arith.select %176, %172, %177 : vector<256x4xi1>, vector<256x4xf32>
    %179 = arith.truncf %178 : vector<256x4xf32> to vector<256x4xbf16>
    %c3_83 = arith.constant 3 : index
    %c0_84 = arith.constant 0 : index
    %c0_85 = arith.constant 0 : index
    %180 = vector.load %arg6[%c3_83, %c0_84, %c0_85] : memref<9x4x16xbf16, #tpu.memory_space<vmem>>, vector<1x4x16xbf16>
    %181 = vector.shape_cast %180 : vector<1x4x16xbf16> to vector<4x16xbf16>
    %cst_86 = arith.constant dense<0.000000e+00> : vector<256x16xf32>
    %182 = tpu.matmul %179, %181, %cst_86 {dimension_numbers = #tpu.dot_dimension_numbers<[1], [0], [0], [1], [0, 0, 1, 1], [], []>} : vector<256x4xbf16>, vector<4x16xbf16>, vector<256x16xf32> -> vector<256x16xf32>
    %183 = arith.addf %171, %182 : vector<256x16xf32>
    %184 = arith.truncf %127 : vector<256x4xf32> to vector<256x4xbf16>
    %c4_87 = arith.constant 4 : index
    %c0_88 = arith.constant 0 : index
    %c0_89 = arith.constant 0 : index
    %185 = vector.load %arg6[%c4_87, %c0_88, %c0_89] : memref<9x4x16xbf16, #tpu.memory_space<vmem>>, vector<1x4x16xbf16>
    %186 = vector.shape_cast %185 : vector<1x4x16xbf16> to vector<4x16xbf16>
    %cst_90 = arith.constant dense<0.000000e+00> : vector<256x16xf32>
    %187 = tpu.matmul %184, %186, %cst_90 {dimension_numbers = #tpu.dot_dimension_numbers<[1], [0], [0], [1], [0, 0, 1, 1], [], []>} : vector<256x4xbf16>, vector<4x16xbf16>, vector<256x16xf32> -> vector<256x16xf32>
    %188 = arith.addf %183, %187 : vector<256x16xf32>
    %c255_i32 = arith.constant 255 : i32
    %189 = tpu.dynamic_rotate %127 by %c255_i32 dim 0 : vector<256x4xf32>, i32 -> vector<256x4xf32>
    %c15_i32_91 = arith.constant 15 : i32
    %190 = vector.broadcast %c15_i32_91 : i32 to vector<256x1xi32>
    %191 = arith.cmpi slt, %130, %190 : vector<256x1xi32>
    %cst_92 = arith.constant 0.000000e+00 : f32
    %192 = vector.shape_cast %191 : vector<256x1xi1> to vector<256x1xi1>
    %193 = vector.broadcast %192 : vector<256x1xi1> to vector<256x4xi1>
    %194 = vector.broadcast %cst_92 : f32 to vector<256x4xf32>
    %195 = arith.select %193, %189, %194 : vector<256x4xi1>, vector<256x4xf32>
    %196 = arith.truncf %195 : vector<256x4xf32> to vector<256x4xbf16>
    %c5_93 = arith.constant 5 : index
    %c0_94 = arith.constant 0 : index
    %c0_95 = arith.constant 0 : index
    %197 = vector.load %arg6[%c5_93, %c0_94, %c0_95] : memref<9x4x16xbf16, #tpu.memory_space<vmem>>, vector<1x4x16xbf16>
    %198 = vector.shape_cast %197 : vector<1x4x16xbf16> to vector<4x16xbf16>
    %cst_96 = arith.constant dense<0.000000e+00> : vector<256x16xf32>
    %199 = tpu.matmul %196, %198, %cst_96 {dimension_numbers = #tpu.dot_dimension_numbers<[1], [0], [0], [1], [0, 0, 1, 1], [], []>} : vector<256x4xbf16>, vector<4x16xbf16>, vector<256x16xf32> -> vector<256x16xf32>
    %200 = arith.addf %188, %199 : vector<256x16xf32>
    %c241_i32 = arith.constant 241 : i32
    %201 = tpu.dynamic_rotate %127 by %c241_i32 dim 0 : vector<256x4xf32>, i32 -> vector<256x4xf32>
    %c240_i32 = arith.constant 240 : i32
    %202 = vector.broadcast %c240_i32 : i32 to vector<256x1xi32>
    %203 = arith.cmpi slt, %128, %202 : vector<256x1xi32>
    %c1_i32_97 = arith.constant 1 : i32
    %204 = vector.broadcast %c1_i32_97 : i32 to vector<256x1xi32>
    %205 = arith.cmpi sge, %130, %204 : vector<256x1xi32>
    %206 = arith.andi %203, %205 : vector<256x1xi1>
    %cst_98 = arith.constant 0.000000e+00 : f32
    %207 = vector.shape_cast %206 : vector<256x1xi1> to vector<256x1xi1>
    %208 = vector.broadcast %207 : vector<256x1xi1> to vector<256x4xi1>
    %209 = vector.broadcast %cst_98 : f32 to vector<256x4xf32>
    %210 = arith.select %208, %201, %209 : vector<256x4xi1>, vector<256x4xf32>
    %211 = arith.truncf %210 : vector<256x4xf32> to vector<256x4xbf16>
    %c6_99 = arith.constant 6 : index
    %c0_100 = arith.constant 0 : index
    %c0_101 = arith.constant 0 : index
    %212 = vector.load %arg6[%c6_99, %c0_100, %c0_101] : memref<9x4x16xbf16, #tpu.memory_space<vmem>>, vector<1x4x16xbf16>
    %213 = vector.shape_cast %212 : vector<1x4x16xbf16> to vector<4x16xbf16>
    %cst_102 = arith.constant dense<0.000000e+00> : vector<256x16xf32>
    %214 = tpu.matmul %211, %213, %cst_102 {dimension_numbers = #tpu.dot_dimension_numbers<[1], [0], [0], [1], [0, 0, 1, 1], [], []>} : vector<256x4xbf16>, vector<4x16xbf16>, vector<256x16xf32> -> vector<256x16xf32>
    %215 = arith.addf %200, %214 : vector<256x16xf32>
    %c240_i32_103 = arith.constant 240 : i32
    %216 = tpu.dynamic_rotate %127 by %c240_i32_103 dim 0 : vector<256x4xf32>, i32 -> vector<256x4xf32>
    %c240_i32_104 = arith.constant 240 : i32
    %217 = vector.broadcast %c240_i32_104 : i32 to vector<256x1xi32>
    %218 = arith.cmpi slt, %128, %217 : vector<256x1xi32>
    %cst_105 = arith.constant 0.000000e+00 : f32
    %219 = vector.shape_cast %218 : vector<256x1xi1> to vector<256x1xi1>
    %220 = vector.broadcast %219 : vector<256x1xi1> to vector<256x4xi1>
    %221 = vector.broadcast %cst_105 : f32 to vector<256x4xf32>
    %222 = arith.select %220, %216, %221 : vector<256x4xi1>, vector<256x4xf32>
    %223 = arith.truncf %222 : vector<256x4xf32> to vector<256x4xbf16>
    %c7_106 = arith.constant 7 : index
    %c0_107 = arith.constant 0 : index
    %c0_108 = arith.constant 0 : index
    %224 = vector.load %arg6[%c7_106, %c0_107, %c0_108] : memref<9x4x16xbf16, #tpu.memory_space<vmem>>, vector<1x4x16xbf16>
    %225 = vector.shape_cast %224 : vector<1x4x16xbf16> to vector<4x16xbf16>
    %cst_109 = arith.constant dense<0.000000e+00> : vector<256x16xf32>
    %226 = tpu.matmul %223, %225, %cst_109 {dimension_numbers = #tpu.dot_dimension_numbers<[1], [0], [0], [1], [0, 0, 1, 1], [], []>} : vector<256x4xbf16>, vector<4x16xbf16>, vector<256x16xf32> -> vector<256x16xf32>
    %227 = arith.addf %215, %226 : vector<256x16xf32>
    %c239_i32 = arith.constant 239 : i32
    %228 = tpu.dynamic_rotate %127 by %c239_i32 dim 0 : vector<256x4xf32>, i32 -> vector<256x4xf32>
    %c240_i32_110 = arith.constant 240 : i32
    %229 = vector.broadcast %c240_i32_110 : i32 to vector<256x1xi32>
    %230 = arith.cmpi slt, %128, %229 : vector<256x1xi32>
    %c15_i32_111 = arith.constant 15 : i32
    %231 = vector.broadcast %c15_i32_111 : i32 to vector<256x1xi32>
    %232 = arith.cmpi slt, %130, %231 : vector<256x1xi32>
    %233 = arith.andi %230, %232 : vector<256x1xi1>
    %cst_112 = arith.constant 0.000000e+00 : f32
    %234 = vector.shape_cast %233 : vector<256x1xi1> to vector<256x1xi1>
    %235 = vector.broadcast %234 : vector<256x1xi1> to vector<256x4xi1>
    %236 = vector.broadcast %cst_112 : f32 to vector<256x4xf32>
    %237 = arith.select %235, %228, %236 : vector<256x4xi1>, vector<256x4xf32>
    %238 = arith.truncf %237 : vector<256x4xf32> to vector<256x4xbf16>
    %c8_113 = arith.constant 8 : index
    %c0_114 = arith.constant 0 : index
    %c0_115 = arith.constant 0 : index
    %239 = vector.load %arg6[%c8_113, %c0_114, %c0_115] : memref<9x4x16xbf16, #tpu.memory_space<vmem>>, vector<1x4x16xbf16>
    %240 = vector.shape_cast %239 : vector<1x4x16xbf16> to vector<4x16xbf16>
    %cst_116 = arith.constant dense<0.000000e+00> : vector<256x16xf32>
    %241 = tpu.matmul %238, %240, %cst_116 {dimension_numbers = #tpu.dot_dimension_numbers<[1], [0], [0], [1], [0, 0, 1, 1], [], []>} : vector<256x4xbf16>, vector<4x16xbf16>, vector<256x16xf32> -> vector<256x16xf32>
    %242 = arith.addf %227, %241 : vector<256x16xf32>
    %c0_117 = arith.constant 0 : index
    %c0_118 = arith.constant 0 : index
    %243 = vector.load %arg7[%c0_117, %c0_118] : memref<1x16xf32, #tpu.memory_space<vmem>>, vector<1x16xf32>
    %244 = vector.broadcast %243 : vector<1x16xf32> to vector<256x16xf32>
    %245 = arith.addf %242, %244 : vector<256x16xf32>
    %cst_119 = arith.constant 0.000000e+00 : f32
    %246 = vector.broadcast %cst_119 : f32 to vector<256x16xf32>
    %247 = arith.maximumf %245, %246 : vector<256x16xf32>
    %248 = arith.addf %124, %247 : vector<256x16xf32>
    %249 = tpu.iota {dimensions = array<i32: 0>} : vector<256x1xi32>
    %c15_i32_120 = arith.constant 15 : i32
    %250 = vector.broadcast %c15_i32_120 : i32 to vector<256x1xi32>
    %251 = arith.andi %249, %250 : vector<256x1xi32>
    %c17_i32_121 = arith.constant 17 : i32
    %252 = tpu.dynamic_rotate %248 by %c17_i32_121 dim 0 : vector<256x16xf32>, i32 -> vector<256x16xf32>
    %c16_i32_122 = arith.constant 16 : i32
    %253 = vector.broadcast %c16_i32_122 : i32 to vector<256x1xi32>
    %254 = arith.cmpi sge, %249, %253 : vector<256x1xi32>
    %c1_i32_123 = arith.constant 1 : i32
    %255 = vector.broadcast %c1_i32_123 : i32 to vector<256x1xi32>
    %256 = arith.cmpi sge, %251, %255 : vector<256x1xi32>
    %257 = arith.andi %254, %256 : vector<256x1xi1>
    %cst_124 = arith.constant 0.000000e+00 : f32
    %258 = vector.shape_cast %257 : vector<256x1xi1> to vector<256x1xi1>
    %259 = vector.broadcast %258 : vector<256x1xi1> to vector<256x16xi1>
    %260 = vector.broadcast %cst_124 : f32 to vector<256x16xf32>
    %261 = arith.select %259, %252, %260 : vector<256x16xi1>, vector<256x16xf32>
    %262 = arith.truncf %261 : vector<256x16xf32> to vector<256x16xbf16>
    %c0_125 = arith.constant 0 : index
    %c0_126 = arith.constant 0 : index
    %c0_127 = arith.constant 0 : index
    %263 = vector.load %arg8[%c0_125, %c0_126, %c0_127] : memref<9x16x128xbf16, #tpu.memory_space<vmem>>, vector<1x16x128xbf16>
    %264 = vector.shape_cast %263 : vector<1x16x128xbf16> to vector<16x128xbf16>
    %cst_128 = arith.constant dense<0.000000e+00> : vector<256x128xf32>
    %265 = tpu.matmul %262, %264, %cst_128 {dimension_numbers = #tpu.dot_dimension_numbers<[1], [0], [0], [1], [0, 0, 1, 1], [], []>} : vector<256x16xbf16>, vector<16x128xbf16>, vector<256x128xf32> -> vector<256x128xf32>
    %c16_i32_129 = arith.constant 16 : i32
    %266 = tpu.dynamic_rotate %248 by %c16_i32_129 dim 0 : vector<256x16xf32>, i32 -> vector<256x16xf32>
    %c16_i32_130 = arith.constant 16 : i32
    %267 = vector.broadcast %c16_i32_130 : i32 to vector<256x1xi32>
    %268 = arith.cmpi sge, %249, %267 : vector<256x1xi32>
    %cst_131 = arith.constant 0.000000e+00 : f32
    %269 = vector.shape_cast %268 : vector<256x1xi1> to vector<256x1xi1>
    %270 = vector.broadcast %269 : vector<256x1xi1> to vector<256x16xi1>
    %271 = vector.broadcast %cst_131 : f32 to vector<256x16xf32>
    %272 = arith.select %270, %266, %271 : vector<256x16xi1>, vector<256x16xf32>
    %273 = arith.truncf %272 : vector<256x16xf32> to vector<256x16xbf16>
    %c1_132 = arith.constant 1 : index
    %c0_133 = arith.constant 0 : index
    %c0_134 = arith.constant 0 : index
    %274 = vector.load %arg8[%c1_132, %c0_133, %c0_134] : memref<9x16x128xbf16, #tpu.memory_space<vmem>>, vector<1x16x128xbf16>
    %275 = vector.shape_cast %274 : vector<1x16x128xbf16> to vector<16x128xbf16>
    %cst_135 = arith.constant dense<0.000000e+00> : vector<256x128xf32>
    %276 = tpu.matmul %273, %275, %cst_135 {dimension_numbers = #tpu.dot_dimension_numbers<[1], [0], [0], [1], [0, 0, 1, 1], [], []>} : vector<256x16xbf16>, vector<16x128xbf16>, vector<256x128xf32> -> vector<256x128xf32>
    %277 = arith.addf %265, %276 : vector<256x128xf32>
    %c15_i32_136 = arith.constant 15 : i32
    %278 = tpu.dynamic_rotate %248 by %c15_i32_136 dim 0 : vector<256x16xf32>, i32 -> vector<256x16xf32>
    %c16_i32_137 = arith.constant 16 : i32
    %279 = vector.broadcast %c16_i32_137 : i32 to vector<256x1xi32>
    %280 = arith.cmpi sge, %249, %279 : vector<256x1xi32>
    %c15_i32_138 = arith.constant 15 : i32
    %281 = vector.broadcast %c15_i32_138 : i32 to vector<256x1xi32>
    %282 = arith.cmpi slt, %251, %281 : vector<256x1xi32>
    %283 = arith.andi %280, %282 : vector<256x1xi1>
    %cst_139 = arith.constant 0.000000e+00 : f32
    %284 = vector.shape_cast %283 : vector<256x1xi1> to vector<256x1xi1>
    %285 = vector.broadcast %284 : vector<256x1xi1> to vector<256x16xi1>
    %286 = vector.broadcast %cst_139 : f32 to vector<256x16xf32>
    %287 = arith.select %285, %278, %286 : vector<256x16xi1>, vector<256x16xf32>
    %288 = arith.truncf %287 : vector<256x16xf32> to vector<256x16xbf16>
    %c2_140 = arith.constant 2 : index
    %c0_141 = arith.constant 0 : index
    %c0_142 = arith.constant 0 : index
    %289 = vector.load %arg8[%c2_140, %c0_141, %c0_142] : memref<9x16x128xbf16, #tpu.memory_space<vmem>>, vector<1x16x128xbf16>
    %290 = vector.shape_cast %289 : vector<1x16x128xbf16> to vector<16x128xbf16>
    %cst_143 = arith.constant dense<0.000000e+00> : vector<256x128xf32>
    %291 = tpu.matmul %288, %290, %cst_143 {dimension_numbers = #tpu.dot_dimension_numbers<[1], [0], [0], [1], [0, 0, 1, 1], [], []>} : vector<256x16xbf16>, vector<16x128xbf16>, vector<256x128xf32> -> vector<256x128xf32>
    %292 = arith.addf %277, %291 : vector<256x128xf32>
    %c1_i32_144 = arith.constant 1 : i32
    %293 = tpu.dynamic_rotate %248 by %c1_i32_144 dim 0 : vector<256x16xf32>, i32 -> vector<256x16xf32>
    %c1_i32_145 = arith.constant 1 : i32
    %294 = vector.broadcast %c1_i32_145 : i32 to vector<256x1xi32>
    %295 = arith.cmpi sge, %251, %294 : vector<256x1xi32>
    %cst_146 = arith.constant 0.000000e+00 : f32
    %296 = vector.shape_cast %295 : vector<256x1xi1> to vector<256x1xi1>
    %297 = vector.broadcast %296 : vector<256x1xi1> to vector<256x16xi1>
    %298 = vector.broadcast %cst_146 : f32 to vector<256x16xf32>
    %299 = arith.select %297, %293, %298 : vector<256x16xi1>, vector<256x16xf32>
    %300 = arith.truncf %299 : vector<256x16xf32> to vector<256x16xbf16>
    %c3_147 = arith.constant 3 : index
    %c0_148 = arith.constant 0 : index
    %c0_149 = arith.constant 0 : index
    %301 = vector.load %arg8[%c3_147, %c0_148, %c0_149] : memref<9x16x128xbf16, #tpu.memory_space<vmem>>, vector<1x16x128xbf16>
    %302 = vector.shape_cast %301 : vector<1x16x128xbf16> to vector<16x128xbf16>
    %cst_150 = arith.constant dense<0.000000e+00> : vector<256x128xf32>
    %303 = tpu.matmul %300, %302, %cst_150 {dimension_numbers = #tpu.dot_dimension_numbers<[1], [0], [0], [1], [0, 0, 1, 1], [], []>} : vector<256x16xbf16>, vector<16x128xbf16>, vector<256x128xf32> -> vector<256x128xf32>
    %304 = arith.addf %292, %303 : vector<256x128xf32>
    %305 = arith.truncf %248 : vector<256x16xf32> to vector<256x16xbf16>
    %c4_151 = arith.constant 4 : index
    %c0_152 = arith.constant 0 : index
    %c0_153 = arith.constant 0 : index
    %306 = vector.load %arg8[%c4_151, %c0_152, %c0_153] : memref<9x16x128xbf16, #tpu.memory_space<vmem>>, vector<1x16x128xbf16>
    %307 = vector.shape_cast %306 : vector<1x16x128xbf16> to vector<16x128xbf16>
    %cst_154 = arith.constant dense<0.000000e+00> : vector<256x128xf32>
    %308 = tpu.matmul %305, %307, %cst_154 {dimension_numbers = #tpu.dot_dimension_numbers<[1], [0], [0], [1], [0, 0, 1, 1], [], []>} : vector<256x16xbf16>, vector<16x128xbf16>, vector<256x128xf32> -> vector<256x128xf32>
    %309 = arith.addf %304, %308 : vector<256x128xf32>
    %c255_i32_155 = arith.constant 255 : i32
    %310 = tpu.dynamic_rotate %248 by %c255_i32_155 dim 0 : vector<256x16xf32>, i32 -> vector<256x16xf32>
    %c15_i32_156 = arith.constant 15 : i32
    %311 = vector.broadcast %c15_i32_156 : i32 to vector<256x1xi32>
    %312 = arith.cmpi slt, %251, %311 : vector<256x1xi32>
    %cst_157 = arith.constant 0.000000e+00 : f32
    %313 = vector.shape_cast %312 : vector<256x1xi1> to vector<256x1xi1>
    %314 = vector.broadcast %313 : vector<256x1xi1> to vector<256x16xi1>
    %315 = vector.broadcast %cst_157 : f32 to vector<256x16xf32>
    %316 = arith.select %314, %310, %315 : vector<256x16xi1>, vector<256x16xf32>
    %317 = arith.truncf %316 : vector<256x16xf32> to vector<256x16xbf16>
    %c5_158 = arith.constant 5 : index
    %c0_159 = arith.constant 0 : index
    %c0_160 = arith.constant 0 : index
    %318 = vector.load %arg8[%c5_158, %c0_159, %c0_160] : memref<9x16x128xbf16, #tpu.memory_space<vmem>>, vector<1x16x128xbf16>
    %319 = vector.shape_cast %318 : vector<1x16x128xbf16> to vector<16x128xbf16>
    %cst_161 = arith.constant dense<0.000000e+00> : vector<256x128xf32>
    %320 = tpu.matmul %317, %319, %cst_161 {dimension_numbers = #tpu.dot_dimension_numbers<[1], [0], [0], [1], [0, 0, 1, 1], [], []>} : vector<256x16xbf16>, vector<16x128xbf16>, vector<256x128xf32> -> vector<256x128xf32>
    %321 = arith.addf %309, %320 : vector<256x128xf32>
    %c241_i32_162 = arith.constant 241 : i32
    %322 = tpu.dynamic_rotate %248 by %c241_i32_162 dim 0 : vector<256x16xf32>, i32 -> vector<256x16xf32>
    %c240_i32_163 = arith.constant 240 : i32
    %323 = vector.broadcast %c240_i32_163 : i32 to vector<256x1xi32>
    %324 = arith.cmpi slt, %249, %323 : vector<256x1xi32>
    %c1_i32_164 = arith.constant 1 : i32
    %325 = vector.broadcast %c1_i32_164 : i32 to vector<256x1xi32>
    %326 = arith.cmpi sge, %251, %325 : vector<256x1xi32>
    %327 = arith.andi %324, %326 : vector<256x1xi1>
    %cst_165 = arith.constant 0.000000e+00 : f32
    %328 = vector.shape_cast %327 : vector<256x1xi1> to vector<256x1xi1>
    %329 = vector.broadcast %328 : vector<256x1xi1> to vector<256x16xi1>
    %330 = vector.broadcast %cst_165 : f32 to vector<256x16xf32>
    %331 = arith.select %329, %322, %330 : vector<256x16xi1>, vector<256x16xf32>
    %332 = arith.truncf %331 : vector<256x16xf32> to vector<256x16xbf16>
    %c6_166 = arith.constant 6 : index
    %c0_167 = arith.constant 0 : index
    %c0_168 = arith.constant 0 : index
    %333 = vector.load %arg8[%c6_166, %c0_167, %c0_168] : memref<9x16x128xbf16, #tpu.memory_space<vmem>>, vector<1x16x128xbf16>
    %334 = vector.shape_cast %333 : vector<1x16x128xbf16> to vector<16x128xbf16>
    %cst_169 = arith.constant dense<0.000000e+00> : vector<256x128xf32>
    %335 = tpu.matmul %332, %334, %cst_169 {dimension_numbers = #tpu.dot_dimension_numbers<[1], [0], [0], [1], [0, 0, 1, 1], [], []>} : vector<256x16xbf16>, vector<16x128xbf16>, vector<256x128xf32> -> vector<256x128xf32>
    %336 = arith.addf %321, %335 : vector<256x128xf32>
    %c240_i32_170 = arith.constant 240 : i32
    %337 = tpu.dynamic_rotate %248 by %c240_i32_170 dim 0 : vector<256x16xf32>, i32 -> vector<256x16xf32>
    %c240_i32_171 = arith.constant 240 : i32
    %338 = vector.broadcast %c240_i32_171 : i32 to vector<256x1xi32>
    %339 = arith.cmpi slt, %249, %338 : vector<256x1xi32>
    %cst_172 = arith.constant 0.000000e+00 : f32
    %340 = vector.shape_cast %339 : vector<256x1xi1> to vector<256x1xi1>
    %341 = vector.broadcast %340 : vector<256x1xi1> to vector<256x16xi1>
    %342 = vector.broadcast %cst_172 : f32 to vector<256x16xf32>
    %343 = arith.select %341, %337, %342 : vector<256x16xi1>, vector<256x16xf32>
    %344 = arith.truncf %343 : vector<256x16xf32> to vector<256x16xbf16>
    %c7_173 = arith.constant 7 : index
    %c0_174 = arith.constant 0 : index
    %c0_175 = arith.constant 0 : index
    %345 = vector.load %arg8[%c7_173, %c0_174, %c0_175] : memref<9x16x128xbf16, #tpu.memory_space<vmem>>, vector<1x16x128xbf16>
    %346 = vector.shape_cast %345 : vector<1x16x128xbf16> to vector<16x128xbf16>
    %cst_176 = arith.constant dense<0.000000e+00> : vector<256x128xf32>
    %347 = tpu.matmul %344, %346, %cst_176 {dimension_numbers = #tpu.dot_dimension_numbers<[1], [0], [0], [1], [0, 0, 1, 1], [], []>} : vector<256x16xbf16>, vector<16x128xbf16>, vector<256x128xf32> -> vector<256x128xf32>
    %348 = arith.addf %336, %347 : vector<256x128xf32>
    %c239_i32_177 = arith.constant 239 : i32
    %349 = tpu.dynamic_rotate %248 by %c239_i32_177 dim 0 : vector<256x16xf32>, i32 -> vector<256x16xf32>
    %c240_i32_178 = arith.constant 240 : i32
    %350 = vector.broadcast %c240_i32_178 : i32 to vector<256x1xi32>
    %351 = arith.cmpi slt, %249, %350 : vector<256x1xi32>
    %c15_i32_179 = arith.constant 15 : i32
    %352 = vector.broadcast %c15_i32_179 : i32 to vector<256x1xi32>
    %353 = arith.cmpi slt, %251, %352 : vector<256x1xi32>
    %354 = arith.andi %351, %353 : vector<256x1xi1>
    %cst_180 = arith.constant 0.000000e+00 : f32
    %355 = vector.shape_cast %354 : vector<256x1xi1> to vector<256x1xi1>
    %356 = vector.broadcast %355 : vector<256x1xi1> to vector<256x16xi1>
    %357 = vector.broadcast %cst_180 : f32 to vector<256x16xf32>
    %358 = arith.select %356, %349, %357 : vector<256x16xi1>, vector<256x16xf32>
    %359 = arith.truncf %358 : vector<256x16xf32> to vector<256x16xbf16>
    %c8_181 = arith.constant 8 : index
    %c0_182 = arith.constant 0 : index
    %c0_183 = arith.constant 0 : index
    %360 = vector.load %arg8[%c8_181, %c0_182, %c0_183] : memref<9x16x128xbf16, #tpu.memory_space<vmem>>, vector<1x16x128xbf16>
    %361 = vector.shape_cast %360 : vector<1x16x128xbf16> to vector<16x128xbf16>
    %cst_184 = arith.constant dense<0.000000e+00> : vector<256x128xf32>
    %362 = tpu.matmul %359, %361, %cst_184 {dimension_numbers = #tpu.dot_dimension_numbers<[1], [0], [0], [1], [0, 0, 1, 1], [], []>} : vector<256x16xbf16>, vector<16x128xbf16>, vector<256x128xf32> -> vector<256x128xf32>
    %363 = arith.addf %348, %362 : vector<256x128xf32>
    %c0_185 = arith.constant 0 : index
    %c0_186 = arith.constant 0 : index
    %364 = vector.load %arg9[%c0_185, %c0_186] : memref<1x128xf32, #tpu.memory_space<vmem>>, vector<1x128xf32>
    %365 = vector.broadcast %364 : vector<1x128xf32> to vector<256x128xf32>
    %366 = arith.addf %363, %365 : vector<256x128xf32>
    %cst_187 = arith.constant 0.000000e+00 : f32
    %367 = vector.broadcast %cst_187 : f32 to vector<256x128xf32>
    %368 = arith.maximumf %366, %367 : vector<256x128xf32>
    %c0_188 = arith.constant 0 : index
    %c0_189 = arith.constant 0 : index
    %c0_190 = arith.constant 0 : index
    %369 = vector.load %arg10[%c0_188, %c0_189, %c0_190] : memref<1x256x128xf32, #tpu.memory_space<vmem>>, vector<1x256x128xf32>
    %370 = vector.shape_cast %369 : vector<1x256x128xf32> to vector<256x128xf32>
    %371 = vector.shape_cast %368 : vector<256x128xf32> to vector<1x256x128xf32>
    tpu.vector_store %arg10[%c0_188, %c0_189, %c0_190], %371 {strides = array<i32>} : memref<1x256x128xf32, #tpu.memory_space<vmem>>, vector<1x256x128xf32>,
    return
  }
  func.func @transform_0(%arg0: i32) -> (i32, i32, i32) {
    %c0_i32 = arith.constant 0 : i32
    %c0_i32_0 = arith.constant 0 : i32
    %c0_i32_1 = arith.constant 0 : i32
    return %arg0, %c0_i32, %c0_i32_0 : i32, i32, i32
  }
  func.func @transform_1(%arg0: i32) -> (i32, i32, i32) {
    %c0_i32 = arith.constant 0 : i32
    %c0_i32_0 = arith.constant 0 : i32
    %c0_i32_1 = arith.constant 0 : i32
    return %arg0, %c0_i32, %c0_i32_0 : i32, i32, i32
  }
  func.func @transform_2(%arg0: i32) -> (i32, i32) {
    %c0_i32 = arith.constant 0 : i32
    %c0_i32_0 = arith.constant 0 : i32
    %c0_i32_1 = arith.constant 0 : i32
    return %c0_i32, %c0_i32_0 : i32, i32
  }
  func.func @transform_3(%arg0: i32) -> (i32, i32, i32) {
    %c0_i32 = arith.constant 0 : i32
    %c0_i32_0 = arith.constant 0 : i32
    %c0_i32_1 = arith.constant 0 : i32
    %c0_i32_2 = arith.constant 0 : i32
    return %c0_i32, %c0_i32_0, %c0_i32_1 : i32, i32, i32
  }
  func.func @transform_4(%arg0: i32) -> (i32, i32) {
    %c0_i32 = arith.constant 0 : i32
    %c0_i32_0 = arith.constant 0 : i32
    %c0_i32_1 = arith.constant 0 : i32
    return %c0_i32, %c0_i32_0 : i32, i32
  }
  func.func @transform_5(%arg0: i32) -> (i32, i32, i32) {
    %c0_i32 = arith.constant 0 : i32
    %c0_i32_0 = arith.constant 0 : i32
    %c0_i32_1 = arith.constant 0 : i32
    %c0_i32_2 = arith.constant 0 : i32
    return %c0_i32, %c0_i32_0, %c0_i32_1 : i32, i32, i32
  }
  func.func @transform_6(%arg0: i32) -> (i32, i32) {
    %c0_i32 = arith.constant 0 : i32
    %c0_i32_0 = arith.constant 0 : i32
    %c0_i32_1 = arith.constant 0 : i32
    return %c0_i32, %c0_i32_0 : i32, i32
  }
  func.func @transform_7(%arg0: i32) -> (i32, i32, i32) {
    %c0_i32 = arith.constant 0 : i32
    %c0_i32_0 = arith.constant 0 : i32
    %c0_i32_1 = arith.constant 0 : i32
    %c0_i32_2 = arith.constant 0 : i32
    return %c0_i32, %c0_i32_0, %c0_i32_1 : i32, i32, i32
  }
  func.func @transform_8(%arg0: i32) -> (i32, i32) {
    %c0_i32 = arith.constant 0 : i32
    %c0_i32_0 = arith.constant 0 : i32
    %c0_i32_1 = arith.constant 0 : i32
    return %c0_i32, %c0_i32_0 : i32, i32
  }
  func.func @transform_9(%arg0: i32) -> (i32, i32, i32) {
    %c0_i32 = arith.constant 0 : i32
    %c0_i32_0 = arith.constant 0 : i32
    %c0_i32_1 = arith.constant 0 : i32
    return %arg0, %c0_i32, %c0_i32_0 : i32, i32, i32
  }
}

</mosaic_0001>

<bundles_post_ra>
// kernel: tpu_custom_call.1
= control target key start
LH: loop header
LB: loop body
LE: loop exit
PB: predicated region body
PF: predicated region fallthrough
CT: control target
= control target key end

     0   :  { %14 = vsyncpa [#allocation3], 0  ;;  %s10949_s0 = inlined_call_operand.vmem [shape: bf16[2,64,4], index: 0, kind: input, shape index: {}]   ;;  %s10950_s1 = inlined_call_operand.vmem [shape: bf16[2,256,4], index: 1, kind: input, shape index: {}]   ;;  %s10951_s2 = inlined_call_operand.vmem [shape: f32[256,64], index: 2, kind: input, shape index: {}]   ;;  %s10952_s3 = inlined_call_operand.vmem [shape: bf16[9,4,16], index: 3, kind: input, shape index: {}]   ;;  %s10953_s4 = inlined_call_operand.vmem [shape: f32[1,16], index: 4, kind: input, shape index: {}]   ;;  %s10954_s5 = inlined_call_operand.vmem [shape: bf16[9,4,16], index: 5, kind: input, shape index: {}]   ;;  %s10955_s6 = inlined_call_operand.vmem [shape: f32[1,16], index: 6, kind: input, shape index: {}]   ;;  %s10956_s7 = inlined_call_operand.vmem [shape: bf16[9,16,128], index: 7, kind: input, shape index: {}]   ;;  %s10957_s8 = inlined_call_operand.vmem [shape: f32[1,128], index: 8, kind: input, shape index: {}]   ;;  %s10958_s9 = inlined_call_operand.hbm [shape: f32[2,256,128], index: 9, kind: output, shape index: {}]  }
   0x1   :  { %16 = vsyncpa [#allocation3 + $0x1], 0  ;;  %s7471_s30 = smov 0   ;;  %s7473_s10 = smov 0  }
   0x2   :  { %s7475_s11 = smov 0   ;;  %s7477_s12 = smov 0  }
   0x3 LB: > { %s7492_s13 = sadd.s32 4294967295, %s7415_s12   ;;  %s6765_s14 = sadd.s32 4294967294, %s7415_s12   ;;  %s7415_s12 = sphi %s7477_s12, %s12284_s12   ;;  %s7411_s11 = sphi %s7475_s11, %s12283_s11   ;;  %s7407_s10 = sphi %s7473_s10, %s12282_s10   ;;  %s7403_s30 = sphi %s7471_s30, %s12281_s30  }
   0x4   : > { %s7496_s15 = sadd.s32 1, %s7415_s12   ;;  %s228_s16 = sadd.s32 1, %s7411_s11 }
   0x5   : > { %s225_s17 = ssub.s32 %s7415_s12, %s7496_s15  ;;  %p238_p0 = scmp.ne.s32.totalorder %s7411_s11, %s7407_s10 }
   0x6   : > { %p226_p1 = scmp.eq.s32.totalorder %s225_s17, 0  ;;  %p239_p2 = scmp.eq.s32.totalorder %s7492_s13, 1 }
   0x7   : > { %p244_p3 = scmp.ne.s32.totalorder %s7407_s10, %s7403_s30  ;;  %p245_p4 = scmp.eq.s32.totalorder %s6765_s14, 1 }
   0x8   : > { %s7507_s18 = scalar_select %p226_p1, %s7411_s11, %s228_s16  }
   0x9   : > { %p7509_p5 = por %p239_p2, %p238_p0  ;;  %p7513_p6 = por %p245_p4, %p244_p3 }
   0xa   : > { %p6768_p7 = scmp.ge.s32.totalorder %s7415_s12, 1  ;;  %p300_p8 = scmp.lt.s32.totalorder %s7415_s12, 3 }
   0xc   : > { %p301_p9 = pnand %p6768_p7, %p300_p8 }
   0xe   : > { %304 = sbr.rel (%p301_p9) target bundleno = 1660 (0x67c), region = 56 }
  0x13   : > { %v6774_v0 = vld [vmem:[%s10952_s3 + $0x2] sm:$0x3]  ;;  %vm10959_vm0 = vcmask 1041408   ;;  %p341_p10 = scmp.lt.s32.totalorder %s7492_s13, 1  ;;  %v368_v1 = vlaneseq  ;;  %v6788_v3 = vld [vmem:[%s10952_s3 + $0x6] sm:$0x3] }
  0x14   : > { %v500_v2 = vsel %vm10959_vm0, %v6774_v0, 0  ;;  %v6814_v4 = vld [vmem:[%s10952_s3 + $0xa] sm:$0x3]  ;;  %v7536_v6 = vsel %vm10959_vm0, %v6788_v3, 0  ;;  %v6819_v8 = vld [vmem:[%s10952_s3 + $0xc] sm:$0x3] }
  0x15   : > { %509 = vmatpush.bf16.msra.mxu0 %v500_v2  ;;  %7303 = vmatpush.bf16.msra.mxu1 %v500_v2  ;;  %s7531_s27 = scalar_select %p341_p10, %s7492_s13, 1  ;;  %v7533_v5 = vshrl.u32 %v368_v1, 7  ;;  %v889_v7 = vsel %vm10959_vm0, %v6814_v4, 0  ;;  %v987_v9 = vsel %vm10959_vm0, %v6819_v8, 0  ;;  %v6824_v10 = vld [vmem:[%s10952_s3 + $0xe] sm:$0x3] }
  0x16   : > { %7304 = vmatpush.bf16.msra.mxu2 %v500_v2  ;;  %7305 = vmatpush.bf16.msra.mxu3 %v7536_v6  ;;  %v454_v11 = vld [vmem:[%s10952_s3] sm:$0x3]  ;;  %vm10966_vm1 = vcmask 31744   ;;  %v1069_v15 = vsel %vm10959_vm0, %v6824_v10, 0  ;;  %v7417_v31 = vmov 0.0   ;;  %s7302_s14 = sshll.u32 %s7492_s13, 8 }
  0x17   : > { %s7271_s22 = sshll.u32 %s7531_s27, 5  ;;  %v7552_v12 = vadd.s32 8, %v7533_v5  ;;  %v7555_v13 = vadd.s32 48, %v7533_v5  ;;  %v7558_v14 = vadd.s32 56, %v7533_v5  ;;  %vm10960_vm2 = vcmp.lt.s32.totalorder %v7533_v5, 7  ;;  %s7272_s21 = sshll.u32 %s7531_s27, 7 }
  0x18   : > { %s7563_s25 = scalar_lea.vmem %s10949_s0, %s7271_s22  ;;  %v544_v16 = vsel %vm10959_vm0, %v454_v11, 0  ;;  %vm10961_vm3 = vcmp.lt.s32.totalorder %v7533_v5, 1  ;;  %v377_v45 = vand.u32 7, %v7533_v5  ;;  %v7767_v58 = vadd.s32 32, %v7533_v5  ;;  %s7858_s24 = scalar_lea.vmem %s10950_s1, %s7272_s21 }
  0x19   : > { %898 = vmatpush.bf16.msrb.mxu1 %v889_v7  ;;  %v352_v17 = vld [vmem:[%s7563_s25] sm:$0xff]   ;;  %v378_v18 = vand.u32 7, %v7552_v12  ;;  %v7571_v19 = vld [vmem:[%s7563_s25 + $0xc] sm:$0xff]   ;;  %v7574_v20 = vld [vmem:[%s7563_s25 + $0x14] sm:$0xff]   ;;  %v383_v21 = vand.u32 7, %v7555_v13  ;;  %v384_v22 = vand.u32 7, %v7558_v14  ;;  %553 = vmatpush.bf16.msrb.mxu0 %v544_v16  ;;  %s6687_s21 = scalar_lea.hbm %s10958_s9, %s7302_s14 }
  0x1a   : > { %996 = vmatpush.bf16.msrb.mxu2 %v987_v9  ;;  %1078 = vmatpush.bf16.msrb.mxu3 %v1069_v15  ;;  %v7578_v23 = vunpack.c.l.bf16 %v352_v17  ;;  %v361_v24 = vunpack.c.h.bf16 %v352_v17  ;;  %v363_v25 = vunpack.c.l.bf16 %v7571_v19  ;;  %v364_v26 = vunpack.c.h.bf16 %v7571_v19  ;;  %v359_v27 = vld [vmem:[%s7563_s25 + $0x1c] sm:$0xf]  ;;  %v354_v38 = vld [vmem:[%s7563_s25 + $0x8] sm:$0xf]  ;;  %s6690_s23 = sshll.u32 %s6687_s21, 4  ;;  %s7373_s14 = scalar_lea.hbm %s10958_s9, 512  ;;  %s6691_s23 = int_to_ptr.hbm [resolvable:$true] %s6690_s23 }
  0x1b   : > { %v365_v28 = vunpack.c.l.bf16 %v7574_v20  ;;  %v366_v29 = vunpack.c.h.bf16 %v7574_v20  ;;  %v7585_v30 = vunpack.c.l.bf16 %v359_v27  ;;  %vm7591_vm4 = vcmp.lt.s32.totalorder %v378_v18, 7  ;;  %6777 = vmatmul.msk.bf16.vlgmr.msra.gmra.mxu1 %vm10966_vm1, %v7571_v19  ;;  %6778 = vmatmul.msk.bf16.vlgmr.msra.gmra.mxu2 %vm10966_vm1, %v7574_v20 }
  0x1c   : > { %v479_v32 = vpack.c.bf16 %v7578_v23, %v7417_v31  ;;  %v575_v33 = vrot.slane %v7578_v23, 1  ;;  %v576_v34 = vrot.slane %v361_v24, 1  ;;  %vm7610_vm5 = vcmp.ge.s32.totalorder %v383_v21, 1 }
  0x1d   : > { %v7597_v36 = vrot.slane %v365_v28, 7  ;;  %v391_v37 = vrot.slane %v366_v29, 7  ;;  %v392_v40 = vrot.slane %v7585_v30, 7  ;;  %vm7616_vm6 = vcmp.ge.s32.totalorder %v384_v22, 1 }
  0x1e   : > { %6775 = vmatmul.msk.bf16.vlgmr.msra.gmra.mxu0 %vm10966_vm1, %v479_v32  ;;  %v590_v39 = vsel %vm10960_vm2, %v575_v33, %v576_v34  ;;  %v362_v49 = vunpack.c.l.bf16 %v354_v38  ;;  %v385_v50 = vrot.slane %v7578_v23, 7  ;;  %v386_v55 = vrot.slane %v361_v24, 7 }
  0x1f   : > { %v625_v43 = vsel %vm7591_vm4, %v590_v39, 0.0  ;;  %v7629_v44 = vsel %vm10961_vm3, %v7597_v36, %v391_v37  ;;  %v7637_v47 = vsel %vm10961_vm3, %v391_v37, %v392_v40  ;;  %vm7651_vm7 = vcmp.lt.s32.totalorder %v377_v45, 7 }
  0x20   : > { %v7633_v46 = vpack.c.bf16 %v625_v43, %v7417_v31  ;;  %v712_v48 = vsel %vm7610_vm5, %v7629_v44, 0.0  ;;  %v713_v51 = vsel %vm7616_vm6, %v7637_v47, 0.0  ;;  %v387_v53 = vrot.slane %v362_v49, 7 }
  0x21   : > { %v717_v52 = vpack.c.bf16 %v713_v51, %v712_v48  ;;  %v577_v54 = vrot.slane %v362_v49, 1  ;;  %vm7655_vm8 = vcmp.ge.s32.totalorder %v377_v45, 1  ;;  %v7668_v61 = vsel %vm10961_vm3, %v385_v50, %v386_v55  ;;  %v6979_v45 = vld [vmem:[%s10954_s5 + $0xa] sm:$0x3] }
  0x22   : > { %v7664_v60 = vsel %vm10961_vm3, %v386_v55, %v387_v53  ;;  %vm7670_vm9 = vcmp.ge.s32.totalorder %v378_v18, 1  ;;  %v401_v63 = vsel %vm10961_vm3, %v392_v40, %v385_v50  ;;  %v862_v0 = vsel %vm7651_vm7, %v590_v39, 0.0 }
  0x23   : > { %6792 = vmatmul.msk.bf16.vlgmr.msra.gmra.mxu3 %vm10966_vm1, %v717_v52  ;;  %v7649_v56 = vsel %vm10960_vm2, %v576_v34, %v577_v54  ;;  %v706_v2 = vsel %vm7655_vm8, %v401_v63, 0.0  ;;  %v707_v3 = vsel %vm7670_vm9, %v7668_v61, 0.0  ;;  %v960_v4 = vsel %vm7655_vm8, %v7668_v61, 0.0 }
  0x24   : > { %v1132_v59 = vsel %vm7651_vm7, %v7649_v56, 0.0  ;;  %v863_v1 = vsel %vm7591_vm4, %v7649_v56, 0.0  ;;  %v961_v7 = vsel %vm7670_vm9, %v7664_v60, 0.0  ;;  %v7692_v8 = vpack.c.bf16 %v707_v3, %v706_v2 }
  0x25   : > { %v578_v9 = vrot.slane %v363_v25, 1  ;;  %v480_v10 = vpack.c.bf16 %v362_v49, %v361_v24  ;;  %v870_v15 = vpack.c.bf16 %v863_v1, %v862_v0  ;;  %v968_v16 = vpack.c.bf16 %v961_v7, %v960_v4  ;;  %v1642_v7 = vld [vmem:[%s10954_s5] sm:$0x3] }
  0x26   : > { %v7704_v18 = vadd.s32 16, %v7533_v5  ;;  %v7707_v27 = vadd.s32 24, %v7533_v5  ;;  %v579_v35 = vrot.slane %v364_v26, 1  ;;  %v388_v37 = vrot.slane %v363_v25, 7 }
  0x27   : > { %v7698_v11 = vsel %vm10960_vm2, %v577_v54, %v578_v9  ;;  %v389_v38 = vrot.slane %v364_v26, 7  ;;  %v443_v49 = vsel %vm7670_vm9, %v401_v63, 0.0  ;;  %v381_v62 = vand.u32 7, %v7767_v58 }
  0x28   : > { %v1133_v17 = vsel %vm7591_vm4, %v7698_v11, 0.0  ;;  %v379_v24 = vand.u32 7, %v7704_v18  ;;  %v380_v34 = vand.u32 7, %v7707_v27  ;;  %v7725_v39 = vsel %vm10960_vm2, %v578_v9, %v579_v35 }
  0x29   : > { %v7709_v32 = vpack.c.bf16 %v1133_v17, %v1132_v59  ;;  %v7737_v25 = vsel %vm10961_vm3, %v388_v37, %v389_v38  ;;  %v7741_v26 = vsel %vm10961_vm3, %v387_v53, %v388_v37  ;;  %v450_v54 = vpack.c.bf16 %v443_v49, %v7417_v31 }
  0x2a   : > { %vm7727_vm10 = vcmp.lt.s32.totalorder %v379_v24, 7  ;;  %vm7731_vm11 = vcmp.lt.s32.totalorder %v380_v34, 7  ;;  %vm7743_vm12 = vcmp.ge.s32.totalorder %v379_v24, 1  ;;  %vm7747_vm13 = vcmp.ge.s32.totalorder %v380_v34, 1 }
  0x2b   : > { %6815 = vmatmul.msk.bf16.vlgmr.msrb.gmra.mxu1 %vm10966_vm1, %v870_v15  ;;  %6820 = vmatmul.msk.bf16.vlgmr.msrb.gmra.mxu2 %vm10966_vm1, %v968_v16  ;;  %v864_v50 = vsel %vm7727_vm10, %v7698_v11, 0.0  ;;  %v865_v51 = vsel %vm7731_vm11, %v7725_v39, 0.0  ;;  %v962_v52 = vsel %vm7743_vm12, %v7741_v26, 0.0  ;;  %v963_v53 = vsel %vm7747_vm13, %v7737_v25, 0.0 }
  0x2c   : > { %v871_v55 = vpack.c.bf16 %v865_v51, %v864_v50  ;;  %v969_v57 = vpack.c.bf16 %v963_v53, %v962_v52  ;;  %v7770_v59 = vadd.s32 40, %v7533_v5  ;;  %v580_v31 = vrot.slane %v365_v28, 1  ;;  %v6865_v51 = vld [vmem:[%s10954_s5 + $0x4] sm:$0x3] }
  0x2d   : > { %v581_v0 = vrot.slane %v366_v29, 1  ;;  %vm7781_vm14 = vcmp.lt.s32.totalorder %v381_v62, 7  ;;  %v7792_v3 = vsel %vm10961_vm3, %v389_v38, %v7597_v36  ;;  %vm7794_vm4 = vcmp.ge.s32.totalorder %v381_v62, 1  ;;  %v6834_v36 = vld [vmem:[%s10954_s5 + $0x2] sm:$0x3] }
  0x2e   : > { %6776 = vmatmul.msk.bf16.gmra.mxu0 %vm10966_vm1, %v480_v10  ;;  %v382_v63 = vand.u32 7, %v7770_v59  ;;  %v7806_v29 = vsel %vm10960_vm2, %v579_v35, %v580_v31  ;;  %v449_v9 = vsel %vm7616_vm6, %v7629_v44, 0.0  ;;  %v1806_v15 = vsel %vm10959_vm0, %v6834_v36, 0 }
  0x2f   : > { %v7802_v28 = vsel %vm10960_vm2, %v580_v31, %v581_v0  ;;  %v1946_v16 = vsel %vm10959_vm0, %v1642_v7, 0  ;;  %1815 = vmatpush.bf16.msra.mxu1 %v1806_v15  ;;  %v444_v24 = vsel %vm7743_vm12, %v7668_v61, 0.0  ;;  %v445_v42 = vsel %vm7747_vm13, %v7664_v60, 0.0 }
  0x30   : > { %vm7785_vm15 = vcmp.lt.s32.totalorder %v382_v63, 7  ;;  %vm7820_vm7 = vcmp.ge.s32.totalorder %v382_v63, 1  ;;  %1955 = vmatpush.bf16.msra.mxu2 %v1946_v16  ;;  %v866_v34 = vsel %vm7781_vm14, %v7806_v29, 0.0  ;;  %v964_v37 = vsel %vm7794_vm4, %v7792_v3, 0.0  ;;  %v1281_v63 = vld [vmem:[%s7858_s24 + $0x7c] sm:$0xf] }
  0x31   : > { %v867_v35 = vsel %vm7785_vm15, %v7802_v28, 0.0  ;;  %v965_v61 = vsel %vm7820_vm7, %v7629_v44, 0.0  ;;  %v451_v38 = vpack.c.bf16 %v445_v42, %v444_v24  ;;  %v582_v52 = vrot.slane %v7585_v30, 1 }
  0x32   : > { %v872_v49 = vpack.c.bf16 %v867_v35, %v866_v34  ;;  %v970_v50 = vpack.c.bf16 %v965_v61, %v964_v37  ;;  %v2328_v53 = vsel %vm10959_vm0, %v6865_v51, 0  ;;  %vm7877_vm6 = vcmp.lt.s32.totalorder %v383_v21, 7 }
  0x33   : > { %6825 = vmatmul.msk.bf16.vlgmr.msrb.gmra.mxu3 %vm10966_vm1, %v480_v10  ;;  %v7864_v44 = vsel %vm10960_vm2, %v581_v0, %v582_v52  ;;  %vm7883_vm8 = vcmp.lt.s32.totalorder %v384_v22, 7  ;;  %v446_v23 = vsel %vm7794_vm4, %v7741_v26, 0.0  ;;  %v447_v21 = vsel %vm7820_vm7, %v7737_v25, 0.0 }
  0x34   : > { %2337 = vmatpush.bf16.msra.mxu3 %v2328_v53  ;;  %v868_v22 = vsel %vm7877_vm6, %v7864_v44, 0.0  ;;  %v966_v0 = vsel %vm7610_vm5, %v7637_v47, 0.0  ;;  %v7906_v7 = vunpack.c.l.bf16 %v1281_v63  ;;  %v1338_v41 = vand.u32 15, %v7533_v5 }
  0x35   : > { %v971_v16 = vpack.c.bf16 0.0, %v966_v0  ;;  %v1339_v47 = vand.u32 15, %v7552_v12  ;;  %v11250_v51 = vmov 0  ;;  %v627_v63 = vsel %vm7731_vm11, %v7698_v11, 0.0 }
  0x36   : > { %11247 = vst [vmem:[#allocation5_spill] sm:$0xff] %v7906_v7  ;;  %v10977_v34 = vrot.slane %v7906_v7, 7  ;;  %v10975_v0 = vmov 0.0|0.0   ;;  %v1341_v11 = vand.u32 15, %v7707_v27  ;;  %v11304_v7 = vmov 0 }
  0x37   : > { %vm7929_vm9 = vcmp.lt.s32.totalorder %v1339_v47, 15  ;;  %v11499_v40 = vmov 0  ;;  %v11516_v2 = vmov 0 }
  0x3b   : > { %6816 = vmatmul.msk.bf16.gmra.mxu1 %vm10966_vm1, %v871_v55  ;;  %6821 = vmatmul.msk.bf16.gmra.mxu2 %vm10966_vm1, %v969_v57  ;;  %v7873_v55 = vsel %vm10960_vm2, %v582_v52, %v575_v33  ;;  %v1250_v33 = vld [vmem:[%s7858_s24] sm:$0xff]   ;;  %v11253_v52 = vmov 0 }
  0x3c   : > { %v869_v31 = vsel %vm7883_vm8, %v7873_v55, 0.0  ;;  %v1282_v36 = vunpack.c.l.bf16 %v1250_v33  ;;  %v11254_v52 = vsel %vm7929_vm9, 4294967295, %v11253_v52 }
  0x3d   : > { %v873_v15 = vpack.c.bf16 %v869_v31, %v868_v22  ;;  %11255 = vst [vmem:[#allocation9_spill] sm:$0xff] %v11254_v52  ;;  %v631_v52 = vsel %vm7883_vm8, %v7864_v44, 0.0 }
  0x3e   : > { %6779 = vmatmul.msk.bf16.vlgmr.msrb.gmra.mxu0 %vm10966_vm1, %v450_v54  ;;  %v6783_v54 = vld [vmem:[%s10952_s3 + $0x4] sm:$0x3]  ;;  %v1370_v42 = vrot.slane %v1282_v36, 7 }
  0x3f   : > { %v651_v62 = vsel %vm10959_vm0, %v6783_v54, 0 }
  0x40   : > { %660 = vmatpush.bf16.msra.mxu0 %v651_v62 }
  0x43   : > { %6826 = vmatmul.msk.bf16.gmra.mxu3 %vm10966_vm1, %v7571_v19  ;;  %v448_v19 = vsel %vm7610_vm5, %v7792_v3, 0.0  ;;  %vm7925_vm5 = vcmp.ge.s32.totalorder %v1338_v41, 1 }
  0x44   : > { %v7826_v17 = vpack.c.bf16 %v449_v9, %v448_v19  ;;  %742 = vmatpush.bf16.msrb.mxu0 %v7536_v6  ;;  %v452_v19 = vpack.c.bf16 %v447_v21, %v446_v23  ;;  %v1283_v9 = vunpack.c.h.bf16 %v1250_v33  ;;  %v7909_v6 = vld [vmem:[%s7858_s24 + $0x8] sm:$0xff]   ;;  %v11251_v51 = vsel %vm7925_vm5, 4294967295, %v11250_v51 }
  0x45   : > { %11248 = vst [vmem:[#allocation6_spill] sm:$0xff] %v7909_v6  ;;  %v1284_v24 = vunpack.c.l.bf16 %v7909_v6  ;;  %v626_v21 = vsel %vm7727_vm10, %v7649_v56, 0.0  ;;  %v11256_v56 = vmov 0 }
  0x46   : > { %v1371_v35 = vrot.slane %v1283_v9, 7  ;;  %v2038_v37 = vrot.slane %v1283_v9, 1  ;;  %11252 = vst [vmem:[#allocation8_spill] sm:$0xff] %v11251_v51  ;;  %v633_v31 = vpack.c.bf16 %v627_v63, %v626_v21 }
  0x47   : > { %v2039_v61 = vrot.slane %v1284_v24, 1  ;;  %v1372_v41 = vrot.slane %v1284_v24, 7 }
  0x48   : > { %v1432_v12 = vsel %vm10961_vm3, %v1370_v42, %v1371_v35 }
  0x49   : > { %v2098_v54 = vsel %vm10960_vm2, %v2038_v37, %v2039_v61 }
  0x4a   : > { %v3056_v23 = vsel %vm7929_vm9, %v2098_v54, 0.0  ;;  %vm11266_vm9 = vcmp.lt.s32.totalorder %v7533_v5, 1 }
  0x4b   : > { %6817 = vmatmul.msk.bf16.gmra.mxu1 %vm10966_vm1, %v872_v49  ;;  %6822 = vmatmul.msk.bf16.gmra.mxu2 %vm10966_vm1, %v970_v50  ;;  %v7919_v49 = vrot.slane %v1282_v36, 1  ;;  %v1433_v50 = vsel %vm10961_vm3, %v10977_v34, %v1370_v42  ;;  %v1340_v36 = vand.u32 15, %v7704_v18  ;;  %v7979_v18 = vld [vmem:[%s7858_s24 + $0x10] sm:$0xff]   ;;  %v1342_v42 = vand.u32 15, %v7767_v58 }
  0x4c   : > { %11262 = vst [vmem:[#allocation12_spill] sm:$0xff] %v7979_v18  ;;  %v1286_v47 = vunpack.c.l.bf16 %v7979_v18  ;;  %v1287_v63 = vunpack.c.h.bf16 %v7979_v18 }
  0x4d   : > { %11249 = vst [vmem:[#allocation7_spill] sm:$0xff] %v7919_v49  ;;  %v2099_v62 = vsel %vm10960_vm2, %v7919_v49, %v2038_v37  ;;  %vm7961_vm0 = vcmp.ge.s32.totalorder %v1340_v36, 1  ;;  %vm7968_vm2 = vcmp.lt.s32.totalorder %v1341_v11, 15  ;;  %vm7985_vm3 = vcmp.ge.s32.totalorder %v1342_v42, 1 }
  0x4e   : > { %6780 = vmatmul.msk.bf16.gmra.mxu0 %vm10966_vm1, %v451_v38  ;;  %v1053_v38 = vpack.c.bf16 0.0, %v7585_v30  ;;  %v2515_v30 = vsel %vm7925_vm5, %v1433_v50, 0.0  ;;  %v7953_v22 = vpack.c.bf16 %v3056_v23, %v2099_v62  ;;  %v11257_v56 = vsel %vm7961_vm0, 4294967295, %v11256_v56  ;;  %v8022_v23 = vld [vmem:[%s7858_s24 + $0x18] sm:$0xff]  }
  0x4f   : > { %v7937_v53 = vpack.c.bf16 %v1432_v12, %v2515_v30  ;;  %11258 = vst [vmem:[#allocation10_spill] sm:$0xff] %v11257_v56  ;;  %v11268_v30 = vmov 0  ;;  %v1374_v36 = vrot.slane %v1286_v47, 7  ;;  %v1288_v11 = vunpack.c.l.bf16 %v8022_v23 }
  0x50   : > { %11276 = vst [vmem:[#allocation15_spill] sm:$0xff] %v8022_v23  ;;  %v629_v42 = vsel %vm7785_vm15, %v7806_v29, 0.0 }
  0x53   : > { %6827 = vmatmul.msk.bf16.gmra.mxu3 %vm10966_vm1, %v7574_v20 }
  0x5b   : > { %6818 = vmatmul.msk.bf16.gmra.mxu1 %vm10966_vm1, %v873_v15  ;;  %6823 = vmatmul.msk.bf16.gmra.mxu2 %vm10966_vm1, %v971_v16  ;;  %v2232_v15 = vsel %vm7968_vm2, %v2098_v54, 0.0  ;;  %v1285_v16 = vunpack.c.h.bf16 %v7909_v6 }
  0x5c   : > { %v2262_v27 = vpack.c.bf16 %v2232_v15, %v2099_v62  ;;  %v1345_v15 = vand.u32 15, %v7558_v14  ;;  %v11283_v14 = vmov 0 }
  0x5d   : > { %v1373_v37 = vrot.slane %v1285_v16, 7 }
  0x5e   : > { %6781 = vmatmul.msk.bf16.gmra.mxu0 %vm10966_vm1, %v452_v19  ;;  %v1596_v19 = vsel %vm7961_vm0, %v1433_v50, 0.0  ;;  %v2040_v50 = vrot.slane %v1285_v16, 1  ;;  %vm11271_vm0 = vcmp.lt.s32.totalorder %v7533_v5, 7  ;;  %v2043_v16 = vrot.slane %v1288_v11, 1 }
  0x5f   : > { %v1627_v9 = vpack.c.bf16 %v1432_v12, %v1596_v19  ;;  %v2041_v12 = vrot.slane %v1286_v47, 1  ;;  %v1375_v19 = vrot.slane %v1287_v63, 7 }
  0x63   : > { %6828 = vmatmul.msk.bf16.gmra.mxu3 %vm10966_vm1, %v1053_v38  ;;  %v1343_v38 = vand.u32 15, %v7770_v59 }
  0x6b   : > { %1816 = vmatmul.bf16.vlgmr.msra.gmra.mxu1 %v10975_v0  ;;  %1956 = vmatmul.bf16.vlgmr.msra.gmra.mxu2 %v10975_v0 }
  0x6e   : > { %6782 = vmatmul.msk.bf16.gmra.mxu0 %vm10966_vm1, %v7826_v17  ;;  %v11259_v17 = vmov 0 }
  0x6f   : > { %v11260_v17 = vsel %vm7968_vm2, 4294967295, %v11259_v17  ;;  %vm11267_vm2 = vmmov %vm11266_vm9 }
  0x70   : > { %11261 = vst [vmem:[#allocation11_spill] sm:$0xff] %v11260_v17  ;;  %v7996_v58 = vsel %vm11267_vm2, %v1372_v41, %v1373_v37  ;;  %vm11273_vm2 = vcmask 31744  }
  0x71   : > { %vm11275_vm5 = vmmov %vm11273_vm2 }
  0x73   : > { %2338 = vmatmul.bf16.vlgmr.msra.gmra.mxu3 %v10975_v0 }
  0x7b   : > { %6835 = vmatmul.msk.bf16.gmra.mxu1 %vm10966_vm1, %v1250_v33  ;;  %6850 = vmatmul.msk.bf16.gmra.mxu2 %vm10966_vm1, %v1627_v9  ;;  %v7991_v33 = vsel %vm11266_vm9, %v1371_v35, %v1372_v41  ;;  %v8007_v35 = vsel %vm11271_vm0, %v2040_v50, %v2041_v12  ;;  %vm11272_vm9 = vmmov %vm11271_vm0 }
  0x7c   : > { %v1598_v24 = vsel %vm7985_vm3, %v7991_v33, 0.0  ;;  %v8012_v54 = vsel %vm11272_vm9, %v2039_v61, %v2040_v50  ;;  %v1344_v61 = vand.u32 15, %v7555_v13  ;;  %vm11277_vm0 = vmmov %vm11273_vm2  ;;  %v628_v13 = vsel %vm7781_vm14, %v7725_v39, 0.0 }
  0x7d   : > { %v1628_v59 = vpack.c.bf16 %v7996_v58, %v1598_v24 }
  0x7e   : > { %6784 = vmatmul.msk.bf16.vlgmr.msra.gmra.mxu0 %vm10966_vm1, %v7633_v46  ;;  %v11263_v46 = vmov 0  ;;  %vm8029_vm9 = vcmp.ge.s32.totalorder %v1344_v61, 1  ;;  %v8077_v61 = vld [vmem:[%s7858_s24 + $0x20] sm:$0xff]  }
  0x7f   : > { %v11264_v46 = vsel %vm7985_vm3, 4294967295, %v11263_v46  ;;  %vm11274_vm3 = vmmov %vm11273_vm2  ;;  %11293 = vst [vmem:[#allocation20_spill] sm:$0xff] %v8077_v61 }
  0x80   : > { %11265 = vst [vmem:[#allocation13_spill] sm:$0xff] %v11264_v46 }
  0x83   : > { %6866 = vmatmul.msk.bf16.gmra.mxu3 %vm10966_vm1, %v2262_v27  ;;  %vm8001_vm1 = vcmp.lt.s32.totalorder %v1343_v38, 15  ;;  %v2042_v27 = vrot.slane %v1287_v63, 1  ;;  %v1314_v63 = vadd.s32 64, %v7533_v5 }
  0x84   : > { %v11269_v30 = vsel %vm8001_vm1, 4294967295, %v11268_v30  ;;  %v2234_v62 = vsel %vm8001_vm1, %v8007_v35, 0.0 }
  0x85   : > { %11270 = vst [vmem:[#allocation14_spill] sm:$0xff] %v11269_v30  ;;  %v2263_v21 = vpack.c.bf16 %v2234_v62, %v8012_v54 }
  0x8b   : > { %6836 = vmatmul.msk.bf16.gmra.mxu1 %vm11274_vm3, %v7909_v6  ;;  %6851 = vmatmul.msk.bf16.gmra.mxu2 %vm11275_vm5, %v1628_v59  ;;  %vm11281_vm3 = vcmp.lt.s32.totalorder %v7533_v5, 1 }
  0x8c   : > { %v8035_v9 = vsel %vm11281_vm3, %v1373_v37, %v1374_v36  ;;  %vm11282_vm5 = vmmov %vm11281_vm3  ;;  %v634_v37 = vpack.c.bf16 %v629_v42, %v628_v13  ;;  %v1290_v42 = vunpack.c.l.bf16 %v8077_v61 }
  0x8d   : > { %v8046_v41 = vsel %vm11282_vm5, %v1374_v36, %v1375_v19  ;;  %v1600_v47 = vsel %vm8029_vm9, %v8035_v9, 0.0  ;;  %vm11290_vm5 = vcmask 31744  }
  0x8e   : > { %6785 = vmatmul.msk.bf16.gmra.mxu0 %vm11273_vm2, %v633_v31  ;;  %v11278_v31 = vmov 0  ;;  %vm8051_vm2 = vcmp.lt.s32.totalorder %v1345_v15, 15  ;;  %v1629_v24 = vpack.c.bf16 %v8046_v41, %v1600_v47  ;;  %v1346_v15 = vand.u32 15, %v1314_v63 }
  0x8f   : > { %v11279_v31 = vsel %vm8029_vm9, 4294967295, %v11278_v31  ;;  %v11284_v14 = vsel %vm8051_vm2, 4294967295, %v11283_v14  ;;  %v1315_v47 = vadd.s32 72, %v7533_v5  ;;  %v11296_v63 = vmov 0 }
  0x90   : > { %11280 = vst [vmem:[#allocation16_spill] sm:$0xff] %v11279_v31 }
  0x91   : > { %11285 = vst [vmem:[#allocation17_spill] sm:$0xff] %v11284_v14 }
  0x93   : > { %6867 = vmatmul.msk.bf16.gmra.mxu3 %vm11277_vm0, %v2263_v21  ;;  %vm11286_vm0 = vcmp.lt.s32.totalorder %v7533_v5, 7 }
  0x94   : > { %v8057_v38 = vsel %vm11286_vm0, %v2042_v27, %v2043_v16  ;;  %vm11288_vm3 = vmmov %vm11286_vm0 }
  0x95   : > { %11287 = vst [vmem:[#allocation18_spill] sm:$0xff] %v8057_v38  ;;  %v8066_v62 = vsel %vm11288_vm3, %v2041_v12, %v2042_v27  ;;  %v2236_v21 = vsel %vm8051_vm2, %v8057_v38, 0.0  ;;  %vm11291_vm0 = vmmov %vm11290_vm5  ;;  %v1289_v12 = vunpack.c.h.bf16 %v8022_v23  ;;  %v1376_v27 = vrot.slane %v1288_v11, 7 }
  0x96   : > { %11289 = vst [vmem:[#allocation19_spill] sm:$0xff] %v8066_v62  ;;  %vm11292_vm9 = vmmov %vm11291_vm0  ;;  %v2264_v36 = vpack.c.bf16 %v2236_v21, %v8066_v62  ;;  %v1347_v11 = vand.u32 15, %v1315_v47 }
  0x97   : > { %vm11294_vm3 = vmmov %vm11291_vm0  ;;  %v2044_v34 = vrot.slane %v1289_v12, 1 }
  0x98   : > { %v8062_v59 = vpop.f32.mrf.mxu1 }
  0x9b   : > { %v8059_v50 = vpop.f32.mrf.mxu0  ;;  %6837 = vmatmul.msk.bf16.gmra.mxu1 %vm11291_vm0, %v7979_v18  ;;  %6852 = vmatmul.msk.bf16.gmra.mxu2 %vm11292_vm9, %v1629_v24  ;;  %v1377_v24 = vrot.slane %v1289_v12, 7  ;;  %vm11295_vm9 = vcmp.lt.s32.totalorder %v7533_v5, 1  ;;  %v2045_v18 = vrot.slane %v1290_v42, 1 }
  0x9c   : > { %v8092_v21 = vsel %vm11295_vm9, %v1375_v19, %v1376_v27  ;;  %vm11300_vm0 = vmmov %vm11295_vm9  ;;  %vm8119_vm9 = vcmp.lt.s32.totalorder %v1347_v11, 15 }
  0x9d   : > { %v8108_v19 = vsel %vm11300_vm0, %v1376_v27, %v1377_v24  ;;  %v11305_v7 = vsel %vm8119_vm9, 4294967295, %v11304_v7  ;;  %vm11310_vm0 = vcmask 31744  }
  0x9e   : > { %6786 = vmatmul.msk.bf16.gmra.mxu0 %vm11290_vm5, %v634_v37  ;;  %v8081_v13 = vpop.f32.mrf.mxu2  ;;  %vm8094_vm5 = vcmp.ge.s32.totalorder %v1346_v15, 1  ;;  %11301 = vst [vmem:[#allocation23_spill] sm:$0xff] %v8108_v19 }
  0x9f   : > { %v11297_v63 = vsel %vm8094_vm5, 4294967295, %v11296_v63  ;;  %v1602_v12 = vsel %vm8094_vm5, %v8092_v21, 0.0  ;;  %11306 = vst [vmem:[#allocation25_spill] sm:$0xff] %v11305_v7  ;;  %vm11313_vm5 = vmmov %vm11310_vm0  ;;  %v1378_v7 = vrot.slane %v1290_v42, 7 }
  0xa0   : > { %v8088_v0 = vpop.f32.mrf.mxu1  ;;  %11298 = vst [vmem:[#allocation21_spill] sm:$0xff] %v11297_v63  ;;  %v1630_v27 = vpack.c.bf16 %v8108_v19, %v1602_v12  ;;  %v8143_v12 = vld [vmem:[%s7858_s24 + $0x28] sm:$0xff]  }
  0xa1   : > { %11314 = vst [vmem:[#allocation29_spill] sm:$0xff] %v8143_v12 }
  0xa3   : > { %v8085_v37 = vpop.f32.mrf.mxu0  ;;  %6868 = vmatmul.msk.bf16.gmra.mxu3 %vm11294_vm3, %v2264_v36  ;;  %v630_v36 = vsel %vm7877_vm6, %v7802_v28, 0.0  ;;  %vm11302_vm3 = vcmp.lt.s32.totalorder %v7533_v5, 7 }
  0xa4   : > { %v635_v47 = vpack.c.bf16 %v631_v52, %v630_v36  ;;  %v8117_v49 = vsel %vm11302_vm3, %v2044_v34, %v2045_v18  ;;  %vm11308_vm8 = vmmov %vm11302_vm3  ;;  %v1316_v36 = vadd.s32 80, %v7533_v5 }
  0xa5   : > { %11303 = vst [vmem:[#allocation24_spill] sm:$0xff] %v8117_v49  ;;  %v8130_v63 = vsel %vm11308_vm8, %v2043_v16, %v2044_v34  ;;  %v2238_v52 = vsel %vm8119_vm9, %v8117_v49, 0.0  ;;  %vm11312_vm3 = vmmov %vm11310_vm0  ;;  %v1291_v16 = vunpack.c.h.bf16 %v8077_v61  ;;  %v1292_v49 = vunpack.c.l.bf16 %v8143_v12 }
  0xa6   : > { %v8098_v6 = vpop.f32.mrf.mxu3  ;;  %v8113_v15 = vpop.f32.mrf.mxu2  ;;  %11309 = vst [vmem:[#allocation27_spill] sm:$0xff] %v8130_v63  ;;  %v2265_v34 = vpack.c.bf16 %v2238_v52, %v8130_v63  ;;  %vm11316_vm8 = vmmov %vm11310_vm0 }
  0xa7   : > { %11299 = vst [vmem:[#allocation22_spill] sm:$0xff] %v8098_v6  ;;  %v2047_v63 = vrot.slane %v1292_v49, 1 }
  0xa8   : > { %v8126_v6 = vpop.f32.mrf.mxu1 }
  0xa9   : > { %11307 = vst [vmem:[#allocation26_spill] sm:$0xff] %v8126_v6  ;;  %v1348_v6 = vand.u32 15, %v1316_v36  ;;  %v11320_v36 = vmov 0 }
  0xab   : > { %v8123_v20 = vpop.f32.mrf.mxu0  ;;  %6838 = vmatmul.msk.bf16.gmra.mxu1 %vm11312_vm3, %v8022_v23  ;;  %6853 = vmatmul.msk.bf16.gmra.mxu2 %vm11313_vm5, %v1630_v27  ;;  %v1379_v27 = vrot.slane %v1291_v16, 7  ;;  %vm11318_vm5 = vcmp.lt.s32.totalorder %v7533_v5, 1 }
  0xac   : > { %v8158_v52 = vsel %vm11318_vm5, %v1377_v24, %v1378_v7  ;;  %vm11324_vm3 = vmmov %vm11318_vm5 }
  0xad   : > { %11319 = vst [vmem:[#allocation32_spill] sm:$0xff] %v8158_v52  ;;  %v8168_v19 = vsel %vm11324_vm3, %v1378_v7, %v1379_v27 }
  0xae   : > { %6787 = vmatmul.msk.bf16.gmra.mxu0 %vm11310_vm0, %v635_v47  ;;  %v8137_v11 = vpop.f32.mrf.mxu3  ;;  %v8147_v14 = vpop.f32.mrf.mxu2  ;;  %v1317_v47 = vadd.s32 88, %v7533_v5  ;;  %vm8160_vm0 = vcmp.ge.s32.totalorder %v1348_v6, 1  ;;  %11325 = vst [vmem:[#allocation35_spill] sm:$0xff] %v8168_v19 }
  0xaf   : > { %11311 = vst [vmem:[#allocation28_spill] sm:$0xff] %v8137_v11  ;;  %v11321_v36 = vsel %vm8160_vm0, 4294967295, %v11320_v36 }
  0xb0   : > { %11315 = vst [vmem:[#allocation30_spill] sm:$0xff] %v8147_v14  ;;  %v8154_v23 = vpop.f32.mrf.mxu1  ;;  %v1349_v42 = vand.u32 15, %v1317_v47  ;;  %v2046_v14 = vrot.slane %v1291_v16, 1  ;;  %v11329_v16 = vmov 0 }
  0xb1   : > { %11317 = vst [vmem:[#allocation31_spill] sm:$0xff] %v8154_v23 }
  0xb2   : > { %11322 = vst [vmem:[#allocation33_spill] sm:$0xff] %v11321_v36  ;;  %vm8179_vm5 = vcmp.lt.s32.totalorder %v1349_v42, 15  ;;  %v1318_v42 = vadd.s32 96, %v7533_v5 }
  0xb3   : > { %v8151_v11 = vpop.f32.mrf.mxu0  ;;  %6869 = vmatmul.msk.bf16.gmra.mxu3 %vm11316_vm8, %v2265_v34  ;;  %v1604_v34 = vsel %vm8160_vm0, %v8158_v52, 0.0  ;;  %vm11327_vm8 = vcmp.lt.s32.totalorder %v7533_v5, 7  ;;  %v11330_v16 = vsel %vm8179_vm5, 4294967295, %v11329_v16 }
  0xb4   : > { %v8177_v6 = vsel %vm11327_vm8, %v2046_v14, %v2047_v63  ;;  %11331 = vst [vmem:[#allocation38_spill] sm:$0xff] %v11330_v16  ;;  %v1631_v23 = vpack.c.bf16 %v8168_v19, %v1604_v34  ;;  %vm11333_vm3 = vmmov %vm11327_vm8  ;;  %vm11335_vm8 = vcmask 31744   ;;  %v1350_v34 = vand.u32 15, %v1318_v42 }
  0xb5   : > { %11328 = vst [vmem:[#allocation37_spill] sm:$0xff] %v8177_v6  ;;  %v8191_v36 = vsel %vm11333_vm3, %v2045_v18, %v2046_v14  ;;  %vm11337_vm0 = vmmov %vm11335_vm8  ;;  %v1293_v14 = vunpack.c.h.bf16 %v8143_v12 }
  0xb6   : > { %v8164_v31 = vpop.f32.mrf.mxu3  ;;  %v8173_v24 = vpop.f32.mrf.mxu2  ;;  %11334 = vst [vmem:[#allocation40_spill] sm:$0xff] %v8191_v36  ;;  %vm11338_vm9 = vmmov %vm11337_vm0 }
  0xb7   : > { %11323 = vst [vmem:[#allocation34_spill] sm:$0xff] %v8164_v31  ;;  %vm11341_vm3 = vmmov %vm11337_vm0 }
  0xb8   : > { %11326 = vst [vmem:[#allocation36_spill] sm:$0xff] %v8173_v24  ;;  %v8187_v31 = vpop.f32.mrf.mxu1  ;;  %v2240_v24 = vsel %vm8179_vm5, %v8177_v6, 0.0  ;;  %v1381_v6 = vrot.slane %v1293_v14, 7 }
  0xb9   : > { %11332 = vst [vmem:[#allocation39_spill] sm:$0xff] %v8187_v31  ;;  %v2266_v18 = vpack.c.bf16 %v2240_v24, %v8191_v36 }
  0xbb   : > { %v555_v47 = vpop.f32.mrf.mxu0  ;;  %6839 = vmatmul.msk.bf16.gmra.mxu1 %vm11337_vm0, %v8077_v61  ;;  %6854 = vmatmul.msk.bf16.gmra.mxu2 %vm11338_vm9, %v1631_v23  ;;  %vm11343_vm9 = vcmp.lt.s32.totalorder %v7533_v5, 1  ;;  %vm8223_vm0 = vcmp.ge.s32.totalorder %v1350_v34, 1 }
  0xbc   : > { %v8185_v7 = vadd.f32 %v555_v47, %v8059_v50  ;;  %v8205_v50 = vld [vmem:[%s7858_s24 + $0x30] sm:$0xff]   ;;  %v1380_v47 = vrot.slane %v1292_v49, 7  ;;  %v11344_v49 = vmov 0 }
  0xbd   : > { %11339 = vst [vmem:[#allocation42_spill] sm:$0xff] %v8205_v50  ;;  %v1294_v16 = vunpack.c.l.bf16 %v8205_v50  ;;  %v11345_v49 = vsel %vm8223_vm0, 4294967295, %v11344_v49 }
  0xbe   : > { %6789 = vmatmul.msk.bf16.vlgmr.msrb.gmra.mxu0 %vm11335_vm8, %v7692_v8  ;;  %v8199_v52 = vpop.f32.mrf.mxu3  ;;  %v8209_v31 = vpop.f32.mrf.mxu2  ;;  %v1319_v8 = vadd.s32 104, %v7533_v5  ;;  %v8221_v24 = vsel %vm11343_vm9, %v1379_v27, %v1380_v47  ;;  %11346 = vst [vmem:[#allocation45_spill] sm:$0xff] %v11345_v49  ;;  %vm11348_vm8 = vmmov %vm11343_vm9 }
  0xbf   : > { %11336 = vst [vmem:[#allocation41_spill] sm:$0xff] %v8199_v52  ;;  %v2049_v36 = vrot.slane %v1294_v16, 1  ;;  %v8237_v27 = vsel %vm11348_vm8, %v1380_v47, %v1381_v6 }
  0xc0   : > { %11340 = vst [vmem:[#allocation43_spill] sm:$0xff] %v8209_v31  ;;  %v8217_v23 = vpop.f32.mrf.mxu1  ;;  %v1351_v42 = vand.u32 15, %v1319_v8  ;;  %v2048_v31 = vrot.slane %v1293_v14, 1 }
  0xc1   : > { %11342 = vst [vmem:[#allocation44_spill] sm:$0xff] %v8217_v23 }
  0xc3   : > { %v557_v52 = vpop.f32.mrf.mxu0  ;;  %6870 = vmatmul.msk.bf16.gmra.mxu3 %vm11341_vm3, %v2266_v18  ;;  %v1606_v18 = vsel %vm8223_vm0, %v8221_v24, 0.0  ;;  %vm11350_vm3 = vcmp.lt.s32.totalorder %v7533_v5, 7 }
  0xc4   : > { %v8215_v61 = vadd.f32 %v557_v52, %v8085_v37  ;;  %v708_v37 = vsel %vm7743_vm12, %v7664_v60, 0.0  ;;  %v709_v52 = vsel %vm7747_vm13, %v7741_v26, 0.0  ;;  %v8246_v8 = vsel %vm11350_vm3, %v2048_v31, %v2049_v36  ;;  %v6898_v26 = vld [vmem:[%s10954_s5 + $0x8] sm:$0x3] }
  0xc5   : > { %v715_v34 = vpack.c.bf16 %v709_v52, %v708_v37  ;;  %11351 = vst [vmem:[#allocation48_spill] sm:$0xff] %v8246_v8  ;;  %vm8248_vm12 = vcmp.lt.s32.totalorder %v1351_v42, 15  ;;  %v11352_v60 = vmov 0  ;;  %v1632_v47 = vpack.c.bf16 %v8237_v27, %v1606_v18  ;;  %v6793_v42 = vld [vmem:[%s10952_s3 + $0x8] sm:$0x3] }
  0xc6   : > { %v8227_v19 = vpop.f32.mrf.mxu3  ;;  %v8242_v14 = vpop.f32.mrf.mxu2  ;;  %v11353_v60 = vsel %vm8248_vm12, 4294967295, %v11352_v60  ;;  %vm11355_vm13 = vcmask 1041408   ;;  %v8272_v18 = vsel %vm11350_vm3, %v2047_v63, %v2048_v31  ;;  %v1295_v63 = vunpack.c.h.bf16 %v8205_v50 }
  0xc7   : > { %11347 = vst [vmem:[#allocation46_spill] sm:$0xff] %v8227_v19  ;;  %v2868_v37 = vsel %vm11355_vm13, %v6898_v26, 0  ;;  %vm11356_vm9 = vmmov %vm11355_vm13  ;;  %v2242_v26 = vsel %vm8248_vm12, %v8246_v8, 0.0  ;;  %vm11360_vm13 = vcmask 31744  }
  0xc8   : > { %11349 = vst [vmem:[#allocation47_spill] sm:$0xff] %v8242_v14  ;;  %v3154_v52 = vsel %vm11356_vm9, %v6979_v45, 0  ;;  %v8267_v14 = vpop.f32.mrf.mxu1  ;;  %2877 = vmatpush.bf16.msrb.mxu1 %v2868_v37  ;;  %vm11358_vm8 = vmmov %vm11356_vm9  ;;  %v1320_v45 = vadd.s32 112, %v7533_v5  ;;  %v2267_v31 = vpack.c.bf16 %v2242_v26, %v8272_v18 }
  0xc9   : > { %11354 = vst [vmem:[#allocation49_spill] sm:$0xff] %v11353_v60  ;;  %3163 = vmatpush.bf16.msrb.mxu2 %v3154_v52  ;;  %v807_v23 = vsel %vm11358_vm8, %v6793_v42, 0  ;;  %vm11362_vm9 = vmmov %vm11360_vm13  ;;  %v1382_v52 = vrot.slane %v1294_v16, 7  ;;  %v11370_v16 = vmov 0 }
  0xca   : > { %11357 = vst [vmem:[#allocation50_spill] sm:$0xff] %v8267_v14  ;;  %816 = vmatpush.bf16.msra.mxu0 %v807_v23  ;;  %vm11363_vm0 = vmmov %vm11362_vm9  ;;  %v1352_v37 = vand.u32 15, %v1320_v45  ;;  %v1383_v14 = vrot.slane %v1295_v63, 7 }
  0xcb   : > { %v560_v48 = vpop.f32.mrf.mxu0  ;;  %11359 = vst [vmem:[#allocation51_spill] sm:$0xff] %v8272_v18  ;;  %6840 = vmatmul.msk.bf16.gmra.mxu1 %vm11362_vm9, %v8143_v12  ;;  %6855 = vmatmul.msk.bf16.gmra.mxu2 %vm11363_vm0, %v1632_v47  ;;  %vm11366_vm8 = vmmov %vm11363_vm0  ;;  %vm11368_vm0 = vcmp.lt.s32.totalorder %v7533_v5, 1  ;;  %vm11377_vm9 = vcmp.lt.s32.totalorder %v7533_v5, 7 }
  0xcc   : > { %v8265_v19 = vadd.f32 %v560_v48, %v8123_v20  ;;  %v8285_v48 = vld [vmem:[%s7858_s24 + $0x38] sm:$0xff]   ;;  %v8301_v26 = vsel %vm11368_vm0, %v1381_v6, %v1382_v52  ;;  %vm8303_vm3 = vcmp.ge.s32.totalorder %v1352_v37, 1 }
  0xcd   : > { %11364 = vst [vmem:[#allocation53_spill] sm:$0xff] %v8285_v48  ;;  %v1296_v23 = vunpack.c.l.bf16 %v8285_v48  ;;  %v11371_v16 = vsel %vm8303_vm3, 4294967295, %v11370_v16 }
  0xce   : > { %6790 = vmatmul.msk.bf16.gmra.mxu0 %vm11360_vm13, %v715_v34  ;;  %v8279_v20 = vpop.f32.mrf.mxu3  ;;  %v8289_v42 = vpop.f32.mrf.mxu2  ;;  %v1321_v34 = vadd.s32 120, %v7533_v5  ;;  %11369 = vst [vmem:[#allocation56_spill] sm:$0xff] %v8301_v26  ;;  %vm11374_vm13 = vmmov %vm11368_vm0 }
  0xcf   : > { %11361 = vst [vmem:[#allocation52_spill] sm:$0xff] %v8279_v20  ;;  %v2051_v60 = vrot.slane %v1296_v23, 1  ;;  %v8317_v6 = vsel %vm11374_vm13, %v1382_v52, %v1383_v14  ;;  %vm11386_vm0 = vmmov %vm11366_vm8 }
  0xd0   : > { %11365 = vst [vmem:[#allocation54_spill] sm:$0xff] %v8289_v42  ;;  %v8297_v47 = vpop.f32.mrf.mxu1  ;;  %v1353_v45 = vand.u32 15, %v1321_v34  ;;  %v2050_v42 = vrot.slane %v1295_v63, 1  ;;  %vm11387_vm13 = vmmov %vm11386_vm0 }
  0xd1   : > { %11367 = vst [vmem:[#allocation55_spill] sm:$0xff] %v8297_v47 }
  0xd2   : > { %11372 = vst [vmem:[#allocation57_spill] sm:$0xff] %v11371_v16  ;;  %v8326_v4 = vsel %vm11377_vm9, %v2050_v42, %v2051_v60 }
  0xd3   : > { %v562_v20 = vpop.f32.mrf.mxu0  ;;  %6871 = vmatmul.msk.bf16.gmra.mxu3 %vm11366_vm8, %v2267_v31  ;;  %11375 = vst [vmem:[#allocation59_spill] sm:$0xff] %v8317_v6  ;;  %v1608_v31 = vsel %vm8303_vm3, %v8301_v26, 0.0 }
  0xd4   : > { %v8295_v12 = vadd.f32 %v562_v20, %v8151_v11  ;;  %v710_v11 = vsel %vm7794_vm4, %v7737_v25, 0.0  ;;  %v711_v20 = vsel %vm7820_vm7, %v7792_v3, 0.0  ;;  %11378 = vst [vmem:[#allocation61_spill] sm:$0xff] %v8326_v4  ;;  %vm8328_vm4 = vcmp.lt.s32.totalorder %v1353_v45, 15  ;;  %vm11383_vm7 = vmmov %vm11377_vm9 }
  0xd5   : > { %v716_v37 = vpack.c.bf16 %v711_v20, %v710_v11  ;;  %v11379_v25 = vmov 0  ;;  %v1633_v10 = vpack.c.bf16 %v8317_v6, %v1608_v31  ;;  %v2244_v11 = vsel %vm8328_vm4, %v8326_v4, 0.0  ;;  %vm11390_vm9 = vmmov %vm11386_vm0 }
  0xd6   : > { %v8307_v49 = vpop.f32.mrf.mxu3  ;;  %v8322_v63 = vpop.f32.mrf.mxu2  ;;  %v11380_v25 = vsel %vm8328_vm4, 4294967295, %v11379_v25  ;;  %v1322_v45 = vadd.s32 128, %v7533_v5 }
  0xd7   : > { %11373 = vst [vmem:[#allocation58_spill] sm:$0xff] %v8307_v49  ;;  %v8340_v49 = vsel %vm11383_vm7, %v2049_v36, %v2050_v42  ;;  %v1297_v42 = vunpack.c.h.bf16 %v8285_v48  ;;  %vm11392_vm7 = vcmp.lt.s32.totalorder %v7533_v5, 1 }
  0xd8   : > { %11376 = vst [vmem:[#allocation60_spill] sm:$0xff] %v8322_v63  ;;  %v8336_v34 = vpop.f32.mrf.mxu1  ;;  %v2268_v36 = vpack.c.bf16 %v2244_v11, %v8340_v49  ;;  %v1354_v31 = vand.u32 15, %v1322_v45 }
  0xd9   : > { %11381 = vst [vmem:[#allocation62_spill] sm:$0xff] %v11380_v25  ;;  %v1385_v11 = vrot.slane %v1297_v42, 7  ;;  %v2052_v25 = vrot.slane %v1297_v42, 1  ;;  %v11403_v42 = vmov 0 }
  0xda   : > { %11382 = vst [vmem:[#allocation63_spill] sm:$0xff] %v8336_v34 }
  0xdb   : > { %v565_v3 = vpop.f32.mrf.mxu0  ;;  %11384 = vst [vmem:[#allocation64_spill] sm:$0xff] %v8340_v49  ;;  %6841 = vmatmul.msk.bf16.gmra.mxu1 %vm11386_vm0, %v8205_v50  ;;  %6856 = vmatmul.msk.bf16.gmra.mxu2 %vm11387_vm13, %v1633_v10  ;;  %vm11398_vm0 = vmmov %vm11392_vm7  ;;  %vm11401_vm13 = vcmp.lt.s32.totalorder %v7533_v5, 7 }
  0xdc   : > { %v8334_v52 = vadd.f32 %v565_v3, %v8062_v59  ;;  %v8353_v59 = vld [vmem:[%s7858_s24 + $0x40] sm:$0xff]   ;;  %v1384_v3 = vrot.slane %v1296_v23, 7  ;;  %v11394_v23 = vmov 0 }
  0xdd   : > { %11388 = vst [vmem:[#allocation66_spill] sm:$0xff] %v8353_v59  ;;  %v1298_v47 = vunpack.c.l.bf16 %v8353_v59 }
  0xde   : > { %6791 = vmatmul.msk.bf16.gmra.mxu0 %vm11366_vm8, %v716_v37  ;;  %v8347_v20 = vpop.f32.mrf.mxu3  ;;  %v8357_v63 = vpop.f32.mrf.mxu2  ;;  %v1323_v37 = vadd.s32 136, %v7533_v5  ;;  %v8369_v45 = vsel %vm11392_vm7, %v1383_v14, %v1384_v3  ;;  %vm8371_vm8 = vcmp.ge.s32.totalorder %v1354_v31, 1  ;;  %vm11406_vm7 = vmmov %vm11401_vm13 }
  0xdf   : > { %11385 = vst [vmem:[#allocation65_spill] sm:$0xff] %v8347_v20  ;;  %v11395_v23 = vsel %vm8371_vm8, 4294967295, %v11394_v23  ;;  %v2053_v34 = vrot.slane %v1298_v47, 1 }
  0xe0   : > { %11389 = vst [vmem:[#allocation67_spill] sm:$0xff] %v8357_v63  ;;  %v8365_v50 = vpop.f32.mrf.mxu1  ;;  %v1355_v63 = vand.u32 15, %v1323_v37 }
  0xe1   : > { %11391 = vst [vmem:[#allocation68_spill] sm:$0xff] %v8365_v50  ;;  %v8389_v31 = vsel %vm11401_vm13, %v2052_v25, %v2053_v34  ;;  %v1324_v50 = vadd.s32 144, %v7533_v5 }
  0xe2   : > { %11393 = vst [vmem:[#allocation69_spill] sm:$0xff] %v8369_v45 }
  0xe3   : > { %v567_v20 = vpop.f32.mrf.mxu0  ;;  %6872 = vmatmul.msk.bf16.gmra.mxu3 %vm11390_vm9, %v2268_v36  ;;  %11396 = vst [vmem:[#allocation70_spill] sm:$0xff] %v11395_v23  ;;  %v7273_v36 = vld [vmem:[%s7563_s25] sm:$0xff]  ;;  %vm8391_vm9 = vcmp.lt.s32.totalorder %v1355_v63, 15  ;;  %v8400_v23 = vsel %vm11406_vm7, %v2051_v60, %v2052_v25  ;;  %v1299_v25 = vunpack.c.h.bf16 %v8353_v59 }
  0xe4   : > { %v8363_v10 = vadd.f32 %v567_v20, %v8088_v0  ;;  %v8379_v0 = vsel %vm11398_vm0, %v1384_v3, %v1385_v11  ;;  %v1610_v20 = vsel %vm8371_vm8, %v8369_v45, 0.0  ;;  %11402 = vst [vmem:[#allocation74_spill] sm:$0xff] %v8389_v31  ;;  %v11404_v42 = vsel %vm8391_vm9, 4294967295, %v11403_v42 }
  0xe5   : > { %11399 = vst [vmem:[#allocation72_spill] sm:$0xff] %v8379_v0  ;;  %v1634_v3 = vpack.c.bf16 %v8379_v0, %v1610_v20  ;;  %vm11408_vm0 = vcmask 31744   ;;  %v8413_v20 = vld [vmem:[%s7858_s24 + $0x48] sm:$0xff]   ;;  %v1356_v0 = vand.u32 15, %v1324_v50  ;;  %v11416_v50 = vmov 0 }
  0xe6   : > { %v8375_v16 = vpop.f32.mrf.mxu3  ;;  %v8384_v14 = vpop.f32.mrf.mxu2  ;;  %11405 = vst [vmem:[#allocation75_spill] sm:$0xff] %v11404_v42  ;;  %vm11410_vm13 = vmmov %vm11408_vm0  ;;  %v1386_v42 = vrot.slane %v1298_v47, 7  ;;  %v1300_v45 = vunpack.c.l.bf16 %v8413_v20 }
  0xe7   : > { %11397 = vst [vmem:[#allocation71_spill] sm:$0xff] %v8375_v16  ;;  %vm11411_vm8 = vmmov %vm11408_vm0 }
  0xe8   : > { %11400 = vst [vmem:[#allocation73_spill] sm:$0xff] %v8384_v14  ;;  %v1817_v16 = vpop.f32.mrf.mxu1  ;;  %v2246_v14 = vsel %vm8391_vm9, %v8389_v31, 0.0  ;;  %vm11413_vm7 = vmmov %vm11408_vm0  ;;  %v2055_v4 = vrot.slane %v1300_v45, 1 }
  0xe9   : > { %11407 = vst [vmem:[#allocation76_spill] sm:$0xff] %v8400_v23  ;;  %v2269_v60 = vpack.c.bf16 %v2246_v14, %v8400_v23  ;;  %v2054_v23 = vrot.slane %v1299_v25, 1 }
  0xea   : > { %11412 = vst [vmem:[#allocation78_spill] sm:$0xff] %v8413_v20 }
  0xeb   : > { %v8395_v37 = vpop.f32.mrf.mxu0  ;;  %6842 = vmatmul.msk.bf16.gmra.mxu1 %vm11410_vm13, %v8285_v48  ;;  %6857 = vmatmul.msk.bf16.gmra.mxu2 %vm11411_vm8, %v1634_v3  ;;  %v1387_v48 = vrot.slane %v1299_v25, 7  ;;  %vm11414_vm8 = vcmp.lt.s32.totalorder %v7533_v5, 1  ;;  %v11424_v25 = vmov 0 }
  0xec   : > { %v8424_v14 = vsel %vm11414_vm8, %v1385_v11, %v1386_v42  ;;  %vm11420_vm13 = vmmov %vm11414_vm8 }
  0xed   : > { %11415 = vst [vmem:[#allocation79_spill] sm:$0xff] %v8424_v14 }
  0xee   : > { %6810 = vmatmul.msk.bf16.vlgmr.msra.gmra.mxu0 %vm11408_vm0, %v7273_v36  ;;  %v8407_v63 = vpop.f32.mrf.mxu3  ;;  %v1957_v31 = vpop.f32.mrf.mxu2  ;;  %v1325_v36 = vadd.s32 152, %v7533_v5  ;;  %vm8426_vm0 = vcmp.ge.s32.totalorder %v1356_v0, 1  ;;  %v7274_v0 = vld [vmem:[%s7563_s25 + $0x8] sm:$0xff] }
  0xef   : > { %11409 = vst [vmem:[#allocation77_spill] sm:$0xff] %v8407_v63  ;;  %v1958_v63 = vadd.f32 %v1957_v31, %v1817_v16  ;;  %v11417_v50 = vsel %vm8426_vm0, 4294967295, %v11416_v50  ;;  %v8434_v16 = vsel %vm11420_vm13, %v1386_v42, %v1387_v48  ;;  %v1612_v31 = vsel %vm8426_vm0, %v8424_v14, 0.0 }
  0xf0   : > { %v1819_v3 = vpop.f32.mrf.mxu1  ;;  %11418 = vst [vmem:[#allocation80_spill] sm:$0xff] %v11417_v50  ;;  %v1357_v47 = vand.u32 15, %v1325_v36  ;;  %v1635_v42 = vpack.c.bf16 %v8434_v16, %v1612_v31 }
  0xf1   : > { %11421 = vst [vmem:[#allocation82_spill] sm:$0xff] %v8434_v16 }
  0xf2   : > { %vm8444_vm8 = vcmp.lt.s32.totalorder %v1357_v47, 15  ;;  %v1326_v47 = vadd.s32 160, %v7533_v5 }
  0xf3   : > { %v8419_v49 = vpop.f32.mrf.mxu0  ;;  %6873 = vmatmul.msk.bf16.gmra.mxu3 %vm11413_vm7, %v2269_v60  ;;  %vm11422_vm7 = vcmp.lt.s32.totalorder %v7533_v5, 7  ;;  %v11425_v25 = vsel %vm8444_vm8, 4294967295, %v11424_v25 }
  0xf4   : > { %v8442_v60 = vsel %vm11422_vm7, %v2054_v23, %v2055_v4  ;;  %11426 = vst [vmem:[#allocation84_spill] sm:$0xff] %v11425_v25  ;;  %vm11427_vm13 = vmmov %vm11422_vm7  ;;  %vm11429_vm7 = vcmask 31744  }
  0xf5   : > { %11423 = vst [vmem:[#allocation83_spill] sm:$0xff] %v8442_v60  ;;  %v2248_v14 = vsel %vm8444_vm8, %v8442_v60, 0.0  ;;  %vm11430_vm0 = vmmov %vm11429_vm7 }
  0xf6   : > { %v2339_v6 = vpop.f32.mrf.mxu3  ;;  %v1959_v11 = vpop.f32.mrf.mxu2  ;;  %vm11431_vm9 = vmmov %vm11430_vm0 }
  0xf7   : > { %v8430_v26 = vadd.f32 %v2339_v6, %v1958_v63  ;;  %v1960_v6 = vadd.f32 %v1959_v11, %v1819_v3  ;;  %v1358_v11 = vand.u32 15, %v1326_v47 }
  0xf8   : > { %v1822_v50 = vpop.f32.mrf.mxu1 }
  0xf9   : > { %11419 = vst [vmem:[#allocation81_spill] sm:$0xff] %v8430_v26  ;;  %v8454_v26 = vsel %vm11427_vm13, %v2053_v34, %v2054_v23  ;;  %v1301_v23 = vunpack.c.h.bf16 %v8413_v20  ;;  %vm8481_vm13 = vcmp.ge.s32.totalorder %v1358_v11, 1 }
  0xfa   : > { %11428 = vst [vmem:[#allocation85_spill] sm:$0xff] %v8454_v26  ;;  %v2270_v34 = vpack.c.bf16 %v2248_v14, %v8454_v26 }
  0xfb   : > { %v662_v63 = vpop.f32.mrf.mxu0  ;;  %6843 = vmatmul.msk.bf16.gmra.mxu1 %vm11430_vm0, %v8353_v59  ;;  %6858 = vmatmul.msk.bf16.gmra.mxu2 %vm11431_vm9, %v1635_v42  ;;  %vm11434_vm9 = vcmp.lt.s32.totalorder %v7533_v5, 1 }
  0xfc   : > { %v8450_v36 = vadd.f32 %v662_v63, %v8185_v7  ;;  %v8465_v7 = vld [vmem:[%s7858_s24 + $0x50] sm:$0xff]   ;;  %v1388_v63 = vrot.slane %v1300_v45, 7  ;;  %v11436_v45 = vmov 0 }
  0xfd   : > { %11432 = vst [vmem:[#allocation86_spill] sm:$0xff] %v8465_v7  ;;  %v1302_v60 = vunpack.c.l.bf16 %v8465_v7  ;;  %v11437_v45 = vsel %vm8481_vm13, 4294967295, %v11436_v45 }
  0xfe   : > { %6811 = vmatmul.msk.bf16.gmra.mxu0 %vm11429_vm7, %v7274_v0  ;;  %v2341_v3 = vpop.f32.mrf.mxu3  ;;  %v1962_v25 = vpop.f32.mrf.mxu2  ;;  %v1327_v0 = vadd.s32 168, %v7533_v5  ;;  %v8479_v14 = vsel %vm11434_vm9, %v1387_v48, %v1388_v63  ;;  %11438 = vst [vmem:[#allocation89_spill] sm:$0xff] %v11437_v45  ;;  %vm11440_vm7 = vmmov %vm11434_vm9 }
  0xff   : > { %v8467_v31 = vadd.f32 %v2341_v3, %v1960_v6  ;;  %v1963_v16 = vadd.f32 %v1962_v25, %v1822_v50  ;;  %v1389_v3 = vrot.slane %v1301_v23, 7  ;;  %11435 = vst [vmem:[#allocation88_spill] sm:$0xff] %v8479_v14  ;;  %v2057_v50 = vrot.slane %v1302_v60, 1 }
 0x100   : > { %v1824_v6 = vpop.f32.mrf.mxu1  ;;  %v1359_v47 = vand.u32 15, %v1327_v0 }
 0x101   : > { %11433 = vst [vmem:[#allocation87_spill] sm:$0xff] %v8467_v31  ;;  %v2056_v31 = vrot.slane %v1301_v23, 1  ;;  %v11444_v23 = vmov 0 }
 0x102   : > { %vm8499_vm9 = vcmp.lt.s32.totalorder %v1359_v47, 15 }
 0x103   : > { %v664_v59 = vpop.f32.mrf.mxu0  ;;  %6874 = vmatmul.msk.bf16.gmra.mxu3 %vm11430_vm0, %v2270_v34  ;;  %v7275_v34 = vld [vmem:[%s7563_s25 + $0x10] sm:$0xff]  ;;  %vm11442_vm0 = vcmp.lt.s32.totalorder %v7533_v5, 7  ;;  %v11445_v23 = vsel %vm8499_vm9, 4294967295, %v11444_v23 }
 0x104   : > { %v8475_v42 = vadd.f32 %v664_v59, %v8215_v61  ;;  %v8489_v61 = vsel %vm11440_vm7, %v1388_v63, %v1389_v3  ;;  %v1614_v59 = vsel %vm8481_vm13, %v8479_v14, 0.0  ;;  %v8497_v11 = vsel %vm11442_vm0, %v2056_v31, %v2057_v50  ;;  %11446 = vst [vmem:[#allocation93_spill] sm:$0xff] %v11445_v23 }
 0x105   : > { %11441 = vst [vmem:[#allocation91_spill] sm:$0xff] %v8489_v61  ;;  %v1636_v63 = vpack.c.bf16 %v8489_v61, %v1614_v59  ;;  %vm11447_vm7 = vcmask 1041408   ;;  %v8513_v47 = vsel %vm11442_vm0, %v2055_v4, %v2056_v31  ;;  %v1328_v59 = vadd.s32 176, %v7533_v5 }
 0x106   : > { %v2344_v25 = vpop.f32.mrf.mxu3  ;;  %v1964_v48 = vpop.f32.mrf.mxu2  ;;  %11443 = vst [vmem:[#allocation92_spill] sm:$0xff] %v8497_v11  ;;  %vm11449_vm13 = vcmask 31744   ;;  %v1303_v31 = vunpack.c.h.bf16 %v8465_v7  ;;  %v1390_v23 = vrot.slane %v1302_v60, 7  ;;  %v11457_v60 = vmov 0 }
 0x107   : > { %v8485_v26 = vadd.f32 %v2344_v25, %v1963_v16  ;;  %v1965_v16 = vadd.f32 %v1964_v48, %v1824_v6  ;;  %v6829_v25 = vld [vmem:[%s10952_s3 + $0x10] sm:$0x3]  ;;  %11448 = vst [vmem:[#allocation94_spill] sm:$0xff] %v8513_v47  ;;  %v2250_v6 = vsel %vm8499_vm9, %v8497_v11, 0.0  ;;  %vm11450_vm8 = vmmov %vm11449_vm13 }
 0x108   : > { %v1159_v14 = vsel %vm11447_vm7, %v6829_v25, 0  ;;  %vm11451_vm4 = vmmov %vm11450_vm8  ;;  %v2271_v4 = vpack.c.bf16 %v2250_v6, %v8513_v47  ;;  %v1360_v25 = vand.u32 15, %v1328_v59 }
 0x109   : > { %11439 = vst [vmem:[#allocation90_spill] sm:$0xff] %v8485_v26  ;;  %v1827_v26 = vpop.f32.mrf.mxu1  ;;  %1168 = vmatpush.bf16.msrb.mxu0 %v1159_v14 }
 0x10b   : > { %v667_v0 = vpop.f32.mrf.mxu0  ;;  %6844 = vmatmul.msk.bf16.gmra.mxu1 %vm11450_vm8, %v8413_v20  ;;  %6859 = vmatmul.msk.bf16.gmra.mxu2 %vm11451_vm4, %v1636_v63  ;;  %vm11454_vm8 = vmmov %vm11451_vm4  ;;  %vm11455_vm4 = vcmp.lt.s32.totalorder %v7533_v5, 1 }
 0x10c   : > { %v8508_v45 = vadd.f32 %v667_v0, %v8265_v19  ;;  %v8524_v19 = vld [vmem:[%s7858_s24 + $0x58] sm:$0xff]   ;;  %v8538_v6 = vsel %vm11455_vm4, %v1389_v3, %v1390_v23  ;;  %vm11461_vm7 = vmmov %vm11455_vm4 }
 0x10d   : > { %11452 = vst [vmem:[#allocation95_spill] sm:$0xff] %v8524_v19  ;;  %v1304_v14 = vunpack.c.l.bf16 %v8524_v19  ;;  %vm11467_vm4 = vmmov %vm11442_vm0 }
 0x10e   : > { %6812 = vmatmul.msk.bf16.gmra.mxu0 %vm11449_vm13, %v7275_v34  ;;  %v2346_v48 = vpop.f32.mrf.mxu3  ;;  %v1967_v11 = vpop.f32.mrf.mxu2  ;;  %v1329_v34 = vadd.s32 184, %v7533_v5  ;;  %11456 = vst [vmem:[#allocation97_spill] sm:$0xff] %v8538_v6  ;;  %vm8540_vm13 = vcmp.ge.s32.totalorder %v1360_v25, 1 }
 0x10f   : > { %v8526_v0 = vadd.f32 %v2346_v48, %v1965_v16  ;;  %v1968_v61 = vadd.f32 %v1967_v11, %v1827_v26  ;;  %v1391_v48 = vrot.slane %v1303_v31, 7  ;;  %v11458_v60 = vsel %vm8540_vm13, 4294967295, %v11457_v60 }
 0x110   : > { %11459 = vst [vmem:[#allocation98_spill] sm:$0xff] %v11458_v60  ;;  %v1361_v59 = vand.u32 15, %v1329_v34  ;;  %v2059_v26 = vrot.slane %v1304_v14, 1 }
 0x111   : > { %11453 = vst [vmem:[#allocation96_spill] sm:$0xff] %v8526_v0  ;;  %v1829_v16 = vpop.f32.mrf.mxu1  ;;  %v2058_v0 = vrot.slane %v1303_v31, 1  ;;  %v11464_v31 = vmov 0 }
 0x113   : > { %v669_v20 = vpop.f32.mrf.mxu0  ;;  %6875 = vmatmul.msk.bf16.gmra.mxu3 %vm11454_vm8, %v2271_v4  ;;  %v7276_v4 = vld [vmem:[%s7563_s25 + $0x18] sm:$0xff]  ;;  %v8556_v25 = vsel %vm11442_vm0, %v2058_v0, %v2059_v26  ;;  %vm8558_vm8 = vcmp.lt.s32.totalorder %v1361_v59, 15  ;;  %v1330_v59 = vadd.s32 192, %v7533_v5  ;;  %s7367_s25 = sshra.s32 %s6691_s23, 4  ;;  %s7368_s25 = int_to_ptr.hbm [resolvable:$true] %s7367_s25 }
 0x114   : > { %v8534_v63 = vadd.f32 %v669_v20, %v8295_v12  ;;  %v8548_v12 = vsel %vm11461_vm7, %v1390_v23, %v1391_v48  ;;  %v1616_v20 = vsel %vm8540_vm13, %v8538_v6, 0.0  ;;  %11463 = vst [vmem:[#allocation101_spill] sm:$0xff] %v8556_v25  ;;  %v11465_v31 = vsel %vm8558_vm8, 4294967295, %v11464_v31  ;;  %s7369_s26 = scalar_lea.hbm %s7368_s25, 256  ;;  %p7374_p0 = scmp.lt.s32.totalorder %s7368_s25, %s10958_s9 }
 0x115   : > { %11462 = vst [vmem:[#allocation100_spill] sm:$0xff] %v8548_v12  ;;  %v1637_v23 = vpack.c.bf16 %v8548_v12, %v1616_v20  ;;  %v2252_v6 = vsel %vm8558_vm8, %v8556_v25, 0.0  ;;  %vm11468_vm7 = vcmask 31744   ;;  %p7370_p11 = scmp.ne.s32.totalorder %s7368_s25, %s7369_s26  ;;  %p7375_p1 = scmp.lt.s32.totalorder %s7373_s14, %s7369_s26 }
 0x116   : > { %v2349_v11 = vpop.f32.mrf.mxu3  ;;  %v1969_v3 = vpop.f32.mrf.mxu2  ;;  %11466 = vst [vmem:[#allocation102_spill] sm:$0xff] %v11465_v31  ;;  %vm11469_vm0 = vmmov %vm11468_vm7 }
 0x117   : > { %v8544_v47 = vadd.f32 %v2349_v11, %v1968_v61  ;;  %v1970_v61 = vadd.f32 %v1969_v3, %v1829_v16  ;;  %vm11470_vm13 = vmmov %vm11469_vm0  ;;  %v1362_v3 = vand.u32 15, %v1330_v59  ;;  %p7371_p12 = pnand %p7370_p11, %p7509_p5  ;;  %p7376_p2 = por %p7375_p1, %p7374_p0 }
 0x119   : > { %11460 = vst [vmem:[#allocation99_spill] sm:$0xff] %v8544_v47  ;;  %v1832_v60 = vpop.f32.mrf.mxu1  ;;  %v8568_v47 = vsel %vm11467_vm4, %v2057_v50, %v2058_v0  ;;  %v1305_v0 = vunpack.c.h.bf16 %v8524_v19  ;;  %vm11473_vm4 = vmmov %vm11469_vm0  ;;  %p7372_p13 = pneg %p7371_p12 }
 0x11a   : > { %v2272_v50 = vpack.c.bf16 %v2252_v6, %v8568_v47 }
 0x11b   : > { %v672_v34 = vpop.f32.mrf.mxu0  ;;  %6845 = vmatmul.msk.bf16.gmra.mxu1 %vm11469_vm0, %v8465_v7  ;;  %6860 = vmatmul.msk.bf16.gmra.mxu2 %vm11470_vm13, %v1637_v23  ;;  %vm11474_vm13 = vcmp.lt.s32.totalorder %v7533_v5, 1  ;;  %v2060_v7 = vrot.slane %v1305_v0, 1  ;;  %p7377_p3 = pnand %p7376_p2, %p7372_p13 }
 0x11c   : > { %v8564_v11 = vadd.f32 %v672_v34, %v8334_v52  ;;  %v8579_v52 = vld [vmem:[%s7858_s24 + $0x60] sm:$0xff]   ;;  %v1392_v34 = vrot.slane %v1304_v14, 7  ;;  %v11475_v14 = vmov 0  ;;  %vm11479_vm0 = vmmov %vm11474_vm13 }
 0x11d   : > { %11471 = vst [vmem:[#allocation103_spill] sm:$0xff] %v8579_v52  ;;  %v1306_v25 = vunpack.c.l.bf16 %v8579_v52 }
 0x11e   : > { %6813 = vmatmul.msk.bf16.gmra.mxu0 %vm11468_vm7, %v7276_v4  ;;  %v2351_v16 = vpop.f32.mrf.mxu3  ;;  %v1972_v31 = vpop.f32.mrf.mxu2  ;;  %v1331_v4 = vadd.s32 200, %v7533_v5  ;;  %v8593_v6 = vsel %vm11474_vm13, %v1391_v48, %v1392_v34  ;;  %vm8595_vm7 = vcmp.ge.s32.totalorder %v1362_v3, 1  ;;  %v571_v48 = vadd.f32 %v8395_v37, %v8081_v13 }
 0x11f   : > { %v8581_v20 = vadd.f32 %v2351_v16, %v1970_v61  ;;  %v1973_v12 = vadd.f32 %v1972_v31, %v1832_v60  ;;  %v1393_v16 = vrot.slane %v1305_v0, 7  ;;  %v11476_v14 = vsel %vm8595_vm7, 4294967295, %v11475_v14 }
 0x120   : > { %11477 = vst [vmem:[#allocation105_spill] sm:$0xff] %v11476_v14  ;;  %v1363_v59 = vand.u32 15, %v1331_v4 }
 0x121   : > { %11472 = vst [vmem:[#allocation104_spill] sm:$0xff] %v8581_v20  ;;  %v1834_v61 = vpop.f32.mrf.mxu1  ;;  %v2061_v20 = vrot.slane %v1306_v25, 1 }
 0x122   : > { %vm8614_vm13 = vcmp.lt.s32.totalorder %v1363_v59, 15  ;;  %v1332_v59 = vadd.s32 208, %v7533_v5 }
 0x123   : > { %v674_v18 = vpop.f32.mrf.mxu0  ;;  %6876 = vmatmul.msk.bf16.gmra.mxu3 %vm11473_vm4, %v2272_v50  ;;  %vm11480_vm4 = vcmp.lt.s32.totalorder %v7533_v5, 7 }
 0x124   : > { %v8589_v23 = vadd.f32 %v674_v18, %v8363_v10  ;;  %v8603_v18 = vsel %vm11479_vm0, %v1392_v34, %v1393_v16  ;;  %v1618_v10 = vsel %vm8595_vm7, %v8593_v6, 0.0  ;;  %v8612_v0 = vsel %vm11480_vm4, %v2060_v7, %v2061_v20  ;;  %vm11485_vm0 = vmmov %vm11480_vm4 }
 0x125   : > { %11481 = vst [vmem:[#allocation107_spill] sm:$0xff] %v8612_v0  ;;  %v1638_v4 = vpack.c.bf16 %v8603_v18, %v1618_v10  ;;  %v8623_v13 = vsel %vm11485_vm0, %v2059_v26, %v2060_v7  ;;  %v2254_v37 = vsel %vm8614_vm13, %v8612_v0, 0.0  ;;  %vm11487_vm4 = vcmask 31744   ;;  %v8635_v10 = vld [vmem:[%s7858_s24 + $0x68] sm:$0xff]  }
 0x126   : > { %v2354_v60 = vpop.f32.mrf.mxu3  ;;  %v1974_v50 = vpop.f32.mrf.mxu2  ;;  %11486 = vst [vmem:[#allocation109_spill] sm:$0xff] %v8623_v13  ;;  %vm11488_vm7 = vmmov %vm11487_vm4  ;;  %v2273_v7 = vpack.c.bf16 %v2254_v37, %v8623_v13  ;;  %v1307_v26 = vunpack.c.h.bf16 %v8579_v52 }
 0x127   : > { %v8599_v31 = vadd.f32 %v2354_v60, %v1973_v12  ;;  %v11482_v12 = vmov 0  ;;  %v1975_v3 = vadd.f32 %v1974_v50, %v1834_v61  ;;  %vm11489_vm8 = vmmov %vm11487_vm4  ;;  %11490 = vst [vmem:[#allocation110_spill] sm:$0xff] %v8635_v10  ;;  %v1364_v50 = vand.u32 15, %v1332_v59 }
 0x128   : > { %v11483_v12 = vsel %vm8614_vm13, 4294967295, %v11482_v12  ;;  %v1395_v37 = vrot.slane %v1307_v26, 7 }
 0x129   : > { %11478 = vst [vmem:[#allocation106_spill] sm:$0xff] %v8599_v31  ;;  %v1837_v14 = vpop.f32.mrf.mxu1  ;;  %v1308_v31 = vunpack.c.l.bf16 %v8635_v10  ;;  %vm8652_vm0 = vcmp.ge.s32.totalorder %v1364_v50, 1 }
 0x12a   : > { %11484 = vst [vmem:[#allocation108_spill] sm:$0xff] %v11483_v12  ;;  %v573_v12 = vadd.f32 %v8419_v49, %v8113_v15  ;;  %v2062_v49 = vrot.slane %v1307_v26, 1 }
 0x12b   : > { %v677_v34 = vpop.f32.mrf.mxu0  ;;  %6846 = vmatmul.msk.bf16.gmra.mxu1 %vm11488_vm7, %v8524_v19  ;;  %6861 = vmatmul.msk.bf16.gmra.mxu2 %vm11489_vm8, %v1638_v4  ;;  %v1333_v19 = vadd.s32 216, %v7533_v5  ;;  %vm11492_vm8 = vmmov %vm11487_vm4  ;;  %vm11493_vm7 = vcmp.lt.s32.totalorder %v7533_v5, 1 }
 0x12c   : > { %v8619_v60 = vadd.f32 %v677_v34, %v571_v48  ;;  %v1394_v34 = vrot.slane %v1306_v25, 7  ;;  %v11494_v25 = vmov 0 }
 0x12d   : > { %v11495_v25 = vsel %vm8652_vm0, 4294967295, %v11494_v25  ;;  %v1365_v15 = vand.u32 15, %v1333_v19 }
 0x12e   : > { %6830 = vmatmul.msk.bf16.vlgmr.msrb.gmra.mxu0 %vm11487_vm4, %v7709_v32  ;;  %v2356_v61 = vpop.f32.mrf.mxu3  ;;  %v1977_v32 = vpop.f32.mrf.mxu2  ;;  %v8650_v59 = vsel %vm11493_vm7, %v1393_v16, %v1394_v34  ;;  %11496 = vst [vmem:[#allocation112_spill] sm:$0xff] %v11495_v25  ;;  %vm11497_vm4 = vmmov %vm11493_vm7  ;;  %vm11503_vm7 = vcmask 31744  }
 0x12f   : > { %v8637_v48 = vadd.f32 %v2356_v61, %v1975_v3  ;;  %v1978_v0 = vadd.f32 %v1977_v32, %v1837_v14  ;;  %v1134_v14 = vsel %vm7727_vm10, %v7725_v39, 0.0  ;;  %v8666_v16 = vsel %vm11497_vm4, %v1394_v34, %v1395_v37  ;;  %vm11504_vm4 = vmmov %vm11503_vm7 }
 0x130   : > { %v1620_v19 = vsel %vm8652_vm0, %v8650_v59, 0.0  ;;  %vm8675_vm10 = vcmp.lt.s32.totalorder %v1365_v15, 15  ;;  %v1334_v15 = vadd.s32 224, %v7533_v5 }
 0x131   : > { %11491 = vst [vmem:[#allocation111_spill] sm:$0xff] %v8637_v48  ;;  %v1839_v61 = vpop.f32.mrf.mxu1  ;;  %v2063_v48 = vrot.slane %v1308_v31, 1  ;;  %v11500_v40 = vsel %vm8675_vm10, 4294967295, %v11499_v40 }
 0x132   : > { %11501 = vst [vmem:[#allocation113_spill] sm:$0xff] %v11500_v40 }
 0x133   : > { %v679_v4 = vpop.f32.mrf.mxu0  ;;  %6877 = vmatmul.msk.bf16.gmra.mxu3 %vm11492_vm8, %v2273_v7  ;;  %vm11498_vm8 = vcmp.lt.s32.totalorder %v7533_v5, 7 }
 0x134   : > { %v8646_v3 = vadd.f32 %v679_v4, %v573_v12  ;;  %v1135_v12 = vsel %vm7731_vm11, %v7806_v29, 0.0  ;;  %v8673_v39 = vsel %vm11498_vm8, %v2062_v49, %v2063_v48  ;;  %vm11502_vm11 = vmmov %vm11498_vm8 }
 0x135   : > { %v1141_v50 = vpack.c.bf16 %v1135_v12, %v1134_v14  ;;  %v8685_v32 = vsel %vm11502_vm11, %v2061_v20, %v2062_v49  ;;  %v2256_v4 = vsel %vm8675_vm10, %v8673_v39, 0.0  ;;  %vm11505_vm8 = vmmov %vm11504_vm4  ;;  %v1309_v49 = vunpack.c.h.bf16 %v8635_v10 }
 0x136   : > { %v2359_v13 = vpop.f32.mrf.mxu3  ;;  %v1979_v26 = vpop.f32.mrf.mxu2  ;;  %v2274_v20 = vpack.c.bf16 %v2256_v4, %v8685_v32  ;;  %v1366_v12 = vand.u32 15, %v1334_v15  ;;  %vm11508_vm11 = vmmov %vm11504_vm4 }
 0x137   : > { %v8662_v7 = vadd.f32 %v2359_v13, %v1978_v0  ;;  %v1980_v43 = vadd.f32 %v1979_v26, %v1839_v61  ;;  %v1639_v0 = vpack.c.bf16 %v8666_v16, %v1620_v19  ;;  %v1396_v19 = vrot.slane %v1308_v31, 7 }
 0x138   : > { %v11510_v31 = vmov 0 }
 0x139   : > { %v1842_v34 = vpop.f32.mrf.mxu1 }
 0x13b   : > { %v744_v29 = vpop.f32.mrf.mxu0  ;;  %6847 = vmatmul.msk.bf16.gmra.mxu1 %vm11504_vm4, %v8579_v52  ;;  %6862 = vmatmul.msk.bf16.gmra.mxu2 %vm11505_vm8, %v1639_v0  ;;  %vm8712_vm4 = vcmp.ge.s32.totalorder %v1366_v12, 1  ;;  %v2064_v52 = vrot.slane %v1309_v49, 1 }
 0x13c   : > { %v8681_v13 = vadd.f32 %v744_v29, %v8450_v36  ;;  %v8696_v36 = vld [vmem:[%s7858_s24 + $0x70] sm:$0xff]   ;;  %v11511_v31 = vsel %vm8712_vm4, 4294967295, %v11510_v31 }
 0x13d   : > { %11506 = vst [vmem:[#allocation114_spill] sm:$0xff] %v8696_v36  ;;  %v1310_v29 = vunpack.c.l.bf16 %v8696_v36 }
 0x13e   : > { %6831 = vmatmul.msk.bf16.gmra.mxu0 %vm11503_vm7, %v1141_v50  ;;  %v2361_v61 = vpop.f32.mrf.mxu3  ;;  %v1982_v26 = vpop.f32.mrf.mxu2  ;;  %v1335_v50 = vadd.s32 232, %v7533_v5  ;;  %vm11509_vm7 = vcmp.lt.s32.totalorder %v7533_v5, 1  ;;  %11512 = vst [vmem:[#allocation116_spill] sm:$0xff] %v11511_v31 }
 0x13f   : > { %v8698_v14 = vadd.f32 %v2361_v61, %v1980_v43  ;;  %v1983_v40 = vadd.f32 %v1982_v26, %v1842_v34  ;;  %v1397_v61 = vrot.slane %v1309_v49, 7  ;;  %v8710_v4 = vsel %vm11509_vm7, %v1395_v37, %v1396_v19  ;;  %vm11514_vm8 = vmmov %vm11509_vm7 }
 0x140   : > { %v1367_v15 = vand.u32 15, %v1335_v50  ;;  %v1622_v49 = vsel %vm8712_vm4, %v8710_v4, 0.0 }
 0x141   : > { %11507 = vst [vmem:[#allocation115_spill] sm:$0xff] %v8698_v14  ;;  %v1844_v43 = vpop.f32.mrf.mxu1  ;;  %v8716_v14 = vrot.slane %v1310_v29, 1  ;;  %v8728_v37 = vsel %vm11514_vm8, %v1396_v19, %v1397_v61  ;;  %v6881_v19 = vld [vmem:[%s10954_s5 + $0x6] sm:$0x3]  ;;  %vm11521_vm8 = vcmask 31744  }
 0x142   : > { %vm11523_vm4 = vmmov %vm11521_vm8 }
 0x143   : > { %v746_v25 = vpop.f32.mrf.mxu0  ;;  %6878 = vmatmul.msk.bf16.gmra.mxu3 %vm11508_vm11, %v2274_v20  ;;  %vm11515_vm11 = vcmp.lt.s32.totalorder %v7533_v5, 7 }
 0x144   : > { %v8706_v0 = vadd.f32 %v746_v25, %v8475_v42  ;;  %v1136_v42 = vsel %vm7781_vm14, %v7802_v28, 0.0  ;;  %v1137_v25 = vsel %vm7785_vm15, %v7864_v44, 0.0  ;;  %v8736_v1 = vsel %vm11515_vm11, %v2064_v52, %v8716_v14  ;;  %vm11520_vm7 = vmmov %vm11515_vm11 }
 0x145   : > { %v1142_v26 = vpack.c.bf16 %v1137_v25, %v1136_v42  ;;  %vm8738_vm14 = vcmp.lt.s32.totalorder %v1367_v15, 15  ;;  %vm11519_vm15 = vcmask 1041408   ;;  %v8752_v15 = vsel %vm11520_vm7, %v2063_v48, %v2064_v52  ;;  %vm11522_vm11 = vmmov %vm11521_vm8  ;;  %v6996_v52 = vld [vmem:[%s10954_s5 + $0xc] sm:$0x3] }
 0x146   : > { %v2364_v34 = vpop.f32.mrf.mxu3  ;;  %v1984_v12 = vpop.f32.mrf.mxu2  ;;  %v11517_v2 = vsel %vm8738_vm14, 4294967295, %v11516_v2  ;;  %v2614_v42 = vsel %vm11519_vm15, %v6881_v19, 0  ;;  %v1336_v25 = vadd.s32 240, %v7533_v5  ;;  %v3504_v19 = vsel %vm11519_vm15, %v6996_v52, 0 }
 0x147   : > { %v8724_v20 = vadd.f32 %v2364_v34, %v1983_v40  ;;  %11518 = vst [vmem:[#allocation118_spill] sm:$0xff] %v11517_v2  ;;  %v1985_v28 = vadd.f32 %v1984_v12, %v1844_v43  ;;  %v1640_v40 = vpack.c.bf16 %v8728_v37, %v1622_v49  ;;  %v2258_v43 = vsel %vm8738_vm14, %v8736_v1, 0.0  ;;  %2623 = vmatpush.bf16.msra.mxu0 %v2614_v42 }
 0x148   : > { %v2275_v12 = vpack.c.bf16 %v2258_v43, %v8752_v15  ;;  %v1398_v42 = vrot.slane %v1310_v29, 7  ;;  %3513 = vmatpush.bf16.msrb.mxu3 %v3504_v19  ;;  %vm11524_vm7 = vcmp.lt.s32.totalorder %v7533_v5, 1  ;;  %v11525_v29 = vmov 0 }
 0x149   : > { %11513 = vst [vmem:[#allocation117_spill] sm:$0xff] %v8724_v20  ;;  %v1847_v34 = vpop.f32.mrf.mxu1  ;;  %vm11530_vm15 = vcmp.lt.s32.totalorder %v7533_v5, 7 }
 0x14b   : > { %v749_v44 = vpop.f32.mrf.mxu0  ;;  %6848 = vmatmul.msk.bf16.gmra.mxu1 %vm11522_vm11, %v8635_v10  ;;  %6863 = vmatmul.msk.bf16.gmra.mxu2 %vm11523_vm4, %v1640_v40  ;;  %v1337_v40 = vadd.s32 248, %v7533_v5  ;;  %vm11529_vm11 = vmmov %vm11524_vm7 }
 0x14c   : > { %v8747_v50 = vadd.f32 %v749_v44, %v8508_v45  ;;  %v1280_v45 = vld [vmem:[%s7858_s24 + $0x78] sm:$0xf]  ;;  %v1311_v44 = vunpack.c.h.bf16 %v8696_v36 }
 0x14d   : > { %v8771_v10 = vunpack.c.l.bf16 %v1280_v45  ;;  %v1369_v45 = vand.u32 15, %v1337_v40 }
 0x14e   : > { %6832 = vmatmul.msk.bf16.gmra.mxu0 %vm11521_vm8, %v1142_v26  ;;  %v2366_v49 = vpop.f32.mrf.mxu3  ;;  %v1368_v26 = vand.u32 15, %v1336_v25  ;;  %v1987_v2 = vpop.f32.mrf.mxu2  ;;  %v8782_v25 = vsel %vm11524_vm7, %v1397_v61, %v1398_v42  ;;  %v2066_v52 = vrot.slane %v1311_v44, 1  ;;  %vm11535_vm7 = vcmask 31744  }
 0x14f   : > { %v8766_v48 = vadd.f32 %v2366_v49, %v1985_v28  ;;  %v1988_v31 = vadd.f32 %v1987_v2, %v1847_v34  ;;  %v8778_v49 = vrot.slane %v1311_v44, 7  ;;  %v11130_v2 = vrot.slane %v8771_v10, 1 }
 0x150   : > { %vm8784_vm8 = vcmp.ge.s32.totalorder %v1368_v26, 1 }
 0x151   : > { %v1849_v43 = vpop.f32.mrf.mxu1  ;;  %v11526_v29 = vsel %vm8784_vm8, 4294967295, %v11525_v29  ;;  %v8797_v61 = vsel %vm11529_vm11, %v1398_v42, %v8778_v49  ;;  %v8806_v57 = vsel %vm11530_vm15, %v2066_v52, %v11130_v2  ;;  %vm11536_vm11 = vmmov %vm11535_vm7 }
 0x152   : > { %11527 = vst [vmem:[#allocation119_spill] sm:$0xff] %v11526_v29 }
 0x153   : > { %v751_v20 = vpop.f32.mrf.mxu0  ;;  %6879 = vmatmul.msk.bf16.gmra.mxu3 %vm11523_vm4, %v2275_v12  ;;  %v1624_v12 = vsel %vm8784_vm8, %v8782_v25, 0.0  ;;  %vm11534_vm4 = vmmov %vm11530_vm15 }
 0x154   : > { %v8776_v28 = vadd.f32 %v751_v20, %v8534_v63  ;;  %v1138_v63 = vsel %vm7877_vm6, %v7873_v55, 0.0  ;;  %vm8808_vm6 = vcmp.lt.s32.totalorder %v1369_v45, 15  ;;  %v11531_v55 = vmov 0  ;;  %vm11537_vm15 = vmmov %vm11535_vm7 }
 0x155   : > { %v1143_v19 = vpack.c.bf16 0.0, %v1138_v63  ;;  %v11532_v55 = vsel %vm8808_vm6, 4294967295, %v11531_v55  ;;  %v1641_v42 = vpack.c.bf16 %v8797_v61, %v1624_v12  ;;  %v8819_v63 = vsel %vm11534_vm4, %v8716_v14, %v2066_v52  ;;  %vm11538_vm4 = vmmov %vm11535_vm7 }
 0x156   : > { %v2369_v20 = vpop.f32.mrf.mxu3  ;;  %v1989_v44 = vpop.f32.mrf.mxu2  ;;  %11533 = vst [vmem:[#allocation121_spill] sm:$0xff] %v11532_v55  ;;  %v2260_v45 = vsel %vm8808_vm6, %v8806_v57, 0.0  ;;  %vm11542_vm6 = vmmov %vm11538_vm4 }
 0x157   : > { %v8792_v34 = vadd.f32 %v2369_v20, %v1988_v31  ;;  %v1990_v31 = vadd.f32 %v1989_v44, %v1849_v43  ;;  %v2276_v43 = vpack.c.bf16 %v2260_v45, %v8819_v63 }
 0x159   : > { %11528 = vst [vmem:[#allocation120_spill] sm:$0xff] %v8792_v34  ;;  %v1852_v20 = vpop.f32.mrf.mxu1 }
 0x15b   : > { %v754_v26 = vpop.f32.mrf.mxu0  ;;  %6849 = vmatmul.msk.bf16.gmra.mxu1 %vm11536_vm11, %v8696_v36  ;;  %6864 = vmatmul.msk.bf16.gmra.mxu2 %vm11537_vm15, %v1641_v42  ;;  %v7277_v42 = vld [vmem:[%s7858_s24] sm:$0xff]  ;;  %vm11540_vm11 = vmmov %vm11538_vm4 }
 0x15c   : > { %v8814_v40 = vadd.f32 %v754_v26, %v8564_v11  ;;  %vm11541_vm15 = vmmov %vm11538_vm4 }
 0x15e   : > { %6833 = vmatmul.msk.bf16.gmra.mxu0 %vm11535_vm7, %v1143_v19  ;;  %v2371_v2 = vpop.f32.mrf.mxu3  ;;  %v1992_v12 = vpop.f32.mrf.mxu2  ;;  %vm11539_vm7 = vnez %v11251_v51  ;;  %v11562_v51 = vld [vmem:[#allocation27_spill] sm:$0xff] }
 0x15f   : > { %v8828_v11 = vadd.f32 %v2371_v2, %v1990_v31  ;;  %v1993_v14 = vadd.f32 %v1992_v12, %v1852_v20  ;;  %v3405_v20 = vsel %vm11539_vm7, %v7991_v33, 0.0  ;;  %vm11546_vm7 = vmmov %vm11538_vm4 }
 0x161   : > { %v1854_v19 = vpop.f32.mrf.mxu1 }
 0x163   : > { %v756_v52 = vpop.f32.mrf.mxu0  ;;  %6880 = vmatmul.msk.bf16.gmra.mxu3 %vm11538_vm4, %v2276_v43 }
 0x164   : > { %v8833_v44 = vadd.f32 %v756_v52, %v8589_v23 }
 0x166   : > { %v2374_v26 = vpop.f32.mrf.mxu3  ;;  %v1994_v29 = vpop.f32.mrf.mxu2 }
 0x167   : > { %v8835_v55 = vadd.f32 %v2374_v26, %v1993_v14  ;;  %v1995_v36 = vadd.f32 %v1994_v29, %v1854_v19  ;;  %v3437_v29 = vpack.c.bf16 %v7996_v58, %v3405_v20  ;;  %v7278_v20 = vld [vmem:[%s7858_s24 + $0x8] sm:$0xff] }
 0x169   : > { %v1857_v31 = vpop.f32.mrf.mxu1 }
 0x16b   : > { %v818_v34 = vpop.f32.mrf.mxu0  ;;  %6963 = vmatmul.msk.bf16.vlgmr.msrb.gmra.mxu1 %vm11541_vm15, %v7277_v42  ;;  %6980 = vmatmul.msk.bf16.vlgmr.msrb.gmra.mxu2 %vm11538_vm4, %v7953_v22  ;;  %vm11544_vm15 = vnez %v11260_v17 }
 0x16c   : > { %v8839_v2 = vadd.f32 %v818_v34, %v8681_v13 }
 0x16e   : > { %6882 = vmatmul.msk.bf16.vlgmr.msra.gmra.mxu0 %vm11540_vm11, %v7937_v53  ;;  %v2376_v23 = vpop.f32.mrf.mxu3  ;;  %v1997_v13 = vpop.f32.mrf.mxu2  ;;  %vm11543_vm11 = vnez %v11257_v56  ;;  %v7280_v56 = vld [vmem:[%s7858_s24 + $0x18] sm:$0xff] }
 0x16f   : > { %v8850_v45 = vadd.f32 %v2376_v23, %v1995_v36  ;;  %v1998_v34 = vadd.f32 %v1997_v13, %v1857_v31  ;;  %v2517_v52 = vsel %vm11543_vm11, %v7991_v33, 0.0  ;;  %v3058_v36 = vsel %vm11544_vm15, %v8007_v35, 0.0  ;;  %vm11548_vm15 = vmmov %vm11538_vm4 }
 0x170   : > { %v2548_v26 = vpack.c.bf16 %v7996_v58, %v2517_v52  ;;  %v3407_v33 = vsel %vm11543_vm11, %v8035_v9, 0.0  ;;  %vm11555_vm11 = vmmov %vm11538_vm4 }
 0x171   : > { %v1859_v53 = vpop.f32.mrf.mxu1 }
 0x173   : > { %v820_v43 = vpop.f32.mrf.mxu0  ;;  %6997 = vmatmul.msk.bf16.vlgmr.msrb.gmra.mxu3 %vm11542_vm6, %v3437_v29  ;;  %vm11545_vm6 = vmmov %vm11538_vm4 }
 0x174   : > { %v8854_v12 = vadd.f32 %v820_v43, %v8706_v0  ;;  %v3088_v0 = vpack.c.bf16 %v3058_v36, %v8012_v54 }
 0x176   : > { %v2379_v14 = vpop.f32.mrf.mxu3  ;;  %v1999_v19 = vpop.f32.mrf.mxu2 }
 0x177   : > { %v8859_v22 = vadd.f32 %v2379_v14, %v1998_v34  ;;  %v2000_v42 = vadd.f32 %v1999_v19, %v1859_v53  ;;  %v3438_v34 = vpack.c.bf16 %v8046_v41, %v3407_v33  ;;  %v7279_v33 = vld [vmem:[%s7858_s24 + $0x10] sm:$0xff] }
 0x179   : > { %v1862_v29 = vpop.f32.mrf.mxu1 }
 0x17b   : > { %v823_v31 = vpop.f32.mrf.mxu0  ;;  %6964 = vmatmul.msk.bf16.gmra.mxu1 %vm11538_vm4, %v7278_v20  ;;  %6981 = vmatmul.msk.bf16.gmra.mxu2 %vm11546_vm7, %v3088_v0  ;;  %vm11551_vm7 = vmmov %vm11538_vm4 }
 0x17c   : > { %v8868_v23 = vadd.f32 %v823_v31, %v8747_v50 }
 0x17e   : > { %6883 = vmatmul.msk.bf16.gmra.mxu0 %vm11545_vm6, %v2548_v26  ;;  %v2381_v13 = vpop.f32.mrf.mxu3  ;;  %v2002_v43 = vpop.f32.mrf.mxu2  ;;  %vm11549_vm6 = vnez %v11264_v46 }
 0x17f   : > { %v8876_v58 = vadd.f32 %v2381_v13, %v2000_v42  ;;  %v2003_v50 = vadd.f32 %v2002_v43, %v1862_v29  ;;  %v2519_v19 = vsel %vm11549_vm6, %v8035_v9, 0.0  ;;  %v3060_v42 = vsel %vm8001_vm1, %v8057_v38, 0.0 }
 0x180   : > { %v2549_v20 = vpack.c.bf16 %v8046_v41, %v2519_v19  ;;  %v3409_v9 = vsel %vm11549_vm6, %v8092_v21, 0.0  ;;  %vm11580_vm6 = vmmov %vm11538_vm4 }
 0x181   : > { %11547 = vst [vmem:[#allocation122_spill] sm:$0xff] %v8876_v58  ;;  %v1864_v52 = vpop.f32.mrf.mxu1 }
 0x183   : > { %v825_v53 = vpop.f32.mrf.mxu0  ;;  %6998 = vmatmul.msk.bf16.gmra.mxu3 %vm11548_vm15, %v3438_v34  ;;  %vm11552_vm15 = vmmov %vm11538_vm4 }
 0x184   : > { %v8881_v14 = vadd.f32 %v825_v53, %v8776_v28  ;;  %v3089_v28 = vpack.c.bf16 %v3060_v42, %v8066_v62  ;;  %v11617_v62 = vld [vmem:[#allocation76_spill] sm:$0xff] }
 0x186   : > { %v2384_v36 = vpop.f32.mrf.mxu3  ;;  %v2004_v31 = vpop.f32.mrf.mxu2 }
 0x187   : > { %v8886_v26 = vadd.f32 %v2384_v36, %v2003_v50  ;;  %v2005_v0 = vadd.f32 %v2004_v31, %v1864_v52  ;;  %v11554_v50 = vld [vmem:[#allocation23_spill] sm:$0xff] }
 0x188   : > { %v3439_v53 = vpack.c.bf16 %v11554_v50, %v3409_v9 }
 0x189   : > { %11550 = vst [vmem:[#allocation123_spill] sm:$0xff] %v8886_v26  ;;  %v1867_v34 = vpop.f32.mrf.mxu1 }
 0x18b   : > { %v828_v29 = vpop.f32.mrf.mxu0  ;;  %6965 = vmatmul.msk.bf16.gmra.mxu1 %vm11552_vm15, %v7279_v33  ;;  %6982 = vmatmul.msk.bf16.gmra.mxu2 %vm11538_vm4, %v3089_v28  ;;  %vm11565_vm15 = vmmov %vm11538_vm4 }
 0x18c   : > { %v8895_v13 = vadd.f32 %v828_v29, %v8814_v40 }
 0x18e   : > { %6884 = vmatmul.msk.bf16.gmra.mxu0 %vm11551_vm7, %v2549_v20  ;;  %v2386_v43 = vpop.f32.mrf.mxu3  ;;  %v2007_v52 = vpop.f32.mrf.mxu2  ;;  %v11556_v20 = vld [vmem:[#allocation16_spill] sm:$0xff] }
 0x18f   : > { %v8903_v41 = vadd.f32 %v2386_v43, %v2005_v0  ;;  %v2008_v40 = vadd.f32 %v2007_v52, %v1867_v34  ;;  %vm11557_vm7 = vnez %v11556_v20  ;;  %v11559_v0 = vld [vmem:[#allocation24_spill] sm:$0xff]  ;;  %v11561_v34 = vld [vmem:[#allocation22_spill] sm:$0xff] }
 0x190   : > { %v2521_v29 = vsel %vm11557_vm7, %v8092_v21, 0.0  ;;  %v3062_v9 = vsel %vm8051_vm2, %v11559_v0, 0.0  ;;  %v770_v52 = vadd.f32 %v11561_v34, %v8619_v60  ;;  %v7281_v0 = vld [vmem:[%s7858_s24 + $0x20] sm:$0xff] }
 0x191   : > { %11553 = vst [vmem:[#allocation124_spill] sm:$0xff] %v8903_v41  ;;  %v1869_v42 = vpop.f32.mrf.mxu1  ;;  %v3090_v46 = vpack.c.bf16 %v3062_v9, %v11562_v51 }
 0x193   : > { %v830_v36 = vpop.f32.mrf.mxu0  ;;  %6999 = vmatmul.msk.bf16.gmra.mxu3 %vm11555_vm11, %v3439_v53  ;;  %v2550_v53 = vpack.c.bf16 %v11554_v50, %v2521_v29  ;;  %vm11564_vm11 = vmmov %vm11538_vm4  ;;  %v11567_v50 = vld [vmem:[#allocation35_spill] sm:$0xff]  ;;  %v11568_v29 = vld [vmem:[#allocation26_spill] sm:$0xff] }
 0x194   : > { %v8908_v19 = vadd.f32 %v830_v36, %v8833_v44  ;;  %v920_v9 = vadd.f32 %v11568_v29, %v8839_v2 }
 0x196   : > { %v2389_v31 = vpop.f32.mrf.mxu3  ;;  %v2009_v43 = vpop.f32.mrf.mxu2 }
 0x197   : > { %v8913_v33 = vadd.f32 %v2389_v31, %v2008_v40  ;;  %v2010_v44 = vadd.f32 %v2009_v43, %v1869_v42  ;;  %v11563_v40 = vld [vmem:[#allocation32_spill] sm:$0xff] }
 0x198   : > { %v3411_v31 = vsel %vm11557_vm7, %v11563_v40, 0.0  ;;  %vm11569_vm7 = vmmov %vm11538_vm4 }
 0x199   : > { %11558 = vst [vmem:[#allocation23_spill] sm:$0xff] %v8913_v33  ;;  %v1872_v21 = vpop.f32.mrf.mxu1  ;;  %v3440_v42 = vpack.c.bf16 %v11567_v50, %v3411_v31  ;;  %v11574_v31 = vld [vmem:[#allocation37_spill] sm:$0xff] }
 0x19b   : > { %v833_v36 = vpop.f32.mrf.mxu0  ;;  %6966 = vmatmul.msk.bf16.gmra.mxu1 %vm11565_vm15, %v7280_v56  ;;  %6983 = vmatmul.msk.bf16.gmra.mxu2 %vm11538_vm4, %v3090_v46  ;;  %v11571_v46 = vld [vmem:[#allocation21_spill] sm:$0xff] }
 0x19c   : > { %v8923_v30 = vadd.f32 %v833_v36, %v770_v52  ;;  %v11570_v36 = vld [vmem:[#allocation30_spill] sm:$0xff] }
 0x19d   : > { %v1018_v20 = vadd.f32 %v11570_v36, %v920_v9  ;;  %v11578_v9 = vld [vmem:[#allocation40_spill] sm:$0xff] }
 0x19e   : > { %6885 = vmatmul.msk.bf16.gmra.mxu0 %vm11564_vm11, %v2550_v53  ;;  %v2391_v28 = vpop.f32.mrf.mxu3  ;;  %v2012_v43 = vpop.f32.mrf.mxu2  ;;  %vm11572_vm11 = vnez %v11571_v46 }
 0x19f   : > { %v8931_v60 = vadd.f32 %v2391_v28, %v2010_v44  ;;  %v2013_v34 = vadd.f32 %v2012_v43, %v1872_v21  ;;  %v2523_v28 = vsel %vm11572_vm11, %v11563_v40, 0.0  ;;  %v11577_v21 = vld [vmem:[#allocation34_spill] sm:$0xff]  ;;  %v3413_v40 = vsel %vm11572_vm11, %v8221_v24, 0.0  ;;  %vm11593_vm11 = vmmov %vm11538_vm4 }
 0x1a0   : > { %v1100_v43 = vadd.f32 %v11577_v21, %v1018_v20  ;;  %v2551_v33 = vpack.c.bf16 %v11567_v50, %v2523_v28  ;;  %v3441_v50 = vpack.c.bf16 %v8237_v27, %v3413_v40 }
 0x1a1   : > { %11566 = vst [vmem:[#allocation22_spill] sm:$0xff] %v8931_v60  ;;  %v1874_v53 = vpop.f32.mrf.mxu1  ;;  %v11575_v60 = vld [vmem:[#allocation25_spill] sm:$0xff] }
 0x1a2   : > { %vm11576_vm15 = vnez %v11575_v60  ;;  %v11588_v60 = vld [vmem:[#allocation56_spill] sm:$0xff] }
 0x1a3   : > { %v8936_v52 = vpop.f32.mrf.mxu0  ;;  %7000 = vmatmul.msk.bf16.gmra.mxu3 %vm11569_vm7, %v3440_v42  ;;  %v3064_v2 = vsel %vm11576_vm15, %v11574_v31, 0.0  ;;  %vm11579_vm7 = vmmov %vm11538_vm4 }
 0x1a4   : > { %v3091_v36 = vpack.c.bf16 %v3064_v2, %v11578_v9  ;;  %vm11582_vm15 = vmmov %vm11538_vm4 }
 0x1a6   : > { %v2394_v56 = vpop.f32.mrf.mxu3  ;;  %v2014_v29 = vpop.f32.mrf.mxu2 }
 0x1a7   : > { %v8943_v44 = vadd.f32 %v2394_v56, %v2013_v34  ;;  %v2015_v42 = vadd.f32 %v2014_v29, %v1874_v53 }
 0x1a9   : > { %11573 = vst [vmem:[#allocation32_spill] sm:$0xff] %v8943_v44  ;;  %v1877_v26 = vpop.f32.mrf.mxu1 }
 0x1ab   : > { %v1170_v51 = vpop.f32.mrf.mxu0  ;;  %6967 = vmatmul.msk.bf16.gmra.mxu1 %vm11538_vm4, %v7281_v0  ;;  %6984 = vmatmul.msk.bf16.gmra.mxu2 %vm11580_vm6, %v3091_v36  ;;  %vm11589_vm6 = vmmov %vm11538_vm4 }
 0x1ac   : > { %v8952_v41 = vadd.f32 %v1170_v51, %v1100_v43  ;;  %v3066_v43 = vsel %vm8179_vm5, %v8246_v8, 0.0  ;;  %v11602_v8 = vld [vmem:[#allocation69_spill] sm:$0xff] }
 0x1ae   : > { %6886 = vmatmul.msk.bf16.gmra.mxu0 %vm11579_vm7, %v2551_v33  ;;  %v2396_v34 = vpop.f32.mrf.mxu3  ;;  %v2017_v53 = vpop.f32.mrf.mxu2  ;;  %v11583_v33 = vld [vmem:[#allocation33_spill] sm:$0xff] }
 0x1af   : > { %v8960_v20 = vadd.f32 %v2396_v34, %v2015_v42  ;;  %v2018_v51 = vadd.f32 %v2017_v53, %v1877_v26  ;;  %vm11584_vm7 = vnez %v11583_v33  ;;  %v7282_v34 = vld [vmem:[%s7858_s24 + $0x28] sm:$0xff] }
 0x1b0   : > { %v2525_v29 = vsel %vm11584_vm7, %v8221_v24, 0.0  ;;  %v3415_v24 = vsel %vm11584_vm7, %v11588_v60, 0.0  ;;  %vm11604_vm7 = vmmov %vm11538_vm4 }
 0x1b1   : > { %11581 = vst [vmem:[#allocation35_spill] sm:$0xff] %v8960_v20  ;;  %v1879_v28 = vpop.f32.mrf.mxu1  ;;  %v2552_v36 = vpack.c.bf16 %v8237_v27, %v2525_v29  ;;  %v11592_v27 = vld [vmem:[#allocation59_spill] sm:$0xff] }
 0x1b3   : > { %v8963_v56 = vpop.f32.mrf.mxu0  ;;  %7001 = vmatmul.msk.bf16.gmra.mxu3 %vm11582_vm15, %v3441_v50  ;;  %v11587_v50 = vld [vmem:[#allocation51_spill] sm:$0xff]  ;;  %vm11590_vm15 = vmmov %vm11538_vm4 }
 0x1b4   : > { %v3092_v53 = vpack.c.bf16 %v3066_v43, %v11587_v50 }
 0x1b6   : > { %v2399_v2 = vpop.f32.mrf.mxu3  ;;  %v2019_v42 = vpop.f32.mrf.mxu2 }
 0x1b7   : > { %v8969_v0 = vadd.f32 %v2399_v2, %v2018_v51  ;;  %v2020_v26 = vadd.f32 %v2019_v42, %v1879_v28  ;;  %v3442_v28 = vpack.c.bf16 %v11592_v27, %v3415_v24 }
 0x1b9   : > { %11585 = vst [vmem:[#allocation26_spill] sm:$0xff] %v8969_v0  ;;  %v1882_v46 = vpop.f32.mrf.mxu1 }
 0x1bb   : > { %v8975_v40 = vpop.f32.mrf.mxu0  ;;  %6968 = vmatmul.msk.bf16.gmra.mxu1 %vm11590_vm15, %v7282_v34  ;;  %6985 = vmatmul.msk.bf16.gmra.mxu2 %vm11538_vm4, %v3092_v53  ;;  %v11597_v53 = vld [vmem:[#allocation61_spill] sm:$0xff]  ;;  %vm11599_vm15 = vcmask 1041408  }
 0x1be   : > { %6887 = vmatmul.msk.bf16.gmra.mxu0 %vm11589_vm6, %v2552_v36  ;;  %v2401_v51 = vpop.f32.mrf.mxu3  ;;  %v2022_v29 = vpop.f32.mrf.mxu2  ;;  %v11594_v36 = vld [vmem:[#allocation45_spill] sm:$0xff] }
 0x1bf   : > { %v8985_v2 = vadd.f32 %v2401_v51, %v2020_v26  ;;  %v2023_v42 = vadd.f32 %v2022_v29, %v1882_v46  ;;  %vm11595_vm6 = vnez %v11594_v36  ;;  %v3068_v51 = vsel %vm8248_vm12, %v11597_v53, 0.0  ;;  %v7012_v46 = vld [vmem:[%s10954_s5 + $0xe] sm:$0x3]  ;;  %v7028_v26 = vld [vmem:[%s10954_s5 + $0x10] sm:$0x3] }
 0x1c0   : > { %v2527_v0 = vsel %vm11595_vm6, %v11588_v60, 0.0  ;;  %v3790_v24 = vsel %vm11599_vm15, %v7012_v46, 0  ;;  %v7283_v60 = vld [vmem:[%s7858_s24 + $0x30] sm:$0xff]  ;;  %v3417_v46 = vsel %vm11595_vm6, %v11602_v8, 0.0 }
 0x1c1   : > { %11591 = vst [vmem:[#allocation30_spill] sm:$0xff] %v8985_v2  ;;  %v1884_v33 = vpop.f32.mrf.mxu1  ;;  %3799 = vmatpush.bf16.msrb.mxu0 %v3790_v24 }
 0x1c3   : > { %v8988_v43 = vpop.f32.mrf.mxu0  ;;  %7002 = vmatmul.msk.bf16.gmra.mxu3 %vm11593_vm11, %v3442_v28  ;;  %v2553_v28 = vpack.c.bf16 %v11592_v27, %v2527_v0  ;;  %vm11601_vm11 = vmmov %vm11599_vm15  ;;  %v11606_v27 = vld [vmem:[#allocation72_spill] sm:$0xff] }
 0x1c4   : > { %v4108_v53 = vsel %vm11601_vm11, %v7028_v26, 0  ;;  %vm11603_vm15 = vmmov %vm11538_vm4  ;;  %v11607_v26 = vld [vmem:[#allocation28_spill] sm:$0xff] }
 0x1c5   : > { %4117 = vmatpush.bf16.msra.mxu1 %v4108_v53  ;;  %v771_v36 = vadd.f32 %v11607_v26, %v8646_v3  ;;  %vm11608_vm11 = vmmov %vm11538_vm4  ;;  %v11615_v3 = vld [vmem:[#allocation55_spill] sm:$0xff]  ;;  %v11616_v26 = vld [vmem:[#allocation68_spill] sm:$0xff] }
 0x1c6   : > { %v2404_v21 = vpop.f32.mrf.mxu3  ;;  %v2024_v29 = vpop.f32.mrf.mxu2 }
 0x1c7   : > { %v8994_v34 = vadd.f32 %v2404_v21, %v2023_v42  ;;  %v2025_v2 = vadd.f32 %v2024_v29, %v1884_v33  ;;  %v11600_v21 = vld [vmem:[#allocation64_spill] sm:$0xff] }
 0x1c8   : > { %v3093_v42 = vpack.c.bf16 %v3068_v51, %v11600_v21  ;;  %v3443_v51 = vpack.c.bf16 %v11606_v27, %v3417_v46 }
 0x1c9   : > { %11596 = vst [vmem:[#allocation34_spill] sm:$0xff] %v8994_v34  ;;  %v1887_v34 = vpop.f32.mrf.mxu1 }
 0x1cb   : > { %v9004_v50 = vpop.f32.mrf.mxu0  ;;  %6969 = vmatmul.msk.bf16.gmra.mxu1 %vm11603_vm15, %v7283_v60  ;;  %6986 = vmatmul.msk.bf16.gmra.mxu2 %vm11604_vm7, %v3093_v42  ;;  %v11610_v42 = vld [vmem:[#allocation63_spill] sm:$0xff]  ;;  %vm11625_vm15 = vmmov %vm11538_vm4  ;;  %v11632_v60 = vld [vmem:[#allocation65_spill] sm:$0xff] }
 0x1cc   : > { %v926_v46 = vadd.f32 %v11610_v42, %v8923_v30  ;;  %v11618_v30 = vld [vmem:[#allocation50_spill] sm:$0xff] }
 0x1ce   : > { %6888 = vmatmul.msk.bf16.gmra.mxu0 %vm11538_vm4, %v2553_v28  ;;  %v2406_v33 = vpop.f32.mrf.mxu3  ;;  %v2027_v24 = vpop.f32.mrf.mxu2  ;;  %v845_v28 = vadd.f32 %v8936_v52, %v771_v36 }
 0x1cf   : > { %v9018_v0 = vadd.f32 %v2406_v33, %v2025_v2  ;;  %v2028_v29 = vadd.f32 %v2027_v24, %v1887_v34  ;;  %v2529_v2 = vsel %vm8303_vm3, %v11602_v8, 0.0  ;;  %v11612_v34 = vld [vmem:[#allocation74_spill] sm:$0xff]  ;;  %v7284_v8 = vld [vmem:[%s7858_s24 + $0x38] sm:$0xff] }
 0x1d0   : > { %v11613_v24 = vld [vmem:[#allocation62_spill] sm:$0xff]  ;;  %v927_v44 = vadd.f32 %v11616_v26, %v845_v28  ;;  %v2554_v36 = vpack.c.bf16 %v11606_v27, %v2529_v2 }
 0x1d1   : > { %11605 = vst [vmem:[#allocation56_spill] sm:$0xff] %v9018_v0  ;;  %v1889_v53 = vpop.f32.mrf.mxu1  ;;  %vm11614_vm7 = vnez %v11613_v24 }
 0x1d2   : > { %v3070_v0 = vsel %vm11614_vm7, %v11612_v34, 0.0 }
 0x1d3   : > { %v1182_v21 = vpop.f32.mrf.mxu0  ;;  %7003 = vmatmul.msk.bf16.gmra.mxu3 %vm11608_vm11, %v3443_v51  ;;  %v925_v51 = vadd.f32 %v11615_v3, %v8908_v19  ;;  %v3094_v17 = vpack.c.bf16 %v3070_v0, %v11617_v62  ;;  %v11621_v19 = vld [vmem:[#allocation79_spill] sm:$0xff]  ;;  %v11622_v3 = vld [vmem:[#allocation60_spill] sm:$0xff]  ;;  %vm11626_vm11 = vmmov %vm11538_vm4 }
 0x1d4   : > { %v3419_v28 = vsel %vm8303_vm3, %v11621_v19, 0.0  ;;  %v11624_v0 = vld [vmem:[#allocation39_spill] sm:$0xff]  ;;  %vm11648_vm3 = vmmov %vm11538_vm4 }
 0x1d5   : > { %v1023_v27 = vadd.f32 %v11622_v3, %v925_v51  ;;  %v922_v26 = vadd.f32 %v11624_v0, %v8868_v23  ;;  %vm11649_vm6 = vmmov %vm11648_vm3 }
 0x1d6   : > { %v2409_v20 = vpop.f32.mrf.mxu3  ;;  %v2029_v52 = vpop.f32.mrf.mxu2 }
 0x1d7   : > { %v9030_v33 = vadd.f32 %v2409_v20, %v2028_v29  ;;  %v2030_v9 = vadd.f32 %v2029_v52, %v1889_v53  ;;  %v924_v20 = vadd.f32 %v11618_v30, %v8895_v13  ;;  %v11619_v29 = vld [vmem:[#allocation67_spill] sm:$0xff]  ;;  %v11623_v53 = vld [vmem:[#allocation73_spill] sm:$0xff]  ;;  %v1105_v23 = vadd.f32 %v11632_v60, %v1023_v27  ;;  %v11636_v60 = vld [vmem:[#allocation36_spill] sm:$0xff] }
 0x1d8   : > { %v1024_v42 = vadd.f32 %v11619_v29, %v926_v46  ;;  %v1025_v2 = vadd.f32 %v11623_v53, %v927_v44  ;;  %v11627_v46 = vld [vmem:[#allocation54_spill] sm:$0xff]  ;;  %v11631_v44 = vld [vmem:[#allocation47_spill] sm:$0xff]  ;;  %v11637_v27 = vld [vmem:[#allocation52_spill] sm:$0xff] }
 0x1d9   : > { %11611 = vst [vmem:[#allocation59_spill] sm:$0xff] %v9030_v33  ;;  %v1892_v24 = vpop.f32.mrf.mxu1  ;;  %v11620_v33 = vld [vmem:[#allocation44_spill] sm:$0xff]  ;;  %v11629_v29 = vld [vmem:[#allocation82_spill] sm:$0xff] }
 0x1da   : > { %v923_v34 = vadd.f32 %v11620_v33, %v8881_v14  ;;  %v1022_v14 = vadd.f32 %v11627_v46, %v924_v20  ;;  %v11628_v33 = vld [vmem:[#allocation71_spill] sm:$0xff]  ;;  %v3444_v51 = vpack.c.bf16 %v11629_v29, %v3419_v28 }
 0x1db   : > { %v1185_v31 = vpop.f32.mrf.mxu0  ;;  %6970 = vmatmul.msk.bf16.gmra.mxu1 %vm11625_vm15, %v7284_v8  ;;  %6987 = vmatmul.msk.bf16.gmra.mxu2 %vm11626_vm11, %v3094_v17  ;;  %v1106_v52 = vadd.f32 %v11628_v33, %v1024_v42  ;;  %v11633_v8 = vld [vmem:[#allocation77_spill] sm:$0xff]  ;;  %v11634_v17 = vld [vmem:[#allocation43_spill] sm:$0xff]  ;;  %v11635_v42 = vld [vmem:[#allocation58_spill] sm:$0xff] }
 0x1dc   : > { %v1021_v53 = vadd.f32 %v11631_v44, %v923_v34  ;;  %v1107_v38 = vadd.f32 %v11633_v8, %v1025_v2  ;;  %v1020_v58 = vadd.f32 %v11634_v17, %v922_v26  ;;  %v1104_v28 = vadd.f32 %v11635_v42, %v1022_v14 }
 0x1dd   : > { %v1196_v0 = vadd.f32 %v1185_v31, %v1106_v52 }
 0x1de   : > { %6889 = vmatmul.msk.bf16.gmra.mxu0 %vm11538_vm4, %v2554_v36  ;;  %v2411_v13 = vpop.f32.mrf.mxu3  ;;  %v11630_v36 = vld [vmem:[#allocation31_spill] sm:$0xff]  ;;  %v2032_v62 = vpop.f32.mrf.mxu2  ;;  %v1103_v33 = vadd.f32 %v11637_v27, %v1021_v53  ;;  %v1194_v2 = vadd.f32 %v9004_v50, %v1104_v28 }
 0x1df   : > { %v9058_v30 = vadd.f32 %v2411_v13, %v2030_v9  ;;  %v921_v3 = vadd.f32 %v11630_v36, %v8854_v12  ;;  %v2033_v20 = vadd.f32 %v2032_v62, %v1892_v24  ;;  %v7349_v9 = vld [vmem:[%s10953_s4] ss:$0 sm:$0xff]  ;;  %v1195_v13 = vadd.f32 %v1182_v21, %v1105_v23  ;;  %v11638_v24 = vld [vmem:[#allocation46_spill] sm:$0xff]  ;;  %v11642_v53 = vld [vmem:[#allocation75_spill] sm:$0xff] }
 0x1e0   : > { %v1208_v26 = vadd.f32 %v7349_v9, %v1196_v0  ;;  %v1102_v52 = vadd.f32 %v11638_v24, %v1020_v58  ;;  %v1193_v36 = vadd.f32 %v8988_v43, %v1103_v33  ;;  %v11639_v21 = vld [vmem:[#allocation70_spill] sm:$0xff]  ;;  %vm11643_vm11 = vnez %v11642_v53  ;;  %v11644_v0 = vld [vmem:[#allocation41_spill] sm:$0xff] }
 0x1e1   : > { %v1894_v34 = vpop.f32.mrf.mxu1  ;;  %v1019_v31 = vadd.f32 %v11636_v60, %v921_v3  ;;  %vm11640_vm15 = vnez %v11639_v21  ;;  %v11641_v3 = vld [vmem:[#allocation83_spill] sm:$0xff]  ;;  %v1206_v17 = vadd.f32 %v7349_v9, %v1194_v2  ;;  %v11646_v33 = vld [vmem:[#allocation81_spill] sm:$0xff] }
 0x1e2   : > { %v2531_v14 = vsel %vm11640_vm15, %v11621_v19, 0.0  ;;  %v3072_v50 = vsel %vm11643_vm11, %v11641_v3, 0.0  ;;  %v1192_v58 = vadd.f32 %v8975_v40, %v1102_v52  ;;  %v1216_v43 = vmax.f32 %v1208_v26, 0.0  ;;  %v11647_v40 = vld [vmem:[#allocation88_spill] sm:$0xff] }
 0x1e3   : > { %v1187_v46 = vpop.f32.mrf.mxu0  ;;  %7004 = vmatmul.msk.bf16.gmra.mxu3 %vm11538_vm4, %v3444_v51  ;;  %v1101_v8 = vadd.f32 %v11644_v0, %v1019_v31  ;;  %v2555_v42 = vpack.c.bf16 %v11629_v29, %v2531_v14  ;;  %v1205_v27 = vadd.f32 %v7349_v9, %v1193_v36  ;;  %v3421_v2 = vsel %vm11640_vm15, %v11647_v40, 0.0 }
 0x1e4   : > { %v1197_v12 = vadd.f32 %v1187_v46, %v1107_v38  ;;  %v1207_v38 = vadd.f32 %v7349_v9, %v1195_v13  ;;  %v7285_v13 = vld [vmem:[%s7858_s24 + $0x40] sm:$0xff]  ;;  %v1204_v26 = vadd.f32 %v7349_v9, %v1192_v58  ;;  %v1214_v52 = vmax.f32 %v1206_v17, 0.0  ;;  %v11652_v17 = vld [vmem:[#allocation87_spill] sm:$0xff] }
 0x1e5   : > { %v1191_v60 = vadd.f32 %v8963_v56, %v1101_v8 }
 0x1e6   : > { %v1209_v62 = vadd.f32 %v7349_v9, %v1197_v12  ;;  %v2414_v44 = vpop.f32.mrf.mxu3  ;;  %v2034_v46 = vpop.f32.mrf.mxu2  ;;  %v11645_v12 = vld [vmem:[#allocation85_spill] sm:$0xff]  ;;  %v1215_v31 = vmax.f32 %v1207_v38, 0.0  ;;  %v1213_v38 = vmax.f32 %v1205_v27, 0.0  ;;  %v11656_v27 = vld [vmem:[#allocation84_spill] sm:$0xff] }
 0x1e7   : > { %v9080_v23 = vadd.f32 %v2414_v44, %v2033_v20  ;;  %v2035_v28 = vadd.f32 %v2034_v46, %v1894_v34  ;;  %v3095_v20 = vpack.c.bf16 %v3072_v50, %v11645_v12  ;;  %v1203_v56 = vadd.f32 %v7349_v9, %v1191_v60  ;;  %v11650_v44 = vld [vmem:[#allocation91_spill] sm:$0xff]  ;;  %v11655_v60 = vld [vmem:[#allocation92_spill] sm:$0xff] }
 0x1e8   : > { %v1217_v51 = vmax.f32 %v1209_v62, 0.0  ;;  %v3445_v14 = vpack.c.bf16 %v11650_v44, %v3421_v2  ;;  %v1212_v50 = vmax.f32 %v1204_v26, 0.0  ;;  %v7286_v26 = vld [vmem:[%s7858_s24 + $0x48] sm:$0xff] }
 0x1e9   : > { %v2879_v24 = vpop.f32.mrf.mxu1 }
 0x1ea   : > { %4404 = vmatpush.msra.mxu2 %v1217_v51  ;;  %v1202_v51 = vadd.f32 %v7349_v9, %v8952_v41 }
 0x1eb   : > { %v2625_v19 = vpop.f32.mrf.mxu0  ;;  %6971 = vmatmul.msk.bf16.gmra.mxu1 %vm11648_vm3, %v7285_v13  ;;  %6988 = vmatmul.msk.bf16.gmra.mxu2 %vm11649_vm6, %v3095_v20  ;;  %v11653_v20 = vld [vmem:[#allocation80_spill] sm:$0xff]  ;;  %vm11657_vm6 = vnez %v11656_v27 }
 0x1ec   : > { %v2705_v62 = vadd.f32 %v2625_v19, %v11646_v33  ;;  %4405 = vmatpush.msra.mxu2 %v1216_v43  ;;  %v3074_v33 = vsel %vm11657_vm6, %v11655_v60, 0.0 }
 0x1ee   : > { %v2959_v29 = vadd.f32 %v2879_v24, %v2705_v62  ;;  %6890 = vmatmul.msk.bf16.gmra.mxu0 %vm11538_vm4, %v2555_v42  ;;  %4406 = vmatpush.msra.mxu2 %v1215_v31  ;;  %v2416_v34 = vpop.f32.mrf.mxu3  ;;  %v3165_v0 = vpop.f32.mrf.mxu2  ;;  %vm11651_vm4 = vmmov %vm11648_vm3  ;;  %v1211_v42 = vmax.f32 %v1203_v56, 0.0  ;;  %vm11654_vm3 = vnez %v11653_v20 }
 0x1ef   : > { %v9098_v36 = vadd.f32 %v2416_v34, %v2035_v28  ;;  %v1210_v28 = vmax.f32 %v1202_v51, 0.0  ;;  %v2533_v41 = vsel %vm11654_vm3, %v11647_v40, 0.0  ;;  %v11659_v34 = vld [vmem:[#allocation90_spill] sm:$0xff]  ;;  %vm11661_vm15 = vmmov %vm11651_vm4 }
 0x1f0   : > { %4407 = vmatpush.msra.mxu2 %v1214_v52  ;;  %v3245_v8 = vadd.f32 %v3165_v0, %v2959_v29  ;;  %v2556_v24 = vpack.c.bf16 %v11650_v44, %v2533_v41  ;;  %v11658_v52 = vld [vmem:[#allocation94_spill] sm:$0xff]  ;;  %vm11662_vm6 = vmmov %vm11651_vm4  ;;  %v11663_v0 = vld [vmem:[#allocation100_spill] sm:$0xff] }
 0x1f1   : > { %v2881_v46 = vpop.f32.mrf.mxu1  ;;  %v3096_v29 = vpack.c.bf16 %v3074_v33, %v11658_v52  ;;  %vm11664_vm11 = vmmov %vm11651_vm4  ;;  %v11666_v41 = vld [vmem:[#allocation89_spill] sm:$0xff] }
 0x1f2   : > { %4408 = vmatpush.msra.mxu2 %v1213_v38  ;;  %v11660_v38 = vld [vmem:[#allocation97_spill] sm:$0xff] }
 0x1f3   : > { %v2627_v58 = vpop.f32.mrf.mxu0  ;;  %7005 = vmatmul.msk.bf16.gmra.mxu3 %vm11651_vm4, %v3445_v14  ;;  %v3423_v40 = vsel %vm11654_vm3, %v11660_v38, 0.0  ;;  %vm11673_vm3 = vmmov %vm11651_vm4 }
 0x1f4   : > { %v2706_v43 = vadd.f32 %v2627_v58, %v11652_v17  ;;  %4409 = vmatpush.msra.mxu2 %v1212_v50 }
 0x1f6   : > { %v2960_v19 = vadd.f32 %v2881_v46, %v2706_v43  ;;  %4410 = vmatpush.msra.mxu2 %v1211_v42  ;;  %v3515_v13 = vpop.f32.mrf.mxu3  ;;  %v3167_v62 = vpop.f32.mrf.mxu2  ;;  %v11665_v46 = vld [vmem:[#allocation96_spill] sm:$0xff] }
 0x1f7   : > { %v9107_v9 = vadd.f32 %v3515_v13, %v3245_v8  ;;  %v3446_v8 = vpack.c.bf16 %v11663_v0, %v3423_v40 }
 0x1f8   : > { %4411 = vmatpush.msra.mxu2 %v1210_v28  ;;  %v3246_v31 = vadd.f32 %v3167_v62, %v2960_v19 }
 0x1f9   : > { %v2884_v14 = vpop.f32.mrf.mxu1 }
 0x1fb   : > { %v2630_v2 = vpop.f32.mrf.mxu0  ;;  %6972 = vmatmul.msk.bf16.gmra.mxu1 %vm11661_vm15, %v7286_v26  ;;  %6989 = vmatmul.msk.bf16.gmra.mxu2 %vm11662_vm6, %v3096_v29  ;;  %vm11667_vm15 = vnez %v11666_v41  ;;  %vm11672_vm6 = vmmov %vm11651_vm4 }
 0x1fc   : > { %v2707_v56 = vadd.f32 %v2630_v2, %v11659_v34  ;;  %v2535_v33 = vsel %vm11667_vm15, %v11660_v38, 0.0  ;;  %v3425_v38 = vsel %vm11667_vm15, %v8593_v6, 0.0  ;;  %vm11683_vm15 = vmmov %vm11673_vm3 }
 0x1fd   : > { %v2557_v29 = vpack.c.bf16 %v11663_v0, %v2535_v33 }
 0x1fe   : > { %v2961_v51 = vadd.f32 %v2884_v14, %v2707_v56  ;;  %6891 = vmatmul.msk.bf16.gmra.mxu0 %vm11651_vm4, %v2556_v24  ;;  %v3517_v50 = vpop.f32.mrf.mxu3  ;;  %v3170_v58 = vpop.f32.mrf.mxu2  ;;  %v11668_v24 = vld [vmem:[#allocation101_spill] sm:$0xff]  ;;  %v7287_v14 = vld [vmem:[%s7858_s24 + $0x50] sm:$0xff] }
 0x1ff   : > { %v9122_v44 = vadd.f32 %v3517_v50, %v3246_v31  ;;  %v11669_v31 = vld [vmem:[#allocation93_spill] sm:$0xff]  ;;  %v3076_v2 = vsel %vm8499_vm9, %v11668_v24, 0.0 }
 0x200   : > { %v3247_v17 = vadd.f32 %v3170_v58, %v2961_v51  ;;  %v3097_v40 = vpack.c.bf16 %v3076_v2, %v8568_v47  ;;  %v11670_v51 = vld [vmem:[#allocation99_spill] sm:$0xff] }
 0x201   : > { %v2886_v28 = vpop.f32.mrf.mxu1 }
 0x203   : > { %v2632_v43 = vpop.f32.mrf.mxu0  ;;  %7006 = vmatmul.msk.bf16.gmra.mxu3 %vm11664_vm11, %v3446_v8  ;;  %vm11671_vm11 = vmmov %vm11651_vm4 }
 0x204   : > { %v2708_v42 = vadd.f32 %v2632_v43, %v11665_v46  ;;  %v3447_v43 = vpack.c.bf16 %v8603_v18, %v3425_v38 }
 0x206   : > { %v2962_v19 = vadd.f32 %v2886_v28, %v2708_v42  ;;  %v3520_v13 = vpop.f32.mrf.mxu3  ;;  %v3172_v26 = vpop.f32.mrf.mxu2 }
 0x207   : > { %v9130_v62 = vadd.f32 %v3520_v13, %v3247_v17 }
 0x208   : > { %v3248_v34 = vadd.f32 %v3172_v26, %v2962_v19  ;;  %v11674_v19 = vld [vmem:[#allocation104_spill] sm:$0xff] }
 0x209   : > { %v2889_v8 = vpop.f32.mrf.mxu1 }
 0x20b   : > { %v2635_v56 = vpop.f32.mrf.mxu0  ;;  %6973 = vmatmul.msk.bf16.gmra.mxu1 %vm11672_vm6, %v7287_v14  ;;  %6990 = vmatmul.msk.bf16.gmra.mxu2 %vm11651_vm4, %v3097_v40  ;;  %v11678_v40 = vld [vmem:[#allocation102_spill] sm:$0xff]  ;;  %vm11682_vm4 = vmmov %vm11673_vm3 }
 0x20c   : > { %v2709_v50 = vadd.f32 %v2635_v56, %v11670_v51  ;;  %vm11679_vm6 = vnez %v11678_v40 }
 0x20e   : > { %v2963_v58 = vadd.f32 %v2889_v8, %v2709_v50  ;;  %6892 = vmatmul.msk.bf16.gmra.mxu0 %vm11671_vm11, %v2557_v29  ;;  %v3522_v17 = vpop.f32.mrf.mxu3  ;;  %v3175_v46 = vpop.f32.mrf.mxu2  ;;  %v11675_v29 = vld [vmem:[#allocation98_spill] sm:$0xff] }
 0x20f   : > { %v9145_v0 = vadd.f32 %v3522_v17, %v3248_v34  ;;  %vm11676_vm11 = vnez %v11675_v29  ;;  %v11677_v34 = vld [vmem:[#allocation107_spill] sm:$0xff]  ;;  %v7288_v17 = vld [vmem:[%s7858_s24 + $0x58] sm:$0xff]  ;;  %v7289_v29 = vld [vmem:[%s7858_s24 + $0x60] sm:$0xff] }
 0x210   : > { %v3249_v42 = vadd.f32 %v3175_v46, %v2963_v58  ;;  %v2537_v56 = vsel %vm11676_vm11, %v8593_v6, 0.0  ;;  %v3078_v51 = vsel %vm11679_vm6, %v11677_v34, 0.0  ;;  %v3427_v6 = vsel %vm11676_vm11, %v8650_v59, 0.0  ;;  %vm11684_vm6 = vmmov %vm11673_vm3 }
 0x211   : > { %v2891_v33 = vpop.f32.mrf.mxu1  ;;  %v2558_v8 = vpack.c.bf16 %v8603_v18, %v2537_v56  ;;  %vm11691_vm11 = vmmov %vm11682_vm4 }
 0x213   : > { %v2637_v28 = vpop.f32.mrf.mxu0  ;;  %7007 = vmatmul.msk.bf16.gmra.mxu3 %vm11673_vm3, %v3447_v43  ;;  %v11680_v43 = vld [vmem:[#allocation109_spill] sm:$0xff] }
 0x214   : > { %v2710_v13 = vadd.f32 %v2637_v28, %v11674_v19  ;;  %v3098_v46 = vpack.c.bf16 %v3078_v51, %v11680_v43  ;;  %v11681_v28 = vld [vmem:[#allocation106_spill] sm:$0xff] }
 0x216   : > { %v2964_v2 = vadd.f32 %v2891_v33, %v2710_v13  ;;  %v3525_v26 = vpop.f32.mrf.mxu3  ;;  %v3177_v50 = vpop.f32.mrf.mxu2 }
 0x217   : > { %v9153_v14 = vadd.f32 %v3525_v26, %v3249_v42 }
 0x218   : > { %v3250_v38 = vadd.f32 %v3177_v50, %v2964_v2  ;;  %v3448_v2 = vpack.c.bf16 %v8666_v16, %v3427_v6  ;;  %v11685_v50 = vld [vmem:[#allocation111_spill] sm:$0xff]  ;;  %v3080_v6 = vsel %vm8614_vm13, %v8673_v39, 0.0 }
 0x219   : > { %v2894_v13 = vpop.f32.mrf.mxu1 }
 0x21b   : > { %v2640_v58 = vpop.f32.mrf.mxu0  ;;  %6974 = vmatmul.msk.bf16.gmra.mxu1 %vm11682_vm4, %v7288_v17  ;;  %6991 = vmatmul.msk.bf16.gmra.mxu2 %vm11683_vm15, %v3098_v46  ;;  %vm11689_vm15 = vmmov %vm11682_vm4 }
 0x21c   : > { %v2711_v19 = vadd.f32 %v2640_v58, %v11681_v28 }
 0x21e   : > { %v2965_v42 = vadd.f32 %v2894_v13, %v2711_v19  ;;  %6893 = vmatmul.msk.bf16.gmra.mxu0 %vm11673_vm3, %v2558_v8  ;;  %v3527_v33 = vpop.f32.mrf.mxu3  ;;  %v3180_v26 = vpop.f32.mrf.mxu2  ;;  %v11686_v13 = vld [vmem:[#allocation105_spill] sm:$0xff] }
 0x21f   : > { %v9168_v18 = vadd.f32 %v3527_v33, %v3250_v38  ;;  %vm11687_vm3 = vnez %v11686_v13  ;;  %v7290_v13 = vld [vmem:[%s7858_s24 + $0x68] sm:$0xff] }
 0x220   : > { %v3251_v56 = vadd.f32 %v3180_v26, %v2965_v42  ;;  %v2539_v17 = vsel %vm11687_vm3, %v8650_v59, 0.0  ;;  %v3429_v59 = vsel %vm11687_vm3, %v8710_v4, 0.0 }
 0x221   : > { %v2896_v28 = vpop.f32.mrf.mxu1  ;;  %v2559_v42 = vpack.c.bf16 %v8666_v16, %v2539_v17 }
 0x223   : > { %v2642_v51 = vpop.f32.mrf.mxu0  ;;  %7008 = vmatmul.msk.bf16.gmra.mxu3 %vm11684_vm6, %v3448_v2  ;;  %vm11690_vm6 = vmmov %vm11682_vm4 }
 0x224   : > { %v2712_v58 = vadd.f32 %v2642_v51, %v11685_v50  ;;  %v3099_v51 = vpack.c.bf16 %v3080_v6, %v8685_v32  ;;  %v11692_v6 = vld [vmem:[#allocation115_spill] sm:$0xff] }
 0x226   : > { %v2966_v19 = vadd.f32 %v2896_v28, %v2712_v58  ;;  %v3530_v8 = vpop.f32.mrf.mxu3  ;;  %v3182_v33 = vpop.f32.mrf.mxu2 }
 0x227   : > { %v9176_v46 = vadd.f32 %v3530_v8, %v3251_v56 }
 0x228   : > { %v3252_v26 = vadd.f32 %v3182_v33, %v2966_v19  ;;  %v3449_v19 = vpack.c.bf16 %v8728_v37, %v3429_v59  ;;  %v3082_v59 = vsel %vm8675_vm10, %v8736_v1, 0.0 }
 0x229   : > { %v2899_v58 = vpop.f32.mrf.mxu1 }
 0x22b   : > { %v2645_v2 = vpop.f32.mrf.mxu0  ;;  %6975 = vmatmul.msk.bf16.gmra.mxu1 %vm11690_vm6, %v7289_v29  ;;  %6992 = vmatmul.msk.bf16.gmra.mxu2 %vm11682_vm4, %v3099_v51  ;;  %v2541_v29 = vsel %vm8652_vm0, %v8710_v4, 0.0  ;;  %v3431_v4 = vsel %vm8652_vm0, %v8782_v25, 0.0  ;;  %vm11698_vm6 = vmmov %vm11682_vm4 }
 0x22c   : > { %v2713_v50 = vadd.f32 %v2645_v2, %v8662_v7  ;;  %vm11708_vm0 = vmmov %vm11682_vm4 }
 0x22e   : > { %v2967_v56 = vadd.f32 %v2899_v58, %v2713_v50  ;;  %6894 = vmatmul.msk.bf16.gmra.mxu0 %vm11689_vm15, %v2559_v42  ;;  %v3532_v28 = vpop.f32.mrf.mxu3  ;;  %v3185_v8 = vpop.f32.mrf.mxu2  ;;  %vm11697_vm15 = vmmov %vm11682_vm4  ;;  %v11704_v58 = vld [vmem:[#allocation5_spill] sm:$0xff] }
 0x22f   : > { %v9191_v16 = vadd.f32 %v3532_v28, %v3252_v26  ;;  %v11705_v41 = vrot.slane %v11704_v58, 7 }
 0x230   : > { %v3253_v7 = vadd.f32 %v3185_v8, %v2967_v56  ;;  %v2560_v56 = vpack.c.bf16 %v8728_v37, %v2541_v29 }
 0x231   : > { %v2901_v2 = vpop.f32.mrf.mxu1 }
 0x233   : > { %v2647_v17 = vpop.f32.mrf.mxu0  ;;  %7009 = vmatmul.msk.bf16.gmra.mxu3 %vm11691_vm11, %v3449_v19  ;;  %vm11696_vm11 = vmmov %vm11682_vm4 }
 0x234   : > { %v2714_v33 = vadd.f32 %v2647_v17, %v11692_v6  ;;  %v3100_v17 = vpack.c.bf16 %v3082_v59, %v8752_v15  ;;  %v11695_v6 = vld [vmem:[#allocation117_spill] sm:$0xff] }
 0x236   : > { %v2968_v50 = vadd.f32 %v2901_v2, %v2714_v33  ;;  %v3535_v42 = vpop.f32.mrf.mxu3  ;;  %v3187_v28 = vpop.f32.mrf.mxu2 }
 0x237   : > { %v9199_v51 = vadd.f32 %v3535_v42, %v3253_v7 }
 0x238   : > { %v3254_v8 = vadd.f32 %v3187_v28, %v2968_v50  ;;  %v3450_v50 = vpack.c.bf16 %v8797_v61, %v3431_v4 }
 0x239   : > { %v2904_v2 = vpop.f32.mrf.mxu1 }
 0x23b   : > { %v2650_v19 = vpop.f32.mrf.mxu0  ;;  %6976 = vmatmul.msk.bf16.gmra.mxu1 %vm11697_vm15, %v7290_v13  ;;  %6993 = vmatmul.msk.bf16.gmra.mxu2 %vm11698_vm6, %v3100_v17  ;;  %v11699_v13 = vld [vmem:[#allocation116_spill] sm:$0xff]  ;;  %vm11702_vm15 = vcmp.lt.s32.totalorder %v7533_v5, 1 }
 0x23c   : > { %v2715_v33 = vadd.f32 %v2650_v19, %v11695_v6  ;;  %vm11706_vm6 = vmmov %vm11702_vm15 }
 0x23e   : > { %v2969_v7 = vadd.f32 %v2904_v2, %v2715_v33  ;;  %6895 = vmatmul.msk.bf16.gmra.mxu0 %vm11696_vm11, %v2560_v56  ;;  %v3537_v42 = vpop.f32.mrf.mxu3  ;;  %v3190_v29 = vpop.f32.mrf.mxu2  ;;  %v1400_v56 = vrot.slane %v8771_v10, 7  ;;  %vm11700_vm11 = vnez %v11699_v13 }
 0x23f   : > { %v9214_v37 = vadd.f32 %v3537_v42, %v3254_v8  ;;  %v2543_v8 = vsel %vm11700_vm11, %v8782_v25, 0.0  ;;  %v11703_v25 = vld [vmem:[#allocation120_spill] sm:$0xff] }
 0x240   : > { %v3255_v59 = vadd.f32 %v3190_v29, %v2969_v7  ;;  %v3084_v7 = vsel %vm8738_vm14, %v8806_v57, 0.0  ;;  %v1402_v20 = vsel %vm11706_vm6, %v1400_v56, %v11705_v41  ;;  %vm11709_vm6 = vmmov %vm11708_vm0 }
 0x241   : > { %v2906_v6 = vpop.f32.mrf.mxu1 }
 0x243   : > { %v2652_v28 = vpop.f32.mrf.mxu0  ;;  %7010 = vmatmul.msk.bf16.gmra.mxu3 %vm11682_vm4, %v3450_v50  ;;  %v2561_v50 = vpack.c.bf16 %v8797_v61, %v2543_v8 }
 0x244   : > { %v2716_v19 = vadd.f32 %v2652_v28, %v8766_v48  ;;  %v1403_v48 = vsel %vm11702_vm15, %v8778_v49, %v1400_v56  ;;  %vm11707_vm15 = vmmov %vm11682_vm4 }
 0x245   : > { %v3433_v61 = vsel %vm11700_vm11, %v1403_v48, 0.0  ;;  %v2545_v13 = vsel %vm8784_vm8, %v1403_v48, 0.0  ;;  %vm11742_vm8 = vcmask 523264  }
 0x246   : > { %v2970_v33 = vadd.f32 %v2906_v6, %v2716_v19  ;;  %v3540_v2 = vpop.f32.mrf.mxu3  ;;  %v3192_v42 = vpop.f32.mrf.mxu2  ;;  %v7291_v19 = vld [vmem:[%s7858_s24 + $0x70] sm:$0xff]  ;;  %v3101_v6 = vpack.c.bf16 %v3084_v7, %v8819_v63  ;;  %v7294_v7 = vld [vmem:[%s10956_s7 + $0x8] sm:$0xff]  ;;  %vm11744_vm11 = vmmov %vm11742_vm8 }
 0x247   : > { %v9223_v17 = vadd.f32 %v3540_v2, %v3255_v59  ;;  %4736 = vmatpush.bf16.msra.mxu3 %v7294_v7 }
 0x248   : > { %v9232_v29 = vadd.f32 %v3192_v42, %v2970_v33  ;;  %v3451_v33 = vpack.c.bf16 %v1402_v20, %v3433_v61  ;;  %v2068_v42 = vrot.slane %v11704_v58, 1 }
 0x249   : > { %v2909_v2 = vpop.f32.mrf.mxu1 }
 0x24b   : > { %v2655_v28 = vpop.f32.mrf.mxu0  ;;  %6977 = vmatmul.msk.bf16.gmra.mxu1 %vm11707_vm15, %v7291_v19  ;;  %6994 = vmatmul.msk.bf16.gmra.mxu2 %vm11708_vm0, %v3101_v6  ;;  %v11710_v19 = vld [vmem:[#allocation7_spill] sm:$0xff]  ;;  %vm11711_vm0 = vcmp.lt.s32.totalorder %v7533_v5, 7 }
 0x24c   : > { %v2717_v59 = vadd.f32 %v2655_v28, %v11703_v25  ;;  %v9257_v6 = vsel %vm11711_vm0, %v2068_v42, %v11710_v19 }
 0x24e   : > { %v2971_v8 = vadd.f32 %v2909_v2, %v2717_v59  ;;  %6896 = vmatmul.msk.bf16.gmra.mxu0 %vm11682_vm4, %v2561_v50  ;;  %v9244_v49 = vpop.f32.mrf.mxu3  ;;  %v3195_v41 = vpop.f32.mrf.mxu2  ;;  %vm11715_vm4 = vmmov %vm11711_vm0 }
 0x24f   : > { %vm11721_vm0 = vmmov %vm11709_vm6 }
 0x250   : > { %v3257_v56 = vadd.f32 %v3195_v41, %v2971_v8  ;;  %v11714_v8 = vrot.slane %v8771_v10, 1 }
 0x251   : > { %v2911_v25 = vpop.f32.mrf.mxu1 }
 0x253   : > { %v2657_v28 = vpop.f32.mrf.mxu0  ;;  %7011 = vmatmul.msk.bf16.gmra.mxu3 %vm11709_vm6, %v3451_v33  ;;  %v9267_v33 = vsel %vm11715_vm4, %v11714_v8, %v2068_v42  ;;  %vm11722_vm4 = vmmov %vm11721_vm0 }
 0x254   : > { %v2718_v50 = vadd.f32 %v2657_v28, %v8828_v11  ;;  %11716 = vst [vmem:[#allocation72_spill] sm:$0xff] %v9267_v33  ;;  %v11717_v11 = vld [vmem:[#allocation121_spill] sm:$0xff]  ;;  %v2562_v28 = vpack.c.bf16 %v1402_v20, %v2545_v13 }
 0x255   : > { %vm11718_vm15 = vnez %v11717_v11 }
 0x256   : > { %v2972_v59 = vadd.f32 %v2911_v25, %v2718_v50  ;;  %v3545_v2 = vpop.f32.mrf.mxu3  ;;  %v3086_v7 = vsel %vm11718_vm15, %v9257_v6, 0.0  ;;  %v3197_v41 = vpop.f32.mrf.mxu2  ;;  %v7292_v25 = vld [vmem:[%s7858_s24 + $0x78] sm:$0xff]  ;;  %s338_s24 = sand.u32 1, %s7407_s10  }
 0x257   : > { %v9261_v21 = vadd.f32 %v3545_v2, %v3257_v56  ;;  %v3102_v48 = vpack.c.bf16 %v3086_v7, %v9267_v33  ;;  %s6769_s27 = sshll.u32 %s338_s24, 8  ;;  %s6676_s13 = scalar_lea.sflag [#allocation3], %s338_s24 }
 0x258   : > { %v9272_v19 = vadd.f32 %v3197_v41, %v2972_v59  ;;  %v11723_v59 = vmov 0.0|0.0   ;;  %s10767_s29 = scalar_lea.vmem [#allocation2], %s6769_s27 }
 0x259   : > { %11713 = vst [vmem:[#allocation69_spill] sm:$0xff] %v9261_v21  ;;  %v2914_v2 = vpop.f32.mrf.mxu1  ;;  %s6688_s22 = sshll.u32 %s10767_s29, 4  ;;  %s6689_s22 = int_to_ptr.vmem [resolvable:$true] %s6688_s22 }
 0x25a   : > { %11719 = vst [vmem:[#allocation28_spill] sm:$0xff] %v9272_v19 }
 0x25b   : > { %v2660_v50 = vpop.f32.mrf.mxu0  ;;  %6978 = vmatmul.msk.bf16.gmra.mxu1 %vm11721_vm0, %v7292_v25  ;;  %6995 = vmatmul.msk.bf16.gmra.mxu2 %vm11722_vm4, %v3102_v48  ;;  %vm11730_vm4 = vmmov %vm11721_vm0 }
 0x25c   : > { %v2719_v56 = vadd.f32 %v2660_v50, %v8835_v55  ;;  %v11724_v50 = vld [vmem:[#allocation9_spill] sm:$0xff] }
 0x25d   : > { %vm11725_vm15 = vnez %v11724_v50  ;;  %v1240_v50 = vld [vmem:[%s10951_s2 + $0xb0] sm:$0xff] }
 0x25e   : > { %v2973_v61 = vadd.f32 %v2914_v2, %v2719_v56  ;;  %6897 = vmatmul.msk.bf16.gmra.mxu0 %vm11709_vm6, %v2562_v28  ;;  %v9278_v42 = vpop.f32.mrf.mxu3  ;;  %v3200_v8 = vpop.f32.mrf.mxu2  ;;  %v4010_v28 = vsel %vm11725_vm15, %v8007_v35, 0.0  ;;  %vm11177_vm6 = vcmask 523264  }
 0x25f   : > { %11720 = vst [vmem:[#allocation63_spill] sm:$0xff] %v9278_v42  ;;  %v4041_v25 = vpack.c.bf16 %v4010_v28, %v8012_v54  ;;  %v1219_v28 = vld [vmem:[%s10951_s2 + $0x8] sm:$0xff] }
 0x260   : > { %v3259_v20 = vadd.f32 %v3200_v8, %v2973_v61 }
 0x261   : > { %v2916_v7 = vpop.f32.mrf.mxu1 }
 0x263   : > { %v2662_v13 = vpop.f32.mrf.mxu0  ;;  %3589 = vmatmul.bf16.gmra.mxu3 %v11723_v59 }
 0x264   : > { %v2720_v41 = vadd.f32 %v2662_v13, %v8850_v45  ;;  %v1218_v45 = vld [vmem:[%s10951_s2] sm:$0xff] }
 0x266   : > { %v2974_v11 = vadd.f32 %v2916_v7, %v2720_v41  ;;  %v3550_v55 = vpop.f32.mrf.mxu3  ;;  %v3202_v2 = vpop.f32.mrf.mxu2  ;;  %v11728_v41 = vld [vmem:[#allocation6_spill] sm:$0xff] }
 0x267   : > { %v9287_v56 = vadd.f32 %v3550_v55, %v3259_v20 }
 0x268   : > { %v9290_v48 = vadd.f32 %v3202_v2, %v2974_v11 }
 0x269   : > { %11726 = vst [vmem:[#allocation55_spill] sm:$0xff] %v9287_v56  ;;  %v2919_v42 = vpop.f32.mrf.mxu1 }
 0x26a   : > { %11727 = vst [vmem:[#allocation68_spill] sm:$0xff] %v9290_v48 }
 0x26b   : > { %v2665_v61 = vpop.f32.mrf.mxu0  ;;  %7029 = vmatmul.msk.bf16.vlgmr.msra.gmra.mxu1 %vm11730_vm4, %v4041_v25  ;;  %7044 = vmatmul.msk.f32.vlgmr.msra.gmra.mxu2 %vm11177_vm6, %v1218_v45  ;;  %v11733_v25 = vld [vmem:[#allocation18_spill] sm:$0xff] }
 0x26c   : > { %v2721_v8 = vadd.f32 %v2665_v61, %v8859_v22  ;;  %v11731_v22 = vld [vmem:[#allocation122_spill] sm:$0xff] }
 0x26e   : > { %v2975_v13 = vadd.f32 %v2919_v42, %v2721_v8  ;;  %7013 = vmatmul.msk.bf16.vlgmr.msrb.gmra.mxu0 %vm11721_vm0, %v11728_v41  ;;  %v9298_v35 = vpop.f32.mrf.mxu3  ;;  %v3205_v54 = vpop.f32.mrf.mxu2  ;;  %v11734_v8 = vld [vmem:[#allocation11_spill] sm:$0xff] }
 0x26f   : > { %11729 = vst [vmem:[#allocation50_spill] sm:$0xff] %v9298_v35  ;;  %vm11735_vm0 = vnez %v11734_v8  ;;  %v11738_v35 = vld [vmem:[#allocation123_spill] sm:$0xff] }
 0x270   : > { %v3261_v11 = vadd.f32 %v3205_v54, %v2975_v13  ;;  %v4012_v45 = vsel %vm11735_vm0, %v11733_v25, 0.0 }
 0x271   : > { %v2921_v55 = vpop.f32.mrf.mxu1 }
 0x273   : > { %v2667_v20 = vpop.f32.mrf.mxu0  ;;  %4737 = vmatmul.bf16.vlgmr.msra.gmra.mxu3 %v11723_v59  ;;  %7045 = vmatmul.msk.f32.gmra.mxu2 %vm11177_vm6, %v1219_v28  ;;  %vm11741_vm6 = vmmov %vm11730_vm4 }
 0x274   : > { %v2722_v7 = vadd.f32 %v2667_v20, %v11731_v22  ;;  %v11737_v20 = vld [vmem:[#allocation19_spill] sm:$0xff] }
 0x275   : > { %v4042_v22 = vpack.c.bf16 %v4012_v45, %v11737_v20  ;;  %v11743_v45 = vld [vmem:[#allocation124_spill] sm:$0xff] }
 0x276   : > { %v2976_v42 = vadd.f32 %v2921_v55, %v2722_v7  ;;  %v3555_v2 = vpop.f32.mrf.mxu3  ;;  %v3207_v13 = vpop.f32.mrf.mxu2  ;;  %v1220_v7 = vld [vmem:[%s10951_s2 + $0x10] sm:$0xff] }
 0x277   : > { %v9308_v61 = vadd.f32 %v3555_v2, %v3261_v11  ;;  %v11739_v11 = vld [vmem:[#allocation12_spill] sm:$0xff] }
 0x278   : > { %v9313_v41 = vadd.f32 %v3207_v13, %v2976_v42 }
 0x279   : > { %11732 = vst [vmem:[#allocation67_spill] sm:$0xff] %v9308_v61  ;;  %v2924_v56 = vpop.f32.mrf.mxu1 }
 0x27a   : > { %11736 = vst [vmem:[#allocation44_spill] sm:$0xff] %v9313_v41  ;;  %v11750_v41 = vld [vmem:[#allocation23_spill] sm:$0xff] }
 0x27b   : > { %v2670_v54 = vpop.f32.mrf.mxu0  ;;  %7030 = vmatmul.msk.bf16.gmra.mxu1 %vm11741_vm6, %v4042_v22  ;;  %7046 = vmatmul.msk.f32.gmra.mxu2 %vm11742_vm8, %v1220_v7  ;;  %vm11752_vm8 = vmmov %vm11730_vm4  ;;  %vm11755_vm6 = vcmask 523264  }
 0x27c   : > { %v2723_v48 = vadd.f32 %v2670_v54, %v11738_v35  ;;  %v1221_v54 = vld [vmem:[%s10951_s2 + $0x18] sm:$0xff] }
 0x27e   : > { %v2977_v55 = vadd.f32 %v2924_v56, %v2723_v48  ;;  %7014 = vmatmul.msk.bf16.gmra.mxu0 %vm11730_vm4, %v11739_v11  ;;  %v9322_v28 = vpop.f32.mrf.mxu3  ;;  %v3210_v42 = vpop.f32.mrf.mxu2  ;;  %v11746_v11 = vld [vmem:[#allocation24_spill] sm:$0xff] }
 0x27f   : > { %11740 = vst [vmem:[#allocation79_spill] sm:$0xff] %v9322_v28  ;;  %v4014_v7 = vsel %vm8001_vm1, %v11746_v11, 0.0  ;;  %v11756_v11 = vld [vmem:[#allocation22_spill] sm:$0xff] }
 0x280   : > { %v3263_v2 = vadd.f32 %v3210_v42, %v2977_v55 }
 0x281   : > { %v2926_v13 = vpop.f32.mrf.mxu1 }
 0x283   : > { %v2672_v25 = vpop.f32.mrf.mxu0  ;;  %7047 = vmatmul.msk.f32.gmra.mxu2 %vm11744_vm11, %v1221_v54  ;;  %vm11754_vm11 = vmmov %vm11730_vm4 }
 0x284   : > { %v2724_v35 = vadd.f32 %v2672_v25, %v11743_v45  ;;  %v11749_v25 = vld [vmem:[#allocation27_spill] sm:$0xff]  ;;  %vm11757_vm4 = vmmov %vm11755_vm6 }
 0x285   : > { %v4043_v45 = vpack.c.bf16 %v4014_v7, %v11749_v25  ;;  %vm11780_vm3 = vmmov %vm11757_vm4 }
 0x286   : > { %v2978_v56 = vadd.f32 %v2926_v13, %v2724_v35  ;;  %v3560_v48 = vpop.f32.mrf.mxu3  ;;  %v3212_v28 = vpop.f32.mrf.mxu2  ;;  %v1222_v35 = vld [vmem:[%s10951_s2 + $0x20] sm:$0xff] }
 0x287   : > { %v9331_v20 = vadd.f32 %v3560_v48, %v3263_v2  ;;  %v11751_v2 = vld [vmem:[#allocation15_spill] sm:$0xff] }
 0x288   : > { %v9336_v55 = vadd.f32 %v3212_v28, %v2978_v56 }
 0x289   : > { %11745 = vst [vmem:[#allocation60_spill] sm:$0xff] %v9331_v20  ;;  %v2929_v59 = vpop.f32.mrf.mxu1 }
 0x28a   : > { %11748 = vst [vmem:[#allocation73_spill] sm:$0xff] %v9336_v55  ;;  %v11763_v55 = vld [vmem:[#allocation32_spill] sm:$0xff] }
 0x28b   : > { %v2675_v42 = vpop.f32.mrf.mxu0  ;;  %7031 = vmatmul.msk.bf16.gmra.mxu1 %vm11754_vm11, %v4043_v45  ;;  %7048 = vmatmul.msk.f32.gmra.mxu2 %vm11755_vm6, %v1222_v35  ;;  %vm11766_vm11 = vmmov %vm11752_vm8  ;;  %v11890_v45 = vld [vmem:[#allocation69_spill] sm:$0xff] }
 0x28c   : > { %v2725_v61 = vadd.f32 %v2675_v42, %v11750_v41  ;;  %v1223_v42 = vld [vmem:[%s10951_s2 + $0x28] sm:$0xff]  ;;  %vm11767_vm6 = vmmov %vm11757_vm4 }
 0x28e   : > { %v2979_v13 = vadd.f32 %v2929_v59, %v2725_v61  ;;  %7015 = vmatmul.msk.bf16.gmra.mxu0 %vm11752_vm8, %v11751_v2  ;;  %v9345_v54 = vpop.f32.mrf.mxu3  ;;  %v3215_v28 = vpop.f32.mrf.mxu2  ;;  %v11759_v2 = vld [vmem:[#allocation37_spill] sm:$0xff] }
 0x28f   : > { %11753 = vst [vmem:[#allocation39_spill] sm:$0xff] %v9345_v54  ;;  %v4016_v35 = vsel %vm8051_vm2, %v11759_v2, 0.0  ;;  %v11768_v2 = vld [vmem:[#allocation35_spill] sm:$0xff] }
 0x290   : > { %v3265_v56 = vadd.f32 %v3215_v28, %v2979_v13 }
 0x291   : > { %v2931_v7 = vpop.f32.mrf.mxu1 }
 0x293   : > { %v2677_v48 = vpop.f32.mrf.mxu0  ;;  %7049 = vmatmul.msk.f32.gmra.mxu2 %vm11757_vm4, %v1223_v42 }
 0x294   : > { %v2726_v41 = vadd.f32 %v2677_v48, %v11756_v11  ;;  %v11762_v48 = vld [vmem:[#allocation40_spill] sm:$0xff] }
 0x295   : > { %v4044_v11 = vpack.c.bf16 %v4016_v35, %v11762_v48 }
 0x296   : > { %v2980_v59 = vadd.f32 %v2931_v7, %v2726_v41  ;;  %v3565_v61 = vpop.f32.mrf.mxu3  ;;  %v3217_v54 = vpop.f32.mrf.mxu2  ;;  %v1224_v41 = vld [vmem:[%s10951_s2 + $0x30] sm:$0xff] }
 0x297   : > { %v9354_v25 = vadd.f32 %v3565_v61, %v3265_v56  ;;  %v11764_v56 = vld [vmem:[#allocation20_spill] sm:$0xff] }
 0x298   : > { %v9359_v13 = vadd.f32 %v3217_v54, %v2980_v59 }
 0x299   : > { %11758 = vst [vmem:[#allocation54_spill] sm:$0xff] %v9354_v25  ;;  %v2934_v19 = vpop.f32.mrf.mxu1 }
 0x29a   : > { %11761 = vst [vmem:[#allocation71_spill] sm:$0xff] %v9359_v13  ;;  %v11775_v13 = vld [vmem:[#allocation26_spill] sm:$0xff] }
 0x29b   : > { %v2680_v28 = vpop.f32.mrf.mxu0  ;;  %7032 = vmatmul.msk.bf16.gmra.mxu1 %vm11766_vm11, %v4044_v11  ;;  %7050 = vmatmul.msk.f32.gmra.mxu2 %vm11767_vm6, %v1224_v41  ;;  %v11771_v11 = vld [vmem:[#allocation25_spill] sm:$0xff]  ;;  %vm11778_vm6 = vmmov %vm11766_vm11 }
 0x29c   : > { %v2727_v20 = vadd.f32 %v2680_v28, %v11763_v55  ;;  %v1225_v28 = vld [vmem:[%s10951_s2 + $0x38] sm:$0xff] }
 0x29e   : > { %v2981_v7 = vadd.f32 %v2934_v19, %v2727_v20  ;;  %7016 = vmatmul.msk.bf16.gmra.mxu0 %vm11752_vm8, %v11764_v56  ;;  %v9368_v42 = vpop.f32.mrf.mxu3  ;;  %v3220_v54 = vpop.f32.mrf.mxu2  ;;  %v11770_v56 = vld [vmem:[#allocation48_spill] sm:$0xff]  ;;  %vm11772_vm8 = vnez %v11771_v11 }
 0x29f   : > { %11765 = vst [vmem:[#allocation82_spill] sm:$0xff] %v9368_v42  ;;  %v4018_v41 = vsel %vm11772_vm8, %v11770_v56, 0.0  ;;  %v11779_v56 = vld [vmem:[#allocation30_spill] sm:$0xff] }
 0x2a0   : > { %v3267_v59 = vadd.f32 %v3220_v54, %v2981_v7 }
 0x2a1   : > { %v2936_v35 = vpop.f32.mrf.mxu1 }
 0x2a3   : > { %v2682_v61 = vpop.f32.mrf.mxu0  ;;  %7051 = vmatmul.msk.f32.gmra.mxu2 %vm11757_vm4, %v1225_v28 }
 0x2a4   : > { %v2728_v55 = vadd.f32 %v2682_v61, %v11768_v2  ;;  %v11774_v61 = vld [vmem:[#allocation51_spill] sm:$0xff] }
 0x2a5   : > { %v4045_v2 = vpack.c.bf16 %v4018_v41, %v11774_v61 }
 0x2a6   : > { %v2982_v19 = vadd.f32 %v2936_v35, %v2728_v55  ;;  %v3570_v20 = vpop.f32.mrf.mxu3  ;;  %v3222_v42 = vpop.f32.mrf.mxu2  ;;  %v1226_v55 = vld [vmem:[%s10951_s2 + $0x40] sm:$0xff] }
 0x2a7   : > { %v9377_v48 = vadd.f32 %v3570_v20, %v3267_v59  ;;  %v11776_v59 = vld [vmem:[#allocation29_spill] sm:$0xff] }
 0x2a8   : > { %v9382_v7 = vadd.f32 %v3222_v42, %v2982_v19 }
 0x2a9   : > { %11769 = vst [vmem:[#allocation31_spill] sm:$0xff] %v9377_v48  ;;  %v2939_v21 = vpop.f32.mrf.mxu1 }
 0x2aa   : > { %11773 = vst [vmem:[#allocation47_spill] sm:$0xff] %v9382_v7  ;;  %v11786_v7 = vld [vmem:[#allocation34_spill] sm:$0xff] }
 0x2ab   : > { %v2685_v54 = vpop.f32.mrf.mxu0  ;;  %7033 = vmatmul.msk.bf16.gmra.mxu1 %vm11778_vm6, %v4045_v2  ;;  %7052 = vmatmul.msk.f32.gmra.mxu2 %vm11757_vm4, %v1226_v55 }
 0x2ac   : > { %v2729_v25 = vadd.f32 %v2685_v54, %v11775_v13  ;;  %v1227_v54 = vld [vmem:[%s10951_s2 + $0x48] sm:$0xff] }
 0x2ae   : > { %v2983_v35 = vadd.f32 %v2939_v21, %v2729_v25  ;;  %7017 = vmatmul.msk.bf16.gmra.mxu0 %vm11766_vm11, %v11776_v59  ;;  %v9391_v28 = vpop.f32.mrf.mxu3  ;;  %v3225_v42 = vpop.f32.mrf.mxu2  ;;  %v11782_v59 = vld [vmem:[#allocation61_spill] sm:$0xff] }
 0x2af   : > { %11777 = vst [vmem:[#allocation65_spill] sm:$0xff] %v9391_v28  ;;  %v4020_v55 = vsel %vm8179_vm5, %v11782_v59, 0.0  ;;  %v11792_v59 = vld [vmem:[#allocation56_spill] sm:$0xff] }
 0x2b0   : > { %v3269_v19 = vadd.f32 %v3225_v42, %v2983_v35 }
 0x2b1   : > { %v2941_v41 = vpop.f32.mrf.mxu1 }
 0x2b3   : > { %v2687_v20 = vpop.f32.mrf.mxu0  ;;  %7053 = vmatmul.msk.f32.gmra.mxu2 %vm11780_vm3, %v1227_v54  ;;  %vm11788_vm3 = vmmov %vm11778_vm6 }
 0x2b4   : > { %v2730_v13 = vadd.f32 %v2687_v20, %v11779_v56  ;;  %v11785_v20 = vld [vmem:[#allocation64_spill] sm:$0xff]  ;;  %vm11790_vm11 = vmmov %vm11788_vm3 }
 0x2b5   : > { %v4046_v56 = vpack.c.bf16 %v4020_v55, %v11785_v20  ;;  %vm11791_vm6 = vmmov %vm11757_vm4 }
 0x2b6   : > { %v2984_v21 = vadd.f32 %v2941_v41, %v2730_v13  ;;  %v3575_v25 = vpop.f32.mrf.mxu3  ;;  %v3227_v28 = vpop.f32.mrf.mxu2  ;;  %v1228_v13 = vld [vmem:[%s10951_s2 + $0x50] sm:$0xff] }
 0x2b7   : > { %v9400_v61 = vadd.f32 %v3575_v25, %v3269_v19  ;;  %v11787_v19 = vld [vmem:[#allocation42_spill] sm:$0xff] }
 0x2b8   : > { %v9405_v35 = vadd.f32 %v3227_v28, %v2984_v21 }
 0x2b9   : > { %11781 = vst [vmem:[#allocation77_spill] sm:$0xff] %v9400_v61  ;;  %v2944_v33 = vpop.f32.mrf.mxu1 }
 0x2ba   : > { %11784 = vst [vmem:[#allocation43_spill] sm:$0xff] %v9405_v35  ;;  %v11796_v35 = vld [vmem:[#allocation59_spill] sm:$0xff] }
 0x2bb   : > { %v2690_v42 = vpop.f32.mrf.mxu0  ;;  %7034 = vmatmul.msk.bf16.gmra.mxu1 %vm11790_vm11, %v4046_v56  ;;  %7054 = vmatmul.msk.f32.gmra.mxu2 %vm11791_vm6, %v1228_v13  ;;  %v11794_v56 = vld [vmem:[#allocation49_spill] sm:$0xff]  ;;  %vm11798_vm11 = vmmov %vm11788_vm3 }
 0x2bc   : > { %v2731_v48 = vadd.f32 %v2690_v42, %v11786_v7  ;;  %v1229_v42 = vld [vmem:[%s10951_s2 + $0x58] sm:$0xff]  ;;  %vm11799_vm6 = vmmov %vm11757_vm4 }
 0x2be   : > { %v2985_v41 = vadd.f32 %v2944_v33, %v2731_v48  ;;  %7018 = vmatmul.msk.bf16.gmra.mxu0 %vm11788_vm3, %v11787_v19  ;;  %v9414_v54 = vpop.f32.mrf.mxu3  ;;  %v3230_v28 = vpop.f32.mrf.mxu2  ;;  %v11793_v19 = vld [vmem:[#allocation74_spill] sm:$0xff] }
 0x2bf   : > { %11789 = vst [vmem:[#allocation58_spill] sm:$0xff] %v9414_v54  ;;  %v4022_v13 = vsel %vm8248_vm12, %v11793_v19, 0.0  ;;  %vm11831_vm12 = vcmp.lt.s32.totalorder %v7533_v5, 7 }
 0x2c0   : > { %v3271_v21 = vadd.f32 %v3230_v28, %v2985_v41 }
 0x2c1   : > { %v2946_v55 = vpop.f32.mrf.mxu1 }
 0x2c3   : > { %v2692_v25 = vpop.f32.mrf.mxu0  ;;  %7055 = vmatmul.msk.f32.gmra.mxu2 %vm11757_vm4, %v1229_v42 }
 0x2c4   : > { %v2732_v7 = vadd.f32 %v2692_v25, %v11792_v59  ;;  %v11795_v25 = vld [vmem:[#allocation76_spill] sm:$0xff] }
 0x2c5   : > { %v4047_v59 = vpack.c.bf16 %v4022_v13, %v11795_v25  ;;  %v1231_v13 = vld [vmem:[%s10951_s2 + $0x68] sm:$0xff] }
 0x2c6   : > { %v2986_v33 = vadd.f32 %v2946_v55, %v2732_v7  ;;  %v3580_v48 = vpop.f32.mrf.mxu3  ;;  %v3232_v54 = vpop.f32.mrf.mxu2  ;;  %v1230_v7 = vld [vmem:[%s10951_s2 + $0x60] sm:$0xff]  ;;  %v11800_v25 = vld [vmem:[#allocation62_spill] sm:$0xff] }
 0x2c7   : > { %v9423_v20 = vadd.f32 %v3580_v48, %v3271_v21  ;;  %v11797_v21 = vld [vmem:[#allocation53_spill] sm:$0xff] }
 0x2c8   : > { %v9428_v41 = vadd.f32 %v3232_v54, %v2986_v33 }
 0x2c9   : > { %v2949_v2 = vpop.f32.mrf.mxu1 }
 0x2cb   : > { %v2695_v28 = vpop.f32.mrf.mxu0  ;;  %7035 = vmatmul.msk.bf16.gmra.mxu1 %vm11798_vm11, %v4047_v59  ;;  %7056 = vmatmul.msk.f32.gmra.mxu2 %vm11799_vm6, %v1230_v7  ;;  %v4024_v59 = vsel %vm11614_vm7, %v11641_v3, 0.0  ;;  %vm11802_vm11 = vmmov %vm11788_vm3  ;;  %vm11815_vm7 = vcmp.lt.s32.totalorder %v7533_v5, 1 }
 0x2cc   : > { %v2733_v61 = vadd.f32 %v2695_v28, %v11796_v35  ;;  %vm11803_vm6 = vmmov %vm11757_vm4 }
 0x2ce   : > { %v2987_v55 = vadd.f32 %v2949_v2, %v2733_v61  ;;  %7019 = vmatmul.msk.bf16.gmra.mxu0 %vm11788_vm3, %v11797_v21  ;;  %v9437_v42 = vpop.f32.mrf.mxu3  ;;  %v3235_v54 = vpop.f32.mrf.mxu2 }
 0x2d0   : > { %v3273_v33 = vadd.f32 %v3235_v54, %v2987_v55 }
 0x2d1   : > { %v2951_v19 = vpop.f32.mrf.mxu1 }
 0x2d3   : > { %v2697_v48 = vpop.f32.mrf.mxu0  ;;  %7057 = vmatmul.msk.f32.gmra.mxu2 %vm11757_vm4, %v1231_v13 }
 0x2d4   : > { %v2734_v35 = vadd.f32 %v2697_v48, %v9058_v30  ;;  %v4048_v30 = vpack.c.bf16 %v4024_v59, %v11645_v12  ;;  %v1233_v59 = vld [vmem:[%s10951_s2 + $0x78] sm:$0xff] }
 0x2d6   : > { %v2988_v61 = vadd.f32 %v2951_v19, %v2734_v35  ;;  %v3585_v2 = vpop.f32.mrf.mxu3  ;;  %v3237_v7 = vpop.f32.mrf.mxu2  ;;  %v1232_v35 = vld [vmem:[%s10951_s2 + $0x70] sm:$0xff] }
 0x2d7   : > { %v9446_v28 = vadd.f32 %v3585_v2, %v3273_v33  ;;  %v11801_v33 = vld [vmem:[#allocation66_spill] sm:$0xff] }
 0x2d8   : > { %v9451_v55 = vadd.f32 %v3237_v7, %v2988_v61 }
 0x2d9   : > { %v2954_v48 = vpop.f32.mrf.mxu1 }
 0x2db   : > { %v2700_v21 = vpop.f32.mrf.mxu0  ;;  %7036 = vmatmul.msk.bf16.gmra.mxu1 %vm11802_vm11, %v4048_v30  ;;  %7058 = vmatmul.msk.f32.gmra.mxu2 %vm11803_vm6, %v1232_v35  ;;  %vm11807_vm6 = vmmov %vm11802_vm11 }
 0x2dc   : > { %v2735_v54 = vadd.f32 %v2700_v21, %v9080_v23 }
 0x2de   : > { %v2989_v19 = vadd.f32 %v2954_v48, %v2735_v54  ;;  %7020 = vmatmul.msk.bf16.gmra.mxu0 %vm11788_vm3, %v11801_v33  ;;  %v9460_v13 = vpop.f32.mrf.mxu3  ;;  %v3240_v3 = vpop.f32.mrf.mxu2  ;;  %vm11804_vm3 = vnez %v11642_v53 }
 0x2df   : > { %v4026_v30 = vsel %vm11804_vm3, %v11655_v60, 0.0  ;;  %v11806_v60 = vld [vmem:[#allocation78_spill] sm:$0xff]  ;;  %vm11808_vm3 = vmmov %vm11757_vm4 }
 0x2e0   : > { %v3275_v61 = vadd.f32 %v3240_v3, %v2989_v19 }
 0x2e1   : > { %v2956_v2 = vpop.f32.mrf.mxu1 }
 0x2e3   : > { %v2702_v12 = vpop.f32.mrf.mxu0  ;;  %7059 = vmatmul.msk.f32.gmra.mxu2 %vm11757_vm4, %v1233_v59 }
 0x2e4   : > { %v2736_v23 = vadd.f32 %v2702_v12, %v9098_v36  ;;  %v4049_v36 = vpack.c.bf16 %v4026_v30, %v11658_v52  ;;  %v1234_v12 = vld [vmem:[%s10951_s2 + $0x80] sm:$0xff] }
 0x2e6   : > { %v2990_v7 = vadd.f32 %v2956_v2, %v2736_v23  ;;  %v3590_v21 = vpop.f32.mrf.mxu3  ;;  %v3242_v48 = vpop.f32.mrf.mxu2 }
 0x2e7   : > { %v9469_v54 = vadd.f32 %v3590_v21, %v3275_v61  ;;  %v9484_v61 = vld [vmem:[%s10955_s6] ss:$0 sm:$0xff]  ;;  %v1235_v21 = vld [vmem:[%s10951_s2 + $0x88] sm:$0xff] }
 0x2e8   : > { %v9474_v35 = vadd.f32 %v3242_v48, %v2990_v7 }
 0x2e9   : > { %v4119_v3 = vpop.f32.mrf.mxu1 }
 0x2ea   : > { %11805 = vst [vmem:[#allocation36_spill] sm:$0xff] %v9474_v35 }
 0x2eb   : > { %v3801_v19 = vpop.f32.mrf.mxu0  ;;  %7037 = vmatmul.msk.bf16.gmra.mxu1 %vm11807_vm6, %v4049_v36  ;;  %7060 = vmatmul.msk.f32.gmra.mxu2 %vm11757_vm4, %v1234_v12  ;;  %vm11813_vm4 = vmmov %vm11807_vm6 }
 0x2ec   : > { %v3881_v33 = vadd.f32 %v3801_v19, %v9107_v9 }
 0x2ee   : > { %v4199_v23 = vadd.f32 %v4119_v3, %v3881_v33  ;;  %7021 = vmatmul.msk.bf16.gmra.mxu0 %vm11802_vm11, %v11806_v60  ;;  %v4413_v52 = vpop.f32.mrf.mxu2  ;;  %vm11809_vm11 = vnez %v11656_v27 }
 0x2ef   : > { %v4028_v36 = vsel %vm11809_vm11, %v11668_v24, 0.0  ;;  %vm11814_vm11 = vcmask 523264  }
 0x2f0   : > { %v4235_v9 = vadd.f32 %v9484_v61, %v4199_v23  ;;  %v4050_v23 = vpack.c.bf16 %v4028_v36, %v8568_v47 }
 0x2f1   : > { %v4121_v7 = vpop.f32.mrf.mxu1 }
 0x2f2   : > { %v4267_v30 = vmax.f32 %v4235_v9, 0.0 }
 0x2f3   : > { %v3803_v2 = vpop.f32.mrf.mxu0  ;;  %7061 = vmatmul.msk.f32.gmra.mxu2 %vm11808_vm3, %v1235_v21  ;;  %vm11191_vm3 = vcmask 130048  }
 0x2f4   : > { %v3882_v59 = vadd.f32 %v3803_v2, %v9122_v44  ;;  %v9500_v33 = vadd.f32 %v4413_v52, %v4267_v30  ;;  %v11812_v30 = vld [vmem:[#allocation86_spill] sm:$0xff] }
 0x2f6   : > { %v4200_v48 = vadd.f32 %v4121_v7, %v3882_v59  ;;  %11810 = vst [vmem:[#allocation52_spill] sm:$0xff] %v9500_v33  ;;  %v4416_v12 = vpop.f32.mrf.mxu2  ;;  %v1236_v59 = vld [vmem:[%s10951_s2 + $0x90] sm:$0xff]  ;;  %v11185_v7 = vrot.slane %v9500_v33, 7 }
 0x2f8   : > { %v4236_v19 = vadd.f32 %v9484_v61, %v4200_v48 }
 0x2f9   : > { %v4124_v2 = vpop.f32.mrf.mxu1 }
 0x2fa   : > { %v4268_v3 = vmax.f32 %v4236_v19, 0.0 }
 0x2fb   : > { %v3806_v44 = vpop.f32.mrf.mxu0  ;;  %7038 = vmatmul.msk.bf16.gmra.mxu1 %vm11813_vm4, %v4050_v23  ;;  %7062 = vmatmul.msk.f32.gmra.mxu2 %vm11814_vm11, %v1236_v59  ;;  %v1237_v23 = vld [vmem:[%s10951_s2 + $0x98] sm:$0xff] }
 0x2fc   : > { %v3883_v60 = vadd.f32 %v3806_v44, %v9130_v62  ;;  %v4417_v9 = vadd.f32 %v4416_v12, %v4268_v3 }
 0x2fe   : > { %v4201_v21 = vadd.f32 %v4124_v2, %v3883_v60  ;;  %v4510_v24 = vrot.slane %v4417_v9, 7  ;;  %v9509_v52 = vpack.c.bf16 %v4417_v9, %v9500_v33  ;;  %7022 = vmatmul.msk.bf16.gmra.mxu0 %vm11807_vm6, %v11812_v30  ;;  %v4419_v19 = vpop.f32.mrf.mxu2  ;;  %v4962_v60 = vrot.slane %v4417_v9, 1 }
 0x2ff   : > { %v11190_v30 = vrot.slane %v9500_v33, 1  ;;  %vm11818_vm6 = vcmp.lt.s32.totalorder %v7533_v5, 1 }
 0x300   : > { %11811 = vst [vmem:[#allocation46_spill] sm:$0xff] %v9509_v52  ;;  %v4237_v47 = vadd.f32 %v9484_v61, %v4201_v21  ;;  %7082 = vmatmul.msk.bf16.gmra.mxu3 %vm11191_vm3, %v9509_v52  ;;  %v9522_v62 = vsel %vm11815_vm7, %v11185_v7, %v4510_v24  ;;  %vm11817_vm7 = vcmp.lt.s32.totalorder %v7533_v5, 7 }
 0x301   : > { %11816 = vst [vmem:[#allocation83_spill] sm:$0xff] %v9522_v62  ;;  %v4126_v12 = vpop.f32.mrf.mxu1  ;;  %vm11819_vm4 = vmmov %vm11817_vm7 }
 0x302   : > { %v4269_v48 = vmax.f32 %v4237_v47, 0.0  ;;  %v5023_v9 = vsel %vm11819_vm4, %v11190_v30, %v4962_v60 }
 0x303   : > { %v3808_v36 = vpop.f32.mrf.mxu0  ;;  %7063 = vmatmul.msk.f32.gmra.mxu2 %vm11814_vm11, %v1237_v23  ;;  %vm11823_vm11 = vcmask 31744  }
 0x304   : > { %v3884_v3 = vadd.f32 %v3808_v36, %v9145_v0  ;;  %v4420_v44 = vadd.f32 %v4419_v19, %v4269_v48  ;;  %v4030_v0 = vsel %vm8499_vm9, %v11677_v34, 0.0  ;;  %vm11830_vm9 = vcmask 130048  }
 0x306   : > { %v4202_v2 = vadd.f32 %v4126_v12, %v3884_v3  ;;  %v4511_v59 = vrot.slane %v4420_v44, 7  ;;  %v4963_v21 = vrot.slane %v4420_v44, 1  ;;  %v4422_v23 = vpop.f32.mrf.mxu2 }
 0x308   : > { %v4238_v47 = vadd.f32 %v9484_v61, %v4202_v2  ;;  %v5022_v48 = vsel %vm11817_vm7, %v4962_v60, %v4963_v21  ;;  %v4570_v19 = vsel %vm11818_vm6, %v4510_v24, %v4511_v59  ;;  %v4051_v24 = vpack.c.bf16 %v4030_v0, %v11680_v43  ;;  %v1238_v60 = vld [vmem:[%s10951_s2 + $0xa0] sm:$0xff]  ;;  %vm11824_vm7 = vmmov %vm11823_vm11 }
 0x309   : > { %v5028_v36 = vsel %vm11735_vm0, %v5022_v48, 0.0  ;;  %v5672_v3 = vsel %vm11725_vm15, %v5022_v48, 0.0  ;;  %v4129_v33 = vpop.f32.mrf.mxu1  ;;  %vm11825_vm6 = vcmask 523264   ;;  %v11826_v43 = vld [vmem:[#allocation13_spill] sm:$0xff] }
 0x30a   : > { %v4270_v12 = vmax.f32 %v4238_v47, 0.0  ;;  %v9546_v34 = vpack.c.bf16 %v5028_v36, %v5023_v9  ;;  %v9548_v2 = vpack.c.bf16 %v5672_v3, %v5023_v9  ;;  %v11822_v36 = vld [vmem:[#allocation95_spill] sm:$0xff]  ;;  %vm11827_vm4 = vnez %v11826_v43 }
 0x30b   : > { %v3811_v7 = vpop.f32.mrf.mxu0  ;;  %7039 = vmatmul.msk.bf16.gmra.mxu1 %vm11824_vm7, %v4051_v24  ;;  %7064 = vmatmul.msk.f32.gmra.mxu2 %vm11825_vm6, %v1238_v60 }
 0x30c   : > { %11820 = vst [vmem:[#allocation75_spill] sm:$0xff] %v9548_v2  ;;  %v3885_v62 = vadd.f32 %v3811_v7, %v9153_v14  ;;  %v4423_v52 = vadd.f32 %v4422_v23, %v4270_v12  ;;  %v4577_v14 = vsel %vm11827_vm4, %v4570_v19, 0.0  ;;  %v11828_v7 = vld [vmem:[#allocation8_spill] sm:$0xff] }
 0x30d   : > { %vm11829_vm3 = vnez %v11828_v7 }
 0x30e   : > { %v4203_v30 = vadd.f32 %v4129_v33, %v3885_v62  ;;  %v4512_v35 = vrot.slane %v4423_v52, 7  ;;  %v9555_v48 = vpack.c.bf16 %v4423_v52, %v4420_v44  ;;  %v4964_v47 = vrot.slane %v4423_v52, 1  ;;  %7023 = vmatmul.msk.bf16.gmra.mxu0 %vm11823_vm11, %v11822_v36  ;;  %v11833_v62 = vld [vmem:[#allocation10_spill] sm:$0xff] }
 0x30f   : > { %v5897_v0 = vsel %vm11829_vm3, %v4570_v19, 0.0  ;;  %vm11832_vm11 = vcmp.lt.s32.totalorder %v7533_v5, 1  ;;  %vm11834_vm7 = vnez %v11833_v62  ;;  %vm11848_vm3 = vcmask 130048  }
 0x310   : > { %11821 = vst [vmem:[#allocation41_spill] sm:$0xff] %v9555_v48  ;;  %v4239_v9 = vadd.f32 %v9484_v61, %v4203_v30  ;;  %7083 = vmatmul.msk.bf16.gmra.mxu3 %vm11830_vm9, %v9555_v48  ;;  %v5021_v33 = vsel %vm11831_vm12, %v4963_v21, %v4964_v47  ;;  %v4569_v52 = vsel %vm11832_vm11, %v4511_v59, %v4512_v35  ;;  %v5253_v44 = vsel %vm11834_vm7, %v4570_v19, 0.0  ;;  %v4425_v30 = vpop.f32.mrf.mxu2  ;;  %v1239_v59 = vld [vmem:[%s10951_s2 + $0xa8] sm:$0xff]  ;;  %vm11837_vm12 = vmmov %vm11825_vm6 }
 0x311   : > { %v9574_v3 = vpack.c.bf16 %v4569_v52, %v4577_v14  ;;  %v9576_v12 = vpack.c.bf16 %v4569_v52, %v5897_v0  ;;  %v9578_v23 = vpack.c.bf16 %v4569_v52, %v5253_v44  ;;  %v4131_v2 = vpop.f32.mrf.mxu1  ;;  %vm11838_vm9 = vnez %v11678_v40 }
 0x312   : > { %v4271_v24 = vmax.f32 %v4239_v9, 0.0  ;;  %v4032_v0 = vsel %vm11838_vm9, %v8673_v39, 0.0  ;;  %vm11839_vm6 = vcmp.lt.s32.totalorder %v7533_v5, 7  ;;  %vm11849_vm9 = vcmp.lt.s32.totalorder %v7533_v5, 7 }
 0x313   : > { %11835 = vst [vmem:[#allocation85_spill] sm:$0xff] %v9576_v12  ;;  %v3813_v60 = vpop.f32.mrf.mxu0  ;;  %7065 = vmatmul.msk.f32.gmra.mxu2 %vm11837_vm12, %v1239_v59  ;;  %v4052_v39 = vpack.c.bf16 %v4032_v0, %v8685_v32  ;;  %v11846_v32 = vld [vmem:[#allocation16_spill] sm:$0xff] }
 0x314   : > { %11836 = vst [vmem:[#allocation81_spill] sm:$0xff] %v9578_v23  ;;  %v3886_v36 = vadd.f32 %v3813_v60, %v9168_v18  ;;  %v4426_v48 = vadd.f32 %v4425_v30, %v4271_v24  ;;  %v11842_v23 = vld [vmem:[#allocation103_spill] sm:$0xff] }
 0x316   : > { %v4204_v21 = vadd.f32 %v4131_v2, %v3886_v36  ;;  %v4513_v7 = vrot.slane %v4426_v48, 7  ;;  %v4965_v19 = vrot.slane %v4426_v48, 1 }
 0x317   : > { %v12074_v4 = vld [vmem:[#allocation41_spill] sm:$0xff] }
 0x318   : > { %v4240_v14 = vadd.f32 %v9484_v61, %v4204_v21  ;;  %v5020_v18 = vsel %vm11839_vm6, %v4964_v47, %v4965_v19  ;;  %v4568_v9 = vsel %vm11832_vm11, %v4512_v35, %v4513_v7  ;;  %v4428_v24 = vpop.f32.mrf.mxu2  ;;  %vm11845_vm6 = vcmask 523264  }
 0x319   : > { %v5030_v52 = vsel %vm8001_vm1, %v5020_v18, 0.0  ;;  %v6350_v2 = vsel %vm11725_vm15, %v5020_v18, 0.0  ;;  %v5674_v47 = vsel %vm11735_vm0, %v5020_v18, 0.0  ;;  %v4134_v59 = vpop.f32.mrf.mxu1  ;;  %vm11843_vm15 = vcmask 31744  }
 0x31a   : > { %v4272_v44 = vmax.f32 %v4240_v14, 0.0  ;;  %v9597_v30 = vpack.c.bf16 %v5030_v52, %v5021_v33  ;;  %v9599_v60 = vpack.c.bf16 %v6350_v2, %v5021_v33  ;;  %v9608_v14 = vpack.c.bf16 %v5674_v47, %v5021_v33  ;;  %vm11844_vm12 = vmmov %vm11843_vm15 }
 0x31b   : > { %v3816_v36 = vpop.f32.mrf.mxu0  ;;  %7040 = vmatmul.msk.bf16.gmra.mxu1 %vm11844_vm12, %v4052_v39  ;;  %7066 = vmatmul.msk.f32.gmra.mxu2 %vm11845_vm6, %v1240_v50  ;;  %vm11847_vm11 = vnez %v11846_v32  ;;  %v5255_v0 = vsel %vm11827_vm4, %v4568_v9, 0.0  ;;  %v5899_v18 = vsel %vm11834_vm7, %v4568_v9, 0.0  ;;  %v1245_v32 = vld [vmem:[%s10951_s2 + $0xd8] sm:$0xff] }
 0x31c   : > { %11840 = vst [vmem:[#allocation88_spill] sm:$0xff] %v9599_v60  ;;  %v3887_v35 = vadd.f32 %v3816_v36, %v9176_v46  ;;  %v4429_v21 = vadd.f32 %v4428_v24, %v4272_v44  ;;  %v4579_v46 = vsel %vm11847_vm11, %v4568_v9, 0.0 }
 0x31d   : > { %11841 = vst [vmem:[#allocation91_spill] sm:$0xff] %v9608_v14 }
 0x31e   : > { %v4205_v52 = vadd.f32 %v4134_v59, %v3887_v35  ;;  %v4514_v12 = vrot.slane %v4429_v21, 7  ;;  %v9610_v2 = vpack.c.bf16 %v4429_v21, %v4426_v48  ;;  %v4966_v60 = vrot.slane %v4429_v21, 1  ;;  %7024 = vmatmul.msk.bf16.gmra.mxu0 %vm11843_vm15, %v11842_v23 }
 0x31f   : > { %vm11850_vm15 = vcmp.lt.s32.totalorder %v7533_v5, 1 }
 0x320   : > { %v4241_v33 = vadd.f32 %v9484_v61, %v4205_v52  ;;  %7084 = vmatmul.msk.bf16.gmra.mxu3 %vm11848_vm3, %v9610_v2  ;;  %v5019_v48 = vsel %vm11849_vm9, %v4965_v19, %v4966_v60  ;;  %v4567_v23 = vsel %vm11850_vm15, %v4513_v7, %v4514_v12  ;;  %v4431_v47 = vpop.f32.mrf.mxu2  ;;  %v1241_v7 = vld [vmem:[%s10951_s2 + $0xb8] sm:$0xff]  ;;  %vm11853_vm3 = vmmov %vm11845_vm6 }
 0x321   : > { %v9629_v44 = vpack.c.bf16 %v4567_v23, %v4579_v46  ;;  %v9631_v24 = vpack.c.bf16 %v4567_v23, %v5255_v0  ;;  %v9633_v36 = vpack.c.bf16 %v4567_v23, %v5899_v18  ;;  %v4136_v21 = vpop.f32.mrf.mxu1  ;;  %v4034_v0 = vsel %vm8614_vm13, %v8736_v1, 0.0  ;;  %vm11854_vm12 = vmmov %vm11850_vm15 }
 0x322   : > { %v4273_v39 = vmax.f32 %v4241_v33, 0.0  ;;  %vm11860_vm15 = vmmov %vm11853_vm3 }
 0x323   : > { %11851 = vst [vmem:[#allocation87_spill] sm:$0xff] %v9631_v24  ;;  %v3818_v35 = vpop.f32.mrf.mxu0  ;;  %7067 = vmatmul.msk.f32.gmra.mxu2 %vm11853_vm3, %v1241_v7  ;;  %v11857_v24 = vld [vmem:[#allocation110_spill] sm:$0xff] }
 0x324   : > { %11852 = vst [vmem:[#allocation92_spill] sm:$0xff] %v9633_v36  ;;  %v3888_v59 = vadd.f32 %v3818_v35, %v9191_v16  ;;  %v4432_v50 = vadd.f32 %v4431_v47, %v4273_v39 }
 0x326   : > { %v4206_v19 = vadd.f32 %v4136_v21, %v3888_v59  ;;  %v4515_v52 = vrot.slane %v4432_v50, 7  ;;  %v4967_v9 = vrot.slane %v4432_v50, 1  ;;  %v4053_v21 = vpack.c.bf16 %v4034_v0, %v8752_v15  ;;  %v11861_v15 = vld [vmem:[#allocation21_spill] sm:$0xff] }
 0x327   : > { %vm11862_vm3 = vnez %v11861_v15  ;;  %v1247_v15 = vld [vmem:[%s10951_s2 + $0xe8] sm:$0xff] }
 0x328   : > { %v4242_v46 = vadd.f32 %v9484_v61, %v4206_v19  ;;  %v5018_v16 = vsel %vm11849_vm9, %v4966_v60, %v4967_v9  ;;  %v4566_v33 = vsel %vm11854_vm12, %v4514_v12, %v4515_v52  ;;  %v4434_v39 = vpop.f32.mrf.mxu2  ;;  %vm11863_vm9 = vcmask 130048  }
 0x329   : > { %v5032_v23 = vsel %vm8051_vm2, %v5018_v16, 0.0  ;;  %v6352_v35 = vsel %vm11735_vm0, %v5018_v16, 0.0  ;;  %v5676_v59 = vsel %vm8001_vm1, %v5018_v16, 0.0  ;;  %v4139_v19 = vpop.f32.mrf.mxu1  ;;  %vm11858_vm0 = vcmask 31744  }
 0x32a   : > { %v4274_v18 = vmax.f32 %v4242_v46, 0.0  ;;  %v9650_v47 = vpack.c.bf16 %v5032_v23, %v5019_v48  ;;  %v9657_v60 = vpack.c.bf16 %v6352_v35, %v5019_v48  ;;  %v9659_v7 = vpack.c.bf16 %v5676_v59, %v5019_v48  ;;  %v1242_v23 = vld [vmem:[%s10951_s2 + $0xc0] sm:$0xff]  ;;  %vm11859_vm6 = vmmov %vm11858_vm0 }
 0x32b   : > { %v3821_v1 = vpop.f32.mrf.mxu0  ;;  %7041 = vmatmul.msk.bf16.gmra.mxu1 %vm11859_vm6, %v4053_v21  ;;  %7068 = vmatmul.msk.f32.gmra.mxu2 %vm11860_vm15, %v1242_v23  ;;  %v5257_v48 = vsel %vm11847_vm11, %v4566_v33, 0.0  ;;  %vm11864_vm12 = vcmp.lt.s32.totalorder %v7533_v5, 7 }
 0x32c   : > { %11855 = vst [vmem:[#allocation84_spill] sm:$0xff] %v9657_v60  ;;  %v3889_v12 = vadd.f32 %v3821_v1, %v9199_v51  ;;  %v4435_v46 = vadd.f32 %v4434_v39, %v4274_v18  ;;  %v4581_v51 = vsel %vm11862_vm3, %v4566_v33, 0.0  ;;  %v5901_v18 = vsel %vm11827_vm4, %v4566_v33, 0.0  ;;  %vm11867_vm4 = vmmov %vm11860_vm15  ;;  %v11873_v60 = vld [vmem:[#allocation114_spill] sm:$0xff] }
 0x32d   : > { %11856 = vst [vmem:[#allocation94_spill] sm:$0xff] %v9659_v7  ;;  %vm11869_vm15 = vmmov %vm11864_vm12 }
 0x32e   : > { %v4207_v8 = vadd.f32 %v4139_v19, %v3889_v12  ;;  %v4516_v14 = vrot.slane %v4435_v46, 7  ;;  %v9665_v36 = vpack.c.bf16 %v4435_v46, %v4432_v50  ;;  %v4968_v16 = vrot.slane %v4435_v46, 1  ;;  %7025 = vmatmul.msk.bf16.gmra.mxu0 %vm11858_vm0, %v11857_v24 }
 0x32f   : > { %vm11865_vm0 = vcmp.lt.s32.totalorder %v7533_v5, 1 }
 0x330   : > { %v4243_v0 = vadd.f32 %v9484_v61, %v4207_v8  ;;  %7085 = vmatmul.msk.bf16.gmra.mxu3 %vm11863_vm9, %v9665_v36  ;;  %v5017_v50 = vsel %vm11864_vm12, %v4967_v9, %v4968_v16  ;;  %v4565_v24 = vsel %vm11865_vm0, %v4515_v52, %v4516_v14  ;;  %v4437_v21 = vpop.f32.mrf.mxu2  ;;  %v1243_v52 = vld [vmem:[%s10951_s2 + $0xc8] sm:$0xff]  ;;  %vm11868_vm6 = vmmov %vm11865_vm0 }
 0x331   : > { %v9684_v39 = vpack.c.bf16 %v4565_v24, %v4581_v51  ;;  %v9686_v35 = vpack.c.bf16 %v4565_v24, %v5257_v48  ;;  %v9688_v59 = vpack.c.bf16 %v4565_v24, %v5901_v18  ;;  %v4141_v46 = vpop.f32.mrf.mxu1  ;;  %vm11876_vm12 = vmmov %vm11867_vm4 }
 0x332   : > { %v4275_v1 = vmax.f32 %v4243_v0, 0.0 }
 0x333   : > { %11866 = vst [vmem:[#allocation90_spill] sm:$0xff] %v9688_v59  ;;  %v3823_v12 = vpop.f32.mrf.mxu0  ;;  %7069 = vmatmul.msk.f32.gmra.mxu2 %vm11867_vm4, %v1243_v52  ;;  %vm11879_vm4 = vcmask 130048  }
 0x334   : > { %v3890_v19 = vadd.f32 %v3823_v12, %v9214_v37  ;;  %v4438_v23 = vadd.f32 %v4437_v21, %v4275_v1  ;;  %v4036_v37 = vsel %vm8675_vm10, %v8806_v57, 0.0 }
 0x336   : > { %v4208_v9 = vadd.f32 %v4141_v46, %v3890_v19  ;;  %v4517_v43 = vrot.slane %v4438_v23, 7  ;;  %v4969_v33 = vrot.slane %v4438_v23, 1 }
 0x338   : > { %v4244_v8 = vadd.f32 %v9484_v61, %v4208_v9  ;;  %v4564_v51 = vsel %vm11868_vm6, %v4516_v14, %v4517_v43  ;;  %v5016_v48 = vsel %vm11869_vm15, %v4968_v16, %v4969_v33  ;;  %v4440_v18 = vpop.f32.mrf.mxu2  ;;  %v4054_v16 = vpack.c.bf16 %v4036_v37, %v8819_v63  ;;  %v11877_v63 = vld [vmem:[#allocation33_spill] sm:$0xff]  ;;  %vm11880_vm6 = vmmov %vm11869_vm15 }
 0x339   : > { %v5034_v0 = vsel %vm11772_vm8, %v5016_v48, 0.0  ;;  %v6354_v21 = vsel %vm8001_vm1, %v5016_v48, 0.0  ;;  %v5678_v14 = vsel %vm8051_vm2, %v5016_v48, 0.0  ;;  %v4144_v52 = vpop.f32.mrf.mxu1  ;;  %vm11874_vm1 = vcmask 31744  }
 0x33a   : > { %v4276_v24 = vmax.f32 %v4244_v8, 0.0  ;;  %v9705_v1 = vpack.c.bf16 %v5034_v0, %v5017_v50  ;;  %v9712_v19 = vpack.c.bf16 %v6354_v21, %v5017_v50  ;;  %v9714_v46 = vpack.c.bf16 %v5678_v14, %v5017_v50  ;;  %v1244_v8 = vld [vmem:[%s10951_s2 + $0xd0] sm:$0xff]  ;;  %vm11875_vm9 = vmmov %vm11874_vm1 }
 0x33b   : > { %v3826_v12 = vpop.f32.mrf.mxu0  ;;  %7042 = vmatmul.msk.bf16.gmra.mxu1 %vm11875_vm9, %v4054_v16  ;;  %7070 = vmatmul.msk.f32.gmra.mxu2 %vm11876_vm12, %v1244_v8  ;;  %vm11878_vm0 = vnez %v11877_v63  ;;  %v5259_v50 = vsel %vm11862_vm3, %v4564_v51, 0.0  ;;  %vm11881_vm15 = vcmp.lt.s32.totalorder %v7533_v5, 1  ;;  %vm11885_vm9 = vmmov %vm11880_vm6  ;;  %v1249_v63 = vld [vmem:[%s10951_s2 + $0xf8] sm:$0xff] }
 0x33c   : > { %11870 = vst [vmem:[#allocation97_spill] sm:$0xff] %v9712_v19  ;;  %v3891_v57 = vadd.f32 %v3826_v12, %v9223_v17  ;;  %v4441_v9 = vadd.f32 %v4440_v18, %v4276_v24  ;;  %v4583_v17 = vsel %vm11878_vm0, %v4564_v51, 0.0  ;;  %v5903_v24 = vsel %vm11847_vm11, %v4564_v51, 0.0  ;;  %vm11883_vm11 = vmmov %vm11876_vm12 }
 0x33d   : > { %11871 = vst [vmem:[#allocation100_spill] sm:$0xff] %v9714_v46  ;;  %v3606_v12 = vadd.f32 %v9244_v49, %v9232_v29 }
 0x33e   : > { %v4209_v22 = vadd.f32 %v4144_v52, %v3891_v57  ;;  %v4518_v0 = vrot.slane %v4441_v9, 7  ;;  %v9720_v7 = vpack.c.bf16 %v4441_v9, %v4438_v23  ;;  %v4970_v48 = vrot.slane %v4441_v9, 1  ;;  %7026 = vmatmul.msk.bf16.gmra.mxu0 %vm11874_vm1, %v11873_v60  ;;  %vm11884_vm1 = vmmov %vm11881_vm15 }
 0x340   : > { %11872 = vst [vmem:[#allocation96_spill] sm:$0xff] %v9720_v7  ;;  %v4245_v37 = vadd.f32 %v9484_v61, %v4209_v22  ;;  %7086 = vmatmul.msk.bf16.gmra.mxu3 %vm11879_vm4, %v9720_v7  ;;  %v5015_v23 = vsel %vm11880_vm6, %v4969_v33, %v4970_v48  ;;  %v4563_v60 = vsel %vm11881_vm15, %v4517_v43, %v4518_v0  ;;  %v4443_v57 = vpop.f32.mrf.mxu2  ;;  %vm11894_vm4 = vmmov %vm11883_vm11  ;;  %vm11897_vm15 = vcmask 130048  }
 0x341   : > { %v9739_v18 = vpack.c.bf16 %v4563_v60, %v4583_v17  ;;  %v9741_v21 = vpack.c.bf16 %v4563_v60, %v5259_v50  ;;  %v9743_v14 = vpack.c.bf16 %v4563_v60, %v5903_v24  ;;  %v4146_v33 = vpop.f32.mrf.mxu1  ;;  %v4038_v50 = vsel %vm8738_vm14, %v9257_v6, 0.0  ;;  %v11930_v60 = vld [vmem:[#allocation70_spill] sm:$0xff] }
 0x342   : > { %v4277_v16 = vmax.f32 %v4245_v37, 0.0  ;;  %v3737_v37 = vpack.c.bf16 %v11704_v58, %v8771_v10  ;;  %v7293_v10 = vld [vmem:[%s10956_s7] sm:$0xff]  ;;  %v7295_v58 = vld [vmem:[%s10956_s7 + $0x10] sm:$0xff] }
 0x343   : > { %11882 = vst [vmem:[#allocation101_spill] sm:$0xff] %v9743_v14  ;;  %v3828_v52 = vpop.f32.mrf.mxu0  ;;  %7071 = vmatmul.msk.f32.gmra.mxu2 %vm11883_vm11, %v1245_v32  ;;  %4879 = vmatpush.bf16.msra.mxu0 %v7293_v10  ;;  %vm11898_vm11 = vmmov %vm11885_vm9  ;;  %v11912_v14 = vmov 0.0|0.0  }
 0x344   : > { %v3892_v9 = vadd.f32 %v3828_v52, %v3606_v12  ;;  %v4444_v8 = vadd.f32 %v4443_v57, %v4277_v16  ;;  %5137 = vmatpush.bf16.msrb.mxu1 %v7295_v58 }
 0x346   : > { %v4210_v43 = vadd.f32 %v4146_v33, %v3892_v9  ;;  %v4519_v51 = vrot.slane %v4444_v8, 7  ;;  %v4971_v22 = vrot.slane %v4444_v8, 1  ;;  %v11887_v9 = vld [vmem:[#allocation72_spill] sm:$0xff] }
 0x347   : > { %v4055_v33 = vpack.c.bf16 %v4038_v50, %v11887_v9 }
 0x348   : > { %v4246_v17 = vadd.f32 %v9484_v61, %v4210_v43  ;;  %v4562_v29 = vsel %vm11884_vm1, %v4518_v0, %v4519_v51  ;;  %v5014_v49 = vsel %vm11885_vm9, %v4970_v48, %v4971_v22  ;;  %v4446_v16 = vpop.f32.mrf.mxu2  ;;  %vm11905_vm9 = vmmov %vm11884_vm1 }
 0x349   : > { %v5036_v24 = vsel %vm8179_vm5, %v5014_v49, 0.0  ;;  %v6356_v0 = vsel %vm8051_vm2, %v5014_v49, 0.0  ;;  %v5680_v48 = vsel %vm11772_vm8, %v5014_v49, 0.0  ;;  %v1246_v49 = vld [vmem:[%s10951_s2 + $0xe0] sm:$0xff]  ;;  %vm11892_vm2 = vcmask 31744  }
 0x34a   : > { %v4278_v12 = vmax.f32 %v4246_v17, 0.0  ;;  %v9763_v57 = vpack.c.bf16 %v5036_v24, %v5015_v23  ;;  %v9776_v6 = vpack.c.bf16 %v6356_v0, %v5015_v23  ;;  %v9778_v32 = vpack.c.bf16 %v5680_v48, %v5015_v23  ;;  %v4149_v17 = vpop.f32.mrf.mxu1  ;;  %vm11893_vm12 = vmmov %vm11892_vm2  ;;  %v11895_v23 = vld [vmem:[#allocation45_spill] sm:$0xff] }
 0x34b   : > { %v3831_v52 = vpop.f32.mrf.mxu0  ;;  %7043 = vmatmul.msk.bf16.gmra.mxu1 %vm11893_vm12, %v4055_v33  ;;  %7072 = vmatmul.msk.f32.gmra.mxu2 %vm11894_vm4, %v1246_v49  ;;  %vm11896_vm6 = vnez %v11895_v23  ;;  %v5905_v33 = vsel %vm11862_vm3, %v4562_v29, 0.0  ;;  %vm11904_vm3 = vmmov %vm11894_vm4  ;;  %vm11907_vm12 = vnez %v11794_v56 }
 0x34c   : > { %11888 = vst [vmem:[#allocation93_spill] sm:$0xff] %v9776_v6  ;;  %v3893_v43 = vadd.f32 %v3831_v52, %v11890_v45  ;;  %v4447_v24 = vadd.f32 %v4446_v16, %v4278_v12  ;;  %v4585_v12 = vsel %vm11896_vm6, %v4562_v29, 0.0  ;;  %v5261_v16 = vsel %vm11878_vm0, %v4562_v29, 0.0 }
 0x34d   : > { %11889 = vst [vmem:[#allocation99_spill] sm:$0xff] %v9778_v32 }
 0x34e   : > { %v4211_v50 = vadd.f32 %v4149_v17, %v3893_v43  ;;  %v4520_v9 = vrot.slane %v4447_v24, 7  ;;  %v9784_v46 = vpack.c.bf16 %v4447_v24, %v4444_v8  ;;  %v4972_v19 = vrot.slane %v4447_v24, 1  ;;  %7027 = vmatmul.msk.bf16.gmra.mxu0 %vm11892_vm2, %v3737_v37  ;;  %v7296_v8 = vld [vmem:[%s10956_s7 + $0x18] sm:$0xff]  ;;  %v7297_v37 = vld [vmem:[%s10956_s7 + $0x20] sm:$0xff]  ;;  %v11903_v17 = vld [vmem:[#allocation63_spill] sm:$0xff] }
 0x34f   : > { %v11902_v43 = vld [vmem:[#allocation28_spill] sm:$0xff]  ;;  %5363 = vmatpush.bf16.msrb.mxu2 %v7296_v8  ;;  %5557 = vmatpush.bf16.msrb.mxu3 %v7297_v37  ;;  %vm11906_vm2 = vmmov %vm11898_vm11 }
 0x350   : > { %11891 = vst [vmem:[#allocation104_spill] sm:$0xff] %v9784_v46  ;;  %v4247_v0 = vadd.f32 %v9484_v61, %v4211_v50  ;;  %7087 = vmatmul.msk.bf16.gmra.mxu3 %vm11897_vm15, %v9784_v46  ;;  %v5013_v48 = vsel %vm11898_vm11, %v4971_v22, %v4972_v19  ;;  %v4561_v52 = vsel %vm11884_vm1, %v4519_v51, %v4520_v9  ;;  %v4449_v50 = vpop.f32.mrf.mxu2  ;;  %vm11916_vm11 = vmmov %vm11906_vm2 }
 0x351   : > { %v9808_v10 = vpack.c.bf16 %v4561_v52, %v4585_v12  ;;  %v9810_v58 = vpack.c.bf16 %v4561_v52, %v5261_v16  ;;  %v9812_v45 = vpack.c.bf16 %v4561_v52, %v5905_v33  ;;  %v3608_v24 = vadd.f32 %v11903_v17, %v11902_v43 }
 0x352   : > { %v4279_v49 = vmax.f32 %v4247_v0, 0.0  ;;  %v4151_v6 = vpop.f32.mrf.mxu1 }
 0x353   : > { %11899 = vst [vmem:[#allocation107_spill] sm:$0xff] %v9808_v10  ;;  %v3833_v22 = vpop.f32.mrf.mxu0  ;;  %7073 = vmatmul.msk.f32.gmra.mxu2 %vm11904_vm3, %v1247_v15 }
 0x354   : > { %11900 = vst [vmem:[#allocation102_spill] sm:$0xff] %v9810_v58  ;;  %v3894_v32 = vadd.f32 %v3833_v22, %v3608_v24  ;;  %v4450_v51 = vadd.f32 %v4449_v50, %v4279_v49  ;;  %v11910_v50 = vld [vmem:[#allocation55_spill] sm:$0xff] }
 0x355   : > { %11901 = vst [vmem:[#allocation109_spill] sm:$0xff] %v9812_v45 }
 0x356   : > { %v4212_v29 = vadd.f32 %v4151_v6, %v3894_v32  ;;  %v4521_v12 = vrot.slane %v4450_v51, 7  ;;  %v4973_v16 = vrot.slane %v4450_v51, 1 }
 0x358   : > { %v4248_v52 = vadd.f32 %v9484_v61, %v4212_v29  ;;  %v4560_v0 = vsel %vm11905_vm9, %v4520_v9, %v4521_v12  ;;  %v5012_v8 = vsel %vm11906_vm2, %v4972_v19, %v4973_v16  ;;  %v4452_v43 = vpop.f32.mrf.mxu2  ;;  %v1248_v29 = vld [vmem:[%s10951_s2 + $0xf0] sm:$0xff]  ;;  %vm11924_vm9 = vmmov %vm11906_vm2  ;;  %vm11925_vm2 = vnez %v11800_v25 }
 0x359   : > { %v5038_v37 = vsel %vm11907_vm12, %v5012_v8, 0.0  ;;  %v6358_v6 = vsel %vm11772_vm8, %v5012_v8, 0.0  ;;  %v5682_v32 = vsel %vm8179_vm5, %v5012_v8, 0.0  ;;  %vm11913_vm8 = vmmov %vm11904_vm3 }
 0x35a   : > { %v4280_v33 = vmax.f32 %v4248_v52, 0.0  ;;  %v9827_v17 = vpack.c.bf16 %v5038_v37, %v5013_v48  ;;  %v9833_v49 = vpack.c.bf16 %v6358_v6, %v5013_v48  ;;  %v9835_v9 = vpack.c.bf16 %v5682_v32, %v5013_v48  ;;  %v4154_v22 = vpop.f32.mrf.mxu1  ;;  %v11914_v48 = vld [vmem:[#allocation57_spill] sm:$0xff] }
 0x35b   : > { %v3836_v24 = vpop.f32.mrf.mxu0  ;;  %4193 = vmatmul.bf16.gmra.mxu1 %v11912_v14  ;;  %7074 = vmatmul.msk.f32.gmra.mxu2 %vm11913_vm8, %v1248_v29  ;;  %vm11915_vm4 = vnez %v11914_v48  ;;  %v5907_v32 = vsel %vm11878_vm0, %v4560_v0, 0.0  ;;  %vm11922_vm0 = vmmov %vm11904_vm3 }
 0x35c   : > { %11908 = vst [vmem:[#allocation106_spill] sm:$0xff] %v9833_v49  ;;  %v3895_v19 = vadd.f32 %v3836_v24, %v11910_v50  ;;  %v4453_v15 = vadd.f32 %v4452_v43, %v4280_v33  ;;  %v4587_v8 = vsel %vm11915_vm4, %v4560_v0, 0.0  ;;  %v5263_v33 = vsel %vm11896_vm6, %v4560_v0, 0.0  ;;  %vm11923_vm3 = vmmov %vm11884_vm1 }
 0x35d   : > { %11909 = vst [vmem:[#allocation111_spill] sm:$0xff] %v9835_v9  ;;  %vm11932_vm8 = vmmov %vm11897_vm15 }
 0x35e   : > { %v4213_v52 = vadd.f32 %v4154_v22, %v3895_v19  ;;  %v4522_v37 = vrot.slane %v4453_v15, 7  ;;  %v9841_v11 = vpack.c.bf16 %v4453_v15, %v4450_v51  ;;  %v4974_v45 = vrot.slane %v4453_v15, 1  ;;  %3875 = vmatmul.bf16.gmra.mxu0 %v11912_v14  ;;  %v11920_v22 = vld [vmem:[#allocation68_spill] sm:$0xff]  ;;  %v11921_v15 = vld [vmem:[#allocation50_spill] sm:$0xff] }
 0x35f   : > { %v3610_v29 = vadd.f32 %v11921_v15, %v11920_v22 }
 0x360   : > { %11911 = vst [vmem:[#allocation108_spill] sm:$0xff] %v9841_v11  ;;  %v4249_v43 = vadd.f32 %v9484_v61, %v4213_v52  ;;  %7088 = vmatmul.msk.bf16.gmra.mxu3 %vm11897_vm15, %v9841_v11  ;;  %v5011_v51 = vsel %vm11916_vm11, %v4973_v16, %v4974_v45  ;;  %v4559_v6 = vsel %vm11884_vm1, %v4521_v12, %v4522_v37  ;;  %v4455_v9 = vpop.f32.mrf.mxu2  ;;  %vm11933_vm15 = vmmov %vm11924_vm9 }
 0x361   : > { %v9859_v24 = vpack.c.bf16 %v4559_v6, %v4587_v8  ;;  %v9861_v50 = vpack.c.bf16 %v4559_v6, %v5263_v33  ;;  %v9863_v19 = vpack.c.bf16 %v4559_v6, %v5907_v32  ;;  %vm11934_vm11 = vmmov %vm11884_vm1 }
 0x362   : > { %v4281_v52 = vmax.f32 %v4249_v43, 0.0  ;;  %v4156_v16 = vpop.f32.mrf.mxu1 }
 0x363   : > { %11917 = vst [vmem:[#allocation115_spill] sm:$0xff] %v9859_v24  ;;  %v3838_v49 = vpop.f32.mrf.mxu0  ;;  %7075 = vmatmul.msk.f32.gmra.mxu2 %vm11922_vm0, %v1249_v63  ;;  %vm11941_vm0 = vnez %v11642_v53 }
 0x364   : > { %11918 = vst [vmem:[#allocation113_spill] sm:$0xff] %v9861_v50  ;;  %v3896_v59 = vadd.f32 %v3838_v49, %v3610_v29  ;;  %v4456_v11 = vadd.f32 %v4455_v9, %v4281_v52  ;;  %v9876_v49 = vpop.f32.mrf.mxu3 }
 0x365   : > { %11919 = vst [vmem:[#allocation117_spill] sm:$0xff] %v9863_v19 }
 0x366   : > { %v4214_v12 = vadd.f32 %v4156_v16, %v3896_v59  ;;  %v4523_v0 = vrot.slane %v4456_v11, 7  ;;  %v4975_v8 = vrot.slane %v4456_v11, 1 }
 0x368   : > { %v4250_v33 = vadd.f32 %v9484_v61, %v4214_v12  ;;  %v4558_v6 = vsel %vm11923_vm3, %v4522_v37, %v4523_v0  ;;  %v5010_v43 = vsel %vm11924_vm9, %v4974_v45, %v4975_v8  ;;  %v4458_v22 = vpop.f32.mrf.mxu2  ;;  %v11928_v45 = vld [vmem:[#allocation67_spill] sm:$0xff] }
 0x369   : > { %v5040_v9 = vsel %vm11925_vm2, %v5010_v43, 0.0  ;;  %v6360_v15 = vsel %vm8179_vm5, %v5010_v43, 0.0  ;;  %v5684_v29 = vsel %vm11907_vm12, %v5010_v43, 0.0  ;;  %vm11931_vm5 = vnez %v11930_v60 }
 0x36a   : > { %v4282_v32 = vmax.f32 %v4250_v33, 0.0  ;;  %v9880_v59 = vpack.c.bf16 %v5040_v9, %v5011_v51  ;;  %v9886_v37 = vpack.c.bf16 %v6360_v15, %v5011_v51  ;;  %v9888_v16 = vpack.c.bf16 %v5684_v29, %v5011_v51  ;;  %v4159_v12 = vpop.f32.mrf.mxu1 }
 0x36b   : > { %v3841_v52 = vpop.f32.mrf.mxu0  ;;  %5138 = vmatmul.bf16.vlgmr.msrb.gmra.mxu1 %v11912_v14  ;;  %v4589_v43 = vsel %vm11931_vm5, %v4558_v6, 0.0  ;;  %v5265_v51 = vsel %vm11915_vm4, %v4558_v6, 0.0 }
 0x36c   : > { %11926 = vst [vmem:[#allocation118_spill] sm:$0xff] %v9886_v37  ;;  %v3897_v63 = vadd.f32 %v3841_v52, %v11928_v45  ;;  %v4459_v19 = vadd.f32 %v4458_v22, %v4282_v32  ;;  %v5909_v32 = vsel %vm11896_vm6, %v4558_v6, 0.0  ;;  %v9908_v22 = vpop.f32.mrf.mxu3  ;;  %vm11939_vm6 = vmmov %vm11884_vm1 }
 0x36d   : > { %11927 = vst [vmem:[#allocation120_spill] sm:$0xff] %v9888_v16  ;;  %vm11940_vm1 = vmmov %vm11924_vm9 }
 0x36e   : > { %v4215_v50 = vadd.f32 %v4159_v12, %v3897_v63  ;;  %v4524_v33 = vrot.slane %v4459_v19, 7  ;;  %v9891_v24 = vpack.c.bf16 %v4459_v19, %v4456_v11  ;;  %v4976_v9 = vrot.slane %v4459_v19, 1  ;;  %4880 = vmatmul.bf16.vlgmr.msra.gmra.mxu0 %v11912_v14  ;;  %v11938_v63 = vld [vmem:[#allocation79_spill] sm:$0xff]  ;;  %vm11950_vm9 = vmmov %vm11932_vm8 }
 0x370   : > { %11929 = vst [vmem:[#allocation5_spill] sm:$0xff] %v9891_v24  ;;  %v4251_v15 = vadd.f32 %v9484_v61, %v4215_v50  ;;  %7089 = vmatmul.msk.bf16.gmra.mxu3 %vm11932_vm8, %v9891_v24  ;;  %v5009_v11 = vsel %vm11933_vm15, %v4975_v8, %v4976_v9  ;;  %v4557_v19 = vsel %vm11934_vm11, %v4523_v0, %v4524_v33  ;;  %v11937_v50 = vld [vmem:[#allocation44_spill] sm:$0xff]  ;;  %v4461_v16 = vpop.f32.mrf.mxu2  ;;  %vm11952_vm15 = vmmov %vm11939_vm6 }
 0x371   : > { %v9910_v29 = vpack.c.bf16 %v4557_v19, %v4589_v43  ;;  %v9912_v52 = vpack.c.bf16 %v4557_v19, %v5265_v51  ;;  %v9914_v45 = vpack.c.bf16 %v4557_v19, %v5909_v32  ;;  %v3612_v12 = vadd.f32 %v11938_v63, %v11937_v50  ;;  %vm11959_vm11 = vmmov %vm11940_vm1 }
 0x372   : > { %v4283_v14 = vmax.f32 %v4251_v15, 0.0  ;;  %v4161_v24 = vpop.f32.mrf.mxu1 }
 0x373   : > { %11935 = vst [vmem:[#allocation7_spill] sm:$0xff] %v9912_v52  ;;  %v3843_v8 = vpop.f32.mrf.mxu0 }
 0x374   : > { %11936 = vst [vmem:[#allocation9_spill] sm:$0xff] %v9914_v45  ;;  %v3898_v37 = vadd.f32 %v3843_v8, %v3612_v12  ;;  %v4462_v0 = vadd.f32 %v4461_v16, %v4283_v14 }
 0x376   : > { %v4216_v58 = vadd.f32 %v4161_v24, %v3898_v37  ;;  %v4525_v23 = vrot.slane %v4462_v0, 7  ;;  %v4977_v6 = vrot.slane %v4462_v0, 1  ;;  %v9931_v37 = vpop.f32.mrf.mxu3 }
 0x377   : > { %11942 = vst [vmem:[#allocation6_spill] sm:$0xff] %v9931_v37 }
 0x378   : > { %v4252_v10 = vadd.f32 %v9484_v61, %v4216_v58  ;;  %v4556_v43 = vsel %vm11939_vm6, %v4524_v33, %v4525_v23  ;;  %v5008_v51 = vsel %vm11940_vm1, %v4976_v9, %v4977_v6  ;;  %v4464_v32 = vpop.f32.mrf.mxu2  ;;  %v11945_v9 = vld [vmem:[#allocation60_spill] sm:$0xff] }
 0x379   : > { %v5042_v19 = vsel %vm11941_vm0, %v5008_v51, 0.0  ;;  %v6362_v14 = vsel %vm11907_vm12, %v5008_v51, 0.0  ;;  %v5686_v24 = vsel %vm11925_vm2, %v5008_v51, 0.0  ;;  %vm11947_vm12 = vmmov %vm11932_vm8  ;;  %v11948_v51 = vld [vmem:[#allocation80_spill] sm:$0xff] }
 0x37a   : > { %v4284_v15 = vmax.f32 %v4252_v10, 0.0  ;;  %v9925_v50 = vpack.c.bf16 %v5042_v19, %v5009_v11  ;;  %v9933_v16 = vpack.c.bf16 %v6362_v14, %v5009_v11  ;;  %v9935_v33 = vpack.c.bf16 %v5686_v24, %v5009_v11  ;;  %v4164_v12 = vpop.f32.mrf.mxu1  ;;  %vm11951_vm8 = vmmov %vm11940_vm1 }
 0x37b   : > { %v3846_v58 = vpop.f32.mrf.mxu0  ;;  %7122 = vmatmul.msk.bf16.gmra.mxu1 %vm11947_vm12, %v9546_v34  ;;  %vm11949_vm3 = vnez %v11948_v51  ;;  %v5267_v14 = vsel %vm11931_vm5, %v4556_v43, 0.0  ;;  %v5911_v34 = vsel %vm11915_vm4, %v4556_v43, 0.0  ;;  %vm11958_vm4 = vmmov %vm11939_vm6  ;;  %vm11960_vm6 = vnez %v11656_v27 }
 0x37c   : > { %11943 = vst [vmem:[#allocation122_spill] sm:$0xff] %v9933_v16  ;;  %v3899_v63 = vadd.f32 %v3846_v58, %v11945_v9  ;;  %v4465_v10 = vadd.f32 %v4464_v32, %v4284_v15  ;;  %v4591_v52 = vsel %vm11949_vm3, %v4556_v43, 0.0  ;;  %v11955_v9 = vld [vmem:[#allocation73_spill] sm:$0xff] }
 0x37d   : > { %11944 = vst [vmem:[#allocation18_spill] sm:$0xff] %v9935_v33 }
 0x37e   : > { %v4217_v8 = vadd.f32 %v4164_v12, %v3899_v63  ;;  %v4526_v19 = vrot.slane %v4465_v10, 7  ;;  %v9938_v45 = vpack.c.bf16 %v4465_v10, %v4462_v0  ;;  %v4978_v56 = vrot.slane %v4465_v10, 1  ;;  %v11956_v63 = vld [vmem:[#allocation39_spill] sm:$0xff] }
 0x37f   : > { %v3614_v12 = vadd.f32 %v11956_v63, %v11955_v9 }
 0x380   : > { %11946 = vst [vmem:[#allocation11_spill] sm:$0xff] %v9938_v45  ;;  %v4253_v11 = vadd.f32 %v9484_v61, %v4217_v8  ;;  %7090 = vmatmul.msk.bf16.gmra.mxu3 %vm11950_vm9, %v9938_v45  ;;  %v5007_v15 = vsel %vm11951_vm8, %v4977_v6, %v4978_v56  ;;  %v4555_v0 = vsel %vm11952_vm15, %v4525_v23, %v4526_v19  ;;  %v4467_v8 = vpop.f32.mrf.mxu2 }
 0x381   : > { %v9955_v32 = vpack.c.bf16 %v4555_v0, %v4591_v52  ;;  %v9957_v24 = vpack.c.bf16 %v4555_v0, %v5267_v14  ;;  %v9959_v58 = vpack.c.bf16 %v4555_v0, %v5911_v34 }
 0x382   : > { %v4285_v10 = vmax.f32 %v4253_v11, 0.0  ;;  %v4166_v37 = vpop.f32.mrf.mxu1 }
 0x383   : > { %11953 = vst [vmem:[#allocation19_spill] sm:$0xff] %v9957_v24  ;;  %v3848_v33 = vpop.f32.mrf.mxu0  ;;  %v9963_v16 = vpop.f32.mrf.mxu3 }
 0x384   : > { %11954 = vst [vmem:[#allocation123_spill] sm:$0xff] %v9959_v58  ;;  %v3900_v6 = vadd.f32 %v3848_v33, %v3614_v12  ;;  %v4468_v23 = vadd.f32 %v4467_v8, %v4285_v10 }
 0x385   : > { %11957 = vst [vmem:[#allocation12_spill] sm:$0xff] %v9963_v16 }
 0x386   : > { %v4218_v45 = vadd.f32 %v4166_v37, %v3900_v6  ;;  %v4527_v48 = vrot.slane %v4468_v23, 7  ;;  %v4979_v43 = vrot.slane %v4468_v23, 1 }
 0x388   : > { %v4254_v52 = vadd.f32 %v9484_v61, %v4218_v45  ;;  %v4554_v14 = vsel %vm11958_vm4, %v4526_v19, %v4527_v48  ;;  %v5006_v0 = vsel %vm11959_vm11, %v4978_v56, %v4979_v43  ;;  %v4470_v9 = vpop.f32.mrf.mxu2  ;;  %v11964_v56 = vld [vmem:[#allocation54_spill] sm:$0xff] }
 0x389   : > { %v5044_v11 = vsel %vm11960_vm6, %v5006_v0, 0.0  ;;  %v6364_v37 = vsel %vm11925_vm2, %v5006_v0, 0.0  ;;  %v5688_v33 = vsel %vm11941_vm0, %v5006_v0, 0.0  ;;  %vm11966_vm2 = vmmov %vm11950_vm9  ;;  %v11967_v0 = vld [vmem:[#allocation89_spill] sm:$0xff] }
 0x38a   : > { %v4286_v34 = vmax.f32 %v4254_v52, 0.0  ;;  %v9972_v63 = vpack.c.bf16 %v5044_v11, %v5007_v15  ;;  %v9980_v19 = vpack.c.bf16 %v6364_v37, %v5007_v15  ;;  %v9982_v10 = vpack.c.bf16 %v5688_v33, %v5007_v15  ;;  %v4169_v6 = vpop.f32.mrf.mxu1  ;;  %vm11969_vm12 = vmmov %vm11966_vm2 }
 0x38b   : > { %v3851_v45 = vpop.f32.mrf.mxu0  ;;  %v9978_v12 = vpop.f32.mrf.mxu3  ;;  %7123 = vmatmul.msk.bf16.gmra.mxu1 %vm11966_vm2, %v9597_v30  ;;  %vm11968_vm1 = vnez %v11967_v0  ;;  %v5269_v37 = vsel %vm11949_vm3, %v4554_v14, 0.0  ;;  %vm11970_vm9 = vmmov %vm11951_vm8  ;;  %v5913_v30 = vsel %vm11931_vm5, %v4554_v14, 0.0 }
 0x38c   : > { %11961 = vst [vmem:[#allocation124_spill] sm:$0xff] %v9978_v12  ;;  %v3901_v8 = vadd.f32 %v3851_v45, %v11964_v56  ;;  %v4471_v52 = vadd.f32 %v4470_v9, %v4286_v34  ;;  %v4593_v24 = vsel %vm11968_vm1, %v4554_v14, 0.0  ;;  %vm11971_vm8 = vmmov %vm11958_vm4  ;;  %v11974_v56 = vld [vmem:[#allocation71_spill] sm:$0xff] }
 0x38d   : > { %11962 = vst [vmem:[#allocation24_spill] sm:$0xff] %v9980_v19  ;;  %vm11977_vm5 = vmmov %vm11958_vm4  ;;  %vm11979_vm4 = vnez %v11669_v31 }
 0x38e   : > { %11963 = vst [vmem:[#allocation14_spill] sm:$0xff] %v9982_v10  ;;  %v4219_v58 = vadd.f32 %v4169_v6, %v3901_v8  ;;  %v4528_v11 = vrot.slane %v4471_v52, 7  ;;  %v9985_v16 = vpack.c.bf16 %v4471_v52, %v4468_v23  ;;  %v4980_v25 = vrot.slane %v4471_v52, 1  ;;  %vm11978_vm15 = vmmov %vm11970_vm9 }
 0x390   : > { %11965 = vst [vmem:[#allocation27_spill] sm:$0xff] %v9985_v16  ;;  %v4255_v15 = vadd.f32 %v9484_v61, %v4219_v58  ;;  %7091 = vmatmul.msk.bf16.gmra.mxu3 %vm11969_vm12, %v9985_v16  ;;  %v5005_v34 = vsel %vm11970_vm9, %v4979_v43, %v4980_v25  ;;  %v4553_v23 = vsel %vm11971_vm8, %v4527_v48, %v4528_v11  ;;  %v11975_v58 = vld [vmem:[#allocation82_spill] sm:$0xff]  ;;  %v4473_v52 = vpop.f32.mrf.mxu2  ;;  %vm11989_vm12 = vmmov %vm11970_vm9 }
 0x391   : > { %v10002_v9 = vpack.c.bf16 %v4553_v23, %v4593_v24  ;;  %v10004_v33 = vpack.c.bf16 %v4553_v23, %v5269_v37  ;;  %v10006_v45 = vpack.c.bf16 %v4553_v23, %v5913_v30  ;;  %v3616_v8 = vadd.f32 %v11975_v58, %v11974_v56  ;;  %vm11990_vm9 = vmmov %vm11977_vm5 }
 0x392   : > { %v4287_v6 = vmax.f32 %v4255_v15, 0.0  ;;  %v4171_v12 = vpop.f32.mrf.mxu1  ;;  %vm11997_vm8 = vmmov %vm11989_vm12 }
 0x393   : > { %11972 = vst [vmem:[#allocation23_spill] sm:$0xff] %v10004_v33  ;;  %v3853_v10 = vpop.f32.mrf.mxu0  ;;  %v10010_v19 = vpop.f32.mrf.mxu3 }
 0x394   : > { %11973 = vst [vmem:[#allocation15_spill] sm:$0xff] %v10006_v45  ;;  %v3902_v43 = vadd.f32 %v3853_v10, %v3616_v8  ;;  %v4474_v48 = vadd.f32 %v4473_v52, %v4287_v6 }
 0x395   : > { %11976 = vst [vmem:[#allocation22_spill] sm:$0xff] %v10010_v19 }
 0x396   : > { %v4220_v16 = vadd.f32 %v4171_v12, %v3902_v43  ;;  %v4529_v60 = vrot.slane %v4474_v48, 7  ;;  %v4981_v14 = vrot.slane %v4474_v48, 1 }
 0x398   : > { %v4256_v24 = vadd.f32 %v9484_v61, %v4220_v16  ;;  %v4552_v37 = vsel %vm11977_vm5, %v4528_v11, %v4529_v60  ;;  %v5004_v23 = vsel %vm11978_vm15, %v4980_v25, %v4981_v14  ;;  %v4476_v56 = vpop.f32.mrf.mxu2  ;;  %v11983_v25 = vld [vmem:[#allocation31_spill] sm:$0xff] }
 0x399   : > { %v5046_v15 = vsel %vm11979_vm4, %v5004_v23, 0.0  ;;  %v6366_v12 = vsel %vm11941_vm0, %v5004_v23, 0.0  ;;  %v5690_v10 = vsel %vm11960_vm6, %v5004_v23, 0.0  ;;  %vm11985_vm0 = vmmov %vm11966_vm2  ;;  %v11986_v23 = vld [vmem:[#allocation98_spill] sm:$0xff] }
 0x39a   : > { %v4288_v30 = vmax.f32 %v4256_v24, 0.0  ;;  %v10019_v58 = vpack.c.bf16 %v5046_v15, %v5005_v34  ;;  %v10027_v11 = vpack.c.bf16 %v6366_v12, %v5005_v34  ;;  %v10029_v6 = vpack.c.bf16 %v5690_v10, %v5005_v34  ;;  %v4174_v43 = vpop.f32.mrf.mxu1  ;;  %vm11988_vm2 = vmmov %vm11985_vm0 }
 0x39b   : > { %v3856_v16 = vpop.f32.mrf.mxu0  ;;  %v10025_v8 = vpop.f32.mrf.mxu3  ;;  %7124 = vmatmul.msk.bf16.gmra.mxu1 %vm11985_vm0, %v9650_v47  ;;  %vm11987_vm11 = vnez %v11986_v23  ;;  %v5271_v12 = vsel %vm11968_vm1, %v4552_v37, 0.0  ;;  %v5915_v47 = vsel %vm11949_vm3, %v4552_v37, 0.0  ;;  %vm11996_vm3 = vmmov %vm11977_vm5  ;;  %vm11998_vm5 = vnez %v11678_v40 }
 0x39c   : > { %11980 = vst [vmem:[#allocation37_spill] sm:$0xff] %v10025_v8  ;;  %v3903_v52 = vadd.f32 %v3856_v16, %v11983_v25  ;;  %v4477_v24 = vadd.f32 %v4476_v56, %v4288_v30  ;;  %v4595_v33 = vsel %vm11987_vm11, %v4552_v37, 0.0  ;;  %v11993_v25 = vld [vmem:[#allocation47_spill] sm:$0xff] }
 0x39d   : > { %11981 = vst [vmem:[#allocation17_spill] sm:$0xff] %v10027_v11 }
 0x39e   : > { %11982 = vst [vmem:[#allocation40_spill] sm:$0xff] %v10029_v6  ;;  %v4221_v45 = vadd.f32 %v4174_v43, %v3903_v52  ;;  %v4530_v15 = vrot.slane %v4477_v24, 7  ;;  %v10032_v19 = vpack.c.bf16 %v4477_v24, %v4474_v48  ;;  %v4982_v53 = vrot.slane %v4477_v24, 1 }
 0x3a0   : > { %11984 = vst [vmem:[#allocation32_spill] sm:$0xff] %v10032_v19  ;;  %v4257_v34 = vadd.f32 %v9484_v61, %v4221_v45  ;;  %7092 = vmatmul.msk.bf16.gmra.mxu3 %vm11988_vm2, %v10032_v19  ;;  %v5003_v30 = vsel %vm11989_vm12, %v4981_v14, %v4982_v53  ;;  %v4551_v48 = vsel %vm11990_vm9, %v4529_v60, %v4530_v15  ;;  %v11994_v45 = vld [vmem:[#allocation65_spill] sm:$0xff]  ;;  %v4479_v24 = vpop.f32.mrf.mxu2  ;;  %vm12007_vm2 = vmmov %vm11997_vm8 }
 0x3a1   : > { %v10049_v56 = vpack.c.bf16 %v4551_v48, %v4595_v33  ;;  %v10051_v10 = vpack.c.bf16 %v4551_v48, %v5271_v12  ;;  %v10053_v16 = vpack.c.bf16 %v4551_v48, %v5915_v47  ;;  %v3618_v52 = vadd.f32 %v11994_v45, %v11993_v25  ;;  %vm12008_vm12 = vmmov %vm11996_vm3 }
 0x3a2   : > { %v4289_v43 = vmax.f32 %v4257_v34, 0.0  ;;  %v4176_v8 = vpop.f32.mrf.mxu1  ;;  %vm12014_vm9 = vmmov %vm12007_vm2 }
 0x3a3   : > { %11991 = vst [vmem:[#allocation20_spill] sm:$0xff] %v10051_v10  ;;  %v3858_v6 = vpop.f32.mrf.mxu0  ;;  %v10057_v11 = vpop.f32.mrf.mxu3 }
 0x3a4   : > { %11992 = vst [vmem:[#allocation35_spill] sm:$0xff] %v10053_v16  ;;  %v3904_v14 = vadd.f32 %v3858_v6, %v3618_v52  ;;  %v4480_v60 = vadd.f32 %v4479_v24, %v4289_v43 }
 0x3a5   : > { %11995 = vst [vmem:[#allocation48_spill] sm:$0xff] %v10057_v11 }
 0x3a6   : > { %v4222_v19 = vadd.f32 %v4176_v8, %v3904_v14  ;;  %v4531_v51 = vrot.slane %v4480_v60, 7  ;;  %v4983_v37 = vrot.slane %v4480_v60, 1 }
 0x3a8   : > { %v4258_v33 = vadd.f32 %v9484_v61, %v4222_v19  ;;  %v4550_v12 = vsel %vm11996_vm3, %v4530_v15, %v4531_v51  ;;  %v5002_v48 = vsel %vm11997_vm8, %v4982_v53, %v4983_v37  ;;  %v4482_v25 = vpop.f32.mrf.mxu2  ;;  %v12002_v53 = vld [vmem:[#allocation77_spill] sm:$0xff]  ;;  %vm12020_vm8 = vmmov %vm11985_vm0 }
 0x3a9   : > { %v5048_v34 = vsel %vm11998_vm5, %v5002_v48, 0.0  ;;  %v6368_v8 = vsel %vm11960_vm6, %v5002_v48, 0.0  ;;  %v5692_v6 = vsel %vm11979_vm4, %v5002_v48, 0.0  ;;  %vm12004_vm6 = vmmov %vm11985_vm0  ;;  %v12005_v48 = vld [vmem:[#allocation105_spill] sm:$0xff] }
 0x3aa   : > { %v4290_v47 = vmax.f32 %v4258_v33, 0.0  ;;  %v10066_v45 = vpack.c.bf16 %v5048_v34, %v5003_v30  ;;  %v10074_v15 = vpack.c.bf16 %v6368_v8, %v5003_v30  ;;  %v10076_v52 = vpack.c.bf16 %v5692_v6, %v5003_v30  ;;  %v4179_v24 = vpop.f32.mrf.mxu1  ;;  %v10090_v30 = vld [vmem:[%s10955_s6] ss:$0 sm:$0xff] }
 0x3ab   : > { %v3861_v61 = vpop.f32.mrf.mxu0  ;;  %v10072_v19 = vpop.f32.mrf.mxu3  ;;  %7125 = vmatmul.msk.bf16.gmra.mxu1 %vm12004_vm6, %v9705_v1  ;;  %vm12006_vm15 = vnez %v12005_v48  ;;  %v5273_v8 = vsel %vm11987_vm11, %v4550_v12, 0.0  ;;  %vm12021_vm6 = vmmov %vm12007_vm2 }
 0x3ac   : > { %11999 = vst [vmem:[#allocation25_spill] sm:$0xff] %v10072_v19  ;;  %v3905_v43 = vadd.f32 %v3861_v61, %v12002_v53  ;;  %v4483_v14 = vadd.f32 %v4482_v25, %v4290_v47  ;;  %v4597_v11 = vsel %vm12006_vm15, %v4550_v12, 0.0  ;;  %v5917_v25 = vsel %vm11968_vm1, %v4550_v12, 0.0  ;;  %vm12013_vm1 = vmmov %vm11996_vm3 }
 0x3ad   : > { %12000 = vst [vmem:[#allocation51_spill] sm:$0xff] %v10074_v15 }
 0x3ae   : > { %12001 = vst [vmem:[#allocation26_spill] sm:$0xff] %v10076_v52  ;;  %v4223_v33 = vadd.f32 %v4179_v24, %v3905_v43  ;;  %v4532_v34 = vrot.slane %v4483_v14, 7  ;;  %v10079_v16 = vpack.c.bf16 %v4483_v14, %v4480_v60  ;;  %v4984_v27 = vrot.slane %v4483_v14, 1  ;;  %v12010_v43 = vld [vmem:[#allocation43_spill] sm:$0xff]  ;;  %v12011_v24 = vld [vmem:[#allocation58_spill] sm:$0xff] }
 0x3af   : > { %v3620_v14 = vadd.f32 %v12011_v24, %v12010_v43 }
 0x3b0   : > { %12003 = vst [vmem:[#allocation29_spill] sm:$0xff] %v10079_v16  ;;  %v4259_v47 = vadd.f32 %v10090_v30, %v4223_v33  ;;  %7093 = vmatmul.msk.bf16.gmra.mxu3 %vm11985_vm0, %v10079_v16  ;;  %v5001_v60 = vsel %vm12007_vm2, %v4983_v37, %v4984_v27  ;;  %v4549_v1 = vsel %vm12008_vm12, %v4531_v51, %v4532_v34  ;;  %v4485_v52 = vpop.f32.mrf.mxu2 }
 0x3b1   : > { %v10101_v6 = vpack.c.bf16 %v4549_v1, %v4597_v11  ;;  %v10103_v61 = vpack.c.bf16 %v4549_v1, %v5273_v8  ;;  %v10105_v53 = vpack.c.bf16 %v4549_v1, %v5917_v25 }
 0x3b2   : > { %v4291_v33 = vmax.f32 %v4259_v47, 0.0  ;;  %v4181_v16 = vpop.f32.mrf.mxu1 }
 0x3b3   : > { %12009 = vst [vmem:[#allocation30_spill] sm:$0xff] %v10105_v53  ;;  %v3863_v15 = vpop.f32.mrf.mxu0  ;;  %v10109_v19 = vpop.f32.mrf.mxu3 }
 0x3b4   : > { %12012 = vst [vmem:[#allocation61_spill] sm:$0xff] %v10109_v19  ;;  %v3906_v37 = vadd.f32 %v3863_v15, %v3620_v14  ;;  %v4486_v51 = vadd.f32 %v4485_v52, %v4291_v33 }
 0x3b6   : > { %v4224_v10 = vadd.f32 %v4181_v16, %v3906_v37  ;;  %v4533_v0 = vrot.slane %v4486_v51, 7  ;;  %v4985_v12 = vrot.slane %v4486_v51, 1 }
 0x3b8   : > { %v4260_v11 = vadd.f32 %v10090_v30, %v4224_v10  ;;  %v4548_v8 = vsel %vm12013_vm1, %v4532_v34, %v4533_v0  ;;  %v5000_v1 = vsel %vm12014_vm9, %v4984_v27, %v4985_v12  ;;  %v4488_v43 = vpop.f32.mrf.mxu2  ;;  %vm12032_vm9 = vmmov %vm12007_vm2 }
 0x3b9   : > { %v5050_v47 = vsel %vm8614_vm13, %v5000_v1, 0.0  ;;  %v6370_v16 = vsel %vm11979_vm4, %v5000_v1, 0.0  ;;  %v5694_v15 = vsel %vm11998_vm5, %v5000_v1, 0.0  ;;  %vm12017_vm4 = vmmov %vm11985_vm0  ;;  %v12018_v1 = vld [vmem:[#allocation112_spill] sm:$0xff] }
 0x3ba   : > { %v4292_v25 = vmax.f32 %v4260_v11, 0.0  ;;  %v10118_v24 = vpack.c.bf16 %v5050_v47, %v5001_v60  ;;  %v10126_v34 = vpack.c.bf16 %v6370_v16, %v5001_v60  ;;  %v10128_v14 = vpack.c.bf16 %v5694_v15, %v5001_v60  ;;  %v4184_v33 = vpop.f32.mrf.mxu1  ;;  %vm12022_vm0 = vmmov %vm12013_vm1 }
 0x3bb   : > { %v3866_v10 = vpop.f32.mrf.mxu0  ;;  %v10124_v52 = vpop.f32.mrf.mxu3  ;;  %7126 = vmatmul.msk.bf16.gmra.mxu1 %vm12017_vm4, %v9763_v57  ;;  %vm12019_vm3 = vnez %v12018_v1  ;;  %v5275_v16 = vsel %vm12006_vm15, %v4548_v8, 0.0  ;;  %v5919_v57 = vsel %vm11987_vm11, %v4548_v8, 0.0  ;;  %vm12025_vm11 = vmmov %vm12022_vm0 }
 0x3bc   : > { %12015 = vst [vmem:[#allocation64_spill] sm:$0xff] %v10126_v34  ;;  %v3907_v27 = vadd.f32 %v3866_v10, %v9423_v20  ;;  %v4489_v37 = vadd.f32 %v4488_v43, %v4292_v25  ;;  %v4599_v19 = vsel %vm12019_vm3, %v4548_v8, 0.0  ;;  %v3622_v10 = vadd.f32 %v9437_v42, %v9428_v41  ;;  %vm12031_vm1 = vmmov %vm12017_vm4 }
 0x3bd   : > { %12016 = vst [vmem:[#allocation34_spill] sm:$0xff] %v10128_v14 }
 0x3be   : > { %v4225_v11 = vadd.f32 %v4184_v33, %v3907_v27  ;;  %v4534_v47 = vrot.slane %v4489_v37, 7  ;;  %v10131_v53 = vpack.c.bf16 %v4489_v37, %v4486_v51  ;;  %v4986_v31 = vrot.slane %v4489_v37, 1 }
 0x3c0   : > { %v4261_v60 = vadd.f32 %v10090_v30, %v4225_v11  ;;  %7094 = vmatmul.msk.bf16.gmra.mxu3 %vm12020_vm8, %v10131_v53  ;;  %v4999_v20 = vsel %vm12021_vm6, %v4985_v12, %v4986_v31  ;;  %v4547_v51 = vsel %vm12022_vm0, %v4533_v0, %v4534_v47  ;;  %v4491_v33 = vpop.f32.mrf.mxu2  ;;  %vm12037_vm8 = vmmov %vm12007_vm2 }
 0x3c1   : > { %v10148_v25 = vpack.c.bf16 %v4547_v51, %v4599_v19  ;;  %v10150_v43 = vpack.c.bf16 %v4547_v51, %v5275_v16  ;;  %v10152_v15 = vpack.c.bf16 %v4547_v51, %v5919_v57 }
 0x3c2   : > { %v4293_v27 = vmax.f32 %v4261_v60, 0.0  ;;  %v4186_v14 = vpop.f32.mrf.mxu1 }
 0x3c3   : > { %12023 = vst [vmem:[#allocation42_spill] sm:$0xff] %v10152_v15  ;;  %v3868_v37 = vpop.f32.mrf.mxu0  ;;  %v10156_v11 = vpop.f32.mrf.mxu3 }
 0x3c4   : > { %12024 = vst [vmem:[#allocation56_spill] sm:$0xff] %v10156_v11  ;;  %v3908_v12 = vadd.f32 %v3868_v37, %v3622_v10  ;;  %v4492_v0 = vadd.f32 %v4491_v33, %v4293_v27 }
 0x3c6   : > { %v4226_v34 = vadd.f32 %v4186_v14, %v3908_v12  ;;  %v4535_v23 = vrot.slane %v4492_v0, 7  ;;  %v4987_v8 = vrot.slane %v4492_v0, 1 }
 0x3c8   : > { %v4262_v19 = vadd.f32 %v10090_v30, %v4226_v34  ;;  %v4546_v16 = vsel %vm12025_vm11, %v4534_v47, %v4535_v23  ;;  %v4998_v51 = vsel %vm12007_vm2, %v4986_v31, %v4987_v8  ;;  %v4494_v60 = vpop.f32.mrf.mxu2  ;;  %vm12045_vm11 = vmmov %vm12007_vm2 }
 0x3c9   : > { %v5052_v41 = vsel %vm8675_vm10, %v4998_v51, 0.0  ;;  %v6372_v14 = vsel %vm11998_vm5, %v4998_v51, 0.0  ;;  %v5696_v10 = vsel %vm8614_vm13, %v4998_v51, 0.0  ;;  %vm12028_vm5 = vmmov %vm12017_vm4  ;;  %v12029_v51 = vld [vmem:[#allocation116_spill] sm:$0xff] }
 0x3ca   : > { %v4294_v42 = vmax.f32 %v4262_v19, 0.0  ;;  %v10165_v57 = vpack.c.bf16 %v5052_v41, %v4999_v20  ;;  %v10173_v47 = vpack.c.bf16 %v6372_v14, %v4999_v20  ;;  %v10175_v33 = vpack.c.bf16 %v5696_v10, %v4999_v20  ;;  %v4189_v37 = vpop.f32.mrf.mxu1  ;;  %vm12033_vm4 = vmmov %vm12022_vm0 }
 0x3cb   : > { %v3871_v34 = vpop.f32.mrf.mxu0  ;;  %v10171_v27 = vpop.f32.mrf.mxu3  ;;  %7127 = vmatmul.msk.bf16.gmra.mxu1 %vm12028_vm5, %v9827_v17  ;;  %vm12030_vm12 = vnez %v12029_v51  ;;  %v5277_v14 = vsel %vm12019_vm3, %v4546_v16, 0.0  ;;  %v5921_v17 = vsel %vm12006_vm15, %v4546_v16, 0.0  ;;  %vm12036_vm15 = vmmov %vm12022_vm0 }
 0x3cc   : > { %12026 = vst [vmem:[#allocation74_spill] sm:$0xff] %v10173_v47  ;;  %v3909_v31 = vadd.f32 %v3871_v34, %v9446_v28  ;;  %v4495_v12 = vadd.f32 %v4494_v60, %v4294_v42  ;;  %v4601_v11 = vsel %vm12030_vm12, %v4546_v16, 0.0  ;;  %v3624_v34 = vadd.f32 %v9460_v13, %v9451_v55  ;;  %vm12044_vm0 = vmmov %vm12031_vm1 }
 0x3cd   : > { %12027 = vst [vmem:[#allocation49_spill] sm:$0xff] %v10175_v33  ;;  %vm12046_vm2 = vmmov %vm12033_vm4 }
 0x3ce   : > { %v4227_v19 = vadd.f32 %v4189_v37, %v3909_v31  ;;  %v4536_v41 = vrot.slane %v4495_v12, 7  ;;  %v10178_v15 = vpack.c.bf16 %v4495_v12, %v4492_v0  ;;  %v4988_v40 = vrot.slane %v4495_v12, 1  ;;  %vm12050_vm5 = vmmov %vm12046_vm2 }
 0x3d0   : > { %v4263_v20 = vadd.f32 %v10090_v30, %v4227_v19  ;;  %7095 = vmatmul.msk.bf16.gmra.mxu3 %vm12031_vm1, %v10178_v15  ;;  %v4997_v28 = vsel %vm12032_vm9, %v4987_v8, %v4988_v40  ;;  %v4545_v0 = vsel %vm12033_vm4, %v4535_v23, %v4536_v41  ;;  %v4497_v37 = vpop.f32.mrf.mxu2  ;;  %vm12057_vm9 = vmmov %vm12044_vm0 }
 0x3d1   : > { %v10195_v42 = vpack.c.bf16 %v4545_v0, %v4601_v11  ;;  %v10197_v60 = vpack.c.bf16 %v4545_v0, %v5277_v14  ;;  %v10199_v10 = vpack.c.bf16 %v4545_v0, %v5921_v17  ;;  %vm12060_vm4 = vmmov %vm12046_vm2 }
 0x3d2   : > { %v4295_v31 = vmax.f32 %v4263_v20, 0.0  ;;  %v4191_v33 = vpop.f32.mrf.mxu1 }
 0x3d3   : > { %12034 = vst [vmem:[#allocation76_spill] sm:$0xff] %v10199_v10  ;;  %v3873_v12 = vpop.f32.mrf.mxu0  ;;  %v10203_v19 = vpop.f32.mrf.mxu3 }
 0x3d4   : > { %12035 = vst [vmem:[#allocation59_spill] sm:$0xff] %v10203_v19  ;;  %v3910_v8 = vadd.f32 %v3873_v12, %v3624_v34  ;;  %v4498_v23 = vadd.f32 %v4497_v37, %v4295_v31 }
 0x3d6   : > { %v4228_v47 = vadd.f32 %v4191_v33, %v3910_v8  ;;  %v4537_v48 = vrot.slane %v4498_v23, 7  ;;  %v4989_v16 = vrot.slane %v4498_v23, 1 }
 0x3d8   : > { %v4264_v11 = vadd.f32 %v10090_v30, %v4228_v47  ;;  %v4544_v14 = vsel %vm12036_vm15, %v4536_v41, %v4537_v48  ;;  %v4996_v0 = vsel %vm12037_vm8, %v4988_v40, %v4989_v16  ;;  %v4500_v20 = vpop.f32.mrf.mxu2  ;;  %vm12061_vm15 = vmmov %vm12046_vm2 }
 0x3d9   : > { %v5054_v55 = vsel %vm8738_vm14, %v4996_v0, 0.0  ;;  %v6374_v33 = vsel %vm8614_vm13, %v4996_v0, 0.0  ;;  %v5698_v34 = vsel %vm8675_vm10, %v4996_v0, 0.0  ;;  %vm12041_vm13 = vmmov %vm12031_vm1  ;;  %v12042_v0 = vld [vmem:[#allocation119_spill] sm:$0xff] }
 0x3da   : > { %v4296_v13 = vmax.f32 %v4264_v11, 0.0  ;;  %v10212_v17 = vpack.c.bf16 %v5054_v55, %v4997_v28  ;;  %v10220_v41 = vpack.c.bf16 %v6374_v33, %v4997_v28  ;;  %v10222_v37 = vpack.c.bf16 %v5698_v34, %v4997_v28  ;;  %v4194_v12 = vpop.f32.mrf.mxu1 }
 0x3db   : > { %v3876_v47 = vpop.f32.mrf.mxu0  ;;  %v10218_v31 = vpop.f32.mrf.mxu3  ;;  %7128 = vmatmul.msk.bf16.gmra.mxu1 %vm12041_vm13, %v9880_v59  ;;  %vm12043_vm6 = vnez %v12042_v0  ;;  %v5279_v33 = vsel %vm12030_vm12, %v4544_v14, 0.0  ;;  %v5923_v59 = vsel %vm12019_vm3, %v4544_v14, 0.0  ;;  %vm12049_vm3 = vmmov %vm12037_vm8 }
 0x3dc   : > { %12038 = vst [vmem:[#allocation53_spill] sm:$0xff] %v10218_v31  ;;  %v3911_v40 = vadd.f32 %v3876_v47, %v9469_v54  ;;  %v4501_v8 = vadd.f32 %v4500_v20, %v4296_v13  ;;  %v4603_v19 = vsel %vm12043_vm6, %v4544_v14, 0.0  ;;  %v12048_v47 = vld [vmem:[#allocation36_spill] sm:$0xff]  ;;  %vm12062_vm8 = vmmov %vm12049_vm3 }
 0x3dd   : > { %12039 = vst [vmem:[#allocation62_spill] sm:$0xff] %v10220_v41  ;;  %vm12064_vm13 = vmmov %vm12049_vm3 }
 0x3de   : > { %12040 = vst [vmem:[#allocation66_spill] sm:$0xff] %v10222_v37  ;;  %v4229_v11 = vadd.f32 %v4194_v12, %v3911_v40  ;;  %v4538_v55 = vrot.slane %v4501_v8, 7  ;;  %v10225_v10 = vpack.c.bf16 %v4501_v8, %v4498_v23  ;;  %v4990_v38 = vrot.slane %v4501_v8, 1 }
 0x3df   : > { %v3626_v40 = vadd.f32 %v9876_v49, %v12048_v47  ;;  %v12051_v49 = vld [vmem:[#allocation121_spill] sm:$0xff] }
 0x3e0   : > { %v4265_v28 = vadd.f32 %v10090_v30, %v4229_v11  ;;  %7096 = vmatmul.msk.bf16.gmra.mxu3 %vm12044_vm0, %v10225_v10  ;;  %v4995_v54 = vsel %vm12045_vm11, %v4989_v16, %v4990_v38  ;;  %v4543_v23 = vsel %vm12046_vm2, %v4537_v48, %v4538_v55  ;;  %v4503_v8 = vpop.f32.mrf.mxu2  ;;  %vm12052_vm1 = vnez %v12051_v49  ;;  %vm12075_vm11 = vmmov %vm12044_vm0 }
 0x3e1   : > { %v10242_v13 = vpack.c.bf16 %v4543_v23, %v4603_v19  ;;  %v10244_v20 = vpack.c.bf16 %v4543_v23, %v5279_v33  ;;  %v10246_v34 = vpack.c.bf16 %v4543_v23, %v5923_v59  ;;  %vm12077_vm2 = vmmov %vm12044_vm0 }
 0x3e2   : > { %v4297_v12 = vmax.f32 %v4265_v28, 0.0  ;;  %v4196_v41 = vpop.f32.mrf.mxu1 }
 0x3e3   : > { %12047 = vst [vmem:[#allocation78_spill] sm:$0xff] %v10246_v34  ;;  %v3878_v11 = vpop.f32.mrf.mxu0  ;;  %v10250_v37 = vpop.f32.mrf.mxu3 }
 0x3e4   : > { %v3912_v16 = vadd.f32 %v3878_v11, %v3626_v40  ;;  %v4504_v48 = vadd.f32 %v4503_v8, %v4297_v12 }
 0x3e6   : > { %v4230_v31 = vadd.f32 %v4196_v41, %v3912_v16  ;;  %v4539_v1 = vrot.slane %v4504_v48, 7  ;;  %v4991_v14 = vrot.slane %v4504_v48, 1 }
 0x3e8   : > { %v4266_v19 = vadd.f32 %v10090_v30, %v4230_v31  ;;  %v4994_v33 = vsel %vm12049_vm3, %v4990_v38, %v4991_v14  ;;  %v4542_v23 = vsel %vm12050_vm5, %v4538_v55, %v4539_v1  ;;  %v4506_v40 = vpop.f32.mrf.mxu2  ;;  %vm12078_vm3 = vmmov %vm12044_vm0 }
 0x3e9   : > { %v5056_v28 = vsel %vm12052_vm1, %v4994_v33, 0.0  ;;  %v6376_v59 = vsel %vm8675_vm10, %v4994_v33, 0.0  ;;  %v5700_v30 = vsel %vm8738_vm14, %v4994_v33, 0.0  ;;  %vm12055_vm10 = vmmov %vm12044_vm0  ;;  %v5281_v33 = vsel %vm12043_vm6, %v4542_v23, 0.0 }
 0x3ea   : > { %v4298_v47 = vmax.f32 %v4266_v19, 0.0  ;;  %v10261_v12 = vpack.c.bf16 %v5056_v28, %v4995_v54  ;;  %v10263_v41 = vpack.c.bf16 %v6376_v59, %v4995_v54  ;;  %v10269_v8 = vpack.c.bf16 %v5700_v30, %v4995_v54  ;;  %v5139_v16 = vpop.f32.mrf.mxu1  ;;  %v12056_v59 = vld [vmem:[#allocation46_spill] sm:$0xff]  ;;  %v12065_v30 = vld [vmem:[#allocation8_spill] sm:$0xff]  ;;  %vm12072_vm6 = vmmov %vm12044_vm0 }
 0x3eb   : > { %v10267_v31 = vpop.f32.mrf.mxu3  ;;  %v4881_v38 = vpop.f32.mrf.mxu0  ;;  %7129 = vmatmul.msk.bf16.gmra.mxu1 %vm12055_vm10, %v9925_v50  ;;  %v5925_v54 = vsel %vm12030_vm12, %v4542_v23, 0.0  ;;  %vm12066_vm12 = vnez %v12065_v30  ;;  %vm12079_vm5 = vmmov %vm12044_vm0 }
 0x3ec   : > { %12053 = vst [vmem:[#allocation86_spill] sm:$0xff] %v10263_v41  ;;  %v4507_v55 = vadd.f32 %v4506_v40, %v4298_v47  ;;  %v4882_v11 = vadd.f32 %v4881_v38, %v9908_v22  ;;  %v12058_v22 = vld [vmem:[#allocation52_spill] sm:$0xff]  ;;  %vm12082_vm10 = vmmov %vm12044_vm0 }
 0x3ed   : > { %12054 = vst [vmem:[#allocation95_spill] sm:$0xff] %v10269_v8  ;;  %v12059_v47 = vrot.slane %v12058_v22, 7  ;;  %v12063_v0 = vrot.slane %v12058_v22, 1  ;;  %v12111_v8 = vld [vmem:[#allocation5_spill] sm:$0xff] }
 0x3ee   : > { %v4540_v26 = vrot.slane %v4507_v55, 7  ;;  %v4992_v34 = vrot.slane %v4507_v55, 1  ;;  %v10272_v19 = vpack.c.bf16 %v4507_v55, %v4504_v48  ;;  %v10274_v28 = vadd.f32 %v5139_v16, %v4882_v11  ;;  %v12068_v16 = vld [vmem:[#allocation83_spill] sm:$0xff] }
 0x3f0   : > { %7165 = vmatmul.msk.bf16.vlgmr.msrb.gmra.mxu3 %vm12057_vm9, %v12056_v59  ;;  %v4572_v48 = vsel %vm12060_vm4, %v4540_v26, %v12059_v47  ;;  %v4541_v40 = vsel %vm12061_vm15, %v4539_v1, %v4540_v26  ;;  %v4993_v50 = vsel %vm12062_vm8, %v4991_v14, %v4992_v34  ;;  %v5024_v51 = vsel %vm12064_vm13, %v4992_v34, %v12063_v0  ;;  %vm12083_vm9 = vmmov %vm12044_vm0 }
 0x3f1   : > { %v4575_v23 = vsel %vm11834_vm7, %v4572_v48, 0.0  ;;  %v5251_v38 = vsel %vm12066_vm12, %v4572_v48, 0.0  ;;  %v10300_v55 = vpack.c.bf16 %v4541_v40, %v5281_v33  ;;  %v10302_v11 = vpack.c.bf16 %v4541_v40, %v5925_v54  ;;  %vm12071_vm7 = vmmov %vm12044_vm0  ;;  %v12076_v48 = vld [vmem:[#allocation81_spill] sm:$0xff] }
 0x3f2   : > { %v4606_v1 = vpack.c.bf16 %v12068_v16, %v4575_v23  ;;  %v5283_v26 = vpack.c.bf16 %v12068_v16, %v5251_v38  ;;  %v6378_v14 = vsel %vm8738_vm14, %v5024_v51, 0.0  ;;  %v5702_v5 = vsel %vm12052_vm1, %v5024_v51, 0.0  ;;  %v10316_v33 = vpop.f32.mrf.mxu1  ;;  %vm12073_vm14 = vmmov %vm12044_vm0 }
 0x3f3   : > { %12067 = vst [vmem:[#allocation13_spill] sm:$0xff] %v10302_v11  ;;  %v10310_v34 = vpop.f32.mrf.mxu3  ;;  %v10312_v62 = vpack.c.bf16 %v6378_v14, %v4993_v50  ;;  %v10314_v59 = vpack.c.bf16 %v5702_v5, %v4993_v50  ;;  %vm12080_vm1 = vmmov %vm12044_vm0  ;;  %v7299_v14 = vld [vmem:[%s10956_s7 + $0x30] sm:$0xff]  ;;  %v12102_v5 = vld [vmem:[#allocation108_spill] sm:$0xff] }
 0x3f4   : > { %7101 = vmatmul.msk.bf16.gmra.mxu0 %vm12071_vm7, %v4606_v1  ;;  %7143 = vmatmul.msk.bf16.vlgmr.msrb.gmra.mxu2 %vm12072_vm6, %v5283_v26  ;;  %vm12084_vm4 = vmmov %vm12044_vm0  ;;  %v12096_v1 = vld [vmem:[#allocation107_spill] sm:$0xff]  ;;  %v12098_v26 = vld [vmem:[#allocation102_spill] sm:$0xff] }
 0x3f5   : > { %12069 = vst [vmem:[#allocation10_spill] sm:$0xff] %v10312_v62  ;;  %vm12085_vm15 = vmmov %vm12044_vm0  ;;  %6009 = vmatpush.bf16.msra.mxu1 %v7299_v14  ;;  %v12107_v14 = vld [vmem:[#allocation113_spill] sm:$0xff] }
 0x3f6   : > { %12070 = vst [vmem:[#allocation103_spill] sm:$0xff] %v10314_v59  ;;  %vm12086_vm8 = vmmov %vm12044_vm0 }
 0x3f7   : > { %vm12088_vm13 = vmmov %vm12044_vm0 }
 0x3f8   : > { %vm12089_vm12 = vmmov %vm12044_vm0 }
 0x3f9   : > { %vm12091_vm7 = vmmov %vm12044_vm0 }
 0x3fa   : > { %v10322_v22 = vpop.f32.mrf.mxu1  ;;  %vm12092_vm6 = vmmov %vm12044_vm0 }
 0x3fb   : > { %v10320_v54 = vpop.f32.mrf.mxu3  ;;  %7130 = vmatmul.msk.bf16.gmra.mxu1 %vm12073_vm14, %v9972_v63  ;;  %vm12094_vm14 = vmmov %vm12044_vm0 }
 0x400   : > { %7166 = vmatmul.msk.bf16.gmra.mxu3 %vm12044_vm0, %v12074_v4 }
 0x402   : > { %v10330_v47 = vpop.f32.mrf.mxu1 }
 0x403   : > { %v10328_v49 = vpop.f32.mrf.mxu3 }
 0x404   : > { %7102 = vmatmul.msk.bf16.gmra.mxu0 %vm12075_vm11, %v9574_v3  ;;  %7144 = vmatmul.msk.bf16.gmra.mxu2 %vm12077_vm2, %v12076_v48  ;;  %v12081_v3 = vld [vmem:[#allocation87_spill] sm:$0xff]  ;;  %vm12097_vm11 = vmmov %vm12044_vm0  ;;  %v7298_v48 = vld [vmem:[%s10956_s7 + $0x28] sm:$0xff] }
 0x405   : > { %vm12099_vm2 = vmmov %vm12044_vm0  ;;  %5783 = vmatpush.bf16.msrb.mxu0 %v7298_v48  ;;  %v12115_v48 = vld [vmem:[#allocation7_spill] sm:$0xff] }
 0x40a   : > { %v10338_v50 = vpop.f32.mrf.mxu1 }
 0x40b   : > { %v10336_v40 = vpop.f32.mrf.mxu3  ;;  %7131 = vmatmul.msk.bf16.gmra.mxu1 %vm12078_vm3, %v10019_v58  ;;  %vm12101_vm3 = vmmov %vm12044_vm0 }
 0x410   : > { %7167 = vmatmul.msk.bf16.gmra.mxu3 %vm12079_vm5, %v9610_v2  ;;  %vm12103_vm5 = vmmov %vm12044_vm0 }
 0x412   : > { %v10346_v0 = vpop.f32.mrf.mxu1 }
 0x413   : > { %v10344_v63 = vpop.f32.mrf.mxu3 }
 0x414   : > { %7103 = vmatmul.msk.bf16.gmra.mxu0 %vm12080_vm1, %v9629_v44  ;;  %7145 = vmatmul.msk.bf16.gmra.mxu2 %vm12082_vm10, %v12081_v3  ;;  %v7301_v3 = vld [vmem:[%s10956_s7 + $0x40] sm:$0xff]  ;;  %vm12106_vm1 = vmmov %vm12044_vm0 }
 0x415   : > { %6461 = vmatpush.bf16.msra.mxu3 %v7301_v3  ;;  %vm12108_vm10 = vmmov %vm12044_vm0 }
 0x41a   : > { %v10354_v23 = vpop.f32.mrf.mxu1 }
 0x41b   : > { %v10352_v51 = vpop.f32.mrf.mxu3  ;;  %7132 = vmatmul.msk.bf16.gmra.mxu1 %vm12083_vm9, %v10066_v45  ;;  %vm12110_vm9 = vmmov %vm12044_vm0 }
 0x420   : > { %7168 = vmatmul.msk.bf16.gmra.mxu3 %vm12084_vm4, %v9665_v36  ;;  %vm12112_vm4 = vmmov %vm12044_vm0 }
 0x422   : > { %v10362_v30 = vpop.f32.mrf.mxu1 }
 0x423   : > { %v10360_v58 = vpop.f32.mrf.mxu3 }
 0x424   : > { %7104 = vmatmul.msk.bf16.gmra.mxu0 %vm12085_vm15, %v9684_v39  ;;  %7146 = vmatmul.msk.bf16.gmra.mxu2 %vm12086_vm8, %v9686_v35  ;;  %vm12114_vm15 = vmmov %vm12044_vm0 }
 0x425   : > { %vm12116_vm8 = vmmov %vm12044_vm0 }
 0x42a   : > { %v10370_v38 = vpop.f32.mrf.mxu1 }
 0x42b   : > { %v10368_v44 = vpop.f32.mrf.mxu3  ;;  %7133 = vmatmul.msk.bf16.gmra.mxu1 %vm12088_vm13, %v10118_v24  ;;  %vm12119_vm13 = vmmov %vm12044_vm0 }
 0x42c   : > { %12087 = vst [vmem:[#allocation16_spill] sm:$0xff] %v10368_v44 }
 0x430   : > { %7169 = vmatmul.msk.bf16.gmra.mxu3 %vm12089_vm12, %v9720_v7  ;;  %vm12121_vm12 = vmmov %vm12044_vm0 }
 0x432   : > { %v10378_v16 = vpop.f32.mrf.mxu1 }
 0x433   : > { %v10376_v45 = vpop.f32.mrf.mxu3 }
 0x434   : > { %12090 = vst [vmem:[#allocation110_spill] sm:$0xff] %v10376_v45  ;;  %7105 = vmatmul.msk.bf16.gmra.mxu0 %vm12091_vm7, %v9739_v18  ;;  %7147 = vmatmul.msk.bf16.gmra.mxu2 %vm12092_vm6, %v9741_v21  ;;  %vm12122_vm7 = vmmov %vm12044_vm0  ;;  %v12128_v45 = vld [vmem:[#allocation27_spill] sm:$0xff] }
 0x435   : > { %vm12124_vm6 = vmmov %vm12044_vm0 }
 0x43a   : > { %v10386_v35 = vpop.f32.mrf.mxu1 }
 0x43b   : > { %v10384_v39 = vpop.f32.mrf.mxu3  ;;  %7134 = vmatmul.msk.bf16.gmra.mxu1 %vm12094_vm14, %v10165_v57  ;;  %v7300_v57 = vld [vmem:[%s10956_s7 + $0x38] sm:$0xff]  ;;  %vm12127_vm14 = vmmov %vm12044_vm0 }
 0x43c   : > { %12093 = vst [vmem:[#allocation21_spill] sm:$0xff] %v10384_v39  ;;  %6235 = vmatpush.bf16.msra.mxu2 %v7300_v57  ;;  %v12126_v39 = vld [vmem:[#allocation92_spill] sm:$0xff] }
 0x440   : > { %7170 = vmatmul.msk.bf16.gmra.mxu3 %vm12044_vm0, %v9784_v46 }
 0x442   : > { %v10398_v18 = vpop.f32.mrf.mxu1 }
 0x443   : > { %v10392_v24 = vpop.f32.mrf.mxu3 }
 0x444   : > { %12095 = vst [vmem:[#allocation114_spill] sm:$0xff] %v10392_v24  ;;  %7106 = vmatmul.msk.bf16.gmra.mxu0 %vm12097_vm11, %v12096_v1  ;;  %7148 = vmatmul.msk.bf16.gmra.mxu2 %vm12099_vm2, %v12098_v26  ;;  %v12105_v26 = vld [vmem:[#allocation115_spill] sm:$0xff]  ;;  %vm12131_vm11 = vmmov %vm12044_vm0 }
 0x445   : > { %vm12133_vm2 = vmmov %vm12044_vm0 }
 0x44a   : > { %v10418_v1 = vpop.f32.mrf.mxu1 }
 0x44b   : > { %v10400_v21 = vpop.f32.mrf.mxu3  ;;  %7135 = vmatmul.msk.bf16.gmra.mxu1 %vm12101_vm3, %v10212_v17  ;;  %vm12136_vm3 = vmmov %vm12044_vm0 }
 0x44c   : > { %12100 = vst [vmem:[#allocation33_spill] sm:$0xff] %v10400_v21  ;;  %v12125_v21 = vld [vmem:[#allocation6_spill] sm:$0xff] }
 0x450   : > { %7171 = vmatmul.msk.bf16.gmra.mxu3 %vm12103_vm5, %v12102_v5  ;;  %vm12138_vm5 = vmmov %vm12044_vm0 }
 0x452   : > { %v10426_v59 = vpop.f32.mrf.mxu1 }
 0x453   : > { %v10420_v17 = vpop.f32.mrf.mxu3 }
 0x454   : > { %12104 = vst [vmem:[#allocation38_spill] sm:$0xff] %v10420_v17  ;;  %7107 = vmatmul.msk.bf16.gmra.mxu0 %vm12106_vm1, %v12105_v26  ;;  %7149 = vmatmul.msk.bf16.gmra.mxu2 %vm12108_vm10, %v12107_v14  ;;  %v4883_v26 = vpop.f32.mrf.mxu0  ;;  %vm12141_vm1 = vmmov %vm12044_vm0 }
 0x455   : > { %v4884_v5 = vadd.f32 %v4883_v26, %v12125_v21  ;;  %v12134_v26 = vld [vmem:[#allocation124_spill] sm:$0xff]  ;;  %vm12143_vm10 = vmmov %vm12044_vm0 }
 0x45a   : > { %v10440_v3 = vpop.f32.mrf.mxu1 }
 0x45b   : > { %v10428_v62 = vpop.f32.mrf.mxu3  ;;  %7136 = vmatmul.msk.bf16.gmra.mxu1 %vm12110_vm9, %v10261_v12  ;;  %v12120_v12 = vld [vmem:[#allocation11_spill] sm:$0xff]  ;;  %vm12146_vm9 = vmmov %vm12044_vm0 }
 0x45c   : > { %12109 = vst [vmem:[#allocation72_spill] sm:$0xff] %v10428_v62  ;;  %v12118_v62 = vld [vmem:[#allocation85_spill] sm:$0xff] }
 0x460   : > { %7172 = vmatmul.msk.bf16.gmra.mxu3 %vm12112_vm4, %v12111_v8  ;;  %vm12148_vm4 = vmmov %vm12044_vm0 }
 0x462   : > { %v10444_v41 = vpop.f32.mrf.mxu1 }
 0x463   : > { %v10434_v57 = vpop.f32.mrf.mxu3 }
 0x464   : > { %12113 = vst [vmem:[#allocation69_spill] sm:$0xff] %v10434_v57  ;;  %7108 = vmatmul.msk.bf16.gmra.mxu0 %vm12114_vm15, %v9910_v29  ;;  %7150 = vmatmul.msk.bf16.gmra.mxu2 %vm12116_vm8, %v12115_v48  ;;  %v12123_v29 = vld [vmem:[#allocation19_spill] sm:$0xff]  ;;  %vm12150_vm15 = vmmov %vm12044_vm0 }
 0x465   : > { %vm12151_vm8 = vmmov %vm12044_vm0 }
 0x46b   : > { %v10442_v14 = vpop.f32.mrf.mxu3  ;;  %7209 = vmatmul.msk.bf16.vlgmr.msra.gmra.mxu1 %vm12119_vm13, %v12118_v62  ;;  %vm12154_vm13 = vmmov %vm12044_vm0 }
 0x46c   : > { %12117 = vst [vmem:[#allocation45_spill] sm:$0xff] %v10442_v14  ;;  %v10455_v14 = vpop.f32.mrf.mxu1 }
 0x470   : > { %7173 = vmatmul.msk.bf16.gmra.mxu3 %vm12121_vm12, %v12120_v12  ;;  %v5220_v12 = vadd.f32 %v10316_v33, %v4884_v5  ;;  %v12132_v33 = vld [vmem:[#allocation23_spill] sm:$0xff]  ;;  %vm12155_vm12 = vmmov %vm12044_vm0 }
 0x471   : > { %v4886_v57 = vpop.f32.mrf.mxu0 }
 0x473   : > { %v5559_v8 = vpop.f32.mrf.mxu3 }
 0x474   : > { %7109 = vmatmul.msk.bf16.gmra.mxu0 %vm12122_vm7, %v9955_v32  ;;  %7151 = vmatmul.msk.bf16.gmra.mxu2 %vm12124_vm6, %v12123_v29  ;;  %v10468_v7 = vpop.f32.mrf.mxu1  ;;  %vm12157_vm7 = vmmov %vm12044_vm0 }
 0x475   : > { %vm12158_vm6 = vmmov %vm12044_vm0 }
 0x477   : > { %v5365_v48 = vpop.f32.mrf.mxu2 }
 0x478   : > { %v5445_v17 = vadd.f32 %v5365_v48, %v10274_v28  ;;  %v12129_v28 = vld [vmem:[#allocation12_spill] sm:$0xff] }
 0x479   : > { %v4888_v11 = vpop.f32.mrf.mxu0  ;;  %v4887_v48 = vadd.f32 %v4886_v57, %v12129_v28  ;;  %v12135_v28 = vld [vmem:[#allocation90_spill] sm:$0xff] }
 0x47a   : > { %v10458_v62 = vadd.f32 %v5559_v8, %v5445_v17 }
 0x47b   : > { %v5561_v24 = vpop.f32.mrf.mxu3  ;;  %7210 = vmatmul.msk.bf16.gmra.mxu1 %vm12127_vm14, %v12126_v39  ;;  %v5221_v39 = vadd.f32 %v10322_v22, %v4887_v48  ;;  %v12139_v48 = vld [vmem:[#allocation22_spill] sm:$0xff]  ;;  %vm12160_vm14 = vmmov %vm12044_vm0 }
 0x47f   : > { %v5367_v32 = vpop.f32.mrf.mxu2 }
 0x480   : > { %v5446_v46 = vadd.f32 %v5367_v32, %v5220_v12  ;;  %7174 = vmatmul.msk.bf16.gmra.mxu3 %vm12044_vm0, %v12128_v45  ;;  %v4889_v12 = vadd.f32 %v4888_v11, %v12134_v26 }
 0x481   : > { %v4891_v29 = vpop.f32.mrf.mxu0 }
 0x482   : > { %v10466_v44 = vadd.f32 %v5561_v24, %v5446_v46  ;;  %v10478_v24 = vpop.f32.mrf.mxu1  ;;  %v5222_v57 = vadd.f32 %v10330_v47, %v4889_v12 }
 0x483   : > { %v5564_v8 = vpop.f32.mrf.mxu3 }
 0x484   : > { %12130 = vst [vmem:[#allocation28_spill] sm:$0xff] %v10466_v44  ;;  %7110 = vmatmul.msk.bf16.gmra.mxu0 %vm12131_vm11, %v10002_v9  ;;  %7152 = vmatmul.msk.bf16.gmra.mxu2 %vm12133_vm2, %v12132_v33  ;;  %v12137_v33 = vld [vmem:[#allocation32_spill] sm:$0xff]  ;;  %vm12162_vm11 = vmmov %vm12044_vm0 }
 0x485   : > { %vm12163_vm2 = vmmov %vm12044_vm0 }
 0x487   : > { %v5370_v21 = vpop.f32.mrf.mxu2 }
 0x488   : > { %v5447_v5 = vadd.f32 %v5370_v21, %v5221_v39  ;;  %v4892_v39 = vadd.f32 %v4891_v29, %v12139_v48 }
 0x489   : > { %v4893_v17 = vpop.f32.mrf.mxu0 }
 0x48a   : > { %v10476_v32 = vadd.f32 %v5564_v8, %v5447_v5  ;;  %v12142_v8 = vld [vmem:[#allocation20_spill] sm:$0xff]  ;;  %v5223_v47 = vadd.f32 %v10338_v50, %v4892_v39  ;;  %v10493_v5 = vpop.f32.mrf.mxu1 }
 0x48b   : > { %v5566_v46 = vpop.f32.mrf.mxu3  ;;  %7211 = vmatmul.msk.bf16.gmra.mxu1 %vm12136_vm3, %v12135_v28  ;;  %v12144_v28 = vld [vmem:[#allocation37_spill] sm:$0xff]  ;;  %vm12165_vm3 = vmmov %vm12044_vm0 }
 0x48f   : > { %v5372_v9 = vpop.f32.mrf.mxu2 }
 0x490   : > { %v5448_v44 = vadd.f32 %v5372_v9, %v5222_v57  ;;  %7175 = vmatmul.msk.bf16.gmra.mxu3 %vm12138_vm5, %v12137_v33  ;;  %v4894_v9 = vadd.f32 %v4893_v17, %v12144_v28  ;;  %vm12166_vm5 = vmmov %vm12044_vm0 }
 0x491   : > { %v4896_v22 = vpop.f32.mrf.mxu0 }
 0x492   : > { %v10486_v21 = vadd.f32 %v5566_v46, %v5448_v44  ;;  %v5224_v29 = vadd.f32 %v10346_v0, %v4894_v9  ;;  %v12145_v46 = vld [vmem:[#allocation101_spill] sm:$0xff]  ;;  %v10503_v50 = vpop.f32.mrf.mxu1 }
 0x493   : > { %v5569_v11 = vpop.f32.mrf.mxu3  ;;  %v12152_v9 = vld [vmem:[#allocation25_spill] sm:$0xff] }
 0x494   : > { %12140 = vst [vmem:[#allocation63_spill] sm:$0xff] %v10486_v21  ;;  %7111 = vmatmul.msk.bf16.gmra.mxu0 %vm12141_vm1, %v10049_v56  ;;  %7153 = vmatmul.msk.bf16.gmra.mxu2 %vm12143_vm10, %v12142_v8  ;;  %v12147_v8 = vld [vmem:[#allocation29_spill] sm:$0xff]  ;;  %vm12168_vm1 = vmmov %vm12044_vm0 }
 0x495   : > { %vm12169_vm10 = vmmov %vm12044_vm0 }
 0x497   : > { %v5375_v26 = vpop.f32.mrf.mxu2 }
 0x498   : > { %v5449_v12 = vadd.f32 %v5375_v26, %v5223_v47  ;;  %v12149_v47 = vld [vmem:[#allocation48_spill] sm:$0xff] }
 0x499   : > { %v4898_v57 = vpop.f32.mrf.mxu0  ;;  %v4897_v26 = vadd.f32 %v4896_v22, %v12149_v47 }
 0x49a   : > { %v10496_v33 = vadd.f32 %v5569_v11, %v5449_v12 }
 0x49b   : > { %v5571_v44 = vpop.f32.mrf.mxu3  ;;  %7212 = vmatmul.msk.bf16.gmra.mxu1 %vm12146_vm9, %v12145_v46  ;;  %v5225_v0 = vadd.f32 %v10354_v23, %v4897_v26  ;;  %v12156_v23 = vld [vmem:[#allocation61_spill] sm:$0xff]  ;;  %vm12172_vm9 = vmmov %vm12044_vm0 }
 0x49f   : > { %v5377_v56 = vpop.f32.mrf.mxu2 }
 0x4a0   : > { %v5450_v48 = vadd.f32 %v5377_v56, %v5224_v29  ;;  %7176 = vmatmul.msk.bf16.gmra.mxu3 %vm12148_vm4, %v12147_v8  ;;  %v4899_v29 = vadd.f32 %v4898_v57, %v12152_v9  ;;  %v10516_v56 = vpop.f32.mrf.mxu1  ;;  %vm12173_vm4 = vmmov %vm12044_vm0 }
 0x4a1   : > { %v4901_v39 = vpop.f32.mrf.mxu0 }
 0x4a2   : > { %v10506_v21 = vadd.f32 %v5571_v44, %v5450_v48  ;;  %v5226_v44 = vadd.f32 %v10362_v30, %v4899_v29  ;;  %v12153_v48 = vld [vmem:[#allocation109_spill] sm:$0xff]  ;;  %v4902_v26 = vadd.f32 %v4901_v39, %v12156_v23 }
 0x4a3   : > { %v5574_v17 = vpop.f32.mrf.mxu3 }
 0x4a4   : > { %7112 = vmatmul.msk.bf16.gmra.mxu0 %vm12150_vm15, %v10101_v6  ;;  %7154 = vmatmul.msk.bf16.gmra.mxu2 %vm12151_vm8, %v10103_v61  ;;  %vm12174_vm15 = vmmov %vm12044_vm0 }
 0x4a5   : > { %vm12176_vm8 = vmmov %vm12044_vm0 }
 0x4a7   : > { %v5380_v11 = vpop.f32.mrf.mxu2 }
 0x4a8   : > { %v5451_v12 = vadd.f32 %v5380_v11, %v5225_v0  ;;  %v10530_v30 = vpop.f32.mrf.mxu1 }
 0x4a9   : > { %v4903_v28 = vpop.f32.mrf.mxu0 }
 0x4aa   : > { %v10514_v46 = vadd.f32 %v5574_v17, %v5451_v12  ;;  %v5227_v17 = vadd.f32 %v10370_v38, %v4902_v26  ;;  %v4904_v29 = vadd.f32 %v4903_v28, %v10124_v52 }
 0x4ab   : > { %v5576_v22 = vpop.f32.mrf.mxu3  ;;  %7213 = vmatmul.msk.bf16.gmra.mxu1 %vm12154_vm13, %v12153_v48  ;;  %vm12178_vm13 = vmmov %vm12044_vm0 }
 0x4af   : > { %v5382_v6 = vpop.f32.mrf.mxu2 }
 0x4b0   : > { %v5452_v47 = vadd.f32 %v5382_v6, %v5226_v44  ;;  %7177 = vmatmul.msk.bf16.gmra.mxu3 %vm12155_vm12, %v10131_v53  ;;  %v10537_v48 = vpop.f32.mrf.mxu1  ;;  %vm12180_vm12 = vmmov %vm12044_vm0 }
 0x4b1   : > { %v4906_v61 = vpop.f32.mrf.mxu0 }
 0x4b2   : > { %v10524_v0 = vadd.f32 %v5576_v22, %v5452_v47  ;;  %v5228_v22 = vadd.f32 %v10378_v16, %v4904_v29  ;;  %v12161_v47 = vld [vmem:[#allocation56_spill] sm:$0xff] }
 0x4b3   : > { %v5579_v57 = vpop.f32.mrf.mxu3  ;;  %v4907_v23 = vadd.f32 %v4906_v61, %v12161_v47 }
 0x4b4   : > { %7113 = vmatmul.msk.bf16.gmra.mxu0 %vm12157_vm7, %v10148_v25  ;;  %7155 = vmatmul.msk.bf16.gmra.mxu2 %vm12158_vm6, %v10150_v43  ;;  %v12159_v25 = vld [vmem:[#allocation117_spill] sm:$0xff]  ;;  %vm12182_vm7 = vmmov %vm12044_vm0 }
 0x4b5   : > { %v5229_v16 = vadd.f32 %v10386_v35, %v4907_v23  ;;  %v12167_v35 = vld [vmem:[#allocation59_spill] sm:$0xff]  ;;  %vm12183_vm6 = vmmov %vm12044_vm0 }
 0x4b7   : > { %v5385_v11 = vpop.f32.mrf.mxu2 }
 0x4b8   : > { %v5453_v12 = vadd.f32 %v5385_v11, %v5227_v17  ;;  %v10551_v17 = vpop.f32.mrf.mxu1 }
 0x4b9   : > { %v4908_v9 = vpop.f32.mrf.mxu0 }
 0x4ba   : > { %v10534_v44 = vadd.f32 %v5579_v57, %v5453_v12  ;;  %v4909_v12 = vadd.f32 %v4908_v9, %v10171_v27 }
 0x4bb   : > { %v5581_v39 = vpop.f32.mrf.mxu3  ;;  %7214 = vmatmul.msk.bf16.gmra.mxu1 %vm12160_vm14, %v12159_v25  ;;  %vm12185_vm14 = vmmov %vm12044_vm0 }
 0x4bf   : > { %v5387_v43 = vpop.f32.mrf.mxu2 }
 0x4c0   : > { %v5454_v6 = vadd.f32 %v5387_v43, %v5228_v22  ;;  %7178 = vmatmul.msk.bf16.gmra.mxu3 %vm12044_vm0, %v10178_v15  ;;  %v12164_v22 = vld [vmem:[#allocation9_spill] sm:$0xff]  ;;  %v10564_v47 = vpop.f32.mrf.mxu1 }
 0x4c1   : > { %v4911_v38 = vpop.f32.mrf.mxu0 }
 0x4c2   : > { %v10544_v26 = vadd.f32 %v5581_v39, %v5454_v6  ;;  %v5230_v39 = vadd.f32 %v10398_v18, %v4909_v12  ;;  %v4912_v43 = vadd.f32 %v4911_v38, %v12167_v35 }
 0x4c3   : > { %v5584_v52 = vpop.f32.mrf.mxu3 }
 0x4c4   : > { %7114 = vmatmul.msk.bf16.gmra.mxu0 %vm12162_vm11, %v10195_v42  ;;  %7156 = vmatmul.msk.bf16.gmra.mxu2 %vm12163_vm2, %v10197_v60  ;;  %v5231_v18 = vadd.f32 %v10418_v1, %v4912_v43  ;;  %vm12188_vm11 = vmmov %vm12044_vm0 }
 0x4c5   : > { %vm12189_vm2 = vmmov %vm12044_vm0 }
 0x4c7   : > { %v5390_v28 = vpop.f32.mrf.mxu2 }
 0x4c8   : > { %v5455_v57 = vadd.f32 %v5390_v28, %v5229_v16  ;;  %v12170_v16 = vld [vmem:[#allocation53_spill] sm:$0xff]  ;;  %v10574_v12 = vpop.f32.mrf.mxu1 }
 0x4c9   : > { %v4913_v11 = vpop.f32.mrf.mxu0 }
 0x4ca   : > { %v10554_v29 = vadd.f32 %v5584_v52, %v5455_v57  ;;  %v4914_v28 = vadd.f32 %v4913_v11, %v12170_v16  ;;  %v12177_v16 = vld [vmem:[#allocation15_spill] sm:$0xff] }
 0x4cb   : > { %v5586_v61 = vpop.f32.mrf.mxu3  ;;  %7215 = vmatmul.msk.bf16.gmra.mxu1 %vm12165_vm3, %v12164_v22  ;;  %vm12191_vm3 = vmmov %vm12044_vm0 }
 0x4cf   : > { %v5392_v42 = vpop.f32.mrf.mxu2 }
 0x4d0   : > { %v5456_v25 = vadd.f32 %v5392_v42, %v5230_v39  ;;  %7179 = vmatmul.msk.bf16.gmra.mxu3 %vm12166_vm5, %v10225_v10  ;;  %v12171_v39 = vld [vmem:[#allocation123_spill] sm:$0xff]  ;;  %v10589_v35 = vpop.f32.mrf.mxu1  ;;  %vm12193_vm5 = vmmov %vm12044_vm0 }
 0x4d1   : > { %v4916_v60 = vpop.f32.mrf.mxu0 }
 0x4d2   : > { %v10562_v6 = vadd.f32 %v5586_v61, %v5456_v25  ;;  %v5232_v61 = vadd.f32 %v10426_v59, %v4914_v28  ;;  %v4917_v1 = vadd.f32 %v4916_v60, %v10250_v37  ;;  %v12175_v25 = vld [vmem:[#allocation75_spill] sm:$0xff] }
 0x4d3   : > { %v5589_v27 = vpop.f32.mrf.mxu3 }
 0x4d4   : > { %7115 = vmatmul.msk.bf16.gmra.mxu0 %vm12168_vm1, %v10242_v13  ;;  %7157 = vmatmul.msk.bf16.gmra.mxu2 %vm12169_vm10, %v10244_v20  ;;  %v5233_v59 = vadd.f32 %v10440_v3, %v4917_v1  ;;  %vm12195_vm1 = vmmov %vm12044_vm0 }
 0x4d5   : > { %vm12196_vm10 = vmmov %vm12044_vm0 }
 0x4d7   : > { %v5395_v9 = vpop.f32.mrf.mxu2 }
 0x4d8   : > { %v5457_v23 = vadd.f32 %v5395_v9, %v5231_v18  ;;  %v10599_v3 = vpop.f32.mrf.mxu1 }
 0x4d9   : > { %v4918_v52 = vpop.f32.mrf.mxu0 }
 0x4da   : > { %v10572_v57 = vadd.f32 %v5589_v27, %v5457_v23  ;;  %v4919_v9 = vadd.f32 %v4918_v52, %v10267_v31  ;;  %v12181_v52 = vld [vmem:[#allocation91_spill] sm:$0xff] }
 0x4db   : > { %v5591_v38 = vpop.f32.mrf.mxu3  ;;  %7216 = vmatmul.msk.bf16.gmra.mxu1 %vm12172_vm9, %v12171_v39  ;;  %vm12198_vm9 = vmmov %vm12044_vm0 }
 0x4dc   : > { %v5234_v60 = vadd.f32 %v10444_v41, %v4919_v9 }
 0x4df   : > { %v5397_v13 = vpop.f32.mrf.mxu2 }
 0x4e0   : > { %v5458_v22 = vadd.f32 %v5397_v13, %v5232_v61  ;;  %7180 = vmatmul.msk.bf16.gmra.mxu3 %vm12173_vm4, %v10272_v19  ;;  %vm12200_vm4 = vmmov %vm12044_vm0 }
 0x4e1   : > { %v4921_v20 = vpop.f32.mrf.mxu0 }
 0x4e2   : > { %v10582_v42 = vadd.f32 %v5591_v38, %v5458_v22  ;;  %v12179_v38 = vld [vmem:[#allocation88_spill] sm:$0xff]  ;;  %v4922_v39 = vadd.f32 %v4921_v20, %v10310_v34 }
 0x4e3   : > { %v5594_v11 = vpop.f32.mrf.mxu3 }
 0x4e4   : > { %7158 = vmatmul.msk.bf16.gmra.mxu2 %vm12174_vm15, %v10300_v55  ;;  %7187 = vmatmul.msk.bf16.vlgmr.msrb.gmra.mxu0 %vm12176_vm8, %v12175_v25  ;;  %v5235_v41 = vadd.f32 %v10455_v14, %v4922_v39  ;;  %vm12202_vm15 = vmmov %vm12044_vm0 }
 0x4e5   : > { %vm12204_vm8 = vmmov %vm12044_vm0 }
 0x4e7   : > { %v5400_v43 = vpop.f32.mrf.mxu2 }
 0x4e8   : > { %v5459_v27 = vadd.f32 %v5400_v43, %v5233_v59  ;;  %v10612_v43 = vpop.f32.mrf.mxu1 }
 0x4e9   : > { %v4923_v18 = vpop.f32.mrf.mxu0 }
 0x4ea   : > { %v10592_v23 = vadd.f32 %v5594_v11, %v5459_v27  ;;  %v4924_v25 = vadd.f32 %v4923_v18, %v10320_v54  ;;  %v12184_v27 = vld [vmem:[#allocation35_spill] sm:$0xff]  ;;  %v12187_v18 = vld [vmem:[#allocation94_spill] sm:$0xff] }
 0x4eb   : > { %v5596_v37 = vpop.f32.mrf.mxu3  ;;  %7217 = vmatmul.msk.bf16.gmra.mxu1 %vm12178_vm13, %v12177_v16  ;;  %vm12207_vm13 = vmmov %vm12044_vm0 }
 0x4ec   : > { %v5236_v20 = vadd.f32 %v10468_v7, %v4924_v25  ;;  %v12192_v25 = vld [vmem:[#allocation97_spill] sm:$0xff] }
 0x4ef   : > { %v5402_v55 = vpop.f32.mrf.mxu2 }
 0x4f0   : > { %v5460_v28 = vadd.f32 %v5402_v55, %v5234_v60  ;;  %7251 = vmatmul.msk.bf16.vlgmr.msra.gmra.mxu3 %vm12180_vm12, %v12179_v38  ;;  %v10626_v7 = vpop.f32.mrf.mxu1  ;;  %vm12209_vm12 = vmmov %vm12044_vm0 }
 0x4f1   : > { %v4926_v61 = vpop.f32.mrf.mxu0 }
 0x4f2   : > { %v10602_v13 = vadd.f32 %v5596_v37, %v5460_v28  ;;  %v4927_v60 = vadd.f32 %v4926_v61, %v10328_v49 }
 0x4f3   : > { %v5599_v31 = vpop.f32.mrf.mxu3 }
 0x4f4   : > { %7188 = vmatmul.msk.bf16.gmra.mxu0 %vm12182_vm7, %v12181_v52  ;;  %7230 = vmatmul.msk.bf16.vlgmr.msra.gmra.mxu2 %vm12183_vm6, %v12074_v4  ;;  %v12186_v4 = vld [vmem:[#allocation84_spill] sm:$0xff]  ;;  %v5237_v55 = vadd.f32 %v10478_v24, %v4927_v60  ;;  %vm12212_vm7 = vmmov %vm12044_vm0 }
 0x4f5   : > { %vm12214_vm6 = vmmov %vm12044_vm0 }
 0x4f7   : > { %v5405_v22 = vpop.f32.mrf.mxu2 }
 0x4f8   : > { %v5461_v1 = vadd.f32 %v5405_v22, %v5235_v41  ;;  %v10633_v41 = vpop.f32.mrf.mxu1  ;;  %v12190_v22 = vld [vmem:[#allocation30_spill] sm:$0xff] }
 0x4f9   : > { %v4928_v11 = vpop.f32.mrf.mxu0 }
 0x4fa   : > { %v10610_v59 = vadd.f32 %v5599_v31, %v5461_v1  ;;  %v4929_v31 = vadd.f32 %v4928_v11, %v10336_v40  ;;  %v12194_v11 = vld [vmem:[#allocation100_spill] sm:$0xff] }
 0x4fb   : > { %v5601_v34 = vpop.f32.mrf.mxu3  ;;  %7218 = vmatmul.msk.bf16.gmra.mxu1 %vm12185_vm14, %v12184_v27  ;;  %vm12217_vm14 = vmmov %vm12044_vm0 }
 0x4fc   : > { %v5238_v61 = vadd.f32 %v10493_v5, %v4929_v31 }
 0x4ff   : > { %v5407_v9 = vpop.f32.mrf.mxu2 }
 0x500   : > { %v5462_v37 = vadd.f32 %v5407_v9, %v5236_v20  ;;  %7252 = vmatmul.msk.bf16.gmra.mxu3 %vm12044_vm0, %v12186_v4 }
 0x501   : > { %v4931_v14 = vpop.f32.mrf.mxu0 }
 0x502   : > { %v10620_v16 = vadd.f32 %v5601_v34, %v5462_v37  ;;  %v4932_v34 = vadd.f32 %v4931_v14, %v10344_v63  ;;  %v10647_v37 = vpop.f32.mrf.mxu1 }
 0x503   : > { %v5604_v54 = vpop.f32.mrf.mxu3 }
 0x504   : > { %7189 = vmatmul.msk.bf16.gmra.mxu0 %vm12188_vm11, %v12187_v18  ;;  %7231 = vmatmul.msk.bf16.gmra.mxu2 %vm12189_vm2, %v9610_v2  ;;  %v5239_v5 = vadd.f32 %v10503_v50, %v4932_v34  ;;  %v12197_v18 = vld [vmem:[#allocation42_spill] sm:$0xff]  ;;  %vm12221_vm11 = vmmov %vm12044_vm0 }
 0x505   : > { %vm12223_vm2 = vmmov %vm12044_vm0 }
 0x507   : > { %v5410_v28 = vpop.f32.mrf.mxu2 }
 0x508   : > { %v5463_v38 = vadd.f32 %v5410_v28, %v5237_v55 }
 0x509   : > { %v4933_v39 = vpop.f32.mrf.mxu0 }
 0x50a   : > { %v10630_v52 = vadd.f32 %v5604_v54, %v5463_v38  ;;  %v4934_v60 = vadd.f32 %v4933_v39, %v10352_v51  ;;  %v12201_v39 = vld [vmem:[#allocation99_spill] sm:$0xff] }
 0x50b   : > { %v5606_v49 = vpop.f32.mrf.mxu3  ;;  %7219 = vmatmul.msk.bf16.gmra.mxu1 %vm12191_vm3, %v12190_v22  ;;  %vm12226_vm3 = vmmov %vm12044_vm0 }
 0x50c   : > { %v5240_v14 = vadd.f32 %v10516_v56, %v4934_v60  ;;  %v12203_v56 = vld [vmem:[#allocation96_spill] sm:$0xff]  ;;  %v12208_v60 = vld [vmem:[#allocation106_spill] sm:$0xff] }
 0x50f   : > { %v5412_v2 = vpop.f32.mrf.mxu2 }
 0x510   : > { %v5464_v1 = vadd.f32 %v5412_v2, %v5238_v61  ;;  %7253 = vmatmul.msk.bf16.gmra.mxu3 %vm12193_vm5, %v12192_v25  ;;  %v12205_v25 = vld [vmem:[#allocation16_spill] sm:$0xff]  ;;  %vm12228_vm5 = vmmov %vm12044_vm0 }
 0x511   : > { %v4936_v24 = vpop.f32.mrf.mxu0 }
 0x512   : > { %v10640_v20 = vadd.f32 %v5606_v49, %v5464_v1  ;;  %v4937_v38 = vadd.f32 %v4936_v24, %v10360_v58  ;;  %v10660_v49 = vpop.f32.mrf.mxu1 }
 0x513   : > { %v5609_v40 = vpop.f32.mrf.mxu3 }
 0x514   : > { %7190 = vmatmul.msk.bf16.gmra.mxu0 %vm12195_vm1, %v12194_v11  ;;  %7232 = vmatmul.msk.bf16.gmra.mxu2 %vm12196_vm10, %v9665_v36  ;;  %v12199_v36 = vld [vmem:[#allocation93_spill] sm:$0xff]  ;;  %v5241_v61 = vadd.f32 %v10530_v30, %v4937_v38  ;;  %vm12231_vm1 = vmmov %vm12044_vm0 }
 0x515   : > { %vm12233_vm10 = vmmov %vm12044_vm0 }
 0x517   : > { %v5415_v27 = vpop.f32.mrf.mxu2 }
 0x518   : > { %v5465_v9 = vadd.f32 %v5415_v27, %v5239_v5  ;;  %v12206_v5 = vld [vmem:[#allocation76_spill] sm:$0xff] }
 0x519   : > { %v4938_v4 = vpop.f32.mrf.mxu0 }
 0x51a   : > { %v10650_v54 = vadd.f32 %v5609_v40, %v5465_v9  ;;  %v4939_v34 = vadd.f32 %v4938_v4, %v12205_v25  ;;  %v10670_v24 = vpop.f32.mrf.mxu1  ;;  %v12216_v25 = vld [vmem:[#allocation78_spill] sm:$0xff] }
 0x51b   : > { %v5611_v63 = vpop.f32.mrf.mxu3  ;;  %7220 = vmatmul.msk.bf16.gmra.mxu1 %vm12198_vm9, %v12197_v18  ;;  %vm12237_vm9 = vmmov %vm12044_vm0 }
 0x51c   : > { %v5242_v11 = vadd.f32 %v10537_v48, %v4939_v34 }
 0x51f   : > { %v5417_v55 = vpop.f32.mrf.mxu2 }
 0x520   : > { %v5466_v28 = vadd.f32 %v5417_v55, %v5240_v14  ;;  %7254 = vmatmul.msk.bf16.gmra.mxu3 %vm12200_vm4, %v12199_v36  ;;  %v12211_v55 = vld [vmem:[#allocation111_spill] sm:$0xff]  ;;  %vm12240_vm4 = vmmov %vm12044_vm0 }
 0x521   : > { %v4941_v50 = vpop.f32.mrf.mxu0 }
 0x522   : > { %v10658_v31 = vadd.f32 %v5611_v63, %v5466_v28  ;;  %v12210_v63 = vld [vmem:[#allocation110_spill] sm:$0xff]  ;;  %v12213_v28 = vld [vmem:[#allocation104_spill] sm:$0xff]  ;;  %v10685_v36 = vpop.f32.mrf.mxu1 }
 0x523   : > { %v5614_v51 = vpop.f32.mrf.mxu3  ;;  %v4942_v14 = vadd.f32 %v4941_v50, %v12210_v63  ;;  %v12220_v63 = vld [vmem:[#allocation120_spill] sm:$0xff] }
 0x524   : > { %7191 = vmatmul.msk.bf16.gmra.mxu0 %vm12202_vm15, %v12201_v39  ;;  %7233 = vmatmul.msk.bf16.gmra.mxu2 %vm12204_vm8, %v12203_v56  ;;  %v12215_v56 = vld [vmem:[#allocation21_spill] sm:$0xff]  ;;  %vm12242_vm15 = vmmov %vm12044_vm0 }
 0x525   : > { %v5243_v48 = vadd.f32 %v10551_v17, %v4942_v14  ;;  %vm12245_vm8 = vmmov %vm12044_vm0 }
 0x527   : > { %v5420_v22 = vpop.f32.mrf.mxu2 }
 0x528   : > { %v5467_v2 = vadd.f32 %v5420_v22, %v5241_v61 }
 0x529   : > { %v4943_v1 = vpop.f32.mrf.mxu0 }
 0x52a   : > { %v10668_v40 = vadd.f32 %v5614_v51, %v5467_v2  ;;  %v4944_v61 = vadd.f32 %v4943_v1, %v12215_v56  ;;  %v10695_v17 = vpop.f32.mrf.mxu1 }
 0x52b   : > { %v5616_v58 = vpop.f32.mrf.mxu3  ;;  %7221 = vmatmul.msk.bf16.gmra.mxu1 %vm12207_vm13, %v12206_v5  ;;  %vm12247_vm13 = vmmov %vm12044_vm0 }
 0x52c   : > { %v5244_v2 = vadd.f32 %v10564_v47, %v4944_v61  ;;  %v12222_v47 = vld [vmem:[#allocation108_spill] sm:$0xff] }
 0x52f   : > { %v5422_v27 = vpop.f32.mrf.mxu2 }
 0x530   : > { %v5468_v9 = vadd.f32 %v5422_v27, %v5242_v11  ;;  %7255 = vmatmul.msk.bf16.gmra.mxu3 %vm12209_vm12, %v12208_v60  ;;  %v12218_v11 = vld [vmem:[#allocation118_spill] sm:$0xff]  ;;  %vm12248_vm12 = vmmov %vm12044_vm0 }
 0x531   : > { %v4946_v30 = vpop.f32.mrf.mxu0  ;;  %v12219_v27 = vld [vmem:[#allocation114_spill] sm:$0xff] }
 0x532   : > { %v10678_v18 = vadd.f32 %v5616_v58, %v5468_v9  ;;  %v4947_v9 = vadd.f32 %v4946_v30, %v12219_v27  ;;  %v10708_v56 = vpop.f32.mrf.mxu1 }
 0x533   : > { %v5619_v4 = vpop.f32.mrf.mxu3 }
 0x534   : > { %7192 = vmatmul.msk.bf16.gmra.mxu0 %vm12212_vm7, %v12211_v55  ;;  %7234 = vmatmul.msk.bf16.gmra.mxu2 %vm12214_vm6, %v12213_v28  ;;  %v5245_v14 = vadd.f32 %v10574_v12, %v4947_v9  ;;  %v12230_v9 = vld [vmem:[#allocation18_spill] sm:$0xff]  ;;  %vm12251_vm7 = vmmov %vm12044_vm0 }
 0x535   : > { %vm12253_vm6 = vmmov %vm12044_vm0 }
 0x537   : > { %v5425_v38 = vpop.f32.mrf.mxu2 }
 0x538   : > { %v5469_v51 = vadd.f32 %v5425_v38, %v5243_v48  ;;  %v12224_v48 = vld [vmem:[#allocation33_spill] sm:$0xff] }
 0x539   : > { %v4948_v39 = vpop.f32.mrf.mxu0 }
 0x53a   : > { %v10688_v22 = vadd.f32 %v5619_v4, %v5469_v51  ;;  %v4949_v38 = vadd.f32 %v4948_v39, %v12224_v48 }
 0x53b   : > { %v5621_v50 = vpop.f32.mrf.mxu3  ;;  %7222 = vmatmul.msk.bf16.gmra.mxu1 %vm12217_vm14, %v12216_v25  ;;  %vm12255_vm14 = vmmov %vm12044_vm0 }
 0x53c   : > { %v5246_v61 = vadd.f32 %v10589_v35, %v4949_v38  ;;  %v10722_v35 = vpop.f32.mrf.mxu1 }
 0x53f   : > { %v5427_v34 = vpop.f32.mrf.mxu2 }
 0x540   : > { %v5470_v58 = vadd.f32 %v5427_v34, %v5244_v2  ;;  %7256 = vmatmul.msk.bf16.gmra.mxu3 %vm12044_vm0, %v12218_v11  ;;  %v12227_v34 = vld [vmem:[#allocation122_spill] sm:$0xff] }
 0x541   : > { %v4951_v5 = vpop.f32.mrf.mxu0 }
 0x542   : > { %v10698_v60 = vadd.f32 %v5621_v50, %v5470_v58  ;;  %v12225_v50 = vld [vmem:[#allocation13_spill] sm:$0xff]  ;;  %v12229_v58 = vld [vmem:[#allocation38_spill] sm:$0xff] }
 0x543   : > { %v5624_v1 = vpop.f32.mrf.mxu3  ;;  %v4952_v11 = vadd.f32 %v4951_v5, %v12229_v58  ;;  %v12238_v58 = vld [vmem:[#allocation69_spill] sm:$0xff] }
 0x544   : > { %7193 = vmatmul.msk.bf16.gmra.mxu0 %vm12221_vm11, %v12220_v63  ;;  %7235 = vmatmul.msk.bf16.gmra.mxu2 %vm12223_vm2, %v12222_v47  ;;  %vm12259_vm11 = vmmov %vm12044_vm0 }
 0x545   : > { %v5247_v63 = vadd.f32 %v10599_v3, %v4952_v11  ;;  %vm12260_vm2 = vmmov %vm12044_vm0 }
 0x547   : > { %v5430_v4 = vpop.f32.mrf.mxu2 }
 0x548   : > { %v5471_v55 = vadd.f32 %v5430_v4, %v5245_v14 }
 0x549   : > { %v4953_v28 = vpop.f32.mrf.mxu0 }
 0x54a   : > { %v10706_v51 = vadd.f32 %v5624_v1, %v5471_v55  ;;  %v12232_v1 = vld [vmem:[#allocation5_spill] sm:$0xff]  ;;  %v12234_v55 = vld [vmem:[#allocation72_spill] sm:$0xff] }
 0x54b   : > { %v5626_v30 = vpop.f32.mrf.mxu3  ;;  %7223 = vmatmul.msk.bf16.gmra.mxu1 %vm12226_vm3, %v12225_v50  ;;  %v4954_v48 = vadd.f32 %v4953_v28, %v12234_v55  ;;  %v12243_v55 = vld [vmem:[#allocation45_spill] sm:$0xff]  ;;  %vm12262_vm3 = vmmov %vm12044_vm0 }
 0x54f   : > { %v5432_v2 = vpop.f32.mrf.mxu2 }
 0x550   : > { %v5472_v25 = vadd.f32 %v5432_v2, %v5246_v61  ;;  %7257 = vmatmul.msk.bf16.gmra.mxu3 %vm12228_vm5, %v12227_v34  ;;  %v10729_v61 = vpop.f32.mrf.mxu1  ;;  %v12235_v2 = vmov 0.0|0.0   ;;  %v12236_v34 = vld [vmem:[#allocation24_spill] sm:$0xff]  ;;  %vm12264_vm5 = vmmov %vm12044_vm0 }
 0x551   : > { %v4956_v12 = vpop.f32.mrf.mxu0 }
 0x552   : > { %v10716_v27 = vadd.f32 %v5626_v30, %v5472_v25  ;;  %v5248_v30 = vadd.f32 %v10612_v43, %v4954_v48  ;;  %v4957_v11 = vadd.f32 %v4956_v12, %v12238_v58 }
 0x553   : > { %v5629_v39 = vpop.f32.mrf.mxu3 }
 0x554   : > { %7194 = vmatmul.msk.bf16.gmra.mxu0 %vm12231_vm1, %v12230_v9  ;;  %7236 = vmatmul.msk.bf16.gmra.mxu2 %vm12233_vm10, %v12232_v1  ;;  %v12241_v1 = vld [vmem:[#allocation11_spill] sm:$0xff]  ;;  %v5249_v43 = vadd.f32 %v10626_v7, %v4957_v11  ;;  %vm12265_vm1 = vmmov %vm12044_vm0 }
 0x555   : > { %vm12267_vm10 = vmmov %vm12044_vm0 }
 0x557   : > { %v5435_v47 = vpop.f32.mrf.mxu2 }
 0x558   : > { %v5473_v14 = vadd.f32 %v5435_v47, %v5247_v63 }
 0x559   : > { %v4958_v4 = vpop.f32.mrf.mxu0 }
 0x55a   : > { %v10726_v38 = vadd.f32 %v5629_v39, %v5473_v14  ;;  %v12239_v39 = vld [vmem:[#allocation14_spill] sm:$0xff]  ;;  %v4959_v48 = vadd.f32 %v4958_v4, %v12243_v55 }
 0x55b   : > { %v5631_v5 = vpop.f32.mrf.mxu3  ;;  %6085 = vmatmul.bf16.gmra.mxu1 %v12235_v2 }
 0x55f   : > { %v5437_v50 = vpop.f32.mrf.mxu2 }
 0x560   : > { %v5474_v25 = vadd.f32 %v5437_v50, %v5248_v30  ;;  %7258 = vmatmul.msk.bf16.gmra.mxu3 %vm12237_vm9, %v12236_v34  ;;  %v12244_v34 = vld [vmem:[#allocation17_spill] sm:$0xff]  ;;  %vm12269_vm9 = vmmov %vm12044_vm0 }
 0x561   : > { %v5785_v3 = vpop.f32.mrf.mxu0 }
 0x562   : > { %v10735_v9 = vadd.f32 %v5631_v5, %v5474_v25  ;;  %v5250_v5 = vadd.f32 %v10633_v41, %v4959_v48  ;;  %v5865_v7 = vadd.f32 %v5785_v3, %v10458_v62  ;;  %v12249_v3 = vld [vmem:[#allocation28_spill] sm:$0xff] }
 0x563   : > { %v5634_v28 = vpop.f32.mrf.mxu3 }
 0x564   : > { %7195 = vmatmul.msk.bf16.gmra.mxu0 %vm12240_vm4, %v12239_v39  ;;  %7237 = vmatmul.msk.bf16.gmra.mxu2 %vm12242_vm15, %v12241_v1  ;;  %v12246_v1 = vld [vmem:[#allocation40_spill] sm:$0xff]  ;;  %v6091_v41 = vadd.f32 %v10647_v37, %v5865_v7  ;;  %vm12270_vm4 = vmmov %vm12044_vm0 }
 0x565   : > { %vm12272_vm15 = vmmov %vm12044_vm0 }
 0x567   : > { %v5440_v63 = vpop.f32.mrf.mxu2 }
 0x568   : > { %v5475_v47 = vadd.f32 %v5440_v63, %v5249_v43  ;;  %v10760_v43 = vld [vmem:[%s10957_s8] ss:$0 sm:$0xff] }
 0x569   : > { %v5787_v14 = vpop.f32.mrf.mxu0 }
 0x56a   : > { %v10743_v30 = vadd.f32 %v5634_v28, %v5475_v47  ;;  %v5866_v63 = vadd.f32 %v5787_v14, %v12249_v3 }
 0x56b   : > { %v5636_v12 = vpop.f32.mrf.mxu3 }
 0x56c   : > { %v6092_v37 = vadd.f32 %v10660_v49, %v5866_v63  ;;  %v12254_v49 = vld [vmem:[#allocation32_spill] sm:$0xff] }
 0x56f   : > { %v5442_v50 = vpop.f32.mrf.mxu2 }
 0x570   : > { %v5476_v25 = vadd.f32 %v5442_v50, %v5250_v5  ;;  %7259 = vmatmul.msk.bf16.gmra.mxu3 %vm12245_vm8, %v12244_v34  ;;  %v12250_v50 = vld [vmem:[#allocation51_spill] sm:$0xff]  ;;  %vm12274_vm8 = vmmov %vm12044_vm0 }
 0x571   : > { %v5790_v58 = vpop.f32.mrf.mxu0 }
 0x572   : > { %v10749_v11 = vadd.f32 %v5636_v12, %v5476_v25  ;;  %v5867_v25 = vadd.f32 %v5790_v58, %v10476_v32  ;;  %v12256_v58 = vld [vmem:[#allocation63_spill] sm:$0xff] }
 0x573   : > { %v6463_v39 = vpop.f32.mrf.mxu3 }
 0x574   : > { %7196 = vmatmul.msk.bf16.gmra.mxu0 %vm12247_vm13, %v12246_v1  ;;  %7238 = vmatmul.msk.bf16.gmra.mxu2 %vm12248_vm12, %v12128_v45  ;;  %v12252_v1 = vld [vmem:[#allocation26_spill] sm:$0xff]  ;;  %vm12275_vm13 = vmmov %vm12044_vm0 }
 0x575   : > { %vm12277_vm12 = vmmov %vm12044_vm0 }
 0x577   : > { %v6237_v4 = vpop.f32.mrf.mxu2 }
 0x578   : > { %v6317_v28 = vadd.f32 %v6237_v4, %v6091_v41  ;;  %v6093_v4 = vadd.f32 %v10670_v24, %v5867_v25  ;;  %v12257_v24 = vld [vmem:[#allocation64_spill] sm:$0xff] }
 0x579   : > { %v5792_v62 = vpop.f32.mrf.mxu0 }
 0x57a   : > { %v6543_v47 = vadd.f32 %v6463_v39, %v6317_v28  ;;  %v10779_v28 = vpop.f32.mrf.mxu1 }
 0x57b   : > { %v6465_v55 = vpop.f32.mrf.mxu3 }
 0x57c   : > { %v6579_v48 = vadd.f32 %v10760_v43, %v6543_v47  ;;  %v5868_v47 = vadd.f32 %v5792_v62, %v12256_v58 }
 0x57e   : > { %v6611_v45 = vmax.f32 %v6579_v48, 0.0 }
 0x57f   : > { %v6239_v12 = vpop.f32.mrf.mxu2 }
 0x580   : > { %6643 = vst [vmem:[%s10767_s29] sm:$0xff] %v6611_v45  ;;  %v6318_v5 = vadd.f32 %v6239_v12, %v6092_v37  ;;  %7260 = vmatmul.msk.bf16.gmra.mxu3 %vm12251_vm7, %v12250_v50  ;;  %v6094_v12 = vadd.f32 %v10685_v36, %v5868_v47  ;;  %vm12279_vm7 = vmmov %vm12044_vm0 }
 0x581   : > { %v5795_v14 = vpop.f32.mrf.mxu0 }
 0x582   : > { %v6544_v34 = vadd.f32 %v6465_v55, %v6318_v5  ;;  %v10788_v25 = vpop.f32.mrf.mxu1 }
 0x583   : > { %v6468_v7 = vpop.f32.mrf.mxu3 }
 0x584   : > { %v6580_v39 = vadd.f32 %v10760_v43, %v6544_v34  ;;  %7197 = vmatmul.msk.bf16.gmra.mxu0 %vm12253_vm6, %v12252_v1  ;;  %7239 = vmatmul.msk.bf16.gmra.mxu2 %vm12255_vm14, %v12254_v49  ;;  %v12258_v49 = vld [vmem:[#allocation34_spill] sm:$0xff]  ;;  %vm12280_vm6 = vmmov %vm12044_vm0 }
 0x586   : > { %v6612_v41 = vmax.f32 %v6580_v39, 0.0  ;;  %v5869_v39 = vadd.f32 %v5795_v14, %v10496_v33 }
 0x587   : > { %v6242_v3 = vpop.f32.mrf.mxu2 }
 0x588   : > { %6644 = vst [vmem:[%s10767_s29 + $0x8] sm:$0xff] %v6612_v41  ;;  %v6319_v63 = vadd.f32 %v6242_v3, %v6093_v4  ;;  %v6095_v41 = vadd.f32 %v10695_v17, %v5869_v39  ;;  %v12261_v17 = vld [vmem:[#allocation74_spill] sm:$0xff] }
 0x589   : > { %v5797_v32 = vpop.f32.mrf.mxu0 }
 0x58a   : > { %v6545_v55 = vadd.f32 %v6468_v7, %v6319_v63  ;;  %v5870_v33 = vadd.f32 %v5797_v32, %v10506_v21  ;;  %v10799_v58 = vpop.f32.mrf.mxu1 }
 0x58b   : > { %v6470_v48 = vpop.f32.mrf.mxu3 }
 0x58c   : > { %v6581_v45 = vadd.f32 %v10760_v43, %v6545_v55 }
 0x58e   : > { %v6613_v37 = vmax.f32 %v6581_v45, 0.0  ;;  %v6096_v45 = vadd.f32 %v10708_v56, %v5870_v33 }
 0x58f   : > { %v6244_v5 = vpop.f32.mrf.mxu2 }
 0x590   : > { %6645 = vst [vmem:[%s10767_s29 + $0x10] sm:$0xff] %v6613_v37  ;;  %v6320_v50 = vadd.f32 %v6244_v5, %v6094_v12  ;;  %7261 = vmatmul.msk.bf16.gmra.mxu3 %vm12044_vm0, %v12257_v24  ;;  %v12263_v24 = vld [vmem:[#allocation49_spill] sm:$0xff] }
 0x591   : > { %v5800_v34 = vpop.f32.mrf.mxu0 }
 0x592   : > { %v6546_v62 = vadd.f32 %v6470_v48, %v6320_v50  ;;  %v5871_v5 = vadd.f32 %v5800_v34, %v10514_v46  ;;  %v6038_v56 = vpop.f32.mrf.mxu1 }
 0x593   : > { %v6473_v7 = vpop.f32.mrf.mxu3 }
 0x594   : > { %v6582_v1 = vadd.f32 %v10760_v43, %v6546_v62  ;;  %7198 = vmatmul.msk.bf16.gmra.mxu0 %vm12259_vm11, %v12258_v49  ;;  %7240 = vmatmul.msk.bf16.gmra.mxu2 %vm12260_vm2, %v12147_v8  ;;  %v6097_v62 = vadd.f32 %v10722_v35, %v5871_v5 }
 0x596   : > { %v6614_v36 = vmax.f32 %v6582_v1, 0.0 }
 0x597   : > { %v6247_v4 = vpop.f32.mrf.mxu2 }
 0x598   : > { %6646 = vst [vmem:[%s10767_s29 + $0x18] sm:$0xff] %v6614_v36  ;;  %v6321_v3 = vadd.f32 %v6247_v4, %v6095_v41 }
 0x599   : > { %v5802_v63 = vpop.f32.mrf.mxu0 }
 0x59a   : > { %v6547_v14 = vadd.f32 %v6473_v7, %v6321_v3  ;;  %v5872_v46 = vadd.f32 %v5802_v63, %v10524_v0 }
 0x59b   : > { %v6475_v47 = vpop.f32.mrf.mxu3 }
 0x59c   : > { %v6583_v55 = vadd.f32 %v10760_v43, %v6547_v14  ;;  %v6098_v3 = vadd.f32 %v10729_v61, %v5872_v46 }
 0x59e   : > { %v6615_v48 = vmax.f32 %v6583_v55, 0.0 }
 0x59f   : > { %v6249_v8 = vpop.f32.mrf.mxu2 }
 0x5a0   : > { %6647 = vst [vmem:[%s10767_s29 + $0x20] sm:$0xff] %v6615_v48  ;;  %v6322_v37 = vadd.f32 %v6249_v8, %v6096_v45  ;;  %7262 = vmatmul.msk.bf16.gmra.mxu3 %vm12262_vm3, %v12261_v17  ;;  %v12268_v45 = vld [vmem:[#allocation66_spill] sm:$0xff] }
 0x5a1   : > { %v5805_v12 = vpop.f32.mrf.mxu0 }
 0x5a2   : > { %v6548_v21 = vadd.f32 %v6475_v47, %v6322_v37  ;;  %v12266_v47 = vld [vmem:[#allocation62_spill] sm:$0xff]  ;;  %v5873_v55 = vadd.f32 %v5805_v12, %v10534_v44 }
 0x5a3   : > { %v6478_v32 = vpop.f32.mrf.mxu3 }
 0x5a4   : > { %v6584_v50 = vadd.f32 %v10760_v43, %v6548_v21  ;;  %7199 = vmatmul.msk.bf16.gmra.mxu0 %vm12264_vm5, %v12263_v24  ;;  %7241 = vmatmul.msk.bf16.gmra.mxu2 %vm12265_vm1, %v10131_v53  ;;  %v6041_v53 = vpop.f32.mrf.mxu1  ;;  %v6099_v8 = vadd.f32 %v10779_v28, %v5873_v55 }
 0x5a6   : > { %v6616_v39 = vmax.f32 %v6584_v50, 0.0 }
 0x5a7   : > { %v6252_v7 = vpop.f32.mrf.mxu2 }
 0x5a8   : > { %6648 = vst [vmem:[%s10767_s29 + $0x28] sm:$0xff] %v6616_v39  ;;  %v6323_v1 = vadd.f32 %v6252_v7, %v6097_v62  ;;  %v12271_v7 = vld [vmem:[#allocation86_spill] sm:$0xff] }
 0x5a9   : > { %v5807_v49 = vpop.f32.mrf.mxu0 }
 0x5aa   : > { %v6549_v34 = vadd.f32 %v6478_v32, %v6323_v1  ;;  %v5874_v44 = vadd.f32 %v5807_v49, %v10544_v26 }
 0x5ab   : > { %v6480_v36 = vpop.f32.mrf.mxu3 }
 0x5ac   : > { %v6585_v41 = vadd.f32 %v10760_v43, %v6549_v34  ;;  %v6043_v5 = vpop.f32.mrf.mxu1  ;;  %v6100_v39 = vadd.f32 %v10788_v25, %v5874_v44 }
 0x5ae   : > { %v6617_v4 = vmax.f32 %v6585_v41, 0.0 }
 0x5af   : > { %v6254_v33 = vpop.f32.mrf.mxu2 }
 0x5b0   : > { %6649 = vst [vmem:[%s10767_s29 + $0x30] sm:$0xff] %v6617_v4  ;;  %v6324_v14 = vadd.f32 %v6254_v33, %v6098_v3  ;;  %7263 = vmatmul.msk.bf16.gmra.mxu3 %vm12267_vm10, %v12266_v47 }
 0x5b1   : > { %v5810_v35 = vpop.f32.mrf.mxu0 }
 0x5b2   : > { %v6550_v48 = vadd.f32 %v6480_v36, %v6324_v14  ;;  %v5875_v1 = vadd.f32 %v5810_v35, %v10554_v29  ;;  %v12273_v36 = vld [vmem:[#allocation95_spill] sm:$0xff] }
 0x5b3   : > { %v6483_v0 = vpop.f32.mrf.mxu3 }
 0x5b4   : > { %v6586_v63 = vadd.f32 %v10760_v43, %v6550_v48  ;;  %7200 = vmatmul.msk.bf16.gmra.mxu0 %vm12269_vm9, %v12268_v45  ;;  %7242 = vmatmul.msk.bf16.gmra.mxu2 %vm12270_vm4, %v10178_v15  ;;  %v6046_v34 = vpop.f32.mrf.mxu1  ;;  %v6101_v41 = vadd.f32 %v10799_v58, %v5875_v1  ;;  %v12276_v45 = vld [vmem:[#allocation10_spill] sm:$0xff] }
 0x5b6   : > { %v6618_v61 = vmax.f32 %v6586_v63, 0.0 }
 0x5b7   : > { %v6257_v37 = vpop.f32.mrf.mxu2 }
 0x5b8   : > { %6650 = vst [vmem:[%s10767_s29 + $0x38] sm:$0xff] %v6618_v61  ;;  %v6325_v17 = vadd.f32 %v6257_v37, %v6099_v8 }
 0x5b9   : > { %v5812_v21 = vpop.f32.mrf.mxu0 }
 0x5ba   : > { %v6551_v12 = vadd.f32 %v6483_v0, %v6325_v17  ;;  %v5876_v29 = vadd.f32 %v5812_v21, %v10562_v6  ;;  %v12278_v17 = vld [vmem:[#allocation103_spill] sm:$0xff] }
 0x5bb   : > { %v6485_v32 = vpop.f32.mrf.mxu3 }
 0x5bc   : > { %v6587_v50 = vadd.f32 %v10760_v43, %v6551_v12  ;;  %v6048_v55 = vpop.f32.mrf.mxu1  ;;  %v6102_v0 = vadd.f32 %v6038_v56, %v5876_v29 }
 0x5be   : > { %v6619_v24 = vmax.f32 %v6587_v50, 0.0 }
 0x5bf   : > { %v6259_v62 = vpop.f32.mrf.mxu2 }
 0x5c0   : > { %6651 = vst [vmem:[%s10767_s29 + $0x40] sm:$0xff] %v6619_v24  ;;  %v6326_v15 = vadd.f32 %v6259_v62, %v6100_v39  ;;  %7264 = vmatmul.msk.bf16.gmra.mxu3 %vm12272_vm15, %v12271_v7 }
 0x5c1   : > { %v5815_v28 = vpop.f32.mrf.mxu0 }
 0x5c2   : > { %v6552_v46 = vadd.f32 %v6485_v32, %v6326_v15  ;;  %v5877_v61 = vadd.f32 %v5815_v28, %v10572_v57 }
 0x5c3   : > { %v6488_v26 = vpop.f32.mrf.mxu3 }
 0x5c4   : > { %v6588_v49 = vadd.f32 %v10760_v43, %v6552_v46  ;;  %7201 = vmatmul.msk.bf16.gmra.mxu0 %vm12274_vm8, %v12273_v36  ;;  %7243 = vmatmul.msk.bf16.gmra.mxu2 %vm12275_vm13, %v10225_v10  ;;  %v6103_v21 = vadd.f32 %v6041_v53, %v5877_v61  ;;  %v6051_v44 = vpop.f32.mrf.mxu1 }
 0x5c6   : > { %v6620_v25 = vmax.f32 %v6588_v49, 0.0 }
 0x5c7   : > { %v6262_v4 = vpop.f32.mrf.mxu2 }
 0x5c8   : > { %6652 = vst [vmem:[%s10767_s29 + $0x48] sm:$0xff] %v6620_v25  ;;  %v6327_v3 = vadd.f32 %v6262_v4, %v6101_v41 }
 0x5c9   : > { %v5817_v33 = vpop.f32.mrf.mxu0 }
 0x5ca   : > { %v6553_v14 = vadd.f32 %v6488_v26, %v6327_v3  ;;  %v5878_v57 = vadd.f32 %v5817_v33, %v10582_v42 }
 0x5cb   : > { %v6490_v47 = vpop.f32.mrf.mxu3 }
 0x5cc   : > { %v6589_v35 = vadd.f32 %v10760_v43, %v6553_v14  ;;  %v6104_v7 = vadd.f32 %v6043_v5, %v5878_v57 }
 0x5ce   : > { %v6621_v48 = vmax.f32 %v6589_v35, 0.0 }
 0x5cf   : > { %v6264_v63 = vpop.f32.mrf.mxu2 }
 0x5d0   : > { %6653 = vst [vmem:[%s10767_s29 + $0x50] sm:$0xff] %v6621_v48  ;;  %v6328_v10 = vadd.f32 %v6264_v63, %v6102_v0  ;;  %7265 = vmatmul.msk.bf16.gmra.mxu3 %vm12277_vm12, %v12276_v45 }
 0x5d1   : > { %v5820_v58 = vpop.f32.mrf.mxu0 }
 0x5d2   : > { %v6554_v8 = vadd.f32 %v6490_v47, %v6328_v10  ;;  %v5879_v46 = vadd.f32 %v5820_v58, %v10592_v23 }
 0x5d3   : > { %v6493_v37 = vpop.f32.mrf.mxu3 }
 0x5d4   : > { %v6590_v6 = vadd.f32 %v10760_v43, %v6554_v8  ;;  %7202 = vmatmul.msk.bf16.gmra.mxu0 %vm12279_vm7, %v12278_v17  ;;  %7244 = vmatmul.msk.bf16.gmra.mxu2 %vm12280_vm6, %v10272_v19  ;;  %v6053_v19 = vpop.f32.mrf.mxu1  ;;  %v6105_v25 = vadd.f32 %v6046_v34, %v5879_v46 }
 0x5d6   : > { %v6622_v56 = vmax.f32 %v6590_v6, 0.0 }
 0x5d7   : > { %v6267_v12 = vpop.f32.mrf.mxu2 }
 0x5d8   : > { %6654 = vst [vmem:[%s10767_s29 + $0x58] sm:$0xff] %v6622_v56  ;;  %v6329_v32 = vadd.f32 %v6267_v12, %v6103_v21 }
 0x5d9   : > { %v5822_v50 = vpop.f32.mrf.mxu0 }
 0x5da   : > { %v6555_v24 = vadd.f32 %v6493_v37, %v6329_v32  ;;  %v5880_v3 = vadd.f32 %v5822_v50, %v10602_v13 }
 0x5db   : > { %v6495_v39 = vpop.f32.mrf.mxu3 }
 0x5dc   : > { %v6591_v62 = vadd.f32 %v10760_v43, %v6555_v24  ;;  %v6056_v29 = vpop.f32.mrf.mxu1  ;;  %v6106_v35 = vadd.f32 %v6048_v55, %v5880_v3 }
 0x5de   : > { %v6623_v15 = vmax.f32 %v6591_v62, 0.0 }
 0x5df   : > { %v6269_v28 = vpop.f32.mrf.mxu2 }
 0x5e0   : > { %6655 = vst [vmem:[%s10767_s29 + $0x60] sm:$0xff] %v6623_v15  ;;  %v6330_v1 = vadd.f32 %v6269_v28, %v6104_v7  ;;  %6537 = vmatmul.bf16.gmra.mxu3 %v12235_v2 }
 0x5e1   : > { %v5825_v53 = vpop.f32.mrf.mxu0 }
 0x5e2   : > { %v6556_v26 = vadd.f32 %v6495_v39, %v6330_v1  ;;  %v5881_v34 = vadd.f32 %v5825_v53, %v10610_v59 }
 0x5e3   : > { %v6498_v49 = vpop.f32.mrf.mxu3 }
 0x5e4   : > { %v6592_v42 = vadd.f32 %v10760_v43, %v6556_v26  ;;  %6311 = vmatmul.bf16.gmra.mxu2 %v12235_v2  ;;  %v6058_v13 = vpop.f32.mrf.mxu1  ;;  %v6107_v61 = vadd.f32 %v6051_v44, %v5881_v34 }
 0x5e6   : > { %v6624_v36 = vmax.f32 %v6592_v42, 0.0 }
 0x5e7   : > { %v6272_v41 = vpop.f32.mrf.mxu2 }
 0x5e8   : > { %6656 = vst [vmem:[%s10767_s29 + $0x68] sm:$0xff] %v6624_v36  ;;  %v6331_v5 = vadd.f32 %v6272_v41, %v6105_v25 }
 0x5e9   : > { %v5827_v4 = vpop.f32.mrf.mxu0 }
 0x5ea   : > { %v6557_v33 = vadd.f32 %v6498_v49, %v6331_v5  ;;  %v5882_v55 = vadd.f32 %v5827_v4, %v10620_v16 }
 0x5eb   : > { %v6500_v14 = vpop.f32.mrf.mxu3 }
 0x5ec   : > { %v6593_v23 = vadd.f32 %v10760_v43, %v6557_v33  ;;  %v6108_v12 = vadd.f32 %v6053_v19, %v5882_v55  ;;  %v6061_v32 = vpop.f32.mrf.mxu1 }
 0x5ee   : > { %v6625_v47 = vmax.f32 %v6593_v23, 0.0 }
 0x5ef   : > { %v6274_v48 = vpop.f32.mrf.mxu2 }
 0x5f0   : > { %6657 = vst [vmem:[%s10767_s29 + $0x70] sm:$0xff] %v6625_v47  ;;  %v6332_v0 = vadd.f32 %v6274_v48, %v6106_v35 }
 0x5f1   : > { %v5830_v2 = vpop.f32.mrf.mxu0 }
 0x5f2   : > { %v6558_v63 = vadd.f32 %v6500_v14, %v6332_v0  ;;  %v5883_v44 = vadd.f32 %v5830_v2, %v10630_v52 }
 0x5f3   : > { %v6503_v10 = vpop.f32.mrf.mxu3 }
 0x5f4   : > { %v6594_v45 = vadd.f32 %v10760_v43, %v6558_v63  ;;  %v6109_v7 = vadd.f32 %v6056_v29, %v5883_v44  ;;  %v6063_v53 = vpop.f32.mrf.mxu1 }
 0x5f6   : > { %v6626_v58 = vmax.f32 %v6594_v45, 0.0 }
 0x5f7   : > { %v6277_v8 = vpop.f32.mrf.mxu2 }
 0x5f8   : > { %6658 = vst [vmem:[%s10767_s29 + $0x78] sm:$0xff] %v6626_v58  ;;  %v6333_v37 = vadd.f32 %v6277_v8, %v6107_v61 }
 0x5f9   : > { %v5832_v6 = vpop.f32.mrf.mxu0 }
 0x5fa   : > { %v6559_v17 = vadd.f32 %v6503_v10, %v6333_v37  ;;  %v5884_v19 = vadd.f32 %v5832_v6, %v10640_v20 }
 0x5fb   : > { %v6505_v56 = vpop.f32.mrf.mxu3 }
 0x5fc   : > { %v6595_v21 = vadd.f32 %v10760_v43, %v6559_v17  ;;  %v6110_v36 = vadd.f32 %v6058_v13, %v5884_v19  ;;  %v6066_v33 = vpop.f32.mrf.mxu1 }
 0x5fe   : > { %v6627_v59 = vmax.f32 %v6595_v21, 0.0 }
 0x5ff   : > { %v6279_v50 = vpop.f32.mrf.mxu2 }
 0x600   : > { %6659 = vst [vmem:[%s10767_s29 + $0x80] sm:$0xff] %v6627_v59  ;;  %v6334_v57 = vadd.f32 %v6279_v50, %v6108_v12 }
 0x601   : > { %v5835_v24 = vpop.f32.mrf.mxu0 }
 0x602   : > { %v6560_v39 = vadd.f32 %v6505_v56, %v6334_v57  ;;  %v5885_v4 = vadd.f32 %v5835_v24, %v10650_v54 }
 0x603   : > { %v6508_v62 = vpop.f32.mrf.mxu3 }
 0x604   : > { %v6596_v15 = vadd.f32 %v10760_v43, %v6560_v39  ;;  %v6111_v23 = vadd.f32 %v6061_v32, %v5885_v4  ;;  %v6068_v54 = vpop.f32.mrf.mxu1 }
 0x606   : > { %v6628_v16 = vmax.f32 %v6596_v15, 0.0 }
 0x607   : > { %v6282_v28 = vpop.f32.mrf.mxu2 }
 0x608   : > { %6660 = vst [vmem:[%s10767_s29 + $0x88] sm:$0xff] %v6628_v16  ;;  %v6335_v1 = vadd.f32 %v6282_v28, %v6109_v7 }
 0x609   : > { %v5837_v46 = vpop.f32.mrf.mxu0 }
 0x60a   : > { %v6561_v26 = vadd.f32 %v6508_v62, %v6335_v1  ;;  %v5886_v0 = vadd.f32 %v5837_v46, %v10658_v31 }
 0x60b   : > { %v6510_v49 = vpop.f32.mrf.mxu3 }
 0x60c   : > { %v6597_v42 = vadd.f32 %v10760_v43, %v6561_v26  ;;  %v6112_v45 = vadd.f32 %v6063_v53, %v5886_v0  ;;  %v6071_v56 = vpop.f32.mrf.mxu1 }
 0x60e   : > { %v6629_v52 = vmax.f32 %v6597_v42, 0.0 }
 0x60f   : > { %v6284_v25 = vpop.f32.mrf.mxu2 }
 0x610   : > { %6661 = vst [vmem:[%s10767_s29 + $0x90] sm:$0xff] %v6629_v52  ;;  %v6336_v41 = vadd.f32 %v6284_v25, %v6110_v36 }
 0x611   : > { %v5840_v5 = vpop.f32.mrf.mxu0 }
 0x612   : > { %v6562_v3 = vadd.f32 %v6510_v49, %v6336_v41  ;;  %v5887_v8 = vadd.f32 %v5840_v5, %v10668_v40 }
 0x613   : > { %v6513_v29 = vpop.f32.mrf.mxu3 }
 0x614   : > { %v6598_v14 = vadd.f32 %v10760_v43, %v6562_v3  ;;  %v6113_v17 = vadd.f32 %v6066_v33, %v5887_v8  ;;  %v6073_v15 = vpop.f32.mrf.mxu1 }
 0x616   : > { %v6630_v20 = vmax.f32 %v6598_v14, 0.0 }
 0x617   : > { %v6287_v47 = vpop.f32.mrf.mxu2 }
 0x618   : > { %6662 = vst [vmem:[%s10767_s29 + $0x98] sm:$0xff] %v6630_v20  ;;  %v6337_v35 = vadd.f32 %v6287_v47, %v6111_v23 }
 0x619   : > { %v5842_v48 = vpop.f32.mrf.mxu0 }
 0x61a   : > { %v6563_v2 = vadd.f32 %v6513_v29, %v6337_v35  ;;  %v5888_v12 = vadd.f32 %v5842_v48, %v10678_v18 }
 0x61b   : > { %v6515_v34 = vpop.f32.mrf.mxu3 }
 0x61c   : > { %v6599_v63 = vadd.f32 %v10760_v43, %v6563_v2  ;;  %v6114_v44 = vadd.f32 %v6068_v54, %v5888_v12  ;;  %v6076_v52 = vpop.f32.mrf.mxu1 }
 0x61e   : > { %v6631_v10 = vmax.f32 %v6599_v63, 0.0 }
 0x61f   : > { %v6289_v13 = vpop.f32.mrf.mxu2 }
 0x620   : > { %6663 = vst [vmem:[%s10767_s29 + $0xa0] sm:$0xff] %v6631_v10  ;;  %v6338_v58 = vadd.f32 %v6289_v13, %v6112_v45 }
 0x621   : > { %v5845_v61 = vpop.f32.mrf.mxu0 }
 0x622   : > { %v6564_v37 = vadd.f32 %v6515_v34, %v6338_v58  ;;  %v5889_v16 = vadd.f32 %v5845_v61, %v10688_v22 }
 0x623   : > { %v6518_v6 = vpop.f32.mrf.mxu3 }
 0x624   : > { %v6600_v55 = vadd.f32 %v10760_v43, %v6564_v37  ;;  %v6115_v46 = vadd.f32 %v6071_v56, %v5889_v16 }
 0x626   : > { %v6632_v31 = vmax.f32 %v6600_v55, 0.0 }
 0x627   : > { %v6292_v21 = vpop.f32.mrf.mxu2 }
 0x628   : > { %6664 = vst [vmem:[%s10767_s29 + $0xa8] sm:$0xff] %v6632_v31  ;;  %v6339_v59 = vadd.f32 %v6292_v21, %v6113_v17 }
 0x629   : > { %v5847_v50 = vpop.f32.mrf.mxu0 }
 0x62a   : > { %v6565_v32 = vadd.f32 %v6518_v6, %v6339_v59  ;;  %v5890_v49 = vadd.f32 %v5847_v50, %v10698_v60  ;;  %v6078_v60 = vpop.f32.mrf.mxu1 }
 0x62b   : > { %v6520_v57 = vpop.f32.mrf.mxu3 }
 0x62c   : > { %v6601_v24 = vadd.f32 %v10760_v43, %v6565_v32  ;;  %v6116_v5 = vadd.f32 %v6073_v15, %v5890_v49 }
 0x62e   : > { %v6633_v40 = vmax.f32 %v6601_v24, 0.0 }
 0x62f   : > { %v6294_v39 = vpop.f32.mrf.mxu2 }
 0x630   : > { %6665 = vst [vmem:[%s10767_s29 + $0xb0] sm:$0xff] %v6633_v40  ;;  %v6340_v62 = vadd.f32 %v6294_v39, %v6114_v44 }
 0x631   : > { %v5850_v18 = vpop.f32.mrf.mxu0 }
 0x632   : > { %v6566_v7 = vadd.f32 %v6520_v57, %v6340_v62  ;;  %v5891_v33 = vadd.f32 %v5850_v18, %v10706_v51  ;;  %v6081_v45 = vpop.f32.mrf.mxu1 }
 0x633   : > { %v6523_v28 = vpop.f32.mrf.mxu3 }
 0x634   : > { %v6602_v1 = vadd.f32 %v10760_v43, %v6566_v7  ;;  %v6117_v47 = vadd.f32 %v6076_v52, %v5891_v33 }
 0x636   : > { %v6634_v53 = vmax.f32 %v6602_v1, 0.0 }
 0x637   : > { %v6297_v19 = vpop.f32.mrf.mxu2 }
 0x638   : > { %6666 = vst [vmem:[%s10767_s29 + $0xb8] sm:$0xff] %v6634_v53  ;;  %v6341_v26 = vadd.f32 %v6297_v19, %v6115_v46 }
 0x639   : > { %v5852_v41 = vpop.f32.mrf.mxu0 }
 0x63a   : > { %v6567_v42 = vadd.f32 %v6523_v28, %v6341_v26  ;;  %v5892_v2 = vadd.f32 %v5852_v41, %v10716_v27  ;;  %v6083_v21 = vpop.f32.mrf.mxu1 }
 0x63b   : > { %v6525_v36 = vpop.f32.mrf.mxu3 }
 0x63c   : > { %v6603_v25 = vadd.f32 %v10760_v43, %v6567_v42  ;;  %v6118_v10 = vadd.f32 %v6078_v60, %v5892_v2 }
 0x63e   : > { %v6635_v22 = vmax.f32 %v6603_v25, 0.0 }
 0x63f   : > { %v6299_v4 = vpop.f32.mrf.mxu2 }
 0x640   : > { %6667 = vst [vmem:[%s10767_s29 + $0xc0] sm:$0xff] %v6635_v22  ;;  %v6342_v3 = vadd.f32 %v6299_v4, %v6116_v5 }
 0x641   : > { %v5855_v48 = vpop.f32.mrf.mxu0 }
 0x642   : > { %v6568_v29 = vadd.f32 %v6525_v36, %v6342_v3  ;;  %v5893_v61 = vadd.f32 %v5855_v48, %v10726_v38  ;;  %v6086_v39 = vpop.f32.mrf.mxu1 }
 0x643   : > { %v6528_v14 = vpop.f32.mrf.mxu3 }
 0x644   : > { %v6604_v20 = vadd.f32 %v10760_v43, %v6568_v29  ;;  %v6119_v31 = vadd.f32 %v6081_v45, %v5893_v61 }
 0x646   : > { %v6636_v23 = vmax.f32 %v6604_v20, 0.0 }
 0x647   : > { %v6302_v35 = vpop.f32.mrf.mxu2 }
 0x648   : > { %6668 = vst [vmem:[%s10767_s29 + $0xc8] sm:$0xff] %v6636_v23  ;;  %v6343_v0 = vadd.f32 %v6302_v35, %v6117_v47 }
 0x649   : > { %v5857_v8 = vpop.f32.mrf.mxu0 }
 0x64a   : > { %v6569_v34 = vadd.f32 %v6528_v14, %v6343_v0  ;;  %v5894_v59 = vadd.f32 %v5857_v8, %v10735_v9  ;;  %v6088_v26 = vpop.f32.mrf.mxu1 }
 0x64b   : > { %v6530_v63 = vpop.f32.mrf.mxu3 }
 0x64c   : > { %v6605_v54 = vadd.f32 %v10760_v43, %v6569_v34  ;;  %v6120_v24 = vadd.f32 %v6083_v21, %v5894_v59 }
 0x64e   : > { %v6637_v51 = vmax.f32 %v6605_v54, 0.0 }
 0x64f   : > { %v6304_v13 = vpop.f32.mrf.mxu2 }
 0x650   : > { %6669 = vst [vmem:[%s10767_s29 + $0xd0] sm:$0xff] %v6637_v51  ;;  %v6344_v58 = vadd.f32 %v6304_v13, %v6118_v10 }
 0x651   : > { %v5860_v32 = vpop.f32.mrf.mxu0 }
 0x652   : > { %v6570_v37 = vadd.f32 %v6530_v63, %v6344_v58  ;;  %v5895_v62 = vadd.f32 %v5860_v32, %v10743_v30 }
 0x653   : > { %v6533_v6 = vpop.f32.mrf.mxu3 }
 0x654   : > { %v6606_v55 = vadd.f32 %v10760_v43, %v6570_v37  ;;  %v6121_v7 = vadd.f32 %v6086_v39, %v5895_v62 }
 0x656   : > { %v6638_v27 = vmax.f32 %v6606_v55, 0.0 }
 0x657   : > { %v6307_v17 = vpop.f32.mrf.mxu2 }
 0x658   : > { %6670 = vst [vmem:[%s10767_s29 + $0xd8] sm:$0xff] %v6638_v27  ;;  %v6345_v56 = vadd.f32 %v6307_v17, %v6119_v31 }
 0x659   : > { %v5862_v9 = vpop.f32.mrf.mxu0 }
 0x65a   : > { %v6571_v12 = vadd.f32 %v6533_v6, %v6345_v56  ;;  %v5896_v46 = vadd.f32 %v5862_v9, %v10749_v11 }
 0x65b   : > { %v6535_v38 = vpop.f32.mrf.mxu3 }
 0x65c   : > { %v6607_v50 = vadd.f32 %v10760_v43, %v6571_v12  ;;  %v6122_v30 = vadd.f32 %v6088_v26, %v5896_v46 }
 0x65e   : > { %v6639_v57 = vmax.f32 %v6607_v50, 0.0 }
 0x65f   : > { %v6309_v40 = vpop.f32.mrf.mxu2 }
 0x660   : > { %6671 = vst [vmem:[%s10767_s29 + $0xe0] sm:$0xff] %v6639_v57  ;;  %v6346_v44 = vadd.f32 %v6309_v40, %v6120_v24 }
 0x662   : > { %v6572_v15 = vadd.f32 %v6535_v38, %v6346_v44 }
 0x663   : > { %v6538_v18 = vpop.f32.mrf.mxu3 }
 0x664   : > { %v6608_v16 = vadd.f32 %v10760_v43, %v6572_v15 }
 0x666   : > { %v6640_v28 = vmax.f32 %v6608_v16, 0.0 }
 0x667   : > { %v6312_v1 = vpop.f32.mrf.mxu2 }
 0x668   : > { %6672 = vst [vmem:[%s10767_s29 + $0xe8] sm:$0xff] %v6640_v28  ;;  %v6347_v53 = vadd.f32 %v6312_v1, %v6121_v7 }
 0x66a   : > { %v6573_v19 = vadd.f32 %v6538_v18, %v6347_v53 }
 0x66b   : > { %v6540_v25 = vpop.f32.mrf.mxu3 }
 0x66c   : > { %v6609_v49 = vadd.f32 %v10760_v43, %v6573_v19 }
 0x66e   : > { %v6641_v42 = vmax.f32 %v6609_v49, 0.0 }
 0x66f   : > { %v6314_v52 = vpop.f32.mrf.mxu2 }
 0x670   : > { %6673 = vst [vmem:[%s10767_s29 + $0xf0] sm:$0xff] %v6641_v42  ;;  %v6348_v36 = vadd.f32 %v6314_v52, %v6122_v30 }
 0x672   : > { %v6574_v22 = vadd.f32 %v6540_v25, %v6348_v36 }
 0x674   : > { %v6610_v11 = vadd.f32 %v10760_v43, %v6574_v22 }
 0x676   : > { %v6642_v41 = vmax.f32 %v6610_v11, 0.0 }
 0x678   : > { %6674 = vst [vmem:[%s10767_s29 + $0xf8] sm:$0xff] %v6642_v41 }
 0x679   : > { %7380 = shalt.err (!%p7377_p3)
}
 0x67a   : > { %s7419_s24 = smov 128   ;;  %s7420_s29 = smov 8  }
 0x67b   : > { %7306 = dma.vmem_to_hbm [thread:$0]  (%p7509_p5), %s6689_s22, 4096, %s6691_s23, %s6676_s13, %s7419_s24, %s7419_s24, %s7420_s29  }
 0x67c PF: > { %p7312_p4 = scmp.ge.s32.totalorder %s7415_s12, 2  ;;  %s6705_s21 = sand.u32 1, %s7403_s30  }
 0x67d   : > { %s6706_s28 = scalar_lea.sflag [#allocation3], %s6705_s21 }
 0x67e   : > { %p7309_p7 = pnand %p7312_p4, %p7513_p6 }
 0x680   : > { %p7310_p8 = pneg %p7309_p7 }
 0x682   : > { %7398 = dma.done.wait (%p7310_p8), %s6706_s28, 4096  }
 0x683   : > { %7400 = vsyncadd (%p7310_p8), %s6706_s28, 4294963200  ;;  %p19_p9 = scmp.ge.s32.totalorder %s7496_s15, 4   ;;  %s12281_s30 = smov %s7407_s10 }
 0x684   : > { %s12282_s10 = smov %s7411_s11  ;;  %s12283_s11 = smov %s7507_s18 }
 0x685   : > { %s12284_s12 = smov %s7496_s15  ;;  %21 = sbr.rel (!%p19_p9) target bundleno = 3 (0x3), region = 118 }
 0x68a   :  { %6712 = vsyncpa [#allocation3], 1 }
 0x68b   :  { %6714 = vsyncpa [#allocation3 + $0x1], 1 }

</bundles_post_ra>
